<compile_context>
chip_gen: v6e
topology: v6e:2x2x1
jax: 0.10.0
libtpu: 0.0.40
codegen_flags: <defaults>
</compile_context>

<pallas_src>
import functools

import jax
import jax.numpy as jnp
from jax.experimental import pallas as pl
from jax.experimental.pallas import tpu as pltpu


def _round_up(x, m):
    return (x + m - 1) // m * m


# ------------------------------ fused kernel ------------------------------- #

def _fused_model_kernel(x1_ref, vmask_ref, w1_ref, sh1_ref, w2_ref, sh2_ref,
                        w3_ref, sh3_ref, wfc_ref, bfc_ref,
                        fm_ref, logits_ref,
                        pad2_ref, pad3_ref, *, H, W):
    """Entire CustomModel forward for one batch element, resident in VMEM.

    x1_ref:            (1, Lw, K1P)   layer-1 im2col patches, wide-row layout
    vmask_ref:         (Lw, 1)        1.0 where column j < W, else 0.0
    w2_ref, w3_ref:    (9, Cin, Cout) BN-scale-folded per-tap conv weights
    w1_ref:            (K1P, 64)
    sh*_ref:           (1, Cout)      folded BN shift (+ conv bias)
    wfc_ref, bfc_ref:  (256, KPAD), (1, KPAD)
    fm_ref:            (1, Lw, 256)   feature map in wide-row layout
    logits_ref:        (1, 1, KPAD)
    pad{2,3}_ref:      (PADR, Cin)    flattened zero-padded activations (persistent)
    """
    Wp = W + 2
    Lw = H * Wp                      # rows of the wide output layout
    lead = Wp + 1                    # first interior row of the padded buffer
    tail = lead + Lw                 # one past the last interior row
    padr = pad2_ref.shape[0]

    valid = vmask_ref[...] > 0.5     # (Lw, 1) bool, True where j < W

    # Keep the 1-element zero conv border intact.  Rows inside [lead, tail) get
    # exact zeros from the masked interior stores below; only the leading /
    # trailing border rows need explicit zeroing, every step (scratch is
    # per-core and persists across grid steps).
    pad2_ref[0:lead, :] = jnp.zeros((lead, pad2_ref.shape[1]), jnp.float32)
    pad2_ref[tail:padr, :] = jnp.zeros((padr - tail, pad2_ref.shape[1]), jnp.float32)
    pad3_ref[0:lead, :] = jnp.zeros((lead, pad3_ref.shape[1]), jnp.float32)
    pad3_ref[tail:padr, :] = jnp.zeros((padr - tail, pad3_ref.shape[1]), jnp.float32)

    def conv3x3(pad_ref, w_ref, shift_ref):
        # 9-tap accumulate over contiguous sublane-offset slices of the
        # flattened padded activation; MXU accumulates, no patch concat.
        acc = None
        for dy in range(3):
            for dx in range(3):
                off = dy * Wp + dx
                tap = pad_ref[off:off + Lw, :]                      # (Lw, Cin)
                part = jnp.dot(tap, w_ref[dy * 3 + dx],
                               preferred_element_type=jnp.float32)
                acc = part if acc is None else acc + part
        return acc + shift_ref[...]                                  # (Lw, Cout)

    # ---- layer 1: Conv(1->64)+BN+ReLU, one matmul over wrapper-built patches.
    h1 = jnp.dot(x1_ref[0], w1_ref[...], preferred_element_type=jnp.float32)
    h1 = jnp.maximum(h1 + sh1_ref[...], 0.0)
    pad2_ref[lead:tail, :] = jnp.where(valid, h1, 0.0)

    # ---- layer 2: Conv(64->128)+BN+ReLU
    h2 = jnp.maximum(conv3x3(pad2_ref, w2_ref, sh2_ref), 0.0)
    pad3_ref[lead:tail, :] = jnp.where(valid, h2, 0.0)

    # ---- layer 3: Conv(128->256), no ReLU -> feature map
    fm = conv3x3(pad3_ref, w3_ref, sh3_ref)          # (Lw, 256); j>=W cols garbage
    fm_ref[0] = fm.astype(fm_ref.dtype)              # lane-dense wide store

    # ---- global max pool over valid positions + FC
    pooled = jnp.max(jnp.where(valid, fm, -jnp.inf), axis=0, keepdims=True)
    logits = jnp.dot(pooled, wfc_ref[...],
                     preferred_element_type=jnp.float32) + bfc_ref[...]
    logits_ref[0] = logits.astype(logits_ref.dtype)


# ------------------------------ wrapper ------------------------------------ #

def custom_model_forward(x_nchw, p):
    """Returns (logits, feature_map) with feature_map in NCHW like PyTorch."""
    eps = 1e-5
    N, cin, H, W = x_nchw.shape
    Wp = W + 2
    Lw = H * Wp
    padr = _round_up((H + 2) * Wp + 2, 8)    # flat padded rows (+2 overflow rows)
    offs = [dy * Wp + dx for dy in range(3) for dx in range(3)]

    # Layer-1 im2col patches in the wide-row layout (pure layout work on the
    # tiny 1-channel input).
    x = jnp.transpose(x_nchw, (0, 2, 3, 1)).astype(jnp.float32)     # NHWC
    xp = jnp.pad(x, ((0, 0), (1, 1), (1, 1), (0, 0)))               # (N,H+2,W+2,cin)
    xpf = jnp.pad(xp.reshape(N, (H + 2) * Wp, cin), ((0, 0), (0, 2), (0, 0)))
    x1p = jnp.concatenate([xpf[:, o:o + Lw, :] for o in offs], axis=-1)  # (N,Lw,9*cin)
    k1 = 9 * cin
    k1p = max(8, _round_up(k1, 8))
    x1p = jnp.pad(x1p, ((0, 0), (0, 0), (0, k1p - k1)))

    # Wide-row validity mask (1.0 where column j < W).
    vmask = (jnp.tile(jnp.arange(Wp), (H,)) < W).astype(jnp.float32)[:, None]

    # Fold BN (running-stats) scale into conv weights; shift (+conv bias) stays
    # as a per-channel add in the kernel epilogue.
    s1 = p['g1'] / jnp.sqrt(p['v1'] + eps)
    sh1 = (p['b1'] - p['m1']) * s1 + p['beta1']
    w1 = jnp.pad((p['w1'] * s1).reshape(k1, 64), ((0, k1p - k1), (0, 0)))

    s2 = p['g2'] / jnp.sqrt(p['v2'] + eps)
    sh2 = (p['b2'] - p['m2']) * s2 + p['beta2']
    w2 = (p['w2'] * s2).reshape(9, 64, 128)

    w3 = p['w3'].reshape(9, 128, 256)
    sh3 = p['b3']

    K = p['wfc'].shape[-1]
    kpad = _round_up(max(K, 128), 128)
    wfc = jnp.pad(p['wfc'], ((0, 0), (0, kpad - K)))
    bfc = jnp.pad(p['bfc'], ((0, kpad - K),))

    kernel = functools.partial(_fused_model_kernel, H=H, W=W)
    fm_wide, logits = pl.pallas_call(
        kernel,
        out_shape=(
            jax.ShapeDtypeStruct((N, Lw, 256), jnp.float32),
            jax.ShapeDtypeStruct((N, 1, kpad), jnp.float32),
        ),
        grid_spec=pltpu.PrefetchScalarGridSpec(
            num_scalar_prefetch=0,
            grid=(N,),
            in_specs=[
                pl.BlockSpec((1, Lw, k1p), lambda n: (n, 0, 0)),
                pl.BlockSpec((Lw, 1), lambda n: (0, 0)),
                pl.BlockSpec((k1p, 64), lambda n: (0, 0)),
                pl.BlockSpec((1, 64), lambda n: (0, 0)),
                pl.BlockSpec((9, 64, 128), lambda n: (0, 0, 0)),
                pl.BlockSpec((1, 128), lambda n: (0, 0)),
                pl.BlockSpec((9, 128, 256), lambda n: (0, 0, 0)),
                pl.BlockSpec((1, 256), lambda n: (0, 0)),
                pl.BlockSpec((256, kpad), lambda n: (0, 0)),
                pl.BlockSpec((1, kpad), lambda n: (0, 0)),
            ],
            out_specs=[
                pl.BlockSpec((1, Lw, 256), lambda n: (n, 0, 0)),
                pl.BlockSpec((1, 1, kpad), lambda n: (n, 0, 0)),
            ],
            scratch_shapes=[
                pltpu.VMEM((padr, 64), jnp.float32),
                pltpu.VMEM((padr, 128), jnp.float32),
            ],
        ),
        compiler_params=pltpu.CompilerParams(
            dimension_semantics=("parallel",),
            # Residency at these shapes is ~7 MiB (weights ~1.6 MiB x2 bufs,
            # fm block 288 KiB x2, scratches ~0.3 MiB, temporaries); 32 MiB is
            # safe on v5e/v6e/v7x.  Re-derive if batch blocking / larger H,W.
            vmem_limit_bytes=32 * 1024 * 1024),
    )(x1p, vmask, w1, sh1[None, :], w2, sh2[None, :], w3, sh3[None, :],
      wfc, bfc[None, :])

    fm = fm_wide.reshape(N, H, Wp, 256)[:, :, :W, :]        # strip pad columns
    logits = logits.reshape(N, kpad)[:, :K]
    return logits, jnp.transpose(fm, (0, 3, 1, 2))          # NHWC -> NCHW


# --------------------------- params / reference ---------------------------- #

def init_params(key, num_classes):
    ks = jax.random.split(key, 12)
    p = {}
    # conv weights in HWIO
    p['w1'] = 0.10 * jax.random.normal(ks[0], (3, 3, 1, 64), jnp.float32)
    p['b1'] = 0.05 * jax.random.normal(ks[1], (64,), jnp.float32)
    p['w2'] = 0.05 * jax.random.normal(ks[2], (3, 3, 64, 128), jnp.float32)
    p['b2'] = 0.05 * jax.random.normal(ks[3], (128,), jnp.float32)
    p['w3'] = 0.05 * jax.random.normal(ks[4], (3, 3, 128, 256), jnp.float32)
    p['b3'] = 0.05 * jax.random.normal(ks[5], (256,), jnp.float32)
    # BN params (inference / running stats)
    p['g1'] = 1.0 + 0.1 * jax.random.normal(ks[6], (64,), jnp.float32)
    p['beta1'] = 0.05 * jax.random.normal(ks[7], (64,), jnp.float32)
    p['m1'] = 0.01 * jax.random.normal(ks[8], (64,), jnp.float32)
    p['v1'] = 0.5 + jax.random.uniform(ks[9], (64,), jnp.float32)
    p['g2'] = 1.0 + 0.1 * jax.random.normal(ks[10], (128,), jnp.float32)
    p['beta2'] = 0.05 * jax.random.normal(ks[11], (128,), jnp.float32)
    p['m2'] = jnp.zeros((128,), jnp.float32)
    p['v2'] = jnp.ones((128,), jnp.float32)
    # fc: (in=256, out=num_classes)
    kf1, kf2 = jax.random.split(ks[0])
    p['wfc'] = 0.05 * jax.random.normal(kf1, (256, num_classes), jnp.float32)
    p['bfc'] = 0.05 * jax.random.normal(kf2, (num_classes,), jnp.float32)
    return p


def reference_forward(x_nchw, p, eps=1e-5):
    x = jnp.transpose(x_nchw, (0, 2, 3, 1))

    def conv(x, w, b):
        y = jax.lax.conv_general_dilated(
            x, w, (1, 1), 'SAME', dimension_numbers=('NHWC', 'HWIO', 'NHWC'))
        return y + b

    def bn(x, g, beta, m, v):
        return g * (x - m) / jnp.sqrt(v + eps) + beta

    h = jax.nn.relu(bn(conv(x, p['w1'], p['b1']),
                       p['g1'], p['beta1'], p['m1'], p['v1']))
    h = jax.nn.relu(bn(conv(h, p['w2'], p['b2']),
                       p['g2'], p['beta2'], p['m2'], p['v2']))
    fm = conv(h, p['w3'], p['b3'])
    pooled = jnp.max(fm, axis=(1, 2))
    logits = pooled @ p['wfc'] + p['bfc']
    return logits, jnp.transpose(fm, (0, 3, 1, 2))


# --------------------------------- main ------------------------------------ #

if __name__ == "__main__":
    num_classes = 10
    N, H, W = 2, 16, 16

    key = jax.random.PRNGKey(0)
    kx, kp = jax.random.split(key)
    x = jax.random.normal(kx, (N, 1, H, W), jnp.float32)   # NCHW like PyTorch
    params = init_params(kp, num_classes)

    fwd = jax.jit(custom_model_forward)
    logits, fmap = fwd(x, params)
    jax.block_until_ready((logits, fmap))

    ref_logits, ref_fmap = reference_forward(x, params)
    assert logits.shape == (N, num_classes) and fmap.shape == (N, 256, H, W)
    assert jnp.allclose(logits, ref_logits, atol=1e-4, rtol=1e-4)
    assert jnp.allclose(fmap, ref_fmap, atol=1e-4, rtol=1e-4)

    print("KERNEL_OK")
</pallas_src>

<mosaic_0001>
module attributes {stable_mosaic.version = 11 : i64} {
  func.func @_fused_model_kernel(%arg0: i32, %arg1: memref<1x288x16xf32, #tpu.memory_space<vmem>>, %arg2: memref<288x1xf32, #tpu.memory_space<vmem>>, %arg3: memref<16x64xf32, #tpu.memory_space<vmem>>, %arg4: memref<1x64xf32, #tpu.memory_space<vmem>>, %arg5: memref<9x64x128xf32, #tpu.memory_space<vmem>>, %arg6: memref<1x128xf32, #tpu.memory_space<vmem>>, %arg7: memref<9x128x256xf32, #tpu.memory_space<vmem>>, %arg8: memref<1x256xf32, #tpu.memory_space<vmem>>, %arg9: memref<256x128xf32, #tpu.memory_space<vmem>>, %arg10: memref<1x128xf32, #tpu.memory_space<vmem>>, %arg11: memref<1x288x256xf32, #tpu.memory_space<vmem>>, %arg12: memref<1x1x128xf32, #tpu.memory_space<vmem>>, %arg13: memref<328x64xf32, #tpu.memory_space<vmem>>, %arg14: memref<328x128xf32, #tpu.memory_space<vmem>>) attributes {dimension_semantics = [#tpu.dimension_semantics<parallel>], iteration_bounds = array<i64: 2>, scalar_prefetch = 0 : i64, scratch_operands = 2 : i64, tpu.core_type = #tpu.core_type<tc>, window_params = [{transform_indices = @transform_0, window_bounds = array<i64: 1, 288, 16>}, {pipeline_mode = #tpu.pipeline_mode<synchronous>, transform_indices = @transform_1, window_bounds = array<i64: 288, 1>}, {pipeline_mode = #tpu.pipeline_mode<synchronous>, transform_indices = @transform_2, window_bounds = array<i64: 16, 64>}, {pipeline_mode = #tpu.pipeline_mode<synchronous>, transform_indices = @transform_3, window_bounds = array<i64: 1, 64>}, {pipeline_mode = #tpu.pipeline_mode<synchronous>, transform_indices = @transform_4, window_bounds = array<i64: 9, 64, 128>}, {pipeline_mode = #tpu.pipeline_mode<synchronous>, transform_indices = @transform_5, window_bounds = array<i64: 1, 128>}, {pipeline_mode = #tpu.pipeline_mode<synchronous>, transform_indices = @transform_6, window_bounds = array<i64: 9, 128, 256>}, {pipeline_mode = #tpu.pipeline_mode<synchronous>, transform_indices = @transform_7, window_bounds = array<i64: 1, 256>}, {pipeline_mode = #tpu.pipeline_mode<synchronous>, transform_indices = @transform_8, window_bounds = array<i64: 256, 128>}, {pipeline_mode = #tpu.pipeline_mode<synchronous>, transform_indices = @transform_9, window_bounds = array<i64: 1, 128>}, {transform_indices = @transform_10, window_bounds = array<i64: 1, 288, 256>}, {transform_indices = @transform_11, window_bounds = array<i64: 1, 1, 128>}]} {
    %c0 = arith.constant 0 : index
    %c0_0 = arith.constant 0 : index
    %0 = vector.load %arg2[%c0, %c0_0] : memref<288x1xf32, #tpu.memory_space<vmem>>, vector<288x1xf32>
    %cst = arith.constant 5.000000e-01 : f32
    %1 = vector.broadcast %cst : f32 to vector<288x1xf32>
    %2 = arith.cmpf ogt, %0, %1 : vector<288x1xf32>
    %cst_1 = arith.constant 0.000000e+00 : f32
    %3 = vector.broadcast %cst_1 : f32 to vector<19x64xf32>
    %c0_2 = arith.constant 0 : index
    %c0_3 = arith.constant 0 : index
    %4 = vector.load %arg13[%c0_2, %c0_3] : memref<328x64xf32, #tpu.memory_space<vmem>>, vector<19x64xf32>
    tpu.vector_store %arg13[%c0_2, %c0_3], %3 {strides = array<i32>} : memref<328x64xf32, #tpu.memory_space<vmem>>, vector<19x64xf32>,
    %cst_4 = arith.constant 0.000000e+00 : f32
    %5 = vector.broadcast %cst_4 : f32 to vector<21x64xf32>
    %c307 = arith.constant 307 : index
    %c0_5 = arith.constant 0 : index
    %6 = vector.load %arg13[%c307, %c0_5] : memref<328x64xf32, #tpu.memory_space<vmem>>, vector<21x64xf32>
    tpu.vector_store %arg13[%c307, %c0_5], %5 {strides = array<i32>} : memref<328x64xf32, #tpu.memory_space<vmem>>, vector<21x64xf32>,
    %cst_6 = arith.constant 0.000000e+00 : f32
    %7 = vector.broadcast %cst_6 : f32 to vector<19x128xf32>
    %c0_7 = arith.constant 0 : index
    %c0_8 = arith.constant 0 : index
    %8 = vector.load %arg14[%c0_7, %c0_8] : memref<328x128xf32, #tpu.memory_space<vmem>>, vector<19x128xf32>
    tpu.vector_store %arg14[%c0_7, %c0_8], %7 {strides = array<i32>} : memref<328x128xf32, #tpu.memory_space<vmem>>, vector<19x128xf32>,
    %cst_9 = arith.constant 0.000000e+00 : f32
    %9 = vector.broadcast %cst_9 : f32 to vector<21x128xf32>
    %c307_10 = arith.constant 307 : index
    %c0_11 = arith.constant 0 : index
    %10 = vector.load %arg14[%c307_10, %c0_11] : memref<328x128xf32, #tpu.memory_space<vmem>>, vector<21x128xf32>
    tpu.vector_store %arg14[%c307_10, %c0_11], %9 {strides = array<i32>} : memref<328x128xf32, #tpu.memory_space<vmem>>, vector<21x128xf32>,
    %c0_12 = arith.constant 0 : index
    %c0_13 = arith.constant 0 : index
    %c0_14 = arith.constant 0 : index
    %11 = vector.load %arg1[%c0_12, %c0_13, %c0_14] : memref<1x288x16xf32, #tpu.memory_space<vmem>>, vector<1x288x16xf32>
    %12 = vector.shape_cast %11 : vector<1x288x16xf32> to vector<288x16xf32>
    %c0_15 = arith.constant 0 : index
    %c0_16 = arith.constant 0 : index
    %13 = vector.load %arg3[%c0_15, %c0_16] : memref<16x64xf32, #tpu.memory_space<vmem>>, vector<16x64xf32>
    %cst_17 = arith.constant dense<0.000000e+00> : vector<288x64xf32>
    %14 = tpu.matmul %12, %13, %cst_17 {dimension_numbers = #tpu.dot_dimension_numbers<[1], [0], [0], [1], [0, 0, 1, 1], [], []>} : vector<288x16xf32>, vector<16x64xf32>, vector<288x64xf32> -> vector<288x64xf32>
    %c0_18 = arith.constant 0 : index
    %c0_19 = arith.constant 0 : index
    %15 = vector.load %arg4[%c0_18, %c0_19] : memref<1x64xf32, #tpu.memory_space<vmem>>, vector<1x64xf32>
    %16 = vector.broadcast %15 : vector<1x64xf32> to vector<288x64xf32>
    %17 = arith.addf %14, %16 : vector<288x64xf32>
    %cst_20 = arith.constant 0.000000e+00 : f32
    %18 = vector.broadcast %cst_20 : f32 to vector<288x64xf32>
    %19 = arith.maximumf %17, %18 : vector<288x64xf32>
    %cst_21 = arith.constant 0.000000e+00 : f32
    %20 = vector.shape_cast %2 : vector<288x1xi1> to vector<288x1xi1>
    %21 = vector.broadcast %20 : vector<288x1xi1> to vector<288x64xi1>
    %22 = vector.broadcast %cst_21 : f32 to vector<288x64xf32>
    %23 = arith.select %21, %19, %22 : vector<288x64xi1>, vector<288x64xf32>
    %c19 = arith.constant 19 : index
    %c0_22 = arith.constant 0 : index
    %24 = vector.load %arg13[%c19, %c0_22] : memref<328x64xf32, #tpu.memory_space<vmem>>, vector<288x64xf32>
    tpu.vector_store %arg13[%c19, %c0_22], %23 {strides = array<i32>} : memref<328x64xf32, #tpu.memory_space<vmem>>, vector<288x64xf32>,
    %c0_23 = arith.constant 0 : index
    %c0_24 = arith.constant 0 : index
    %25 = vector.load %arg13[%c0_23, %c0_24] : memref<328x64xf32, #tpu.memory_space<vmem>>, vector<288x64xf32>
    %c0_25 = arith.constant 0 : index
    %c0_26 = arith.constant 0 : index
    %c0_27 = arith.constant 0 : index
    %26 = vector.load %arg5[%c0_25, %c0_26, %c0_27] : memref<9x64x128xf32, #tpu.memory_space<vmem>>, vector<1x64x128xf32>
    %27 = vector.shape_cast %26 : vector<1x64x128xf32> to vector<64x128xf32>
    %cst_28 = arith.constant dense<0.000000e+00> : vector<288x128xf32>
    %28 = tpu.matmul %25, %27, %cst_28 {dimension_numbers = #tpu.dot_dimension_numbers<[1], [0], [0], [1], [0, 0, 1, 1], [], []>} : vector<288x64xf32>, vector<64x128xf32>, vector<288x128xf32> -> vector<288x128xf32>
    %c1 = arith.constant 1 : index
    %c0_29 = arith.constant 0 : index
    %29 = vector.load %arg13[%c1, %c0_29] : memref<328x64xf32, #tpu.memory_space<vmem>>, vector<288x64xf32>
    %c1_30 = arith.constant 1 : index
    %c0_31 = arith.constant 0 : index
    %c0_32 = arith.constant 0 : index
    %30 = vector.load %arg5[%c1_30, %c0_31, %c0_32] : memref<9x64x128xf32, #tpu.memory_space<vmem>>, vector<1x64x128xf32>
    %31 = vector.shape_cast %30 : vector<1x64x128xf32> to vector<64x128xf32>
    %cst_33 = arith.constant dense<0.000000e+00> : vector<288x128xf32>
    %32 = tpu.matmul %29, %31, %cst_33 {dimension_numbers = #tpu.dot_dimension_numbers<[1], [0], [0], [1], [0, 0, 1, 1], [], []>} : vector<288x64xf32>, vector<64x128xf32>, vector<288x128xf32> -> vector<288x128xf32>
    %33 = arith.addf %28, %32 : vector<288x128xf32>
    %c2 = arith.constant 2 : index
    %c0_34 = arith.constant 0 : index
    %34 = vector.load %arg13[%c2, %c0_34] : memref<328x64xf32, #tpu.memory_space<vmem>>, vector<288x64xf32>
    %c2_35 = arith.constant 2 : index
    %c0_36 = arith.constant 0 : index
    %c0_37 = arith.constant 0 : index
    %35 = vector.load %arg5[%c2_35, %c0_36, %c0_37] : memref<9x64x128xf32, #tpu.memory_space<vmem>>, vector<1x64x128xf32>
    %36 = vector.shape_cast %35 : vector<1x64x128xf32> to vector<64x128xf32>
    %cst_38 = arith.constant dense<0.000000e+00> : vector<288x128xf32>
    %37 = tpu.matmul %34, %36, %cst_38 {dimension_numbers = #tpu.dot_dimension_numbers<[1], [0], [0], [1], [0, 0, 1, 1], [], []>} : vector<288x64xf32>, vector<64x128xf32>, vector<288x128xf32> -> vector<288x128xf32>
    %38 = arith.addf %33, %37 : vector<288x128xf32>
    %c18 = arith.constant 18 : index
    %c0_39 = arith.constant 0 : index
    %39 = vector.load %arg13[%c18, %c0_39] : memref<328x64xf32, #tpu.memory_space<vmem>>, vector<288x64xf32>
    %c3 = arith.constant 3 : index
    %c0_40 = arith.constant 0 : index
    %c0_41 = arith.constant 0 : index
    %40 = vector.load %arg5[%c3, %c0_40, %c0_41] : memref<9x64x128xf32, #tpu.memory_space<vmem>>, vector<1x64x128xf32>
    %41 = vector.shape_cast %40 : vector<1x64x128xf32> to vector<64x128xf32>
    %cst_42 = arith.constant dense<0.000000e+00> : vector<288x128xf32>
    %42 = tpu.matmul %39, %41, %cst_42 {dimension_numbers = #tpu.dot_dimension_numbers<[1], [0], [0], [1], [0, 0, 1, 1], [], []>} : vector<288x64xf32>, vector<64x128xf32>, vector<288x128xf32> -> vector<288x128xf32>
    %43 = arith.addf %38, %42 : vector<288x128xf32>
    %c19_43 = arith.constant 19 : index
    %c0_44 = arith.constant 0 : index
    %44 = vector.load %arg13[%c19_43, %c0_44] : memref<328x64xf32, #tpu.memory_space<vmem>>, vector<288x64xf32>
    %c4 = arith.constant 4 : index
    %c0_45 = arith.constant 0 : index
    %c0_46 = arith.constant 0 : index
    %45 = vector.load %arg5[%c4, %c0_45, %c0_46] : memref<9x64x128xf32, #tpu.memory_space<vmem>>, vector<1x64x128xf32>
    %46 = vector.shape_cast %45 : vector<1x64x128xf32> to vector<64x128xf32>
    %cst_47 = arith.constant dense<0.000000e+00> : vector<288x128xf32>
    %47 = tpu.matmul %44, %46, %cst_47 {dimension_numbers = #tpu.dot_dimension_numbers<[1], [0], [0], [1], [0, 0, 1, 1], [], []>} : vector<288x64xf32>, vector<64x128xf32>, vector<288x128xf32> -> vector<288x128xf32>
    %48 = arith.addf %43, %47 : vector<288x128xf32>
    %c20 = arith.constant 20 : index
    %c0_48 = arith.constant 0 : index
    %49 = vector.load %arg13[%c20, %c0_48] : memref<328x64xf32, #tpu.memory_space<vmem>>, vector<288x64xf32>
    %c5 = arith.constant 5 : index
    %c0_49 = arith.constant 0 : index
    %c0_50 = arith.constant 0 : index
    %50 = vector.load %arg5[%c5, %c0_49, %c0_50] : memref<9x64x128xf32, #tpu.memory_space<vmem>>, vector<1x64x128xf32>
    %51 = vector.shape_cast %50 : vector<1x64x128xf32> to vector<64x128xf32>
    %cst_51 = arith.constant dense<0.000000e+00> : vector<288x128xf32>
    %52 = tpu.matmul %49, %51, %cst_51 {dimension_numbers = #tpu.dot_dimension_numbers<[1], [0], [0], [1], [0, 0, 1, 1], [], []>} : vector<288x64xf32>, vector<64x128xf32>, vector<288x128xf32> -> vector<288x128xf32>
    %53 = arith.addf %48, %52 : vector<288x128xf32>
    %c36 = arith.constant 36 : index
    %c0_52 = arith.constant 0 : index
    %54 = vector.load %arg13[%c36, %c0_52] : memref<328x64xf32, #tpu.memory_space<vmem>>, vector<288x64xf32>
    %c6 = arith.constant 6 : index
    %c0_53 = arith.constant 0 : index
    %c0_54 = arith.constant 0 : index
    %55 = vector.load %arg5[%c6, %c0_53, %c0_54] : memref<9x64x128xf32, #tpu.memory_space<vmem>>, vector<1x64x128xf32>
    %56 = vector.shape_cast %55 : vector<1x64x128xf32> to vector<64x128xf32>
    %cst_55 = arith.constant dense<0.000000e+00> : vector<288x128xf32>
    %57 = tpu.matmul %54, %56, %cst_55 {dimension_numbers = #tpu.dot_dimension_numbers<[1], [0], [0], [1], [0, 0, 1, 1], [], []>} : vector<288x64xf32>, vector<64x128xf32>, vector<288x128xf32> -> vector<288x128xf32>
    %58 = arith.addf %53, %57 : vector<288x128xf32>
    %c37 = arith.constant 37 : index
    %c0_56 = arith.constant 0 : index
    %59 = vector.load %arg13[%c37, %c0_56] : memref<328x64xf32, #tpu.memory_space<vmem>>, vector<288x64xf32>
    %c7 = arith.constant 7 : index
    %c0_57 = arith.constant 0 : index
    %c0_58 = arith.constant 0 : index
    %60 = vector.load %arg5[%c7, %c0_57, %c0_58] : memref<9x64x128xf32, #tpu.memory_space<vmem>>, vector<1x64x128xf32>
    %61 = vector.shape_cast %60 : vector<1x64x128xf32> to vector<64x128xf32>
    %cst_59 = arith.constant dense<0.000000e+00> : vector<288x128xf32>
    %62 = tpu.matmul %59, %61, %cst_59 {dimension_numbers = #tpu.dot_dimension_numbers<[1], [0], [0], [1], [0, 0, 1, 1], [], []>} : vector<288x64xf32>, vector<64x128xf32>, vector<288x128xf32> -> vector<288x128xf32>
    %63 = arith.addf %58, %62 : vector<288x128xf32>
    %c38 = arith.constant 38 : index
    %c0_60 = arith.constant 0 : index
    %64 = vector.load %arg13[%c38, %c0_60] : memref<328x64xf32, #tpu.memory_space<vmem>>, vector<288x64xf32>
    %c8 = arith.constant 8 : index
    %c0_61 = arith.constant 0 : index
    %c0_62 = arith.constant 0 : index
    %65 = vector.load %arg5[%c8, %c0_61, %c0_62] : memref<9x64x128xf32, #tpu.memory_space<vmem>>, vector<1x64x128xf32>
    %66 = vector.shape_cast %65 : vector<1x64x128xf32> to vector<64x128xf32>
    %cst_63 = arith.constant dense<0.000000e+00> : vector<288x128xf32>
    %67 = tpu.matmul %64, %66, %cst_63 {dimension_numbers = #tpu.dot_dimension_numbers<[1], [0], [0], [1], [0, 0, 1, 1], [], []>} : vector<288x64xf32>, vector<64x128xf32>, vector<288x128xf32> -> vector<288x128xf32>
    %68 = arith.addf %63, %67 : vector<288x128xf32>
    %c0_64 = arith.constant 0 : index
    %c0_65 = arith.constant 0 : index
    %69 = vector.load %arg6[%c0_64, %c0_65] : memref<1x128xf32, #tpu.memory_space<vmem>>, vector<1x128xf32>
    %70 = vector.broadcast %69 : vector<1x128xf32> to vector<288x128xf32>
    %71 = arith.addf %68, %70 : vector<288x128xf32>
    %cst_66 = arith.constant 0.000000e+00 : f32
    %72 = vector.broadcast %cst_66 : f32 to vector<288x128xf32>
    %73 = arith.maximumf %71, %72 : vector<288x128xf32>
    %cst_67 = arith.constant 0.000000e+00 : f32
    %74 = vector.shape_cast %2 : vector<288x1xi1> to vector<288x1xi1>
    %75 = vector.broadcast %74 : vector<288x1xi1> to vector<288x128xi1>
    %76 = vector.broadcast %cst_67 : f32 to vector<288x128xf32>
    %77 = arith.select %75, %73, %76 : vector<288x128xi1>, vector<288x128xf32>
    %c19_68 = arith.constant 19 : index
    %c0_69 = arith.constant 0 : index
    %78 = vector.load %arg14[%c19_68, %c0_69] : memref<328x128xf32, #tpu.memory_space<vmem>>, vector<288x128xf32>
    tpu.vector_store %arg14[%c19_68, %c0_69], %77 {strides = array<i32>} : memref<328x128xf32, #tpu.memory_space<vmem>>, vector<288x128xf32>,
    %c0_70 = arith.constant 0 : index
    %c0_71 = arith.constant 0 : index
    %79 = vector.load %arg14[%c0_70, %c0_71] : memref<328x128xf32, #tpu.memory_space<vmem>>, vector<288x128xf32>
    %c0_72 = arith.constant 0 : index
    %c0_73 = arith.constant 0 : index
    %c0_74 = arith.constant 0 : index
    %80 = vector.load %arg7[%c0_72, %c0_73, %c0_74] : memref<9x128x256xf32, #tpu.memory_space<vmem>>, vector<1x128x256xf32>
    %81 = vector.shape_cast %80 : vector<1x128x256xf32> to vector<128x256xf32>
    %cst_75 = arith.constant dense<0.000000e+00> : vector<288x256xf32>
    %82 = tpu.matmul %79, %81, %cst_75 {dimension_numbers = #tpu.dot_dimension_numbers<[1], [0], [0], [1], [0, 0, 1, 1], [], []>} : vector<288x128xf32>, vector<128x256xf32>, vector<288x256xf32> -> vector<288x256xf32>
    %c1_76 = arith.constant 1 : index
    %c0_77 = arith.constant 0 : index
    %83 = vector.load %arg14[%c1_76, %c0_77] : memref<328x128xf32, #tpu.memory_space<vmem>>, vector<288x128xf32>
    %c1_78 = arith.constant 1 : index
    %c0_79 = arith.constant 0 : index
    %c0_80 = arith.constant 0 : index
    %84 = vector.load %arg7[%c1_78, %c0_79, %c0_80] : memref<9x128x256xf32, #tpu.memory_space<vmem>>, vector<1x128x256xf32>
    %85 = vector.shape_cast %84 : vector<1x128x256xf32> to vector<128x256xf32>
    %cst_81 = arith.constant dense<0.000000e+00> : vector<288x256xf32>
    %86 = tpu.matmul %83, %85, %cst_81 {dimension_numbers = #tpu.dot_dimension_numbers<[1], [0], [0], [1], [0, 0, 1, 1], [], []>} : vector<288x128xf32>, vector<128x256xf32>, vector<288x256xf32> -> vector<288x256xf32>
    %87 = arith.addf %82, %86 : vector<288x256xf32>
    %c2_82 = arith.constant 2 : index
    %c0_83 = arith.constant 0 : index
    %88 = vector.load %arg14[%c2_82, %c0_83] : memref<328x128xf32, #tpu.memory_space<vmem>>, vector<288x128xf32>
    %c2_84 = arith.constant 2 : index
    %c0_85 = arith.constant 0 : index
    %c0_86 = arith.constant 0 : index
    %89 = vector.load %arg7[%c2_84, %c0_85, %c0_86] : memref<9x128x256xf32, #tpu.memory_space<vmem>>, vector<1x128x256xf32>
    %90 = vector.shape_cast %89 : vector<1x128x256xf32> to vector<128x256xf32>
    %cst_87 = arith.constant dense<0.000000e+00> : vector<288x256xf32>
    %91 = tpu.matmul %88, %90, %cst_87 {dimension_numbers = #tpu.dot_dimension_numbers<[1], [0], [0], [1], [0, 0, 1, 1], [], []>} : vector<288x128xf32>, vector<128x256xf32>, vector<288x256xf32> -> vector<288x256xf32>
    %92 = arith.addf %87, %91 : vector<288x256xf32>
    %c18_88 = arith.constant 18 : index
    %c0_89 = arith.constant 0 : index
    %93 = vector.load %arg14[%c18_88, %c0_89] : memref<328x128xf32, #tpu.memory_space<vmem>>, vector<288x128xf32>
    %c3_90 = arith.constant 3 : index
    %c0_91 = arith.constant 0 : index
    %c0_92 = arith.constant 0 : index
    %94 = vector.load %arg7[%c3_90, %c0_91, %c0_92] : memref<9x128x256xf32, #tpu.memory_space<vmem>>, vector<1x128x256xf32>
    %95 = vector.shape_cast %94 : vector<1x128x256xf32> to vector<128x256xf32>
    %cst_93 = arith.constant dense<0.000000e+00> : vector<288x256xf32>
    %96 = tpu.matmul %93, %95, %cst_93 {dimension_numbers = #tpu.dot_dimension_numbers<[1], [0], [0], [1], [0, 0, 1, 1], [], []>} : vector<288x128xf32>, vector<128x256xf32>, vector<288x256xf32> -> vector<288x256xf32>
    %97 = arith.addf %92, %96 : vector<288x256xf32>
    %c19_94 = arith.constant 19 : index
    %c0_95 = arith.constant 0 : index
    %98 = vector.load %arg14[%c19_94, %c0_95] : memref<328x128xf32, #tpu.memory_space<vmem>>, vector<288x128xf32>
    %c4_96 = arith.constant 4 : index
    %c0_97 = arith.constant 0 : index
    %c0_98 = arith.constant 0 : index
    %99 = vector.load %arg7[%c4_96, %c0_97, %c0_98] : memref<9x128x256xf32, #tpu.memory_space<vmem>>, vector<1x128x256xf32>
    %100 = vector.shape_cast %99 : vector<1x128x256xf32> to vector<128x256xf32>
    %cst_99 = arith.constant dense<0.000000e+00> : vector<288x256xf32>
    %101 = tpu.matmul %98, %100, %cst_99 {dimension_numbers = #tpu.dot_dimension_numbers<[1], [0], [0], [1], [0, 0, 1, 1], [], []>} : vector<288x128xf32>, vector<128x256xf32>, vector<288x256xf32> -> vector<288x256xf32>
    %102 = arith.addf %97, %101 : vector<288x256xf32>
    %c20_100 = arith.constant 20 : index
    %c0_101 = arith.constant 0 : index
    %103 = vector.load %arg14[%c20_100, %c0_101] : memref<328x128xf32, #tpu.memory_space<vmem>>, vector<288x128xf32>
    %c5_102 = arith.constant 5 : index
    %c0_103 = arith.constant 0 : index
    %c0_104 = arith.constant 0 : index
    %104 = vector.load %arg7[%c5_102, %c0_103, %c0_104] : memref<9x128x256xf32, #tpu.memory_space<vmem>>, vector<1x128x256xf32>
    %105 = vector.shape_cast %104 : vector<1x128x256xf32> to vector<128x256xf32>
    %cst_105 = arith.constant dense<0.000000e+00> : vector<288x256xf32>
    %106 = tpu.matmul %103, %105, %cst_105 {dimension_numbers = #tpu.dot_dimension_numbers<[1], [0], [0], [1], [0, 0, 1, 1], [], []>} : vector<288x128xf32>, vector<128x256xf32>, vector<288x256xf32> -> vector<288x256xf32>
    %107 = arith.addf %102, %106 : vector<288x256xf32>
    %c36_106 = arith.constant 36 : index
    %c0_107 = arith.constant 0 : index
    %108 = vector.load %arg14[%c36_106, %c0_107] : memref<328x128xf32, #tpu.memory_space<vmem>>, vector<288x128xf32>
    %c6_108 = arith.constant 6 : index
    %c0_109 = arith.constant 0 : index
    %c0_110 = arith.constant 0 : index
    %109 = vector.load %arg7[%c6_108, %c0_109, %c0_110] : memref<9x128x256xf32, #tpu.memory_space<vmem>>, vector<1x128x256xf32>
    %110 = vector.shape_cast %109 : vector<1x128x256xf32> to vector<128x256xf32>
    %cst_111 = arith.constant dense<0.000000e+00> : vector<288x256xf32>
    %111 = tpu.matmul %108, %110, %cst_111 {dimension_numbers = #tpu.dot_dimension_numbers<[1], [0], [0], [1], [0, 0, 1, 1], [], []>} : vector<288x128xf32>, vector<128x256xf32>, vector<288x256xf32> -> vector<288x256xf32>
    %112 = arith.addf %107, %111 : vector<288x256xf32>
    %c37_112 = arith.constant 37 : index
    %c0_113 = arith.constant 0 : index
    %113 = vector.load %arg14[%c37_112, %c0_113] : memref<328x128xf32, #tpu.memory_space<vmem>>, vector<288x128xf32>
    %c7_114 = arith.constant 7 : index
    %c0_115 = arith.constant 0 : index
    %c0_116 = arith.constant 0 : index
    %114 = vector.load %arg7[%c7_114, %c0_115, %c0_116] : memref<9x128x256xf32, #tpu.memory_space<vmem>>, vector<1x128x256xf32>
    %115 = vector.shape_cast %114 : vector<1x128x256xf32> to vector<128x256xf32>
    %cst_117 = arith.constant dense<0.000000e+00> : vector<288x256xf32>
    %116 = tpu.matmul %113, %115, %cst_117 {dimension_numbers = #tpu.dot_dimension_numbers<[1], [0], [0], [1], [0, 0, 1, 1], [], []>} : vector<288x128xf32>, vector<128x256xf32>, vector<288x256xf32> -> vector<288x256xf32>
    %117 = arith.addf %112, %116 : vector<288x256xf32>
    %c38_118 = arith.constant 38 : index
    %c0_119 = arith.constant 0 : index
    %118 = vector.load %arg14[%c38_118, %c0_119] : memref<328x128xf32, #tpu.memory_space<vmem>>, vector<288x128xf32>
    %c8_120 = arith.constant 8 : index
    %c0_121 = arith.constant 0 : index
    %c0_122 = arith.constant 0 : index
    %119 = vector.load %arg7[%c8_120, %c0_121, %c0_122] : memref<9x128x256xf32, #tpu.memory_space<vmem>>, vector<1x128x256xf32>
    %120 = vector.shape_cast %119 : vector<1x128x256xf32> to vector<128x256xf32>
    %cst_123 = arith.constant dense<0.000000e+00> : vector<288x256xf32>
    %121 = tpu.matmul %118, %120, %cst_123 {dimension_numbers = #tpu.dot_dimension_numbers<[1], [0], [0], [1], [0, 0, 1, 1], [], []>} : vector<288x128xf32>, vector<128x256xf32>, vector<288x256xf32> -> vector<288x256xf32>
    %122 = arith.addf %117, %121 : vector<288x256xf32>
    %c0_124 = arith.constant 0 : index
    %c0_125 = arith.constant 0 : index
    %123 = vector.load %arg8[%c0_124, %c0_125] : memref<1x256xf32, #tpu.memory_space<vmem>>, vector<1x256xf32>
    %124 = vector.broadcast %123 : vector<1x256xf32> to vector<288x256xf32>
    %125 = arith.addf %122, %124 : vector<288x256xf32>
    %c0_126 = arith.constant 0 : index
    %c0_127 = arith.constant 0 : index
    %c0_128 = arith.constant 0 : index
    %126 = vector.load %arg11[%c0_126, %c0_127, %c0_128] : memref<1x288x256xf32, #tpu.memory_space<vmem>>, vector<1x288x256xf32>
    %127 = vector.shape_cast %126 : vector<1x288x256xf32> to vector<288x256xf32>
    %128 = vector.shape_cast %125 : vector<288x256xf32> to vector<1x288x256xf32>
    tpu.vector_store %arg11[%c0_126, %c0_127, %c0_128], %128 {strides = array<i32>} : memref<1x288x256xf32, #tpu.memory_space<vmem>>, vector<1x288x256xf32>,
    %cst_129 = arith.constant 0xFF800000 : f32
    %129 = vector.shape_cast %2 : vector<288x1xi1> to vector<288x1xi1>
    %130 = vector.broadcast %129 : vector<288x1xi1> to vector<288x256xi1>
    %131 = vector.broadcast %cst_129 : f32 to vector<288x256xf32>
    %132 = arith.select %130, %125, %131 : vector<288x256xi1>, vector<288x256xf32>
    %cst_130 = arith.constant dense<0xFF800000> : vector<256xf32>
    %133 = vector.multi_reduction <maximumf>, %132, %cst_130 [0] : vector<288x256xf32> to vector<256xf32>
    %134 = vector.shape_cast %133 : vector<256xf32> to vector<1x256xf32>
    %c0_131 = arith.constant 0 : index
    %c0_132 = arith.constant 0 : index
    %135 = vector.load %arg9[%c0_131, %c0_132] : memref<256x128xf32, #tpu.memory_space<vmem>>, vector<256x128xf32>
    %cst_133 = arith.constant dense<0.000000e+00> : vector<1x128xf32>
    %136 = tpu.matmul %134, %135, %cst_133 {dimension_numbers = #tpu.dot_dimension_numbers<[1], [0], [0], [1], [0, 0, 1, 1], [], []>} : vector<1x256xf32>, vector<256x128xf32>, vector<1x128xf32> -> vector<1x128xf32>
    %c0_134 = arith.constant 0 : index
    %c0_135 = arith.constant 0 : index
    %137 = vector.load %arg10[%c0_134, %c0_135] : memref<1x128xf32, #tpu.memory_space<vmem>>, vector<1x128xf32>
    %138 = arith.addf %136, %137 : vector<1x128xf32>
    %c0_136 = arith.constant 0 : index
    %c0_137 = arith.constant 0 : index
    %c0_138 = arith.constant 0 : index
    %139 = vector.load %arg12[%c0_136, %c0_137, %c0_138] : memref<1x1x128xf32, #tpu.memory_space<vmem>>, vector<1x1x128xf32>
    %140 = vector.shape_cast %139 : vector<1x1x128xf32> to vector<1x128xf32>
    %141 = vector.shape_cast %138 : vector<1x128xf32> to vector<1x1x128xf32>
    tpu.vector_store %arg12[%c0_136, %c0_137, %c0_138], %141 {strides = array<i32>} : memref<1x1x128xf32, #tpu.memory_space<vmem>>, vector<1x1x128xf32>,
    return
  }
  func.func @transform_0(%arg0: i32) -> (i32, i32, i32) {
    %c0_i32 = arith.constant 0 : i32
    %c0_i32_0 = arith.constant 0 : i32
    %c0_i32_1 = arith.constant 0 : i32
    return %arg0, %c0_i32, %c0_i32_0 : i32, i32, i32
  }
  func.func @transform_1(%arg0: i32) -> (i32, i32) {
    %c0_i32 = arith.constant 0 : i32
    %c0_i32_0 = arith.constant 0 : i32
    %c0_i32_1 = arith.constant 0 : i32
    return %c0_i32, %c0_i32_0 : i32, i32
  }
  func.func @transform_2(%arg0: i32) -> (i32, i32) {
    %c0_i32 = arith.constant 0 : i32
    %c0_i32_0 = arith.constant 0 : i32
    %c0_i32_1 = arith.constant 0 : i32
    return %c0_i32, %c0_i32_0 : i32, i32
  }
  func.func @transform_3(%arg0: i32) -> (i32, i32) {
    %c0_i32 = arith.constant 0 : i32
    %c0_i32_0 = arith.constant 0 : i32
    %c0_i32_1 = arith.constant 0 : i32
    return %c0_i32, %c0_i32_0 : i32, i32
  }
  func.func @transform_4(%arg0: i32) -> (i32, i32, i32) {
    %c0_i32 = arith.constant 0 : i32
    %c0_i32_0 = arith.constant 0 : i32
    %c0_i32_1 = arith.constant 0 : i32
    %c0_i32_2 = arith.constant 0 : i32
    return %c0_i32, %c0_i32_0, %c0_i32_1 : i32, i32, i32
  }
  func.func @transform_5(%arg0: i32) -> (i32, i32) {
    %c0_i32 = arith.constant 0 : i32
    %c0_i32_0 = arith.constant 0 : i32
    %c0_i32_1 = arith.constant 0 : i32
    return %c0_i32, %c0_i32_0 : i32, i32
  }
  func.func @transform_6(%arg0: i32) -> (i32, i32, i32) {
    %c0_i32 = arith.constant 0 : i32
    %c0_i32_0 = arith.constant 0 : i32
    %c0_i32_1 = arith.constant 0 : i32
    %c0_i32_2 = arith.constant 0 : i32
    return %c0_i32, %c0_i32_0, %c0_i32_1 : i32, i32, i32
  }
  func.func @transform_7(%arg0: i32) -> (i32, i32) {
    %c0_i32 = arith.constant 0 : i32
    %c0_i32_0 = arith.constant 0 : i32
    %c0_i32_1 = arith.constant 0 : i32
    return %c0_i32, %c0_i32_0 : i32, i32
  }
  func.func @transform_8(%arg0: i32) -> (i32, i32) {
    %c0_i32 = arith.constant 0 : i32
    %c0_i32_0 = arith.constant 0 : i32
    %c0_i32_1 = arith.constant 0 : i32
    return %c0_i32, %c0_i32_0 : i32, i32
  }
  func.func @transform_9(%arg0: i32) -> (i32, i32) {
    %c0_i32 = arith.constant 0 : i32
    %c0_i32_0 = arith.constant 0 : i32
    %c0_i32_1 = arith.constant 0 : i32
    return %c0_i32, %c0_i32_0 : i32, i32
  }
  func.func @transform_10(%arg0: i32) -> (i32, i32, i32) {
    %c0_i32 = arith.constant 0 : i32
    %c0_i32_0 = arith.constant 0 : i32
    %c0_i32_1 = arith.constant 0 : i32
    return %arg0, %c0_i32, %c0_i32_0 : i32, i32, i32
  }
  func.func @transform_11(%arg0: i32) -> (i32, i32, i32) {
    %c0_i32 = arith.constant 0 : i32
    %c0_i32_0 = arith.constant 0 : i32
    %c0_i32_1 = arith.constant 0 : i32
    return %arg0, %c0_i32, %c0_i32_0 : i32, i32, i32
  }
}

</mosaic_0001>

<bundles_post_ra>
// kernel: custom_model_forward.1
= control target key start
LH: loop header
LB: loop body
LE: loop exit
PB: predicated region body
PF: predicated region fallthrough
CT: control target
= control target key end

     0   :  { %s16973_s0 = inlined_call_operand.vmem [shape: f32[2,288,16], index: 0, kind: input, shape index: {}]   ;;  %s16974_s1 = inlined_call_operand.vmem [shape: f32[288,1], index: 1, kind: input, shape index: {}]   ;;  %s16975_s2 = inlined_call_operand.vmem [shape: f32[16,64], index: 2, kind: input, shape index: {}]   ;;  %s16976_s3 = inlined_call_operand.vmem [shape: f32[1,64], index: 3, kind: input, shape index: {}]   ;;  %s16977_s4 = inlined_call_operand.vmem [shape: f32[9,64,128], index: 4, kind: input, shape index: {}]   ;;  %s16978_s5 = inlined_call_operand.vmem [shape: f32[1,128], index: 5, kind: input, shape index: {}]   ;;  %s16979_s6 = inlined_call_operand.vmem [shape: f32[9,128,256], index: 6, kind: input, shape index: {}]   ;;  %s16980_s7 = inlined_call_operand.vmem [shape: f32[1,256], index: 7, kind: input, shape index: {}]   ;;  %s16981_s8 = inlined_call_operand.vmem [shape: f32[256,128], index: 8, kind: input, shape index: {}]   ;;  %s16982_s9 = inlined_call_operand.vmem [shape: f32[1,128], index: 9, kind: input, shape index: {}]   ;;  %s16983_s10 = inlined_call_operand.vmem [shape: f32[2,288,256], index: 10, kind: output, shape index: {0}]   ;;  %s16984_s11 = inlined_call_operand.hbm [shape: f32[2,1,128], index: 11, kind: output, shape index: {1}]  }
   0x1   :  { %17081 = sst [smem:[#allocation118_spill]] %s16973_s0 }
   0x2   :  { %17082 = sst [smem:[#allocation119_spill]] %s16974_s1 }
   0x3   :  { %17 = vsyncpa [#allocation5], 0 }
   0x4   :  { %19 = vsyncpa [#allocation5 + $0x1], 0  ;;  %s11380_s17 = smov 0   ;;  %s11382_s18 = smov 0  }
   0x5   :  { %s11384_s19 = smov 0   ;;  %s11386_s20 = smov 0  }
   0x6 LB: > { %s11401_s21 = sadd.s32 4294967295, %s11315_s20   ;;  %s9323_s22 = sadd.s32 4294967294, %s11315_s20   ;;  %s11315_s20 = sphi %s11386_s20, %s17732_s20   ;;  %s11311_s19 = sphi %s11384_s19, %s17731_s19   ;;  %s11307_s18 = sphi %s11382_s18, %s17730_s18   ;;  %s11303_s17 = sphi %s11380_s17, %s17729_s17  }
   0x7   : > { %s11405_s23 = sadd.s32 1, %s11315_s20   ;;  %s273_s24 = sadd.s32 1, %s11311_s19 }
   0x8   : > { %s270_s25 = ssub.s32 %s11315_s20, %s11405_s23  ;;  %p283_p0 = scmp.ne.s32.totalorder %s11311_s19, %s11307_s18 }
   0x9   : > { %p271_p1 = scmp.eq.s32.totalorder %s270_s25, 0  ;;  %p284_p2 = scmp.eq.s32.totalorder %s11401_s21, 1 }
   0xa   : > { %p289_p3 = scmp.ne.s32.totalorder %s11307_s18, %s11303_s17  ;;  %p290_p4 = scmp.eq.s32.totalorder %s9323_s22, 1 }
   0xb   : > { %s11416_s26 = scalar_select %p271_p1, %s11311_s19, %s273_s24  }
   0xc   : > { %p11418_p5 = por %p284_p2, %p283_p0  ;;  %p11422_p6 = por %p290_p4, %p289_p3 }
   0xd   : > { %p9326_p7 = scmp.ge.s32.totalorder %s11315_s20, 1  ;;  %p343_p8 = scmp.lt.s32.totalorder %s11315_s20, 3 }
   0xf   : > { %p344_p9 = pnand %p9326_p7, %p343_p8 }
  0x11   : > { %347 = sbr.rel (%p344_p9) target bundleno = 1840 (0x730), region = 60 }
  0x16   : > { %v521_v0 = vld [vmem:[%s16975_s2 + $0x8] sm:$0xff]  ;;  %v520_v1 = vld [vmem:[%s16975_s2] sm:$0xff]  ;;  %p387_p10 = scmp.lt.s32.totalorder %s11401_s21, 1  ;;  %s17085_s1 = sld [smem:[#allocation119_spill]]  ;;  %v11317_v3 = vmov 0   ;;  %vm529_vm4 = vcmask 130048  }
  0x17   : > { %10483 = vmatprep.subr.mxu0 %v521_v0  ;;  %11246 = vset.pattern.permute.xlu0 %v11317_v3  ;;  %s17086_s0 = sld [smem:[#allocation118_spill]]  ;;  %s10011_s30 = sshll.u32 %s11401_s21, 4 }
  0x18   : > { %10484 = vmatpush3.msra.mxu0 %v521_v0  ;;  %s11449_s12 = scalar_select %p387_p10, %s11401_s21, 1  ;;  %11247 = vset.pattern.permute.xlu1 %v11317_v3 }
  0x19   : > { %10485 = vmatprep.subr.mxu0 %v520_v1  ;;  %s11319_s24 = smov [#allocation4]  }
  0x1a   : > { %10486 = vmatpush3.msra.mxu0 %v520_v1  ;;  %s11203_s22 = smul.u32 288, %s11449_s12  ;;  %s11259_s25 = sshll.u32 %s11319_s24, 4  ;;  %s11260_s25 = int_to_ptr.vmem [resolvable:$false] %s11259_s25 }
  0x1b   : > { %s11204_s14 = smul.u32 576, %s11449_s12  ;;  %s11261_s21 = scalar_lea.vmem %s11260_s25, 32 }
  0x1c   : > { %v397_v2 = vld [vmem:[%s17085_s1] sm:$0xff]  ;;  %v399_v4 = vld [vmem:[%s17085_s1 + $0x10] sm:$0xff]  ;;  %v398_v5 = vld [vmem:[%s17085_s1 + $0x8] sm:$0xff] }
  0x1d   : > { %vm433_vm0 = vcmp.gt.f32.partialorder %v397_v2, 0.5  ;;  %v400_v6 = vld [vmem:[%s17085_s1 + $0x18] sm:$0xff]  ;;  %vm435_vm1 = vcmp.gt.f32.partialorder %v399_v4, 0.5  ;;  %vm434_vm2 = vcmp.gt.f32.partialorder %v398_v5, 0.5  ;;  %v401_v8 = vld [vmem:[%s17085_s1 + $0x20] sm:$0xff]  ;;  %v402_v10 = vld [vmem:[%s17085_s1 + $0x28] sm:$0xff]  ;;  %s11466_s29 = scalar_lea.vmem %s17086_s0, %s11203_s22  ;;  %s9241_s22 = scalar_lea.hbm %s16984_s11, %s10011_s30 }
  0x1e   : > { %v919_v7 = vsel %vm433_vm0, 1, %v11317_v3  ;;  %vm436_vm3 = vcmp.gt.f32.partialorder %v400_v6, 0.5  ;;  %v921_v9 = vsel %vm435_vm1, 1, %v11317_v3  ;;  %v920_v11 = vsel %vm434_vm2, 1, %v11317_v3  ;;  %v403_v13 = vld [vmem:[%s17085_s1 + $0x30] sm:$0xff]  ;;  %v404_v14 = vld [vmem:[%s17085_s1 + $0x38] sm:$0xff] }
  0x1f   : > { %956 = vperm.xlu0 %11246, %v919_v7   ;;  %962 = vperm.xlu1 %11247, %v921_v9   ;;  %v922_v12 = vsel %vm436_vm3, 1, %v11317_v3  ;;  %vm437_vm5 = vcmp.gt.f32.partialorder %v401_v8, 0.5  ;;  %vm438_vm6 = vcmp.gt.f32.partialorder %v402_v10, 0.5  ;;  %v484_v15 = vld [vmem:[%s11466_s29] sm:$0xff]  ;;  %v485_v16 = vld [vmem:[%s11466_s29 + $0x8] sm:$0xff]  ;;  %v486_v17 = vld [vmem:[%s11466_s29 + $0x10] sm:$0xff] }
  0x20   : > { %10487 = vmatprep.mubr.msk.f32.mxu0 %vm529_vm4, %v484_v15  ;;  %v923_v18 = vsel %vm437_vm5, 1, %v11317_v3  ;;  %v924_v19 = vsel %vm438_vm6, 1, %v11317_v3  ;;  %vm439_vm7 = vcmp.gt.f32.partialorder %v403_v13, 0.5  ;;  %v487_v20 = vld [vmem:[%s11466_s29 + $0x18] sm:$0xff]  ;;  %vm440_vm8 = vcmp.gt.f32.partialorder %v404_v14, 0.5  ;;  %v405_v21 = vld [vmem:[%s17085_s1 + $0x40] sm:$0xff] }
  0x21   : > { %10488 = vmatmul.mubr.msk.f32.vlgmr.msra.gmra.mxu0 %vm529_vm4, %v485_v16  ;;  %v488_v22 = vld [vmem:[%s11466_s29 + $0x20] sm:$0xff]  ;;  %v406_v23 = vld [vmem:[%s17085_s1 + $0x48] sm:$0xff]  ;;  %v925_v24 = vsel %vm439_vm7, 1, %v11317_v3  ;;  %v926_v25 = vsel %vm440_vm8, 1, %v11317_v3  ;;  %vm441_vm9 = vcmp.gt.f32.partialorder %v405_v21, 0.5  ;;  %v407_v27 = vld [vmem:[%s17085_s1 + $0x50] sm:$0xff] }
  0x22   : > { %10490 = vmatprep.mubr.msk.f32.mxu0 %vm529_vm4, %v486_v17  ;;  %v489_v26 = vld [vmem:[%s11466_s29 + $0x28] sm:$0xff]  ;;  %vm442_vm10 = vcmp.gt.f32.partialorder %v406_v23, 0.5  ;;  %v490_v28 = vld [vmem:[%s11466_s29 + $0x30] sm:$0xff]  ;;  %v408_v29 = vld [vmem:[%s17085_s1 + $0x58] sm:$0xff]  ;;  %v927_v30 = vsel %vm441_vm9, 1, %v11317_v3  ;;  %vm443_vm11 = vcmp.gt.f32.partialorder %v407_v27, 0.5 }
  0x23   : > { %959 = vperm.xlu0 %11246, %v920_v11   ;;  %965 = vperm.xlu1 %11247, %v922_v12   ;;  %v928_v31 = vsel %vm442_vm10, 1, %v11317_v3  ;;  %v491_v32 = vld [vmem:[%s11466_s29 + $0x38] sm:$0xff]  ;;  %vm444_vm12 = vcmp.gt.f32.partialorder %v408_v29, 0.5  ;;  %v409_v33 = vld [vmem:[%s17085_s1 + $0x60] sm:$0xff]  ;;  %v410_v35 = vld [vmem:[%s17085_s1 + $0x68] sm:$0xff]  ;;  %v929_v36 = vsel %vm443_vm11, 1, %v11317_v3 }
  0x24   : > { %v492_v34 = vld [vmem:[%s11466_s29 + $0x40] sm:$0xff]  ;;  %v930_v37 = vsel %vm444_vm12, 1, %v11317_v3  ;;  %vm445_vm13 = vcmp.gt.f32.partialorder %v409_v33, 0.5  ;;  %v493_v38 = vld [vmem:[%s11466_s29 + $0x48] sm:$0xff]  ;;  %vm446_vm14 = vcmp.gt.f32.partialorder %v410_v35, 0.5  ;;  %v411_v39 = vld [vmem:[%s17085_s1 + $0x70] sm:$0xff] }
  0x25   : > { %10491 = vmatmul.mubr.msk.f32.gmra.mxu0 %vm529_vm4, %v487_v20  ;;  %v494_v40 = vld [vmem:[%s11466_s29 + $0x50] sm:$0xff]  ;;  %v412_v41 = vld [vmem:[%s17085_s1 + $0x78] sm:$0xff]  ;;  %v931_v42 = vsel %vm445_vm13, 1, %v11317_v3  ;;  %v932_v43 = vsel %vm446_vm14, 1, %v11317_v3  ;;  %vm447_vm15 = vcmp.gt.f32.partialorder %v411_v39, 0.5  ;;  %v413_v45 = vld [vmem:[%s17085_s1 + $0x80] sm:$0xff] }
  0x26   : > { %10493 = vmatprep.mubr.msk.f32.mxu0 %vm529_vm4, %v488_v22  ;;  %v495_v44 = vld [vmem:[%s11466_s29 + $0x58] sm:$0xff]  ;;  %vm448_vm0 = vcmp.gt.f32.partialorder %v412_v41, 0.5  ;;  %v496_v46 = vld [vmem:[%s11466_s29 + $0x60] sm:$0xff]  ;;  %v414_v47 = vld [vmem:[%s17085_s1 + $0x88] sm:$0xff]  ;;  %v933_v48 = vsel %vm447_vm15, 1, %v11317_v3  ;;  %vm449_vm1 = vcmp.gt.f32.partialorder %v413_v45, 0.5 }
  0x27   : > { %968 = vperm.xlu0 %11246, %v923_v18   ;;  %971 = vperm.xlu1 %11247, %v924_v19   ;;  %v934_v49 = vsel %vm448_vm0, 1, %v11317_v3  ;;  %v497_v50 = vld [vmem:[%s11466_s29 + $0x68] sm:$0xff]  ;;  %vm450_vm2 = vcmp.gt.f32.partialorder %v414_v47, 0.5  ;;  %v415_v51 = vld [vmem:[%s17085_s1 + $0x90] sm:$0xff]  ;;  %v416_v53 = vld [vmem:[%s17085_s1 + $0x98] sm:$0xff]  ;;  %v935_v54 = vsel %vm449_vm1, 1, %v11317_v3 }
  0x28   : > { %v498_v52 = vld [vmem:[%s11466_s29 + $0x70] sm:$0xff]  ;;  %v936_v55 = vsel %vm450_vm2, 1, %v11317_v3  ;;  %vm451_vm3 = vcmp.gt.f32.partialorder %v415_v51, 0.5  ;;  %v499_v56 = vld [vmem:[%s11466_s29 + $0x78] sm:$0xff]  ;;  %vm452_vm5 = vcmp.gt.f32.partialorder %v416_v53, 0.5  ;;  %v417_v57 = vld [vmem:[%s17085_s1 + $0xa0] sm:$0xff] }
  0x29   : > { %10494 = vmatmul.mubr.msk.f32.gmra.mxu0 %vm529_vm4, %v489_v26  ;;  %v500_v58 = vld [vmem:[%s11466_s29 + $0x80] sm:$0xff]  ;;  %v418_v59 = vld [vmem:[%s17085_s1 + $0xa8] sm:$0xff]  ;;  %v937_v60 = vsel %vm451_vm3, 1, %v11317_v3  ;;  %v938_v61 = vsel %vm452_vm5, 1, %v11317_v3  ;;  %vm453_vm6 = vcmp.gt.f32.partialorder %v417_v57, 0.5  ;;  %v419_v63 = vld [vmem:[%s17085_s1 + $0xb0] sm:$0xff] }
  0x2a   : > { %10496 = vmatprep.mubr.msk.f32.mxu0 %vm529_vm4, %v490_v28  ;;  %v501_v62 = vld [vmem:[%s11466_s29 + $0x88] sm:$0xff]  ;;  %vm454_vm7 = vcmp.gt.f32.partialorder %v418_v59, 0.5  ;;  %v502_v0 = vld [vmem:[%s11466_s29 + $0x90] sm:$0xff]  ;;  %v420_v1 = vld [vmem:[%s17085_s1 + $0xb8] sm:$0xff]  ;;  %v939_v2 = vsel %vm453_vm6, 1, %v11317_v3  ;;  %vm455_vm8 = vcmp.gt.f32.partialorder %v419_v63, 0.5 }
  0x2b   : > { %974 = vperm.xlu0 %11246, %v925_v24   ;;  %977 = vperm.xlu1 %11247, %v926_v25   ;;  %v940_v4 = vsel %vm454_vm7, 1, %v11317_v3  ;;  %v503_v5 = vld [vmem:[%s11466_s29 + $0x98] sm:$0xff]  ;;  %vm456_vm9 = vcmp.gt.f32.partialorder %v420_v1, 0.5  ;;  %v421_v6 = vld [vmem:[%s17085_s1 + $0xc0] sm:$0xff]  ;;  %v422_v8 = vld [vmem:[%s17085_s1 + $0xc8] sm:$0xff]  ;;  %v941_v9 = vsel %vm455_vm8, 1, %v11317_v3 }
  0x2c   : > { %v504_v7 = vld [vmem:[%s11466_s29 + $0xa0] sm:$0xff]  ;;  %v942_v10 = vsel %vm456_vm9, 1, %v11317_v3  ;;  %vm457_vm10 = vcmp.gt.f32.partialorder %v421_v6, 0.5  ;;  %v505_v11 = vld [vmem:[%s11466_s29 + $0xa8] sm:$0xff]  ;;  %vm458_vm11 = vcmp.gt.f32.partialorder %v422_v8, 0.5  ;;  %v423_v12 = vld [vmem:[%s17085_s1 + $0xd0] sm:$0xff] }
  0x2d   : > { %10497 = vmatmul.mubr.msk.f32.gmra.mxu0 %vm529_vm4, %v491_v32  ;;  %v506_v13 = vld [vmem:[%s11466_s29 + $0xb0] sm:$0xff]  ;;  %v424_v14 = vld [vmem:[%s17085_s1 + $0xd8] sm:$0xff]  ;;  %v943_v15 = vsel %vm457_vm10, 1, %v11317_v3  ;;  %v944_v16 = vsel %vm458_vm11, 1, %v11317_v3  ;;  %vm459_vm12 = vcmp.gt.f32.partialorder %v423_v12, 0.5  ;;  %v425_v18 = vld [vmem:[%s17085_s1 + $0xe0] sm:$0xff] }
  0x2e   : > { %10499 = vmatprep.mubr.msk.f32.mxu0 %vm529_vm4, %v492_v34  ;;  %v507_v17 = vld [vmem:[%s11466_s29 + $0xb8] sm:$0xff]  ;;  %vm460_vm13 = vcmp.gt.f32.partialorder %v424_v14, 0.5  ;;  %v508_v19 = vld [vmem:[%s11466_s29 + $0xc0] sm:$0xff]  ;;  %v426_v20 = vld [vmem:[%s17085_s1 + $0xe8] sm:$0xff]  ;;  %v945_v21 = vsel %vm459_vm12, 1, %v11317_v3  ;;  %vm461_vm14 = vcmp.gt.f32.partialorder %v425_v18, 0.5 }
  0x2f   : > { %980 = vperm.xlu0 %11246, %v927_v30   ;;  %983 = vperm.xlu1 %11247, %v928_v31   ;;  %v946_v22 = vsel %vm460_vm13, 1, %v11317_v3  ;;  %v509_v23 = vld [vmem:[%s11466_s29 + $0xc8] sm:$0xff]  ;;  %vm462_vm15 = vcmp.gt.f32.partialorder %v426_v20, 0.5  ;;  %v427_v24 = vld [vmem:[%s17085_s1 + $0xf0] sm:$0xff]  ;;  %v428_v26 = vld [vmem:[%s17085_s1 + $0xf8] sm:$0xff]  ;;  %v947_v27 = vsel %vm461_vm14, 1, %v11317_v3 }
  0x30   : > { %v510_v25 = vld [vmem:[%s11466_s29 + $0xd0] sm:$0xff]  ;;  %v948_v28 = vsel %vm462_vm15, 1, %v11317_v3  ;;  %vm463_vm0 = vcmp.gt.f32.partialorder %v427_v24, 0.5  ;;  %v511_v29 = vld [vmem:[%s11466_s29 + $0xd8] sm:$0xff]  ;;  %v512_v30 = vld [vmem:[%s11466_s29 + $0xe0] sm:$0xff]  ;;  %vm464_vm1 = vcmp.gt.f32.partialorder %v428_v26, 0.5 }
  0x31   : > { %10500 = vmatmul.mubr.msk.f32.gmra.mxu0 %vm529_vm4, %v493_v38  ;;  %v429_v31 = vld [vmem:[%s17085_s1 + $0x100] sm:$0xff]  ;;  %v430_v32 = vld [vmem:[%s17085_s1 + $0x108] sm:$0xff]  ;;  %v9373_v33 = vld [vmem:[%s16977_s4 + $0x78] sm:$0xff]  ;;  %v949_v35 = vsel %vm463_vm0, 1, %v11317_v3  ;;  %vm469_vm7 = vcmask 523264   ;;  %v11318_v57 = vmov 0.0  }
  0x32   : > { %10502 = vmatprep.mubr.msk.f32.mxu0 %vm529_vm4, %v494_v40  ;;  %v1214_v34 = vld [vmem:[%s16977_s4 + $0x38] sm:$0xff]  ;;  %10541 = vmatprep.subr.mxu1 %v9373_v33  ;;  %vm465_vm2 = vcmp.gt.f32.partialorder %v429_v31, 0.5  ;;  %v513_v38 = vld [vmem:[%s11466_s29 + $0xe8] sm:$0xff]  ;;  %vm466_vm3 = vcmp.gt.f32.partialorder %v430_v32, 0.5  ;;  %v431_v39 = vld [vmem:[%s17085_s1 + $0x110] sm:$0xff]  ;;  %470 = vst.msk [vmem:[#allocation2] sm:$0xff] %vm469_vm7, %v11318_v57 }
  0x33   : > { %986 = vperm.xlu0 %11246, %v929_v36   ;;  %989 = vperm.xlu1 %11247, %v930_v37   ;;  %v950_v36 = vsel %vm464_vm1, 1, %v11317_v3  ;;  %v9372_v37 = vld [vmem:[%s16977_s4 + $0x70] sm:$0xff]  ;;  %vm467_vm5 = vcmp.gt.f32.partialorder %v431_v39, 0.5  ;;  %v9371_v45 = vld [vmem:[%s16977_s4 + $0x68] sm:$0xff]  ;;  %v9370_v53 = vld [vmem:[%s16977_s4 + $0x60] sm:$0xff]  ;;  %471 = vst.msk [vmem:[#allocation2 + $0x8] sm:$0xff] %vm469_vm7, %v11318_v57 }
  0x34   : > { %10611 = vmatprep.subr.mxu0 %v1214_v34  ;;  %10542 = vmatpush3.msra.mxu1 %v9373_v33  ;;  %v1213_v40 = vld [vmem:[%s16977_s4 + $0x30] sm:$0xff]  ;;  %v1212_v47 = vld [vmem:[%s16977_s4 + $0x28] sm:$0xff]  ;;  %474 = vst.msk [vmem:[#allocation2 + $0x133] sm:$0xff] %vm469_vm7, %v11318_v57  ;;  %475 = vst.msk [vmem:[#allocation2 + $0x13b] sm:$0xff] %vm469_vm7, %v11318_v57  ;;  %vm472_vm8 = vcmask 518144  }
  0x35   : > { %10503 = vmatmul.mubr.msk.f32.gmra.mxu0 %vm529_vm4, %v495_v44  ;;  %v514_v41 = vld [vmem:[%s11466_s29 + $0xf0] sm:$0xff]  ;;  %10543 = vmatprep.subr.mxu1 %v9372_v37  ;;  %v952_v44 = vsel %vm466_vm3, 1, %v11317_v3  ;;  %v517_v51 = vld [vmem:[%s11466_s29 + $0x108] sm:$0xff]  ;;  %478 = vst [vmem:[#allocation3] sm:$0xff] %v11318_v57  ;;  %479 = vst [vmem:[#allocation3 + $0x8] sm:$0xff] %v11318_v57 }
  0x36   : > { %10505 = vmatprep.mubr.msk.f32.mxu0 %vm529_vm4, %v496_v46  ;;  %10612 = vmatpush3.msra.mxu0 %v1214_v34  ;;  %v515_v46 = vld [vmem:[%s11466_s29 + $0xf8] sm:$0xff]  ;;  %480 = vst [vmem:[#allocation3 + $0x10] sm:$0x7] %v11318_v57  ;;  %481 = vst [vmem:[#allocation3 + $0x133] sm:$0xff] %v11318_v57  ;;  %v1209_v59 = vld [vmem:[%s16977_s4 + $0x10] sm:$0xff] }
  0x37   : > { %992 = vperm.xlu0 %11246, %v931_v42   ;;  %995 = vperm.xlu1 %11247, %v932_v43   ;;  %v432_v42 = vld [vmem:[%s17085_s1 + $0x118] sm:$0xff]  ;;  %v951_v43 = vsel %vm465_vm2, 1, %v11317_v3  ;;  %482 = vst [vmem:[#allocation3 + $0x13b] sm:$0xff] %v11318_v57  ;;  %483 = vst [vmem:[#allocation3 + $0x143] sm:$0x1f] %v11318_v57  ;;  %v1207_v63 = vld [vmem:[%s16977_s4] sm:$0xff] }
  0x38   : > { %10613 = vmatprep.subr.mxu0 %v1213_v40  ;;  %vm468_vm6 = vcmp.gt.f32.partialorder %v432_v42, 0.5  ;;  %10544 = vmatpush3.msra.mxu1 %v9372_v37  ;;  %473 = vst.msk [vmem:[#allocation2 + $0x10] sm:$0x7] %vm472_vm8, %v11318_v57  ;;  %v9452_v6 = vld [vmem:[%s16977_s4 + $0xb0] sm:$0xff]  ;;  %v9450_v8 = vld [vmem:[%s16977_s4 + $0xa0] sm:$0xff]  ;;  %v9495_v14 = vld [vmem:[%s16977_s4 + $0xe8] sm:$0xff] }
  0x39   : > { %10506 = vmatmul.mubr.msk.f32.gmra.mxu0 %vm529_vm4, %v497_v50  ;;  %10545 = vmatprep.subr.mxu1 %v9371_v45  ;;  %v954_v50 = vsel %vm468_vm6, 1, %v11317_v3  ;;  %v1171_v1 = vld [vmem:[#allocation2] sm:$0xff]  ;;  %v9496_v12 = vld [vmem:[%s16977_s4 + $0xf0] sm:$0xff] }
  0x3a   : > { %10508 = vmatprep.mubr.msk.f32.mxu0 %vm529_vm4, %v498_v52  ;;  %10614 = vmatpush3.msra.mxu0 %v1213_v40  ;;  %v518_v52 = vld [vmem:[%s11466_s29 + $0x110] sm:$0xff]  ;;  %v9490_v20 = vld [vmem:[%s16977_s4 + $0xc0] sm:$0xff] }
  0x3b   : > { %998 = vperm.xlu0 %11246, %v933_v48   ;;  %1001 = vperm.xlu1 %11247, %v934_v49   ;;  %v516_v48 = vld [vmem:[%s11466_s29 + $0x100] sm:$0xff]  ;;  %v953_v49 = vsel %vm467_vm5, 1, %v11317_v3  ;;  %v9492_v18 = vld [vmem:[%s16977_s4 + $0xd0] sm:$0xff] }
  0x3c   : > { %10615 = vmatprep.subr.mxu0 %v1212_v47  ;;  %10546 = vmatpush3.msra.mxu1 %v9371_v45  ;;  %v1211_v3 = vld [vmem:[%s16977_s4 + $0x20] sm:$0xff] }
  0x3d   : > { %10509 = vmatmul.mubr.msk.f32.gmra.mxu0 %vm529_vm4, %v499_v56  ;;  %10547 = vmatprep.subr.mxu1 %v9370_v53  ;;  %v1210_v56 = vld [vmem:[%s16977_s4 + $0x18] sm:$0xff]  ;;  %v11797_v33 = vld [vmem:[%s16976_s3] ss:$0 sm:$0xff] }
  0x3e   : > { %10511 = vmatprep.mubr.msk.f32.mxu0 %vm529_vm4, %v500_v58  ;;  %10616 = vmatpush3.msra.mxu0 %v1212_v47  ;;  %v9368_v58 = vld [vmem:[%s16977_s4 + $0x50] sm:$0xff] }
  0x3f   : > { %1004 = vperm.xlu0 %11246, %v935_v54   ;;  %1007 = vperm.xlu1 %11247, %v936_v55   ;;  %v519_v54 = vld [vmem:[%s11466_s29 + $0x118] sm:$0xff]  ;;  %s16348_s29 = scalar_lea.vmem %s16983_s10, %s11204_s14 }
  0x40   : > { %10617 = vmatprep.subr.mxu0 %v1211_v3  ;;  %10548 = vmatpush3.msra.mxu1 %v9370_v53  ;;  %v9369_v55 = vld [vmem:[%s16977_s4 + $0x58] sm:$0xff] }
  0x41   : > { %10512 = vmatmul.mubr.msk.f32.gmra.mxu0 %vm529_vm4, %v501_v62  ;;  %10549 = vmatprep.subr.mxu1 %v9369_v55  ;;  %v9366_v62 = vld [vmem:[%s16977_s4 + $0x40] sm:$0xff] }
  0x42   : > { %10514 = vmatprep.mubr.msk.f32.mxu0 %vm529_vm4, %v502_v0  ;;  %10618 = vmatpush3.msra.mxu0 %v1211_v3  ;;  %v1215_v0 = vld [vmem:[#allocation2 + $0x1] sm:$0xff] }
  0x43   : > { %1010 = vperm.xlu0 %11246, %v937_v60   ;;  %1013 = vperm.xlu1 %11247, %v938_v61   ;;  %v9367_v60 = vld [vmem:[%s16977_s4 + $0x48] sm:$0xff] }
  0x44   : > { %10619 = vmatprep.subr.mxu0 %v1210_v56  ;;  %10550 = vmatpush3.msra.mxu1 %v9369_v55  ;;  %v1208_v61 = vld [vmem:[%s16977_s4 + $0x8] sm:$0xff] }
  0x45   : > { %10515 = vmatmul.mubr.msk.f32.gmra.mxu0 %vm529_vm4, %v503_v5  ;;  %10551 = vmatprep.subr.mxu1 %v9368_v58  ;;  %v9453_v5 = vld [vmem:[%s16977_s4 + $0xb8] sm:$0xff] }
  0x46   : > { %10517 = vmatprep.mubr.msk.f32.mxu0 %vm529_vm4, %v504_v7  ;;  %10620 = vmatpush3.msra.mxu0 %v1210_v56  ;;  %v9451_v7 = vld [vmem:[%s16977_s4 + $0xa8] sm:$0xff] }
  0x47   : > { %1016 = vperm.xlu0 %11246, %v939_v2   ;;  %1019 = vperm.xlu1 %11247, %v940_v4   ;;  %v1216_v2 = vld [vmem:[#allocation2 + $0x9] sm:$0xff] }
  0x48   : > { %10621 = vmatprep.subr.mxu0 %v1209_v59  ;;  %10552 = vmatpush3.msra.mxu1 %v9368_v58  ;;  %v1172_v4 = vld [vmem:[#allocation2 + $0x8] sm:$0xff] }
  0x49   : > { %10518 = vmatmul.mubr.msk.f32.gmra.mxu0 %vm529_vm4, %v505_v11  ;;  %10553 = vmatprep.subr.mxu1 %v9367_v60  ;;  %v9497_v11 = vld [vmem:[%s16977_s4 + $0xf8] sm:$0xff] }
  0x4a   : > { %10520 = vmatprep.mubr.msk.f32.mxu0 %vm529_vm4, %v506_v13  ;;  %10622 = vmatpush3.msra.mxu0 %v1209_v59  ;;  %v9447_v13 = vld [vmem:[%s16977_s4 + $0x88] sm:$0xff] }
  0x4b   : > { %1022 = vperm.xlu0 %11246, %v941_v9   ;;  %1025 = vperm.xlu1 %11247, %v942_v10   ;;  %v9449_v9 = vld [vmem:[%s16977_s4 + $0x98] sm:$0xff]  ;;  %v9448_v10 = vld [vmem:[%s16977_s4 + $0x90] sm:$0xff] }
  0x4c   : > { %10623 = vmatprep.subr.mxu0 %v1208_v61  ;;  %10554 = vmatpush3.msra.mxu1 %v9367_v60 }
  0x4d   : > { %10521 = vmatmul.mubr.msk.f32.gmra.mxu0 %vm529_vm4, %v507_v17  ;;  %10555 = vmatprep.subr.mxu1 %v9366_v62  ;;  %v9493_v17 = vld [vmem:[%s16977_s4 + $0xd8] sm:$0xff] }
  0x4e   : > { %10523 = vmatprep.mubr.msk.f32.mxu0 %vm529_vm4, %v508_v19  ;;  %10624 = vmatpush3.msra.mxu0 %v1208_v61  ;;  %v9491_v19 = vld [vmem:[%s16977_s4 + $0xc8] sm:$0xff] }
  0x4f   : > { %1028 = vperm.xlu0 %11246, %v943_v15   ;;  %1031 = vperm.xlu1 %11247, %v944_v16   ;;  %v9494_v15 = vld [vmem:[%s16977_s4 + $0xe0] sm:$0xff] }
  0x50   : > { %10625 = vmatprep.subr.mxu0 %v1207_v63  ;;  %10556 = vmatpush3.msra.mxu1 %v9366_v62  ;;  %v9446_v16 = vld [vmem:[%s16977_s4 + $0x80] sm:$0xff] }
  0x51   : > { %10524 = vmatmul.mubr.msk.f32.gmra.mxu0 %vm529_vm4, %v509_v23  ;;  %10557 = vmatprep.mubr.msk.f32.mxu1 %vm469_vm7, %v1215_v0 }
  0x52   : > { %10526 = vmatprep.mubr.msk.f32.mxu0 %vm529_vm4, %v510_v25  ;;  %10626 = vmatpush3.msra.mxu0 %v1207_v63  ;;  %v11838_v63 = vld [vmem:[%s16977_s4 + $0x178] sm:$0xff] }
  0x53   : > { %1034 = vperm.xlu0 %11246, %v945_v21   ;;  %1037 = vperm.xlu1 %11247, %v946_v22   ;;  %v11769_v21 = vld [vmem:[%s16977_s4 + $0x138] sm:$0xff] }
  0x54   : > { %10558 = vmatmul.mubr.msk.f32.vlgmr.msra.gmra.mxu1 %vm469_vm7, %v1216_v2  ;;  %10681 = vmatprep.subr.mxu1 %v9453_v5 }
  0x55   : > { %10527 = vmatmul.mubr.msk.f32.gmra.mxu0 %vm529_vm4, %v511_v29  ;;  %10682 = vmatpush3.msra.mxu1 %v9453_v5 }
  0x56   : > { %10529 = vmatprep.mubr.msk.f32.mxu0 %vm529_vm4, %v512_v30  ;;  %10683 = vmatprep.subr.mxu1 %v9452_v6 }
  0x57   : > { %1040 = vperm.xlu0 %11246, %v947_v27   ;;  %1043 = vperm.xlu1 %11247, %v948_v28  }
  0x58   : > { %10684 = vmatpush3.msra.mxu1 %v9452_v6  ;;  %10751 = vmatprep.subr.mxu0 %v9497_v11 }
  0x59   : > { %10530 = vmatmul.mubr.msk.f32.gmra.mxu0 %vm529_vm4, %v513_v38  ;;  %10685 = vmatprep.subr.mxu1 %v9451_v7 }
  0x5a   : > { %10532 = vmatprep.mubr.msk.f32.mxu0 %vm529_vm4, %v514_v41  ;;  %10686 = vmatpush3.msra.mxu1 %v9451_v7 }
  0x5b   : > { %1046 = vperm.xlu0 %11246, %v949_v35   ;;  %1049 = vperm.xlu1 %11247, %v950_v36  }
  0x5c   : > { %10687 = vmatprep.subr.mxu1 %v9450_v8 }
  0x5d   : > { %10533 = vmatmul.mubr.msk.f32.gmra.mxu0 %vm529_vm4, %v515_v46  ;;  %10688 = vmatpush3.msra.mxu1 %v9450_v8 }
  0x5e   : > { %10535 = vmatprep.mubr.msk.f32.mxu0 %vm529_vm4, %v516_v48  ;;  %10689 = vmatprep.subr.mxu1 %v9449_v9 }
  0x5f   : > { %1052 = vperm.xlu0 %11246, %v951_v43   ;;  %1055 = vperm.xlu1 %11247, %v952_v44  }
  0x60   : > { %10690 = vmatpush3.msra.mxu1 %v9449_v9 }
  0x61   : > { %10536 = vmatmul.mubr.msk.f32.gmra.mxu0 %vm529_vm4, %v517_v51  ;;  %10691 = vmatprep.subr.mxu1 %v9448_v10 }
  0x62   : > { %10538 = vmatprep.mubr.msk.f32.mxu0 %vm529_vm4, %v518_v52  ;;  %10692 = vmatpush3.msra.mxu1 %v9448_v10 }
  0x63   : > { %1058 = vperm.xlu0 %11246, %v953_v49   ;;  %1061 = vperm.xlu1 %11247, %v954_v50  }
  0x64   : > { %10693 = vmatprep.subr.mxu1 %v9447_v13 }
  0x65   : > { %10539 = vmatmul.mubr.msk.f32.gmra.mxu0 %vm529_vm4, %v519_v54  ;;  %10694 = vmatpush3.msra.mxu1 %v9447_v13 }
  0x66   : > { %10627 = vmatprep.mubr.msk.f32.mxu0 %vm469_vm7, %v1171_v1  ;;  %10695 = vmatprep.subr.mxu1 %v9446_v16 }
  0x67   : > { %10696 = vmatpush3.msra.mxu1 %v9446_v16 }
  0x68   : > { %10821 = vmatprep.subr.mxu1 %v11769_v21 }
  0x69   : > { %10628 = vmatmul.mubr.msk.f32.vlgmr.msra.gmra.mxu0 %vm469_vm7, %v1172_v4 }
  0x6a   : > { %10752 = vmatpush3.msra.mxu0 %v9497_v11 }
  0x6b   : > { %10753 = vmatprep.subr.mxu0 %v9496_v12 }
  0x6c   : > { %10754 = vmatpush3.msra.mxu0 %v9496_v12 }
  0x6d   : > { %10755 = vmatprep.subr.mxu0 %v9495_v14 }
  0x6e   : > { %10756 = vmatpush3.msra.mxu0 %v9495_v14 }
  0x6f   : > { %10757 = vmatprep.subr.mxu0 %v9494_v15 }
  0x70   : > { %10758 = vmatpush3.msra.mxu0 %v9494_v15 }
  0x71   : > { %10759 = vmatprep.subr.mxu0 %v9493_v17 }
  0x72   : > { %10760 = vmatpush3.msra.mxu0 %v9493_v17 }
  0x73   : > { %10761 = vmatprep.subr.mxu0 %v9492_v18 }
  0x74   : > { %10762 = vmatpush3.msra.mxu0 %v9492_v18 }
  0x75   : > { %10763 = vmatprep.subr.mxu0 %v9491_v19 }
  0x76   : > { %10764 = vmatpush3.msra.mxu0 %v9491_v19 }
  0x77   : > { %10765 = vmatprep.subr.mxu0 %v9490_v20 }
  0x78   : > { %10766 = vmatpush3.msra.mxu0 %v9490_v20 }
  0x79   : > { %10891 = vmatprep.subr.mxu0 %v11838_v63 }
  0x9a   : > { %v11772_v22 = vpop.permute.xlu1 %962  ;;  %v11774_v23 = vpop.permute.xlu0 %956 }
  0x9b   : > { %17087 = vst [vmem:[#allocation7_spill] sm:$0xff] %v11772_v22  ;;  %17088 = vst [vmem:[#allocation8_spill] sm:$0xff] %v11774_v23  ;;  %vm1063_vm9 = vcmp.eq.s32.totalorder %v11774_v23, 1  ;;  %vm1065_vm11 = vcmp.eq.s32.totalorder %v11772_v22, 1 }
  0x9e   : > { %v11776_v24 = vpop.permute.xlu1 %965  ;;  %v11778_v25 = vpop.permute.xlu0 %959 }
  0x9f   : > { %17089 = vst [vmem:[#allocation9_spill] sm:$0xff] %v11776_v24  ;;  %17090 = vst [vmem:[#allocation10_spill] sm:$0xff] %v11778_v25  ;;  %vm1064_vm4 = vcmp.eq.s32.totalorder %v11778_v25, 1  ;;  %vm1066_vm10 = vcmp.eq.s32.totalorder %v11776_v24, 1  ;;  %v9913_v25 = vld [vmem:[%s16979_s6 + $0x5f0] sm:$0xff] }
  0xa2   : > { %v11780_v26 = vpop.permute.xlu1 %971  ;;  %v11782_v27 = vpop.permute.xlu0 %968 }
  0xa3   : > { %17091 = vst [vmem:[#allocation11_spill] sm:$0xff] %v11780_v26  ;;  %17092 = vst [vmem:[#allocation12_spill] sm:$0xff] %v11782_v27  ;;  %vm1068_vm12 = vcmp.eq.s32.totalorder %v11780_v26, 1  ;;  %vm1067_vm13 = vcmp.eq.s32.totalorder %v11782_v27, 1 }
  0xa6   : > { %v11784_v28 = vpop.permute.xlu1 %977  ;;  %v11786_v29 = vpop.permute.xlu0 %974 }
  0xa7   : > { %17093 = vst [vmem:[#allocation13_spill] sm:$0xff] %v11784_v28  ;;  %17094 = vst [vmem:[#allocation14_spill] sm:$0xff] %v11786_v29  ;;  %vm1070_vm14 = vcmp.eq.s32.totalorder %v11784_v28, 1  ;;  %vm1069_vm15 = vcmp.eq.s32.totalorder %v11786_v29, 1 }
  0xaa   : > { %v11788_v30 = vpop.permute.xlu1 %983  ;;  %v11790_v31 = vpop.permute.xlu0 %980 }
  0xab   : > { %17095 = vst [vmem:[#allocation15_spill] sm:$0xff] %v11788_v30  ;;  %17096 = vst [vmem:[#allocation16_spill] sm:$0xff] %v11790_v31  ;;  %vm1072_vm0 = vcmp.eq.s32.totalorder %v11788_v30, 1  ;;  %vm1071_vm1 = vcmp.eq.s32.totalorder %v11790_v31, 1 }
  0xae   : > { %v11792_v32 = vpop.permute.xlu1 %989  ;;  %v11799_v34 = vpop.permute.xlu0 %986 }
  0xaf   : > { %17097 = vst [vmem:[#allocation17_spill] sm:$0xff] %v11792_v32  ;;  %17098 = vst [vmem:[#allocation18_spill] sm:$0xff] %v11799_v34  ;;  %vm1074_vm2 = vcmp.eq.s32.totalorder %v11792_v32, 1  ;;  %vm1073_vm3 = vcmp.eq.s32.totalorder %v11799_v34, 1 }
  0xb2   : > { %v11803_v38 = vpop.permute.xlu1 %995  ;;  %v11806_v42 = vpop.permute.xlu0 %992 }
  0xb3   : > { %17099 = vst [vmem:[#allocation19_spill] sm:$0xff] %v11803_v38  ;;  %17100 = vst [vmem:[#allocation20_spill] sm:$0xff] %v11806_v42  ;;  %vm1076_vm5 = vcmp.eq.s32.totalorder %v11803_v38, 1  ;;  %vm16985_vm6 = vcmp.eq.s32.totalorder %v11806_v42, 1 }
  0xb6   : > { %v11818_v51 = vpop.permute.xlu1 %1001  ;;  %v11825_v55 = vpop.permute.xlu0 %998 }
  0xb7   : > { %17101 = vst [vmem:[#allocation21_spill] sm:$0xff] %v11818_v51  ;;  %17102 = vst [vmem:[#allocation22_spill] sm:$0xff] %v11825_v55  ;;  %vm16986_vm8 = vcmp.eq.s32.totalorder %v11818_v51, 1 }
  0xba   : > { %v11843_v1 = vpop.permute.xlu1 %1007  ;;  %v11852_v11 = vpop.permute.xlu0 %1004 }
  0xbb   : > { %17103 = vst [vmem:[#allocation23_spill] sm:$0xff] %v11843_v1  ;;  %17104 = vst [vmem:[#allocation24_spill] sm:$0xff] %v11852_v11 }
  0xe1   : > { %v10489_v35 = vpop.f32.mrf.mxu0 }
  0xe2   : > { %v710_v36 = vadd.f32 %v10489_v35, %v11797_v33 }
  0xe3   : > { %v704_v37 = vpop.f32.mrf.mxu0 }
  0xe4   : > { %v884_v39 = vmax.f32 %v710_v36, 0.0  ;;  %v705_v40 = vadd.f32 %v11797_v33, %v704_v37 }
  0xe5   : > { %v10492_v41 = vpop.f32.mrf.mxu0 }
  0xe6   : > { %v1100_v43 = vsel %vm1064_vm4, %v884_v39, 0.0  ;;  %v883_v44 = vmax.f32 %v705_v40, 0.0  ;;  %v720_v45 = vadd.f32 %v10492_v41, %v11797_v33  ;;  %v11868_v39 = vpop.permute.xlu1 %1013 }
  0xe7   : > { %1136 = vst.msk [vmem:[#allocation2 + $0x1b] sm:$0xff] %vm469_vm7, %v1100_v43  ;;  %v714_v46 = vpop.f32.mrf.mxu0  ;;  %17105 = vst [vmem:[#allocation25_spill] sm:$0xff] %v11868_v39 }
  0xe8   : > { %v1099_v47 = vsel %vm1063_vm9, %v883_v44, 0.0  ;;  %v886_v48 = vmax.f32 %v720_v45, 0.0  ;;  %v715_v49 = vadd.f32 %v11797_v33, %v714_v46  ;;  %v11877_v45 = vpop.permute.xlu0 %1010 }
  0xe9   : > { %1135 = vst.msk [vmem:[#allocation2 + $0x13] sm:$0xff] %vm469_vm7, %v1099_v47  ;;  %v10495_v50 = vpop.f32.mrf.mxu0  ;;  %17106 = vst [vmem:[#allocation26_spill] sm:$0xff] %v11877_v45 }
  0xea   : > { %v1102_v52 = vsel %vm1066_vm10, %v886_v48, 0.0  ;;  %v885_v53 = vmax.f32 %v715_v49, 0.0  ;;  %v730_v3 = vadd.f32 %v10495_v50, %v11797_v33 }
  0xeb   : > { %1138 = vst.msk [vmem:[#allocation2 + $0x2b] sm:$0xff] %vm469_vm7, %v1102_v52  ;;  %v724_v54 = vpop.f32.mrf.mxu0 }
  0xec   : > { %v1101_v56 = vsel %vm1065_vm11, %v885_v53, 0.0  ;;  %v888_v57 = vmax.f32 %v730_v3, 0.0  ;;  %v725_v58 = vadd.f32 %v11797_v33, %v724_v54 }
  0xed   : > { %1137 = vst.msk [vmem:[#allocation2 + $0x23] sm:$0xff] %vm469_vm7, %v1101_v56  ;;  %v10498_v59 = vpop.f32.mrf.mxu0 }
  0xee   : > { %v1104_v60 = vsel %vm1068_vm12, %v888_v57, 0.0  ;;  %v887_v61 = vmax.f32 %v725_v58, 0.0  ;;  %v740_v62 = vadd.f32 %v10498_v59, %v11797_v33  ;;  %v11893_v59 = vpop.permute.xlu1 %1019 }
  0xef   : > { %1140 = vst.msk [vmem:[#allocation2 + $0x3b] sm:$0xff] %vm469_vm7, %v1104_v60  ;;  %v734_v0 = vpop.f32.mrf.mxu0  ;;  %17107 = vst [vmem:[#allocation27_spill] sm:$0xff] %v11893_v59 }
  0xf0   : > { %v1103_v2 = vsel %vm1067_vm13, %v887_v61, 0.0  ;;  %v890_v4 = vmax.f32 %v740_v62, 0.0  ;;  %v735_v5 = vadd.f32 %v11797_v33, %v734_v0  ;;  %v1217_v6 = vld [vmem:[#allocation2 + $0x11] sm:$0xff]  ;;  %v1218_v8 = vld [vmem:[#allocation2 + $0x19] sm:$0xff] }
  0xf1   : > { %v1173_v7 = vld [vmem:[#allocation2 + $0x10] sm:$0xff]  ;;  %1139 = vst.msk [vmem:[#allocation2 + $0x33] sm:$0xff] %vm469_vm7, %v1103_v2  ;;  %v10501_v9 = vpop.f32.mrf.mxu0  ;;  %10560 = vmatprep.mubr.msk.f32.mxu1 %vm469_vm7, %v1217_v6  ;;  %v1174_v10 = vld [vmem:[#allocation2 + $0x18] sm:$0xff] }
  0xf2   : > { %10630 = vmatprep.mubr.msk.f32.mxu0 %vm469_vm7, %v1173_v7  ;;  %v1106_v12 = vsel %vm1070_vm14, %v890_v4, 0.0  ;;  %v889_v13 = vmax.f32 %v735_v5, 0.0  ;;  %v750_v14 = vadd.f32 %v10501_v9, %v11797_v33  ;;  %10561 = vmatmul.mubr.msk.f32.gmra.mxu1 %vm469_vm7, %v1218_v8  ;;  %v11902_v7 = vpop.permute.xlu0 %1016 }
  0xf3   : > { %10631 = vmatmul.mubr.msk.f32.gmra.mxu0 %vm469_vm7, %v1174_v10  ;;  %1142 = vst.msk [vmem:[#allocation2 + $0x4b] sm:$0xff] %vm469_vm7, %v1106_v12  ;;  %v744_v15 = vpop.f32.mrf.mxu0  ;;  %17108 = vst [vmem:[#allocation28_spill] sm:$0xff] %v11902_v7 }
  0xf4   : > { %v1105_v16 = vsel %vm1069_vm15, %v889_v13, 0.0  ;;  %v892_v17 = vmax.f32 %v750_v14, 0.0  ;;  %v745_v18 = vadd.f32 %v11797_v33, %v744_v15  ;;  %v1219_v19 = vld [vmem:[#allocation2 + $0x21] sm:$0xff]  ;;  %v1220_v35 = vld [vmem:[#allocation2 + $0x29] sm:$0xff] }
  0xf5   : > { %v1175_v20 = vld [vmem:[#allocation2 + $0x20] sm:$0xff]  ;;  %1141 = vst.msk [vmem:[#allocation2 + $0x43] sm:$0xff] %vm469_vm7, %v1105_v16  ;;  %v10504_v36 = vpop.f32.mrf.mxu0  ;;  %10563 = vmatprep.mubr.msk.f32.mxu1 %vm469_vm7, %v1219_v19  ;;  %v1176_v37 = vld [vmem:[#allocation2 + $0x28] sm:$0xff] }
  0xf6   : > { %10633 = vmatprep.mubr.msk.f32.mxu0 %vm469_vm7, %v1175_v20  ;;  %v1108_v40 = vsel %vm1072_vm0, %v892_v17, 0.0  ;;  %v891_v41 = vmax.f32 %v745_v18, 0.0  ;;  %v760_v43 = vadd.f32 %v10504_v36, %v11797_v33  ;;  %10564 = vmatmul.mubr.msk.f32.gmra.mxu1 %vm469_vm7, %v1220_v35  ;;  %v11918_v35 = vpop.permute.xlu1 %1025 }
  0xf7   : > { %10634 = vmatmul.mubr.msk.f32.gmra.mxu0 %vm469_vm7, %v1176_v37  ;;  %1144 = vst.msk [vmem:[#allocation2 + $0x5b] sm:$0xff] %vm469_vm7, %v1108_v40  ;;  %v754_v44 = vpop.f32.mrf.mxu0  ;;  %17109 = vst [vmem:[#allocation29_spill] sm:$0xff] %v11918_v35 }
  0xf8   : > { %v1107_v46 = vsel %vm1071_vm1, %v891_v41, 0.0  ;;  %v894_v47 = vmax.f32 %v760_v43, 0.0  ;;  %v755_v48 = vadd.f32 %v11797_v33, %v754_v44  ;;  %v1221_v49 = vld [vmem:[#allocation2 + $0x31] sm:$0xff]  ;;  %v1222_v52 = vld [vmem:[#allocation2 + $0x39] sm:$0xff]  ;;  %v11927_v43 = vpop.permute.xlu0 %1022 }
  0xf9   : > { %v1177_v50 = vld [vmem:[#allocation2 + $0x30] sm:$0xff]  ;;  %1143 = vst.msk [vmem:[#allocation2 + $0x53] sm:$0xff] %vm469_vm7, %v1107_v46  ;;  %v10507_v53 = vpop.f32.mrf.mxu0  ;;  %10566 = vmatprep.mubr.msk.f32.mxu1 %vm469_vm7, %v1221_v49  ;;  %v1178_v3 = vld [vmem:[#allocation2 + $0x38] sm:$0xff]  ;;  %17110 = vst [vmem:[#allocation30_spill] sm:$0xff] %v11927_v43 }
  0xfa   : > { %10636 = vmatprep.mubr.msk.f32.mxu0 %vm469_vm7, %v1177_v50  ;;  %v1110_v54 = vsel %vm1074_vm2, %v894_v47, 0.0  ;;  %v893_v56 = vmax.f32 %v755_v48, 0.0  ;;  %v770_v57 = vadd.f32 %v10507_v53, %v11797_v33  ;;  %10567 = vmatmul.mubr.msk.f32.gmra.mxu1 %vm469_vm7, %v1222_v52  ;;  %v4137_v30 = vld [vmem:[#allocation2 + $0x2d] sm:$0xff] }
  0xfb   : > { %10637 = vmatmul.mubr.msk.f32.gmra.mxu0 %vm469_vm7, %v1178_v3  ;;  %1146 = vst.msk [vmem:[#allocation2 + $0x6b] sm:$0xff] %vm469_vm7, %v1110_v54  ;;  %v764_v58 = vpop.f32.mrf.mxu0 }
  0xfc   : > { %v1109_v60 = vsel %vm1073_vm3, %v893_v56, 0.0  ;;  %v896_v61 = vmax.f32 %v770_v57, 0.0  ;;  %v765_v62 = vadd.f32 %v11797_v33, %v764_v58  ;;  %v1223_v0 = vld [vmem:[#allocation2 + $0x41] sm:$0xff]  ;;  %v1224_v4 = vld [vmem:[#allocation2 + $0x49] sm:$0xff]  ;;  %v11943_v58 = vpop.permute.xlu1 %1031 }
  0xfd   : > { %v1179_v2 = vld [vmem:[#allocation2 + $0x40] sm:$0xff]  ;;  %1145 = vst.msk [vmem:[#allocation2 + $0x63] sm:$0xff] %vm469_vm7, %v1109_v60  ;;  %v10510_v5 = vpop.f32.mrf.mxu0  ;;  %10569 = vmatprep.mubr.msk.f32.mxu1 %vm469_vm7, %v1223_v0  ;;  %v1180_v6 = vld [vmem:[#allocation2 + $0x48] sm:$0xff]  ;;  %17111 = vst [vmem:[#allocation31_spill] sm:$0xff] %v11943_v58 }
  0xfe   : > { %10639 = vmatprep.mubr.msk.f32.mxu0 %vm469_vm7, %v1179_v2  ;;  %v1112_v8 = vsel %vm1076_vm5, %v896_v61, 0.0  ;;  %v895_v9 = vmax.f32 %v765_v62, 0.0  ;;  %v780_v10 = vadd.f32 %v10510_v5, %v11797_v33  ;;  %10570 = vmatmul.mubr.msk.f32.gmra.mxu1 %vm469_vm7, %v1224_v4 }
  0xff   : > { %10640 = vmatmul.mubr.msk.f32.gmra.mxu0 %vm469_vm7, %v1180_v6  ;;  %1148 = vst.msk [vmem:[#allocation2 + $0x7b] sm:$0xff] %vm469_vm7, %v1112_v8  ;;  %v774_v12 = vpop.f32.mrf.mxu0  ;;  %v11952_v8 = vpop.permute.xlu0 %1028 }
 0x100   : > { %v1111_v13 = vsel %vm16985_vm6, %v895_v9, 0.0  ;;  %v898_v14 = vmax.f32 %v780_v10, 0.0  ;;  %v775_v15 = vadd.f32 %v11797_v33, %v774_v12  ;;  %v1225_v16 = vld [vmem:[#allocation2 + $0x51] sm:$0xff]  ;;  %v1226_v18 = vld [vmem:[#allocation2 + $0x59] sm:$0xff]  ;;  %vm16987_vm6 = vcmp.eq.s32.totalorder %v11825_v55, 1  ;;  %17112 = vst [vmem:[#allocation32_spill] sm:$0xff] %v11952_v8 }
 0x101   : > { %v1181_v17 = vld [vmem:[#allocation2 + $0x50] sm:$0xff]  ;;  %1147 = vst.msk [vmem:[#allocation2 + $0x73] sm:$0xff] %vm469_vm7, %v1111_v13  ;;  %v10513_v19 = vpop.f32.mrf.mxu0  ;;  %10572 = vmatprep.mubr.msk.f32.mxu1 %vm469_vm7, %v1225_v16  ;;  %v1182_v20 = vld [vmem:[#allocation2 + $0x58] sm:$0xff] }
 0x102   : > { %10642 = vmatprep.mubr.msk.f32.mxu0 %vm469_vm7, %v1181_v17  ;;  %v1114_v36 = vsel %vm16986_vm8, %v898_v14, 0.0  ;;  %v897_v37 = vmax.f32 %v775_v15, 0.0  ;;  %v790_v40 = vadd.f32 %v10513_v19, %v11797_v33  ;;  %10573 = vmatmul.mubr.msk.f32.gmra.mxu1 %vm469_vm7, %v1226_v18  ;;  %vm16988_vm8 = vcmp.eq.s32.totalorder %v11843_v1, 1 }
 0x103   : > { %10643 = vmatmul.mubr.msk.f32.gmra.mxu0 %vm469_vm7, %v1182_v20  ;;  %1150 = vst.msk [vmem:[#allocation2 + $0x8b] sm:$0xff] %vm469_vm7, %v1114_v36  ;;  %v784_v41 = vpop.f32.mrf.mxu0 }
 0x104   : > { %v1113_v44 = vsel %vm16987_vm6, %v897_v37, 0.0  ;;  %v900_v46 = vmax.f32 %v790_v40, 0.0  ;;  %v785_v47 = vadd.f32 %v11797_v33, %v784_v41  ;;  %v1227_v48 = vld [vmem:[#allocation2 + $0x61] sm:$0xff]  ;;  %v1228_v50 = vld [vmem:[#allocation2 + $0x69] sm:$0xff]  ;;  %vm16989_vm6 = vcmp.eq.s32.totalorder %v11852_v11, 1  ;;  %v11968_v37 = vpop.permute.xlu1 %1037 }
 0x105   : > { %v1183_v49 = vld [vmem:[#allocation2 + $0x60] sm:$0xff]  ;;  %1149 = vst.msk [vmem:[#allocation2 + $0x83] sm:$0xff] %vm469_vm7, %v1113_v44  ;;  %v10516_v52 = vpop.f32.mrf.mxu0  ;;  %10575 = vmatprep.mubr.msk.f32.mxu1 %vm469_vm7, %v1227_v48  ;;  %v1184_v53 = vld [vmem:[#allocation2 + $0x68] sm:$0xff]  ;;  %17113 = vst [vmem:[#allocation33_spill] sm:$0xff] %v11968_v37 }
 0x106   : > { %10645 = vmatprep.mubr.msk.f32.mxu0 %vm469_vm7, %v1183_v49  ;;  %v1116_v3 = vsel %vm16988_vm8, %v900_v46, 0.0  ;;  %v899_v54 = vmax.f32 %v785_v47, 0.0  ;;  %v800_v56 = vadd.f32 %v10516_v52, %v11797_v33  ;;  %10576 = vmatmul.mubr.msk.f32.gmra.mxu1 %vm469_vm7, %v1228_v50  ;;  %vm16990_vm8 = vcmp.eq.s32.totalorder %v11868_v39, 1  ;;  %v11977_v47 = vpop.permute.xlu0 %1034 }
 0x107   : > { %10646 = vmatmul.mubr.msk.f32.gmra.mxu0 %vm469_vm7, %v1184_v53  ;;  %1152 = vst.msk [vmem:[#allocation2 + $0x9b] sm:$0xff] %vm469_vm7, %v1116_v3  ;;  %v794_v57 = vpop.f32.mrf.mxu0  ;;  %17114 = vst [vmem:[#allocation34_spill] sm:$0xff] %v11977_v47 }
 0x108   : > { %v1115_v60 = vsel %vm16989_vm6, %v899_v54, 0.0  ;;  %v902_v61 = vmax.f32 %v800_v56, 0.0  ;;  %v795_v62 = vadd.f32 %v11797_v33, %v794_v57  ;;  %v1229_v0 = vld [vmem:[#allocation2 + $0x71] sm:$0xff]  ;;  %v1230_v4 = vld [vmem:[#allocation2 + $0x79] sm:$0xff]  ;;  %vm16991_vm6 = vcmp.eq.s32.totalorder %v11877_v45, 1 }
 0x109   : > { %v1185_v2 = vld [vmem:[#allocation2 + $0x70] sm:$0xff]  ;;  %1151 = vst.msk [vmem:[#allocation2 + $0x93] sm:$0xff] %vm469_vm7, %v1115_v60  ;;  %v10519_v5 = vpop.f32.mrf.mxu0  ;;  %10578 = vmatprep.mubr.msk.f32.mxu1 %vm469_vm7, %v1229_v0  ;;  %v1186_v6 = vld [vmem:[#allocation2 + $0x78] sm:$0xff]  ;;  %v11993_v0 = vpop.permute.xlu1 %1043 }
 0x10a   : > { %10648 = vmatprep.mubr.msk.f32.mxu0 %vm469_vm7, %v1185_v2  ;;  %v1118_v9 = vsel %vm16990_vm8, %v902_v61, 0.0  ;;  %v901_v10 = vmax.f32 %v795_v62, 0.0  ;;  %v810_v12 = vadd.f32 %v10519_v5, %v11797_v33  ;;  %10579 = vmatmul.mubr.msk.f32.gmra.mxu1 %vm469_vm7, %v1230_v4  ;;  %vm16992_vm8 = vcmp.eq.s32.totalorder %v11893_v59, 1  ;;  %17115 = vst [vmem:[#allocation35_spill] sm:$0xff] %v11993_v0 }
 0x10b   : > { %10649 = vmatmul.mubr.msk.f32.gmra.mxu0 %vm469_vm7, %v1186_v6  ;;  %1154 = vst.msk [vmem:[#allocation2 + $0xab] sm:$0xff] %vm469_vm7, %v1118_v9  ;;  %v804_v13 = vpop.f32.mrf.mxu0 }
 0x10c   : > { %v1117_v14 = vsel %vm16991_vm6, %v901_v10, 0.0  ;;  %v904_v15 = vmax.f32 %v810_v12, 0.0  ;;  %v805_v16 = vadd.f32 %v11797_v33, %v804_v13  ;;  %v1231_v17 = vld [vmem:[#allocation2 + $0x81] sm:$0xff]  ;;  %v1232_v19 = vld [vmem:[#allocation2 + $0x89] sm:$0xff]  ;;  %vm16993_vm6 = vcmp.eq.s32.totalorder %v11902_v7, 1 }
 0x10d   : > { %v1187_v18 = vld [vmem:[#allocation2 + $0x80] sm:$0xff]  ;;  %1153 = vst.msk [vmem:[#allocation2 + $0xa3] sm:$0xff] %vm469_vm7, %v1117_v14  ;;  %v10522_v20 = vpop.f32.mrf.mxu0  ;;  %10581 = vmatprep.mubr.msk.f32.mxu1 %vm469_vm7, %v1231_v17  ;;  %v1188_v36 = vld [vmem:[#allocation2 + $0x88] sm:$0xff]  ;;  %v12002_v14 = vpop.permute.xlu0 %1040 }
 0x10e   : > { %10651 = vmatprep.mubr.msk.f32.mxu0 %vm469_vm7, %v1187_v18  ;;  %v1120_v40 = vsel %vm16992_vm8, %v904_v15, 0.0  ;;  %v903_v41 = vmax.f32 %v805_v16, 0.0  ;;  %v820_v44 = vadd.f32 %v10522_v20, %v11797_v33  ;;  %10582 = vmatmul.mubr.msk.f32.gmra.mxu1 %vm469_vm7, %v1232_v19  ;;  %vm16994_vm8 = vcmp.eq.s32.totalorder %v11918_v35, 1  ;;  %17116 = vst [vmem:[#allocation36_spill] sm:$0xff] %v12002_v14 }
 0x10f   : > { %10652 = vmatmul.mubr.msk.f32.gmra.mxu0 %vm469_vm7, %v1188_v36  ;;  %1156 = vst.msk [vmem:[#allocation2 + $0xbb] sm:$0xff] %vm469_vm7, %v1120_v40  ;;  %v814_v46 = vpop.f32.mrf.mxu0 }
 0x110   : > { %v1119_v48 = vsel %vm16993_vm6, %v903_v41, 0.0  ;;  %v906_v49 = vmax.f32 %v820_v44, 0.0  ;;  %v815_v50 = vadd.f32 %v11797_v33, %v814_v46  ;;  %v1233_v52 = vld [vmem:[#allocation2 + $0x91] sm:$0xff]  ;;  %v1234_v3 = vld [vmem:[#allocation2 + $0x99] sm:$0xff]  ;;  %vm16995_vm6 = vcmp.eq.s32.totalorder %v11927_v43, 1 }
 0x111   : > { %v1189_v53 = vld [vmem:[#allocation2 + $0x90] sm:$0xff]  ;;  %1155 = vst.msk [vmem:[#allocation2 + $0xb3] sm:$0xff] %vm469_vm7, %v1119_v48  ;;  %v10525_v54 = vpop.f32.mrf.mxu0  ;;  %10584 = vmatprep.mubr.msk.f32.mxu1 %vm469_vm7, %v1233_v52  ;;  %v1190_v56 = vld [vmem:[#allocation2 + $0x98] sm:$0xff] }
 0x112   : > { %10654 = vmatprep.mubr.msk.f32.mxu0 %vm469_vm7, %v1189_v53  ;;  %v1122_v57 = vsel %vm16994_vm8, %v906_v49, 0.0  ;;  %v905_v60 = vmax.f32 %v815_v50, 0.0  ;;  %v830_v61 = vadd.f32 %v10525_v54, %v11797_v33  ;;  %10585 = vmatmul.mubr.msk.f32.gmra.mxu1 %vm469_vm7, %v1234_v3  ;;  %vm16996_vm8 = vcmp.eq.s32.totalorder %v11943_v58, 1  ;;  %v12018_v49 = vpop.permute.xlu1 %1049  ;;  %v12027_v54 = vpop.permute.xlu0 %1046 }
 0x113   : > { %10655 = vmatmul.mubr.msk.f32.gmra.mxu0 %vm469_vm7, %v1190_v56  ;;  %1158 = vst.msk [vmem:[#allocation2 + $0xcb] sm:$0xff] %vm469_vm7, %v1122_v57  ;;  %v824_v62 = vpop.f32.mrf.mxu0  ;;  %17117 = vst [vmem:[#allocation37_spill] sm:$0xff] %v12018_v49 }
 0x114   : > { %v1121_v2 = vsel %vm16995_vm6, %v905_v60, 0.0  ;;  %v908_v4 = vmax.f32 %v830_v61, 0.0  ;;  %v825_v5 = vadd.f32 %v11797_v33, %v824_v62  ;;  %v1235_v6 = vld [vmem:[#allocation2 + $0xa1] sm:$0xff]  ;;  %v1236_v10 = vld [vmem:[#allocation2 + $0xa9] sm:$0xff]  ;;  %vm16997_vm6 = vcmp.eq.s32.totalorder %v11952_v8, 1  ;;  %17118 = vst [vmem:[#allocation38_spill] sm:$0xff] %v12027_v54 }
 0x115   : > { %v1191_v9 = vld [vmem:[#allocation2 + $0xa0] sm:$0xff]  ;;  %1157 = vst.msk [vmem:[#allocation2 + $0xc3] sm:$0xff] %vm469_vm7, %v1121_v2  ;;  %v10528_v12 = vpop.f32.mrf.mxu0  ;;  %10587 = vmatprep.mubr.msk.f32.mxu1 %vm469_vm7, %v1235_v6  ;;  %v1192_v13 = vld [vmem:[#allocation2 + $0xa8] sm:$0xff] }
 0x116   : > { %10657 = vmatprep.mubr.msk.f32.mxu0 %vm469_vm7, %v1191_v9  ;;  %v1124_v15 = vsel %vm16996_vm8, %v908_v4, 0.0  ;;  %v907_v16 = vmax.f32 %v825_v5, 0.0  ;;  %v840_v17 = vadd.f32 %v10528_v12, %v11797_v33  ;;  %10588 = vmatmul.mubr.msk.f32.gmra.mxu1 %vm469_vm7, %v1236_v10  ;;  %vm16998_vm8 = vcmp.eq.s32.totalorder %v11968_v37, 1 }
 0x117   : > { %10658 = vmatmul.mubr.msk.f32.gmra.mxu0 %vm469_vm7, %v1192_v13  ;;  %1160 = vst.msk [vmem:[#allocation2 + $0xdb] sm:$0xff] %vm469_vm7, %v1124_v15  ;;  %v834_v18 = vpop.f32.mrf.mxu0  ;;  %v12043_v13 = vpop.permute.xlu1 %1055 }
 0x118   : > { %v1123_v19 = vsel %vm16997_vm6, %v907_v16, 0.0  ;;  %v910_v20 = vmax.f32 %v840_v17, 0.0  ;;  %v835_v36 = vadd.f32 %v11797_v33, %v834_v18  ;;  %v1237_v40 = vld [vmem:[#allocation2 + $0xb1] sm:$0xff]  ;;  %v1238_v44 = vld [vmem:[#allocation2 + $0xb9] sm:$0xff]  ;;  %vm16999_vm6 = vcmp.eq.s32.totalorder %v11977_v47, 1  ;;  %17119 = vst [vmem:[#allocation39_spill] sm:$0xff] %v12043_v13 }
 0x119   : > { %v1193_v41 = vld [vmem:[#allocation2 + $0xb0] sm:$0xff]  ;;  %1159 = vst.msk [vmem:[#allocation2 + $0xd3] sm:$0xff] %vm469_vm7, %v1123_v19  ;;  %v10531_v46 = vpop.f32.mrf.mxu0  ;;  %10590 = vmatprep.mubr.msk.f32.mxu1 %vm469_vm7, %v1237_v40  ;;  %v1194_v48 = vld [vmem:[#allocation2 + $0xb8] sm:$0xff] }
 0x11a   : > { %10660 = vmatprep.mubr.msk.f32.mxu0 %vm469_vm7, %v1193_v41  ;;  %v1126_v50 = vsel %vm16998_vm8, %v910_v20, 0.0  ;;  %v909_v52 = vmax.f32 %v835_v36, 0.0  ;;  %v850_v53 = vadd.f32 %v10531_v46, %v11797_v33  ;;  %10591 = vmatmul.mubr.msk.f32.gmra.mxu1 %vm469_vm7, %v1238_v44  ;;  %vm17000_vm8 = vcmp.eq.s32.totalorder %v11993_v0, 1  ;;  %v12052_v41 = vpop.permute.xlu0 %1052 }
 0x11b   : > { %10661 = vmatmul.mubr.msk.f32.gmra.mxu0 %vm469_vm7, %v1194_v48  ;;  %1162 = vst.msk [vmem:[#allocation2 + $0xeb] sm:$0xff] %vm469_vm7, %v1126_v50  ;;  %v844_v3 = vpop.f32.mrf.mxu0  ;;  %17120 = vst [vmem:[#allocation40_spill] sm:$0xff] %v12052_v41 }
 0x11c   : > { %v1125_v56 = vsel %vm16999_vm6, %v909_v52, 0.0  ;;  %v912_v57 = vmax.f32 %v850_v53, 0.0  ;;  %v845_v60 = vadd.f32 %v11797_v33, %v844_v3  ;;  %v1239_v61 = vld [vmem:[#allocation2 + $0xc1] sm:$0xff]  ;;  %v1240_v2 = vld [vmem:[#allocation2 + $0xc9] sm:$0xff]  ;;  %vm17001_vm6 = vcmp.eq.s32.totalorder %v12002_v14, 1 }
 0x11d   : > { %v1195_v62 = vld [vmem:[#allocation2 + $0xc0] sm:$0xff]  ;;  %1161 = vst.msk [vmem:[#allocation2 + $0xe3] sm:$0xff] %vm469_vm7, %v1125_v56  ;;  %v10534_v4 = vpop.f32.mrf.mxu0  ;;  %10593 = vmatprep.mubr.msk.f32.mxu1 %vm469_vm7, %v1239_v61  ;;  %v1196_v5 = vld [vmem:[#allocation2 + $0xc8] sm:$0xff] }
 0x11e   : > { %10663 = vmatprep.mubr.msk.f32.mxu0 %vm469_vm7, %v1195_v62  ;;  %v1128_v6 = vsel %vm17000_vm8, %v912_v57, 0.0  ;;  %v911_v9 = vmax.f32 %v845_v60, 0.0  ;;  %v860_v10 = vadd.f32 %v10534_v4, %v11797_v33  ;;  %10594 = vmatmul.mubr.msk.f32.gmra.mxu1 %vm469_vm7, %v1240_v2  ;;  %vm17002_vm8 = vcmp.eq.s32.totalorder %v12018_v49, 1  ;;  %v12068_v2 = vpop.permute.xlu1 %1061 }
 0x11f   : > { %10664 = vmatmul.mubr.msk.f32.gmra.mxu0 %vm469_vm7, %v1196_v5  ;;  %1164 = vst.msk [vmem:[#allocation2 + $0xfb] sm:$0xff] %vm469_vm7, %v1128_v6  ;;  %v854_v12 = vpop.f32.mrf.mxu0  ;;  %17121 = vst [vmem:[#allocation41_spill] sm:$0xff] %v12068_v2 }
 0x120   : > { %v1127_v15 = vsel %vm17001_vm6, %v911_v9, 0.0  ;;  %v914_v16 = vmax.f32 %v860_v10, 0.0  ;;  %v855_v17 = vadd.f32 %v11797_v33, %v854_v12  ;;  %v1241_v18 = vld [vmem:[#allocation2 + $0xd1] sm:$0xff]  ;;  %v1242_v20 = vld [vmem:[#allocation2 + $0xd9] sm:$0xff]  ;;  %vm17003_vm6 = vcmp.eq.s32.totalorder %v12027_v54, 1  ;;  %v12077_v10 = vpop.permute.xlu0 %1058 }
 0x121   : > { %v1197_v19 = vld [vmem:[#allocation2 + $0xd0] sm:$0xff]  ;;  %1163 = vst.msk [vmem:[#allocation2 + $0xf3] sm:$0xff] %vm469_vm7, %v1127_v15  ;;  %v10537_v36 = vpop.f32.mrf.mxu0  ;;  %10596 = vmatprep.mubr.msk.f32.mxu1 %vm469_vm7, %v1241_v18  ;;  %v1198_v40 = vld [vmem:[#allocation2 + $0xd8] sm:$0xff]  ;;  %17122 = vst [vmem:[#allocation42_spill] sm:$0xff] %v12077_v10 }
 0x122   : > { %10666 = vmatprep.mubr.msk.f32.mxu0 %vm469_vm7, %v1197_v19  ;;  %v1130_v44 = vsel %vm17002_vm8, %v914_v16, 0.0  ;;  %v913_v46 = vmax.f32 %v855_v17, 0.0  ;;  %v870_v48 = vadd.f32 %v10537_v36, %v11797_v33  ;;  %10597 = vmatmul.mubr.msk.f32.gmra.mxu1 %vm469_vm7, %v1242_v20  ;;  %vm17004_vm8 = vcmp.eq.s32.totalorder %v12043_v13, 1  ;;  %v2861_v54 = vld [vmem:[#allocation2 + $0xeb] sm:$0xff] }
 0x123   : > { %10667 = vmatmul.mubr.msk.f32.gmra.mxu0 %vm469_vm7, %v1198_v40  ;;  %1166 = vst.msk [vmem:[#allocation2 + $0x10b] sm:$0xff] %vm469_vm7, %v1130_v44  ;;  %v864_v50 = vpop.f32.mrf.mxu0 }
 0x124   : > { %v1129_v52 = vsel %vm17003_vm6, %v913_v46, 0.0  ;;  %v916_v53 = vmax.f32 %v870_v48, 0.0  ;;  %v865_v3 = vadd.f32 %v11797_v33, %v864_v50  ;;  %v1243_v56 = vld [vmem:[#allocation2 + $0xe1] sm:$0xff]  ;;  %v1244_v60 = vld [vmem:[#allocation2 + $0xe9] sm:$0xff]  ;;  %vm17005_vm6 = vcmp.eq.s32.totalorder %v12052_v41, 1 }
 0x125   : > { %v1199_v57 = vld [vmem:[#allocation2 + $0xe0] sm:$0xff]  ;;  %1165 = vst.msk [vmem:[#allocation2 + $0x103] sm:$0xff] %vm469_vm7, %v1129_v52  ;;  %v10540_v61 = vpop.f32.mrf.mxu0  ;;  %10599 = vmatprep.mubr.msk.f32.mxu1 %vm469_vm7, %v1243_v56  ;;  %v1200_v62 = vld [vmem:[#allocation2 + $0xe8] sm:$0xff]  ;;  %v10559_v52 = vpop.f32.mrf.mxu1 }
 0x126   : > { %10669 = vmatprep.mubr.msk.f32.mxu0 %vm469_vm7, %v1199_v57  ;;  %v1132_v4 = vsel %vm17004_vm8, %v916_v53, 0.0  ;;  %v915_v5 = vmax.f32 %v865_v3, 0.0  ;;  %v880_v6 = vadd.f32 %v10540_v61, %v11797_v33  ;;  %10600 = vmatmul.mubr.msk.f32.gmra.mxu1 %vm469_vm7, %v1244_v60  ;;  %vm1098_vm8 = vcmp.eq.s32.totalorder %v12068_v2, 1  ;;  %v1966_v3 = vld [vmem:[#allocation2 + $0x2] sm:$0xff] }
 0x127   : > { %10670 = vmatmul.mubr.msk.f32.gmra.mxu0 %vm469_vm7, %v1200_v62  ;;  %1168 = vst.msk [vmem:[#allocation2 + $0x11b] sm:$0xff] %vm469_vm7, %v1132_v4  ;;  %v874_v9 = vpop.f32.mrf.mxu0  ;;  %v2400_v4 = vld [vmem:[#allocation2 + $0x12] sm:$0xff]  ;;  %v12405_v2 = vld [vmem:[#allocation2 + $0xdc] sm:$0xff]  ;;  %v12410_v41 = vld [vmem:[#allocation2 + $0xe4] sm:$0xff] }
 0x128   : > { %v1131_v12 = vsel %vm17005_vm6, %v915_v5, 0.0  ;;  %v918_v15 = vmax.f32 %v880_v6, 0.0  ;;  %v875_v16 = vadd.f32 %v11797_v33, %v874_v9  ;;  %v1245_v17 = vld [vmem:[#allocation2 + $0xf1] sm:$0xff]  ;;  %v1246_v19 = vld [vmem:[#allocation2 + $0xf9] sm:$0xff]  ;;  %vm17006_vm6 = vcmp.eq.s32.totalorder %v12077_v10, 1 }
 0x129   : > { %v1201_v18 = vld [vmem:[#allocation2 + $0xf0] sm:$0xff]  ;;  %1167 = vst.msk [vmem:[#allocation2 + $0x113] sm:$0xff] %vm469_vm7, %v1131_v12  ;;  %10602 = vmatprep.mubr.msk.f32.mxu1 %vm469_vm7, %v1245_v17  ;;  %v1202_v20 = vld [vmem:[#allocation2 + $0xf8] sm:$0xff]  ;;  %v10629_v53 = vpop.f32.mrf.mxu0  ;;  %v2402_v12 = vld [vmem:[#allocation2 + $0x22] sm:$0xff] }
 0x12a   : > { %10672 = vmatprep.mubr.msk.f32.mxu0 %vm469_vm7, %v1201_v18  ;;  %v1134_v36 = vsel %vm1098_vm8, %v918_v15, 0.0  ;;  %v917_v40 = vmax.f32 %v875_v16, 0.0  ;;  %10603 = vmatmul.mubr.msk.f32.gmra.mxu1 %vm469_vm7, %v1246_v19  ;;  %v12099_v56 = vadd.f32 %v10629_v53, %v10559_v52  ;;  %v1967_v5 = vld [vmem:[#allocation2 + $0xa] sm:$0xff]  ;;  %v2401_v6 = vld [vmem:[#allocation2 + $0x1a] sm:$0xff]  ;;  %v2410_v52 = vld [vmem:[#allocation2 + $0x62] sm:$0xff] }
 0x12b   : > { %10673 = vmatmul.mubr.msk.f32.gmra.mxu0 %vm469_vm7, %v1202_v20  ;;  %1170 = vst.msk [vmem:[#allocation2 + $0x12b] sm:$0xff] %vm469_vm7, %v1134_v36  ;;  %v9540_v9 = vld [vmem:[%s16977_s4 + $0x130] sm:$0xff]  ;;  %v9539_v16 = vld [vmem:[%s16977_s4 + $0x128] sm:$0xff]  ;;  %v2405_v18 = vld [vmem:[#allocation2 + $0x3a] sm:$0xff]  ;;  %v12417_v13 = vpop.f32.mrf.mxu0 }
 0x12c   : > { %v1133_v33 = vsel %vm17006_vm6, %v917_v40, 0.0  ;;  %v1247_v44 = vld [vmem:[#allocation2 + $0x101] sm:$0xff]  ;;  %v1248_v48 = vld [vmem:[#allocation2 + $0x109] sm:$0xff]  ;;  %v9537_v40 = vld [vmem:[%s16977_s4 + $0x118] sm:$0xff]  ;;  %vm476_vm6 = vcmask 520192  }
 0x12d   : > { %v1203_v46 = vld [vmem:[#allocation2 + $0x100] sm:$0xff]  ;;  %1169 = vst.msk [vmem:[#allocation2 + $0x123] sm:$0xff] %vm469_vm7, %v1133_v33  ;;  %10605 = vmatprep.mubr.msk.f32.mxu1 %vm469_vm7, %v1247_v44  ;;  %v1204_v50 = vld [vmem:[#allocation2 + $0x108] sm:$0xff]  ;;  %v9584_v17 = vld [vmem:[%s16977_s4 + $0x170] sm:$0xff] }
 0x12e   : > { %10675 = vmatprep.mubr.msk.f32.mxu0 %vm469_vm7, %v1203_v46  ;;  %10606 = vmatmul.mubr.msk.f32.gmra.mxu1 %vm469_vm7, %v1248_v48  ;;  %v2403_v15 = vld [vmem:[#allocation2 + $0x2a] sm:$0xff]  ;;  %v2406_v20 = vld [vmem:[#allocation2 + $0x42] sm:$0xff]  ;;  %v2408_v44 = vld [vmem:[#allocation2 + $0x52] sm:$0xff] }
 0x12f   : > { %10676 = vmatmul.mubr.msk.f32.gmra.mxu0 %vm469_vm7, %v1204_v50  ;;  %v9583_v19 = vld [vmem:[%s16977_s4 + $0x168] sm:$0xff]  ;;  %v9582_v33 = vld [vmem:[%s16977_s4 + $0x160] sm:$0xff]  ;;  %v9536_v48 = vld [vmem:[%s16977_s4 + $0x110] sm:$0xff] }
 0x130   : > { %v1249_v57 = vld [vmem:[#allocation2 + $0x111] sm:$0xff]  ;;  %v1250_v61 = vld [vmem:[#allocation2 + $0x119] sm:$0xff] }
 0x131   : > { %v1205_v60 = vld [vmem:[#allocation2 + $0x110] sm:$0xff]  ;;  %10608 = vmatprep.mubr.msk.f32.mxu1 %vm469_vm7, %v1249_v57  ;;  %v1206_v62 = vld [vmem:[#allocation2 + $0x118] sm:$0xff] }
 0x132   : > { %10678 = vmatprep.mubr.msk.f32.mxu0 %vm469_vm7, %v1205_v60  ;;  %10609 = vmatmul.mubr.msk.f32.gmra.mxu1 %vm469_vm7, %v1250_v61  ;;  %v2407_v36 = vld [vmem:[#allocation2 + $0x4a] sm:$0xff]  ;;  %v2409_v46 = vld [vmem:[#allocation2 + $0x5a] sm:$0xff]  ;;  %v2412_v60 = vld [vmem:[#allocation2 + $0x72] sm:$0xff] }
 0x133   : > { %10679 = vmatmul.mubr.msk.f32.gmra.mxu0 %vm469_vm7, %v1206_v62  ;;  %10697 = vmatprep.mubr.msk.f32.mxu1 %vm469_vm7, %v1966_v3  ;;  %v9581_v50 = vld [vmem:[%s16977_s4 + $0x158] sm:$0xff]  ;;  %v2411_v53 = vld [vmem:[#allocation2 + $0x6a] sm:$0xff]  ;;  %v9534_v62 = vld [vmem:[%s16977_s4 + $0x100] sm:$0xff] }
 0x134   : > { %10767 = vmatprep.mubr.msk.f32.mxu0 %vm469_vm7, %v2400_v4  ;;  %v9535_v3 = vld [vmem:[%s16977_s4 + $0x108] sm:$0xff]  ;;  %v9580_v57 = vld [vmem:[%s16977_s4 + $0x150] sm:$0xff]  ;;  %v2413_v61 = vld [vmem:[#allocation2 + $0x7a] sm:$0xff] }
 0x135   : > { %v12400_v10 = vld [vmem:[#allocation2 + $0xd4] sm:$0xff]  ;;  %v12419_v49 = vld [vmem:[#allocation2 + $0xec] sm:$0xff]  ;;  %v12433_v35 = vld [vmem:[#allocation2 + $0xfc] sm:$0xff] }
 0x136   : > { %10698 = vmatmul.mubr.msk.f32.vlgmr.msra.gmra.mxu1 %vm469_vm7, %v1967_v5  ;;  %v2414_v5 = vld [vmem:[#allocation2 + $0x82] sm:$0xff]  ;;  %v2862_v0 = vld [vmem:[#allocation2 + $0xf3] sm:$0xff]  ;;  %v2865_v45 = vld [vmem:[#allocation2 + $0x10b] sm:$0xff] }
 0x137   : > { %10768 = vmatmul.mubr.msk.f32.vlgmr.msra.gmra.mxu0 %vm469_vm7, %v2401_v6  ;;  %10822 = vmatpush3.msra.mxu1 %v11769_v21  ;;  %v2404_v21 = vld [vmem:[#allocation2 + $0x32] sm:$0xff]  ;;  %v2863_v43 = vld [vmem:[#allocation2 + $0xfb] sm:$0xff] }
 0x138   : > { %10700 = vmatprep.mubr.msk.f32.mxu1 %vm469_vm7, %v2400_v4  ;;  %10770 = vmatprep.mubr.msk.f32.mxu0 %vm469_vm7, %v2402_v12  ;;  %v9579_v4 = vld [vmem:[%s16977_s4 + $0x148] sm:$0xff]  ;;  %v12424_v47 = vld [vmem:[#allocation2 + $0xf4] sm:$0xff]  ;;  %v12461_v51 = vld [vmem:[#allocation2 + $0x11c] sm:$0xff] }
 0x139   : > { %10823 = vmatprep.subr.mxu1 %v9540_v9  ;;  %10892 = vmatpush3.msra.mxu0 %v11838_v63  ;;  %v9538_v63 = vld [vmem:[%s16977_s4 + $0x120] sm:$0xff]  ;;  %v12447_v39 = vld [vmem:[#allocation2 + $0x10c] sm:$0xff] }
 0x13a   : > { %10824 = vmatpush3.msra.mxu1 %v9540_v9  ;;  %10893 = vmatprep.subr.mxu0 %v9584_v17  ;;  %v9578_v9 = vld [vmem:[%s16977_s4 + $0x140] sm:$0xff]  ;;  %v2869_v34 = vld [vmem:[#allocation2 + $0x12b] sm:$0xff] }
 0x13b   : > { %10701 = vmatmul.mubr.msk.f32.gmra.mxu1 %vm469_vm7, %v2401_v6  ;;  %10771 = vmatmul.mubr.msk.f32.gmra.mxu0 %vm469_vm7, %v2403_v15  ;;  %v2415_v6 = vld [vmem:[#allocation2 + $0x8a] sm:$0xff]  ;;  %v2867_v55 = vld [vmem:[#allocation2 + $0x11b] sm:$0xff] }
 0x13c   : > { %10703 = vmatprep.mubr.msk.f32.mxu1 %vm469_vm7, %v2402_v12  ;;  %10773 = vmatprep.mubr.msk.f32.mxu0 %vm469_vm7, %v2404_v21  ;;  %v12182_v12 = vld [vmem:[%s16977_s4 + $0x1b8] sm:$0xff]  ;;  %v12475_v32 = vld [vmem:[#allocation2 + $0x12c] sm:$0xff] }
 0x13d   : > { %10825 = vmatprep.subr.mxu1 %v9539_v16  ;;  %10894 = vmatpush3.msra.mxu0 %v9584_v17  ;;  %v12192_v17 = vld [vmem:[%s16977_s4 + $0x1f8] sm:$0xff] }
 0x13e   : > { %10826 = vmatpush3.msra.mxu1 %v9539_v16  ;;  %10895 = vmatprep.subr.mxu0 %v9583_v19  ;;  %v2417_v16 = vld [vmem:[#allocation2 + $0x9a] sm:$0xff] }
 0x13f   : > { %10704 = vmatmul.mubr.msk.f32.gmra.mxu1 %vm469_vm7, %v2403_v15  ;;  %10774 = vmatmul.mubr.msk.f32.gmra.mxu0 %vm469_vm7, %v2405_v18  ;;  %v2416_v15 = vld [vmem:[#allocation2 + $0x92] sm:$0xff] }
 0x140   : > { %10706 = vmatprep.mubr.msk.f32.mxu1 %vm469_vm7, %v2404_v21  ;;  %10776 = vmatprep.mubr.msk.f32.mxu0 %vm469_vm7, %v2406_v20  ;;  %v2418_v21 = vld [vmem:[#allocation2 + $0xa2] sm:$0xff] }
 0x141   : > { %10827 = vmatprep.subr.mxu1 %v9538_v63  ;;  %10896 = vmatpush3.msra.mxu0 %v9583_v19  ;;  %v2421_v19 = vld [vmem:[#allocation2 + $0xba] sm:$0xff] }
 0x142   : > { %10828 = vmatpush3.msra.mxu1 %v9538_v63  ;;  %10897 = vmatprep.subr.mxu0 %v9582_v33  ;;  %v2420_v63 = vld [vmem:[#allocation2 + $0xb2] sm:$0xff] }
 0x143   : > { %10707 = vmatmul.mubr.msk.f32.gmra.mxu1 %vm469_vm7, %v2405_v18  ;;  %10777 = vmatmul.mubr.msk.f32.gmra.mxu0 %vm469_vm7, %v2407_v36  ;;  %v2419_v18 = vld [vmem:[#allocation2 + $0xaa] sm:$0xff] }
 0x144   : > { %10709 = vmatprep.mubr.msk.f32.mxu1 %vm469_vm7, %v2406_v20  ;;  %10779 = vmatprep.mubr.msk.f32.mxu0 %vm469_vm7, %v2408_v44  ;;  %v2422_v20 = vld [vmem:[#allocation2 + $0xc2] sm:$0xff] }
 0x145   : > { %10829 = vmatprep.subr.mxu1 %v9537_v40  ;;  %10898 = vmatpush3.msra.mxu0 %v9582_v33  ;;  %v2425_v33 = vld [vmem:[#allocation2 + $0xda] sm:$0xff] }
 0x146   : > { %10830 = vmatpush3.msra.mxu1 %v9537_v40  ;;  %10899 = vmatprep.subr.mxu0 %v9581_v50  ;;  %v2424_v40 = vld [vmem:[#allocation2 + $0xd2] sm:$0xff] }
 0x147   : > { %10710 = vmatmul.mubr.msk.f32.gmra.mxu1 %vm469_vm7, %v2407_v36  ;;  %10780 = vmatmul.mubr.msk.f32.gmra.mxu0 %vm469_vm7, %v2409_v46  ;;  %v2423_v36 = vld [vmem:[#allocation2 + $0xca] sm:$0xff] }
 0x148   : > { %10712 = vmatprep.mubr.msk.f32.mxu1 %vm469_vm7, %v2408_v44  ;;  %10782 = vmatprep.mubr.msk.f32.mxu0 %vm469_vm7, %v2410_v52  ;;  %v2426_v44 = vld [vmem:[#allocation2 + $0xe2] sm:$0xff] }
 0x149   : > { %10831 = vmatprep.subr.mxu1 %v9536_v48  ;;  %10900 = vmatpush3.msra.mxu0 %v9581_v50  ;;  %v2429_v50 = vld [vmem:[#allocation2 + $0xfa] sm:$0xff] }
 0x14a   : > { %10832 = vmatpush3.msra.mxu1 %v9536_v48  ;;  %10901 = vmatprep.subr.mxu0 %v9580_v57  ;;  %v2428_v48 = vld [vmem:[#allocation2 + $0xf2] sm:$0xff] }
 0x14b   : > { %10713 = vmatmul.mubr.msk.f32.gmra.mxu1 %vm469_vm7, %v2409_v46  ;;  %10783 = vmatmul.mubr.msk.f32.gmra.mxu0 %vm469_vm7, %v2411_v53  ;;  %v2427_v46 = vld [vmem:[#allocation2 + $0xea] sm:$0xff] }
 0x14c   : > { %10715 = vmatprep.mubr.msk.f32.mxu1 %vm469_vm7, %v2410_v52  ;;  %10785 = vmatprep.mubr.msk.f32.mxu0 %vm469_vm7, %v2412_v60  ;;  %v2430_v52 = vld [vmem:[#allocation2 + $0x102] sm:$0xff] }
 0x14d   : > { %10833 = vmatprep.subr.mxu1 %v9535_v3  ;;  %10902 = vmatpush3.msra.mxu0 %v9580_v57  ;;  %v2433_v57 = vld [vmem:[#allocation2 + $0x11a] sm:$0xff] }
 0x14e   : > { %10834 = vmatpush3.msra.mxu1 %v9535_v3  ;;  %10903 = vmatprep.subr.mxu0 %v9579_v4  ;;  %v2432_v3 = vld [vmem:[#allocation2 + $0x112] sm:$0xff] }
 0x14f   : > { %10716 = vmatmul.mubr.msk.f32.gmra.mxu1 %vm469_vm7, %v2411_v53  ;;  %10786 = vmatmul.mubr.msk.f32.gmra.mxu0 %vm469_vm7, %v2413_v61  ;;  %v2431_v53 = vld [vmem:[#allocation2 + $0x10a] sm:$0xff] }
 0x150   : > { %10718 = vmatprep.mubr.msk.f32.mxu1 %vm469_vm7, %v2412_v60  ;;  %10788 = vmatprep.mubr.msk.f32.mxu0 %vm469_vm7, %v2414_v5  ;;  %v2434_v60 = vld [vmem:[#allocation2 + $0x122] sm:$0xff] }
 0x151   : > { %10835 = vmatprep.subr.mxu1 %v9534_v62  ;;  %10904 = vmatpush3.msra.mxu0 %v9579_v4  ;;  %v3268_v4 = vld [vmem:[#allocation2 + $0x14] sm:$0xff] }
 0x152   : > { %10836 = vmatpush3.msra.mxu1 %v9534_v62  ;;  %10905 = vmatprep.subr.mxu0 %v9578_v9  ;;  %v2834_v62 = vld [vmem:[#allocation2 + $0x13] sm:$0xff] }
 0x153   : > { %10719 = vmatmul.mubr.msk.f32.gmra.mxu1 %vm469_vm7, %v2413_v61  ;;  %10789 = vmatmul.mubr.msk.f32.gmra.mxu0 %vm469_vm7, %v2415_v6  ;;  %v2435_v61 = vld [vmem:[#allocation2 + $0x12a] sm:$0xff] }
 0x154   : > { %10721 = vmatprep.mubr.msk.f32.mxu1 %vm469_vm7, %v2414_v5  ;;  %10791 = vmatprep.mubr.msk.f32.mxu0 %vm469_vm7, %v2416_v15  ;;  %v2835_v5 = vld [vmem:[#allocation2 + $0x1b] sm:$0xff] }
 0x155   : > { %10961 = vmatprep.subr.mxu1 %v12182_v12  ;;  %10906 = vmatpush3.msra.mxu0 %v9578_v9  ;;  %v9628_v9 = vld [vmem:[%s16977_s4 + $0x1b0] sm:$0xff] }
 0x156   : > { %11031 = vmatprep.subr.mxu0 %v12192_v17 }
 0x157   : > { %10722 = vmatmul.mubr.msk.f32.gmra.mxu1 %vm469_vm7, %v2415_v6  ;;  %10792 = vmatmul.mubr.msk.f32.gmra.mxu0 %vm469_vm7, %v2417_v16  ;;  %v3269_v6 = vld [vmem:[#allocation2 + $0x1c] sm:$0xff] }
 0x158   : > { %10724 = vmatprep.mubr.msk.f32.mxu1 %vm469_vm7, %v2416_v15  ;;  %10794 = vmatprep.mubr.msk.f32.mxu0 %vm469_vm7, %v2418_v21  ;;  %v2836_v15 = vld [vmem:[#allocation2 + $0x23] sm:$0xff] }
 0x15b   : > { %10725 = vmatmul.mubr.msk.f32.gmra.mxu1 %vm469_vm7, %v2417_v16  ;;  %10795 = vmatmul.mubr.msk.f32.gmra.mxu0 %vm469_vm7, %v2419_v18  ;;  %v12242_v16 = vld [vmem:[#allocation2 + $0x24] sm:$0xff] }
 0x15c   : > { %10727 = vmatprep.mubr.msk.f32.mxu1 %vm469_vm7, %v2418_v21  ;;  %10797 = vmatprep.mubr.msk.f32.mxu0 %vm469_vm7, %v2420_v63  ;;  %v2837_v21 = vld [vmem:[#allocation2 + $0x2b] sm:$0xff] }
 0x15f   : > { %10728 = vmatmul.mubr.msk.f32.gmra.mxu1 %vm469_vm7, %v2419_v18  ;;  %10798 = vmatmul.mubr.msk.f32.gmra.mxu0 %vm469_vm7, %v2421_v19  ;;  %v12246_v18 = vld [vmem:[#allocation2 + $0x2c] sm:$0xff] }
 0x160   : > { %10730 = vmatprep.mubr.msk.f32.mxu1 %vm469_vm7, %v2420_v63  ;;  %10800 = vmatprep.mubr.msk.f32.mxu0 %vm469_vm7, %v2422_v20  ;;  %v9627_v63 = vld [vmem:[%s16977_s4 + $0x1a8] sm:$0xff] }
 0x163   : > { %10731 = vmatmul.mubr.msk.f32.gmra.mxu1 %vm469_vm7, %v2421_v19  ;;  %10801 = vmatmul.mubr.msk.f32.gmra.mxu0 %vm469_vm7, %v2423_v36  ;;  %v2838_v19 = vld [vmem:[#allocation2 + $0x33] sm:$0xff] }
 0x164   : > { %10733 = vmatprep.mubr.msk.f32.mxu1 %vm469_vm7, %v2422_v20  ;;  %10803 = vmatprep.mubr.msk.f32.mxu0 %vm469_vm7, %v2424_v40  ;;  %v12258_v20 = vld [vmem:[#allocation2 + $0x34] sm:$0xff] }
 0x167   : > { %10734 = vmatmul.mubr.msk.f32.gmra.mxu1 %vm469_vm7, %v2423_v36  ;;  %10804 = vmatmul.mubr.msk.f32.gmra.mxu0 %vm469_vm7, %v2425_v33  ;;  %v2839_v36 = vld [vmem:[#allocation2 + $0x3b] sm:$0xff] }
 0x168   : > { %10736 = vmatprep.mubr.msk.f32.mxu1 %vm469_vm7, %v2424_v40  ;;  %10806 = vmatprep.mubr.msk.f32.mxu0 %vm469_vm7, %v2426_v44  ;;  %v9626_v40 = vld [vmem:[%s16977_s4 + $0x1a0] sm:$0xff] }
 0x16b   : > { %10737 = vmatmul.mubr.msk.f32.gmra.mxu1 %vm469_vm7, %v2425_v33  ;;  %10807 = vmatmul.mubr.msk.f32.gmra.mxu0 %vm469_vm7, %v2427_v46  ;;  %v9671_v33 = vld [vmem:[%s16977_s4 + $0x1e8] sm:$0xff] }
 0x16c   : > { %10739 = vmatprep.mubr.msk.f32.mxu1 %vm469_vm7, %v2426_v44  ;;  %10809 = vmatprep.mubr.msk.f32.mxu0 %vm469_vm7, %v2428_v48  ;;  %v2840_v44 = vld [vmem:[#allocation2 + $0x43] sm:$0xff] }
 0x16f   : > { %10740 = vmatmul.mubr.msk.f32.gmra.mxu1 %vm469_vm7, %v2427_v46  ;;  %10810 = vmatmul.mubr.msk.f32.gmra.mxu0 %vm469_vm7, %v2429_v50  ;;  %v12274_v46 = vld [vmem:[#allocation2 + $0x44] sm:$0xff] }
 0x170   : > { %10742 = vmatprep.mubr.msk.f32.mxu1 %vm469_vm7, %v2428_v48  ;;  %10812 = vmatprep.mubr.msk.f32.mxu0 %vm469_vm7, %v2430_v52  ;;  %v2841_v48 = vld [vmem:[#allocation2 + $0x4b] sm:$0xff] }
 0x173   : > { %10743 = vmatmul.mubr.msk.f32.gmra.mxu1 %vm469_vm7, %v2429_v50  ;;  %10813 = vmatmul.mubr.msk.f32.gmra.mxu0 %vm469_vm7, %v2431_v53  ;;  %v12279_v50 = vld [vmem:[#allocation2 + $0x4c] sm:$0xff] }
 0x174   : > { %10745 = vmatprep.mubr.msk.f32.mxu1 %vm469_vm7, %v2430_v52  ;;  %10815 = vmatprep.mubr.msk.f32.mxu0 %vm469_vm7, %v2432_v3  ;;  %v9625_v52 = vld [vmem:[%s16977_s4 + $0x198] sm:$0xff] }
 0x177   : > { %10746 = vmatmul.mubr.msk.f32.gmra.mxu1 %vm469_vm7, %v2431_v53  ;;  %10816 = vmatmul.mubr.msk.f32.gmra.mxu0 %vm469_vm7, %v2433_v57  ;;  %v9670_v53 = vld [vmem:[%s16977_s4 + $0x1e0] sm:$0xff] }
 0x178   : > { %10748 = vmatprep.mubr.msk.f32.mxu1 %vm469_vm7, %v2432_v3  ;;  %10818 = vmatprep.mubr.msk.f32.mxu0 %vm469_vm7, %v2434_v60  ;;  %v2842_v3 = vld [vmem:[#allocation2 + $0x53] sm:$0xff]  ;;  %v2843_v60 = vld [vmem:[#allocation2 + $0x5b] sm:$0xff] }
 0x17b   : > { %10749 = vmatmul.mubr.msk.f32.gmra.mxu1 %vm469_vm7, %v2433_v57  ;;  %10819 = vmatmul.mubr.msk.f32.gmra.mxu0 %vm469_vm7, %v2435_v61  ;;  %v12290_v57 = vld [vmem:[#allocation2 + $0x54] sm:$0xff]  ;;  %v12295_v61 = vld [vmem:[#allocation2 + $0x5c] sm:$0xff] }
 0x17c   : > { %10837 = vmatprep.mubr.msk.f32.mxu1 %vm469_vm7, %v2834_v62  ;;  %10907 = vmatprep.mubr.msk.f32.mxu0 %vm469_vm7, %v3268_v4  ;;  %v9624_v62 = vld [vmem:[%s16977_s4 + $0x190] sm:$0xff]  ;;  %v9669_v4 = vld [vmem:[%s16977_s4 + $0x1d8] sm:$0xff] }
 0x17f   : > { %10838 = vmatmul.mubr.msk.f32.vlgmr.msra.gmra.mxu1 %vm469_vm7, %v2835_v5  ;;  %10908 = vmatmul.mubr.msk.f32.vlgmr.msra.gmra.mxu0 %vm469_vm7, %v3269_v6  ;;  %v2844_v5 = vld [vmem:[#allocation2 + $0x63] sm:$0xff] }
 0x180   : > { %10962 = vmatpush3.msra.mxu1 %v12182_v12  ;;  %10840 = vmatprep.mubr.msk.f32.mxu1 %vm469_vm7, %v2836_v15  ;;  %v9672_v12 = vld [vmem:[%s16977_s4 + $0x1f0] sm:$0xff]  ;;  %v12306_v6 = vld [vmem:[#allocation2 + $0x64] sm:$0xff] }
 0x181   : > { %10910 = vmatprep.mubr.msk.f32.mxu0 %vm469_vm7, %v12242_v16  ;;  %10963 = vmatprep.subr.mxu1 %v9628_v9  ;;  %v2845_v15 = vld [vmem:[#allocation2 + $0x6b] sm:$0xff] }
 0x182   : > { %10964 = vmatpush3.msra.mxu1 %v9628_v9  ;;  %11032 = vmatpush3.msra.mxu0 %v12192_v17  ;;  %v12263_v17 = vld [vmem:[#allocation2 + $0x3c] sm:$0xff]  ;;  %v12308_v9 = vld [vmem:[#allocation3] sm:$0xff] }
 0x183   : > { %10841 = vmatmul.mubr.msk.f32.gmra.mxu1 %vm469_vm7, %v2837_v21  ;;  %10911 = vmatmul.mubr.msk.f32.gmra.mxu0 %vm469_vm7, %v12246_v18  ;;  %477 = vst.msk [vmem:[#allocation2 + $0x143] sm:$0x1f] %vm476_vm6, %v12308_v9  ;;  %v12314_v21 = vld [vmem:[#allocation2 + $0x6c] sm:$0xff] }
 0x184   : > { %10843 = vmatprep.mubr.msk.f32.mxu1 %vm469_vm7, %v2838_v19  ;;  %10913 = vmatprep.mubr.msk.f32.mxu0 %vm469_vm7, %v12258_v20  ;;  %v2846_v19 = vld [vmem:[#allocation2 + $0x73] sm:$0xff] }
 0x185   : > { %10965 = vmatprep.subr.mxu1 %v9627_v63  ;;  %11033 = vmatprep.subr.mxu0 %v9672_v12 }
 0x186   : > { %10966 = vmatpush3.msra.mxu1 %v9627_v63  ;;  %11034 = vmatpush3.msra.mxu0 %v9672_v12  ;;  %v9623_v63 = vld [vmem:[%s16977_s4 + $0x188] sm:$0xff]  ;;  %v9668_v12 = vld [vmem:[%s16977_s4 + $0x1d0] sm:$0xff] }
 0x187   : > { %10844 = vmatmul.mubr.msk.f32.gmra.mxu1 %vm469_vm7, %v2839_v36  ;;  %10914 = vmatmul.mubr.msk.f32.gmra.mxu0 %vm469_vm7, %v12263_v17  ;;  %v12325_v36 = vld [vmem:[#allocation2 + $0x74] sm:$0xff] }
 0x188   : > { %10846 = vmatprep.mubr.msk.f32.mxu1 %vm469_vm7, %v2840_v44  ;;  %10916 = vmatprep.mubr.msk.f32.mxu0 %vm469_vm7, %v12274_v46  ;;  %v9622_v44 = vld [vmem:[%s16977_s4 + $0x180] sm:$0xff] }
 0x189   : > { %10967 = vmatprep.subr.mxu1 %v9626_v40  ;;  %11035 = vmatprep.subr.mxu0 %v9671_v33 }
 0x18a   : > { %10968 = vmatpush3.msra.mxu1 %v9626_v40  ;;  %11036 = vmatpush3.msra.mxu0 %v9671_v33  ;;  %v2847_v40 = vld [vmem:[#allocation2 + $0x7b] sm:$0xff] }
 0x18b   : > { %10847 = vmatmul.mubr.msk.f32.gmra.mxu1 %vm469_vm7, %v2841_v48  ;;  %10917 = vmatmul.mubr.msk.f32.gmra.mxu0 %vm469_vm7, %v12279_v50  ;;  %v12330_v33 = vld [vmem:[#allocation2 + $0x7c] sm:$0xff]  ;;  %v9667_v48 = vld [vmem:[%s16977_s4 + $0x1c8] sm:$0xff] }
 0x18c   : > { %10849 = vmatprep.mubr.msk.f32.mxu1 %vm469_vm7, %v2842_v3  ;;  %10919 = vmatprep.mubr.msk.f32.mxu0 %vm469_vm7, %v12290_v57  ;;  %v2849_v3 = vld [vmem:[#allocation2 + $0x8b] sm:$0xff] }
 0x18d   : > { %10969 = vmatprep.subr.mxu1 %v9625_v52  ;;  %11037 = vmatprep.subr.mxu0 %v9670_v53 }
 0x18e   : > { %10970 = vmatpush3.msra.mxu1 %v9625_v52  ;;  %11038 = vmatpush3.msra.mxu0 %v9670_v53  ;;  %v2848_v52 = vld [vmem:[#allocation2 + $0x83] sm:$0xff] }
 0x18f   : > { %10850 = vmatmul.mubr.msk.f32.gmra.mxu1 %vm469_vm7, %v2843_v60  ;;  %10920 = vmatmul.mubr.msk.f32.gmra.mxu0 %vm469_vm7, %v12295_v61  ;;  %v12341_v53 = vld [vmem:[#allocation2 + $0x84] sm:$0xff]  ;;  %v12346_v60 = vld [vmem:[#allocation2 + $0x8c] sm:$0xff] }
 0x190   : > { %10852 = vmatprep.mubr.msk.f32.mxu1 %vm469_vm7, %v2844_v5  ;;  %10922 = vmatprep.mubr.msk.f32.mxu0 %vm469_vm7, %v12306_v6  ;;  %v2850_v5 = vld [vmem:[#allocation2 + $0x93] sm:$0xff] }
 0x191   : > { %10971 = vmatprep.subr.mxu1 %v9624_v62  ;;  %11039 = vmatprep.subr.mxu0 %v9669_v4 }
 0x192   : > { %10972 = vmatpush3.msra.mxu1 %v9624_v62  ;;  %11040 = vmatpush3.msra.mxu0 %v9669_v4  ;;  %v9666_v62 = vld [vmem:[%s16977_s4 + $0x1c0] sm:$0xff]  ;;  %v12354_v4 = vld [vmem:[%s16977_s4 + $0x238] sm:$0xff] }
 0x193   : > { %10853 = vmatmul.mubr.msk.f32.gmra.mxu1 %vm469_vm7, %v2845_v15  ;;  %10923 = vmatmul.mubr.msk.f32.gmra.mxu0 %vm469_vm7, %v12314_v21  ;;  %v12359_v15 = vld [vmem:[#allocation2 + $0x94] sm:$0xff] }
 0x194   : > { %10855 = vmatprep.mubr.msk.f32.mxu1 %vm469_vm7, %v2846_v19  ;;  %10925 = vmatprep.mubr.msk.f32.mxu0 %vm469_vm7, %v12325_v36  ;;  %v2852_v19 = vld [vmem:[#allocation2 + $0xa3] sm:$0xff] }
 0x195   : > { %10973 = vmatprep.subr.mxu1 %v9623_v63  ;;  %11041 = vmatprep.subr.mxu0 %v9668_v12 }
 0x196   : > { %10974 = vmatpush3.msra.mxu1 %v9623_v63  ;;  %11042 = vmatpush3.msra.mxu0 %v9668_v12  ;;  %v2851_v63 = vld [vmem:[#allocation2 + $0x9b] sm:$0xff] }
 0x197   : > { %10856 = vmatmul.mubr.msk.f32.gmra.mxu1 %vm469_vm7, %v2847_v40  ;;  %10926 = vmatmul.mubr.msk.f32.gmra.mxu0 %vm469_vm7, %v12330_v33  ;;  %v12365_v12 = vld [vmem:[#allocation2 + $0x9c] sm:$0xff]  ;;  %v12370_v40 = vld [vmem:[#allocation2 + $0xa4] sm:$0xff] }
 0x198   : > { %10858 = vmatprep.mubr.msk.f32.mxu1 %vm469_vm7, %v2848_v52  ;;  %10928 = vmatprep.mubr.msk.f32.mxu0 %vm469_vm7, %v12341_v53  ;;  %v2854_v52 = vld [vmem:[#allocation2 + $0xb3] sm:$0xff] }
 0x199   : > { %10975 = vmatprep.subr.mxu1 %v9622_v44  ;;  %11043 = vmatprep.subr.mxu0 %v9667_v48 }
 0x19a   : > { %10976 = vmatpush3.msra.mxu1 %v9622_v44  ;;  %11044 = vmatpush3.msra.mxu0 %v9667_v48  ;;  %v2853_v44 = vld [vmem:[#allocation2 + $0xab] sm:$0xff] }
 0x19b   : > { %10859 = vmatmul.mubr.msk.f32.gmra.mxu1 %vm469_vm7, %v2849_v3  ;;  %10929 = vmatmul.mubr.msk.f32.gmra.mxu0 %vm469_vm7, %v12346_v60  ;;  %v12375_v48 = vld [vmem:[#allocation2 + $0xac] sm:$0xff]  ;;  %v12380_v3 = vld [vmem:[#allocation2 + $0xb4] sm:$0xff] }
 0x19c   : > { %10861 = vmatprep.mubr.msk.f32.mxu1 %vm469_vm7, %v2850_v5  ;;  %10931 = vmatprep.mubr.msk.f32.mxu0 %vm469_vm7, %v12359_v15  ;;  %v12385_v5 = vld [vmem:[#allocation2 + $0xbc] sm:$0xff] }
 0x19d   : > { %11045 = vmatprep.subr.mxu0 %v9666_v62  ;;  %11101 = vmatprep.subr.mxu1 %v12354_v4 }
 0x19e   : > { %11046 = vmatpush3.msra.mxu0 %v9666_v62  ;;  %v2855_v62 = vld [vmem:[#allocation2 + $0xbb] sm:$0xff] }
 0x19f   : > { %10862 = vmatmul.mubr.msk.f32.gmra.mxu1 %vm469_vm7, %v2851_v63  ;;  %10932 = vmatmul.mubr.msk.f32.gmra.mxu0 %vm469_vm7, %v12365_v12  ;;  %v2856_v63 = vld [vmem:[#allocation2 + $0xc3] sm:$0xff] }
 0x1a0   : > { %10864 = vmatprep.mubr.msk.f32.mxu1 %vm469_vm7, %v2852_v19  ;;  %10934 = vmatprep.mubr.msk.f32.mxu0 %vm469_vm7, %v12370_v40  ;;  %v12390_v19 = vld [vmem:[#allocation2 + $0xc4] sm:$0xff] }
 0x1a3   : > { %10865 = vmatmul.mubr.msk.f32.gmra.mxu1 %vm469_vm7, %v2853_v44  ;;  %10935 = vmatmul.mubr.msk.f32.gmra.mxu0 %vm469_vm7, %v12375_v48  ;;  %v2857_v44 = vld [vmem:[#allocation2 + $0xcb] sm:$0xff] }
 0x1a4   : > { %10867 = vmatprep.mubr.msk.f32.mxu1 %vm469_vm7, %v2854_v52  ;;  %10937 = vmatprep.mubr.msk.f32.mxu0 %vm469_vm7, %v12380_v3  ;;  %v12395_v52 = vld [vmem:[#allocation2 + $0xcc] sm:$0xff] }
 0x1a7   : > { %10868 = vmatmul.mubr.msk.f32.gmra.mxu1 %vm469_vm7, %v2855_v62  ;;  %10938 = vmatmul.mubr.msk.f32.gmra.mxu0 %vm469_vm7, %v12385_v5  ;;  %v2858_v62 = vld [vmem:[#allocation2 + $0xd3] sm:$0xff] }
 0x1a8   : > { %10870 = vmatprep.mubr.msk.f32.mxu1 %vm469_vm7, %v2856_v63  ;;  %10940 = vmatprep.mubr.msk.f32.mxu0 %vm469_vm7, %v12390_v19  ;;  %v2859_v63 = vld [vmem:[#allocation2 + $0xdb] sm:$0xff] }
 0x1ab   : > { %10871 = vmatmul.mubr.msk.f32.gmra.mxu1 %vm469_vm7, %v2857_v44  ;;  %10941 = vmatmul.mubr.msk.f32.gmra.mxu0 %vm469_vm7, %v12395_v52  ;;  %v2860_v44 = vld [vmem:[#allocation2 + $0xe3] sm:$0xff] }
 0x1ac   : > { %10873 = vmatprep.mubr.msk.f32.mxu1 %vm469_vm7, %v2858_v62  ;;  %10943 = vmatprep.mubr.msk.f32.mxu0 %vm469_vm7, %v12400_v10  ;;  %v12415_v62 = vpop.f32.mrf.mxu1 }
 0x1af   : > { %10874 = vmatmul.mubr.msk.f32.gmra.mxu1 %vm469_vm7, %v2859_v63  ;;  %10944 = vmatmul.mubr.msk.f32.gmra.mxu0 %vm469_vm7, %v12405_v2 }
 0x1b0   : > { %10876 = vmatprep.mubr.msk.f32.mxu1 %vm469_vm7, %v2860_v44  ;;  %10946 = vmatprep.mubr.msk.f32.mxu0 %vm469_vm7, %v12410_v41 }
 0x1b2   : > { %v10562_v14 = vpop.f32.mrf.mxu1 }
 0x1b3   : > { %v10632_v63 = vpop.f32.mrf.mxu0  ;;  %10877 = vmatmul.mubr.msk.f32.gmra.mxu1 %vm469_vm7, %v2861_v54  ;;  %10947 = vmatmul.mubr.msk.f32.gmra.mxu0 %vm469_vm7, %v12419_v49 }
 0x1b4   : > { %v12426_v44 = vadd.f32 %v10632_v63, %v10562_v14  ;;  %10879 = vmatprep.mubr.msk.f32.mxu1 %vm469_vm7, %v2862_v0  ;;  %10949 = vmatprep.mubr.msk.f32.mxu0 %vm469_vm7, %v12424_v47  ;;  %v1444_v37 = vpop.f32.mrf.mxu1  ;;  %v2864_v14 = vld [vmem:[#allocation2 + $0x103] sm:$0xff] }
 0x1b5   : > { %v1797_v8 = vpop.f32.mrf.mxu0  ;;  %v12438_v63 = vld [vmem:[#allocation2 + $0x104] sm:$0xff] }
 0x1b6   : > { %v12431_v58 = vadd.f32 %v1797_v8, %v1444_v37  ;;  %v10565_v54 = vpop.f32.mrf.mxu1 }
 0x1b7   : > { %v10635_v7 = vpop.f32.mrf.mxu0  ;;  %10880 = vmatmul.mubr.msk.f32.gmra.mxu1 %vm469_vm7, %v2863_v43  ;;  %10950 = vmatmul.mubr.msk.f32.gmra.mxu0 %vm469_vm7, %v12433_v35 }
 0x1b8   : > { %v12440_v0 = vadd.f32 %v10635_v7, %v10565_v54  ;;  %10882 = vmatprep.mubr.msk.f32.mxu1 %vm469_vm7, %v2864_v14  ;;  %10952 = vmatprep.mubr.msk.f32.mxu0 %vm469_vm7, %v12438_v63  ;;  %v1454_v8 = vpop.f32.mrf.mxu1  ;;  %v2866_v7 = vld [vmem:[#allocation2 + $0x113] sm:$0xff] }
 0x1b9   : > { %v1807_v37 = vpop.f32.mrf.mxu0  ;;  %v12452_v54 = vld [vmem:[#allocation2 + $0x114] sm:$0xff] }
 0x1ba   : > { %v12445_v59 = vadd.f32 %v1807_v37, %v1454_v8  ;;  %v10568_v43 = vpop.f32.mrf.mxu1 }
 0x1bb   : > { %v10638_v11 = vpop.f32.mrf.mxu0  ;;  %10883 = vmatmul.mubr.msk.f32.gmra.mxu1 %vm469_vm7, %v2865_v45  ;;  %10953 = vmatmul.mubr.msk.f32.gmra.mxu0 %vm469_vm7, %v12447_v39 }
 0x1bc   : > { %v12454_v14 = vadd.f32 %v10638_v11, %v10568_v43  ;;  %10885 = vmatprep.mubr.msk.f32.mxu1 %vm469_vm7, %v2866_v7  ;;  %10955 = vmatprep.mubr.msk.f32.mxu0 %vm469_vm7, %v12452_v54  ;;  %v1464_v8 = vpop.f32.mrf.mxu1  ;;  %v2868_v11 = vld [vmem:[#allocation2 + $0x123] sm:$0xff] }
 0x1bd   : > { %v1817_v37 = vpop.f32.mrf.mxu0  ;;  %v12466_v43 = vld [vmem:[#allocation2 + $0x124] sm:$0xff] }
 0x1be   : > { %v12459_v1 = vadd.f32 %v1817_v37, %v1464_v8  ;;  %v10571_v45 = vpop.f32.mrf.mxu1 }
 0x1bf   : > { %v10641_v42 = vpop.f32.mrf.mxu0  ;;  %10886 = vmatmul.mubr.msk.f32.gmra.mxu1 %vm469_vm7, %v2867_v55  ;;  %10956 = vmatmul.mubr.msk.f32.gmra.mxu0 %vm469_vm7, %v12461_v51 }
 0x1c0   : > { %v12468_v7 = vadd.f32 %v10641_v42, %v10571_v45  ;;  %10888 = vmatprep.mubr.msk.f32.mxu1 %vm469_vm7, %v2868_v11  ;;  %10958 = vmatprep.mubr.msk.f32.mxu0 %vm469_vm7, %v12466_v43  ;;  %v1474_v8 = vpop.f32.mrf.mxu1  ;;  %v4136_v42 = vld [vmem:[#allocation2 + $0x25] sm:$0xff] }
 0x1c1   : > { %v1827_v37 = vpop.f32.mrf.mxu0 }
 0x1c2   : > { %v12473_v38 = vadd.f32 %v1827_v37, %v1474_v8  ;;  %v10574_v55 = vpop.f32.mrf.mxu1 }
 0x1c3   : > { %v10644_v31 = vpop.f32.mrf.mxu0  ;;  %10889 = vmatmul.mubr.msk.f32.gmra.mxu1 %vm469_vm7, %v2869_v34  ;;  %10959 = vmatmul.mubr.msk.f32.gmra.mxu0 %vm469_vm7, %v12475_v32  ;;  %v9716_v34 = vld [vmem:[%s16977_s4 + $0x230] sm:$0xff] }
 0x1c4   : > { %v12480_v45 = vadd.f32 %v10644_v31, %v10574_v55  ;;  %10977 = vmatprep.mubr.msk.f32.mxu1 %vm469_vm7, %v12242_v16  ;;  %11047 = vmatprep.mubr.msk.f32.mxu0 %vm469_vm7, %v4136_v42  ;;  %v1484_v11 = vpop.f32.mrf.mxu1  ;;  %v4138_v16 = vld [vmem:[#allocation2 + $0x35] sm:$0xff] }
 0x1c5   : > { %v1837_v8 = vpop.f32.mrf.mxu0 }
 0x1c6   : > { %v12485_v37 = vadd.f32 %v1837_v8, %v1484_v11  ;;  %v10577_v29 = vpop.f32.mrf.mxu1  ;;  %v4139_v8 = vld [vmem:[#allocation2 + $0x3d] sm:$0xff] }
 0x1c7   : > { %v10647_v28 = vpop.f32.mrf.mxu0  ;;  %10978 = vmatmul.mubr.msk.f32.vlgmr.msra.gmra.mxu1 %vm469_vm7, %v12246_v18  ;;  %11048 = vmatmul.mubr.msk.f32.vlgmr.msra.gmra.mxu0 %vm469_vm7, %v4137_v30  ;;  %v4140_v18 = vld [vmem:[#allocation2 + $0x45] sm:$0xff] }
 0x1c8   : > { %v12493_v31 = vadd.f32 %v10647_v28, %v10577_v29  ;;  %11102 = vmatpush3.msra.mxu1 %v12354_v4  ;;  %10980 = vmatprep.mubr.msk.f32.mxu1 %vm469_vm7, %v12258_v20  ;;  %v1494_v55 = vpop.f32.mrf.mxu1  ;;  %v9715_v28 = vld [vmem:[%s16977_s4 + $0x228] sm:$0xff] }
 0x1c9   : > { %11050 = vmatprep.mubr.msk.f32.mxu0 %vm469_vm7, %v4138_v16  ;;  %v1847_v42 = vpop.f32.mrf.mxu0  ;;  %11103 = vmatprep.subr.mxu1 %v9716_v34 }
 0x1ca   : > { %v12499_v11 = vadd.f32 %v1847_v42, %v1494_v55  ;;  %11104 = vmatpush3.msra.mxu1 %v9716_v34  ;;  %v10580_v29 = vpop.f32.mrf.mxu1  ;;  %v4141_v55 = vld [vmem:[#allocation2 + $0x4d] sm:$0xff] }
 0x1cb   : > { %v10650_v30 = vpop.f32.mrf.mxu0  ;;  %10981 = vmatmul.mubr.msk.f32.gmra.mxu1 %vm469_vm7, %v12263_v17  ;;  %11051 = vmatmul.mubr.msk.f32.gmra.mxu0 %vm469_vm7, %v4139_v8  ;;  %v9714_v17 = vld [vmem:[%s16977_s4 + $0x220] sm:$0xff] }
 0x1cc   : > { %v12507_v20 = vadd.f32 %v10650_v30, %v10580_v29  ;;  %10983 = vmatprep.mubr.msk.f32.mxu1 %vm469_vm7, %v12274_v46  ;;  %11053 = vmatprep.mubr.msk.f32.mxu0 %vm469_vm7, %v4140_v18  ;;  %v1504_v4 = vpop.f32.mrf.mxu1  ;;  %v4142_v46 = vld [vmem:[#allocation2 + $0x55] sm:$0xff] }
 0x1cd   : > { %v1857_v34 = vpop.f32.mrf.mxu0  ;;  %11105 = vmatprep.subr.mxu1 %v9715_v28 }
 0x1ce   : > { %v12512_v16 = vadd.f32 %v1857_v34, %v1504_v4  ;;  %11106 = vmatpush3.msra.mxu1 %v9715_v28  ;;  %v10583_v42 = vpop.f32.mrf.mxu1  ;;  %v4143_v4 = vld [vmem:[#allocation2 + $0x5d] sm:$0xff] }
 0x1cf   : > { %v10653_v8 = vpop.f32.mrf.mxu0  ;;  %10984 = vmatmul.mubr.msk.f32.gmra.mxu1 %vm469_vm7, %v12279_v50  ;;  %11054 = vmatmul.mubr.msk.f32.gmra.mxu0 %vm469_vm7, %v4141_v55  ;;  %v9713_v50 = vld [vmem:[%s16977_s4 + $0x218] sm:$0xff] }
 0x1d0   : > { %v12520_v29 = vadd.f32 %v10653_v8, %v10583_v42  ;;  %10986 = vmatprep.mubr.msk.f32.mxu1 %vm469_vm7, %v12290_v57  ;;  %11056 = vmatprep.mubr.msk.f32.mxu0 %vm469_vm7, %v4142_v46  ;;  %v1514_v28 = vpop.f32.mrf.mxu1  ;;  %v4144_v57 = vld [vmem:[#allocation2 + $0x65] sm:$0xff] }
 0x1d1   : > { %v1867_v30 = vpop.f32.mrf.mxu0  ;;  %11107 = vmatprep.subr.mxu1 %v9714_v17 }
 0x1d2   : > { %v12525_v18 = vadd.f32 %v1867_v30, %v1514_v28  ;;  %11108 = vmatpush3.msra.mxu1 %v9714_v17  ;;  %v10586_v34 = vpop.f32.mrf.mxu1  ;;  %v4145_v28 = vld [vmem:[#allocation2 + $0x6d] sm:$0xff] }
 0x1d3   : > { %v10656_v55 = vpop.f32.mrf.mxu0  ;;  %10987 = vmatmul.mubr.msk.f32.gmra.mxu1 %vm469_vm7, %v12295_v61  ;;  %11057 = vmatmul.mubr.msk.f32.gmra.mxu0 %vm469_vm7, %v4143_v4  ;;  %v9712_v61 = vld [vmem:[%s16977_s4 + $0x210] sm:$0xff] }
 0x1d4   : > { %v12533_v42 = vadd.f32 %v10656_v55, %v10586_v34  ;;  %10989 = vmatprep.mubr.msk.f32.mxu1 %vm469_vm7, %v12306_v6  ;;  %11059 = vmatprep.mubr.msk.f32.mxu0 %vm469_vm7, %v4144_v57  ;;  %v1524_v17 = vpop.f32.mrf.mxu1  ;;  %v4146_v6 = vld [vmem:[#allocation2 + $0x75] sm:$0xff] }
 0x1d5   : > { %v1877_v8 = vpop.f32.mrf.mxu0  ;;  %11109 = vmatprep.subr.mxu1 %v9713_v50 }
 0x1d6   : > { %v12538_v46 = vadd.f32 %v1877_v8, %v1524_v17  ;;  %11110 = vmatpush3.msra.mxu1 %v9713_v50  ;;  %v10589_v30 = vpop.f32.mrf.mxu1  ;;  %v4147_v17 = vld [vmem:[#allocation2 + $0x7d] sm:$0xff] }
 0x1d7   : > { %v10659_v4 = vpop.f32.mrf.mxu0  ;;  %10990 = vmatmul.mubr.msk.f32.gmra.mxu1 %vm469_vm7, %v12314_v21  ;;  %11060 = vmatmul.mubr.msk.f32.gmra.mxu0 %vm469_vm7, %v4145_v28  ;;  %v9711_v21 = vld [vmem:[%s16977_s4 + $0x208] sm:$0xff] }
 0x1d8   : > { %v12546_v34 = vadd.f32 %v10659_v4, %v10589_v30  ;;  %10992 = vmatprep.mubr.msk.f32.mxu1 %vm469_vm7, %v12325_v36  ;;  %11062 = vmatprep.mubr.msk.f32.mxu0 %vm469_vm7, %v4146_v6  ;;  %v1534_v50 = vpop.f32.mrf.mxu1  ;;  %v4148_v36 = vld [vmem:[#allocation2 + $0x85] sm:$0xff] }
 0x1d9   : > { %v1887_v55 = vpop.f32.mrf.mxu0  ;;  %11111 = vmatprep.subr.mxu1 %v9712_v61 }
 0x1da   : > { %v12551_v57 = vadd.f32 %v1887_v55, %v1534_v50  ;;  %11112 = vmatpush3.msra.mxu1 %v9712_v61  ;;  %v10592_v8 = vpop.f32.mrf.mxu1  ;;  %v4149_v50 = vld [vmem:[#allocation2 + $0x8d] sm:$0xff] }
 0x1db   : > { %v10662_v28 = vpop.f32.mrf.mxu0  ;;  %10993 = vmatmul.mubr.msk.f32.gmra.mxu1 %vm469_vm7, %v12330_v33  ;;  %11063 = vmatmul.mubr.msk.f32.gmra.mxu0 %vm469_vm7, %v4147_v17  ;;  %v9710_v33 = vld [vmem:[%s16977_s4 + $0x200] sm:$0xff] }
 0x1dc   : > { %v12559_v30 = vadd.f32 %v10662_v28, %v10592_v8  ;;  %10995 = vmatprep.mubr.msk.f32.mxu1 %vm469_vm7, %v12341_v53  ;;  %11065 = vmatprep.mubr.msk.f32.mxu0 %vm469_vm7, %v4148_v36  ;;  %v1544_v61 = vpop.f32.mrf.mxu1  ;;  %v4150_v53 = vld [vmem:[#allocation2 + $0x95] sm:$0xff] }
 0x1dd   : > { %v1897_v4 = vpop.f32.mrf.mxu0  ;;  %11113 = vmatprep.subr.mxu1 %v9711_v21 }
 0x1de   : > { %v12564_v6 = vadd.f32 %v1897_v4, %v1544_v61  ;;  %11114 = vmatpush3.msra.mxu1 %v9711_v21  ;;  %v10595_v55 = vpop.f32.mrf.mxu1  ;;  %v4151_v61 = vld [vmem:[#allocation2 + $0x9d] sm:$0xff] }
 0x1df   : > { %v10665_v17 = vpop.f32.mrf.mxu0  ;;  %10996 = vmatmul.mubr.msk.f32.gmra.mxu1 %vm469_vm7, %v12346_v60  ;;  %11066 = vmatmul.mubr.msk.f32.gmra.mxu0 %vm469_vm7, %v4149_v50  ;;  %v4152_v60 = vld [vmem:[#allocation2 + $0xa5] sm:$0xff] }
 0x1e0   : > { %v12572_v8 = vadd.f32 %v10665_v17, %v10595_v55  ;;  %10998 = vmatprep.mubr.msk.f32.mxu1 %vm469_vm7, %v12359_v15  ;;  %11068 = vmatprep.mubr.msk.f32.mxu0 %vm469_vm7, %v4150_v53  ;;  %v1554_v21 = vpop.f32.mrf.mxu1 }
 0x1e1   : > { %v1907_v28 = vpop.f32.mrf.mxu0  ;;  %11115 = vmatprep.subr.mxu1 %v9710_v33 }
 0x1e2   : > { %v12577_v36 = vadd.f32 %v1907_v28, %v1554_v21  ;;  %11116 = vmatpush3.msra.mxu1 %v9710_v33  ;;  %v10598_v4 = vpop.f32.mrf.mxu1  ;;  %v4153_v33 = vld [vmem:[#allocation2 + $0xad] sm:$0xff] }
 0x1e3   : > { %v10668_v27 = vpop.f32.mrf.mxu0  ;;  %10999 = vmatmul.mubr.msk.f32.gmra.mxu1 %vm469_vm7, %v12365_v12  ;;  %11069 = vmatmul.mubr.msk.f32.gmra.mxu0 %vm469_vm7, %v4151_v61  ;;  %v4154_v12 = vld [vmem:[#allocation2 + $0xb5] sm:$0xff] }
 0x1e4   : > { %v12582_v50 = vadd.f32 %v10668_v27, %v10598_v4  ;;  %11001 = vmatprep.mubr.msk.f32.mxu1 %vm469_vm7, %v12370_v40  ;;  %11071 = vmatprep.mubr.msk.f32.mxu0 %vm469_vm7, %v4152_v60  ;;  %v1564_v15 = vpop.f32.mrf.mxu1  ;;  %v4155_v4 = vld [vmem:[#allocation2 + $0xbd] sm:$0xff] }
 0x1e5   : > { %v1917_v55 = vpop.f32.mrf.mxu0 }
 0x1e6   : > { %v12587_v17 = vadd.f32 %v1917_v55, %v1564_v15  ;;  %v10601_v53 = vpop.f32.mrf.mxu1 }
 0x1e7   : > { %v10671_v21 = vpop.f32.mrf.mxu0  ;;  %11002 = vmatmul.mubr.msk.f32.gmra.mxu1 %vm469_vm7, %v12375_v48  ;;  %11072 = vmatmul.mubr.msk.f32.gmra.mxu0 %vm469_vm7, %v4153_v33  ;;  %v4156_v48 = vld [vmem:[#allocation2 + $0xc5] sm:$0xff] }
 0x1e8   : > { %v12592_v27 = vadd.f32 %v10671_v21, %v10601_v53  ;;  %11004 = vmatprep.mubr.msk.f32.mxu1 %vm469_vm7, %v12380_v3  ;;  %11074 = vmatprep.mubr.msk.f32.mxu0 %vm469_vm7, %v4154_v12  ;;  %v1574_v40 = vpop.f32.mrf.mxu1  ;;  %v4157_v21 = vld [vmem:[#allocation2 + $0xcd] sm:$0xff] }
 0x1e9   : > { %v1927_v28 = vpop.f32.mrf.mxu0 }
 0x1ea   : > { %v12597_v61 = vadd.f32 %v1927_v28, %v1574_v40  ;;  %v10604_v60 = vpop.f32.mrf.mxu1 }
 0x1eb   : > { %v10674_v15 = vpop.f32.mrf.mxu0  ;;  %11005 = vmatmul.mubr.msk.f32.gmra.mxu1 %vm469_vm7, %v12385_v5  ;;  %11075 = vmatmul.mubr.msk.f32.gmra.mxu0 %vm469_vm7, %v4155_v4  ;;  %v4158_v5 = vld [vmem:[#allocation2 + $0xd5] sm:$0xff] }
 0x1ec   : > { %v12602_v55 = vadd.f32 %v10674_v15, %v10604_v60  ;;  %11007 = vmatprep.mubr.msk.f32.mxu1 %vm469_vm7, %v12390_v19  ;;  %11077 = vmatprep.mubr.msk.f32.mxu0 %vm469_vm7, %v4156_v48  ;;  %v1584_v3 = vpop.f32.mrf.mxu1  ;;  %v4159_v60 = vld [vmem:[#allocation2 + $0xdd] sm:$0xff] }
 0x1ed   : > { %v1937_v33 = vpop.f32.mrf.mxu0 }
 0x1ee   : > { %v12607_v53 = vadd.f32 %v1937_v33, %v1584_v3  ;;  %v10607_v12 = vpop.f32.mrf.mxu1 }
 0x1ef   : > { %v10677_v40 = vpop.f32.mrf.mxu0  ;;  %11008 = vmatmul.mubr.msk.f32.gmra.mxu1 %vm469_vm7, %v12395_v52  ;;  %11078 = vmatmul.mubr.msk.f32.gmra.mxu0 %vm469_vm7, %v4157_v21  ;;  %v4160_v52 = vld [vmem:[#allocation2 + $0xe5] sm:$0xff]  ;;  %v4161_v21 = vld [vmem:[#allocation2 + $0xed] sm:$0xff] }
 0x1f0   : > { %v12612_v28 = vadd.f32 %v10677_v40, %v10607_v12  ;;  %11010 = vmatprep.mubr.msk.f32.mxu1 %vm469_vm7, %v12400_v10  ;;  %11080 = vmatprep.mubr.msk.f32.mxu0 %vm469_vm7, %v4158_v5  ;;  %v12617_v19 = vpop.f32.mrf.mxu1 }
 0x1f1   : > { %17123 = vst [vmem:[#allocation43_spill] sm:$0xff] %v12617_v19  ;;  %v12619_v4 = vpop.f32.mrf.mxu0  ;;  %v4582_v19 = vld [vmem:[#allocation2 + $0x86] sm:$0xff] }
 0x1f2   : > { %17124 = vst [vmem:[#allocation44_spill] sm:$0xff] %v12619_v4  ;;  %v10610_v15 = vpop.f32.mrf.mxu1  ;;  %v4580_v4 = vld [vmem:[#allocation2 + $0x76] sm:$0xff] }
 0x1f3   : > { %v10680_v48 = vpop.f32.mrf.mxu0  ;;  %11011 = vmatmul.mubr.msk.f32.gmra.mxu1 %vm469_vm7, %v12405_v2  ;;  %11081 = vmatmul.mubr.msk.f32.gmra.mxu0 %vm469_vm7, %v4159_v60  ;;  %v4162_v2 = vld [vmem:[#allocation2 + $0xf5] sm:$0xff] }
 0x1f4   : > { %v12624_v3 = vadd.f32 %v10680_v48, %v10610_v15  ;;  %11013 = vmatprep.mubr.msk.f32.mxu1 %vm469_vm7, %v12410_v41  ;;  %11083 = vmatprep.mubr.msk.f32.mxu0 %vm469_vm7, %v4160_v52  ;;  %v12629_v10 = vpop.f32.mrf.mxu1  ;;  %v4163_v48 = vld [vmem:[#allocation2 + $0xfd] sm:$0xff] }
 0x1f5   : > { %17125 = vst [vmem:[#allocation45_spill] sm:$0xff] %v12629_v10  ;;  %v12631_v33 = vpop.f32.mrf.mxu0  ;;  %v4578_v10 = vld [vmem:[#allocation2 + $0x66] sm:$0xff] }
 0x1f6   : > { %17126 = vst [vmem:[#allocation46_spill] sm:$0xff] %v12631_v33  ;;  %v10699_v12 = vpop.f32.mrf.mxu1 }
 0x1f7   : > { %v10769_v40 = vpop.f32.mrf.mxu0  ;;  %11014 = vmatmul.mubr.msk.f32.gmra.mxu1 %vm469_vm7, %v12419_v49  ;;  %11084 = vmatmul.mubr.msk.f32.gmra.mxu0 %vm469_vm7, %v4161_v21  ;;  %v2365_v5 = vadd.f32 %v10699_v12, %v12099_v56  ;;  %v4164_v49 = vld [vmem:[#allocation2 + $0x105] sm:$0xff] }
 0x1f8   : > { %11016 = vmatprep.mubr.msk.f32.mxu1 %vm469_vm7, %v12424_v47  ;;  %11086 = vmatprep.mubr.msk.f32.mxu0 %vm469_vm7, %v4162_v2  ;;  %v12640_v41 = vpop.f32.mrf.mxu1  ;;  %v4165_v2 = vld [vmem:[#allocation2 + $0x10d] sm:$0xff] }
 0x1f9   : > { %v12642_v60 = vpop.f32.mrf.mxu0  ;;  %v12644_v15 = vadd.f32 %v10769_v40, %v2365_v5 }
 0x1fb   : > { %v10702_v52 = vpop.f32.mrf.mxu1  ;;  %v10772_v33 = vpop.f32.mrf.mxu0  ;;  %11017 = vmatmul.mubr.msk.f32.gmra.mxu1 %vm469_vm7, %v12433_v35  ;;  %11087 = vmatmul.mubr.msk.f32.gmra.mxu0 %vm469_vm7, %v4163_v48 }
 0x1fc   : > { %v2367_v56 = vadd.f32 %v10702_v52, %v12426_v44  ;;  %11019 = vmatprep.mubr.msk.f32.mxu1 %vm469_vm7, %v12438_v63  ;;  %11089 = vmatprep.mubr.msk.f32.mxu0 %vm469_vm7, %v4164_v49  ;;  %v4166_v44 = vld [vmem:[#allocation2 + $0x115] sm:$0xff]  ;;  %v4167_v49 = vld [vmem:[#allocation2 + $0x11d] sm:$0xff] }
 0x1fd   : > { %v2195_v47 = vpop.f32.mrf.mxu1  ;;  %v12653_v21 = vpop.f32.mrf.mxu0 }
 0x1fe   : > { %v12655_v12 = vadd.f32 %v10772_v33, %v2367_v56  ;;  %v12658_v40 = vadd.f32 %v2195_v47, %v12431_v58 }
 0x1ff   : > { %v10705_v35 = vpop.f32.mrf.mxu1  ;;  %v10775_v5 = vpop.f32.mrf.mxu0  ;;  %11020 = vmatmul.mubr.msk.f32.gmra.mxu1 %vm469_vm7, %v12447_v39  ;;  %11090 = vmatmul.mubr.msk.f32.gmra.mxu0 %vm469_vm7, %v4165_v2 }
 0x200   : > { %v2369_v63 = vadd.f32 %v10705_v35, %v12440_v0  ;;  %11022 = vmatprep.mubr.msk.f32.mxu1 %vm469_vm7, %v12452_v54  ;;  %11092 = vmatprep.mubr.msk.f32.mxu0 %vm469_vm7, %v4166_v44  ;;  %v4168_v0 = vld [vmem:[#allocation2 + $0x125] sm:$0xff]  ;;  %v4170_v35 = vld [vmem:[#allocation2 + $0x135] sm:$0xff] }
 0x201   : > { %v2205_v33 = vpop.f32.mrf.mxu1  ;;  %v12667_v48 = vpop.f32.mrf.mxu0 }
 0x202   : > { %v12669_v58 = vadd.f32 %v10775_v5, %v2369_v63  ;;  %v12672_v52 = vadd.f32 %v2205_v33, %v12445_v59  ;;  %v3736_v59 = vld [vmem:[#allocation2 + $0x134] sm:$0xff] }
 0x203   : > { %v10708_v39 = vpop.f32.mrf.mxu1  ;;  %v10778_v56 = vpop.f32.mrf.mxu0  ;;  %11023 = vmatmul.mubr.msk.f32.gmra.mxu1 %vm469_vm7, %v12461_v51  ;;  %11093 = vmatmul.mubr.msk.f32.gmra.mxu0 %vm469_vm7, %v4167_v49  ;;  %v4169_v51 = vld [vmem:[#allocation2 + $0x12d] sm:$0xff]  ;;  %v4171_v49 = vld [vmem:[#allocation2 + $0x13d] sm:$0xff] }
 0x204   : > { %v2371_v54 = vadd.f32 %v10708_v39, %v12454_v14  ;;  %11025 = vmatprep.mubr.msk.f32.mxu1 %vm469_vm7, %v12466_v43  ;;  %11095 = vmatprep.mubr.msk.f32.mxu0 %vm469_vm7, %v4168_v0  ;;  %v3737_v43 = vld [vmem:[#allocation2 + $0x13c] sm:$0xff] }
 0x205   : > { %v2215_v47 = vpop.f32.mrf.mxu1  ;;  %v12681_v2 = vpop.f32.mrf.mxu0 }
 0x206   : > { %v12683_v5 = vadd.f32 %v10778_v56, %v2371_v54  ;;  %v12686_v44 = vadd.f32 %v2215_v47, %v12459_v1  ;;  %v4570_v47 = vld [vmem:[#allocation2 + $0x26] sm:$0xff] }
 0x207   : > { %v10711_v63 = vpop.f32.mrf.mxu1  ;;  %v10781_v33 = vpop.f32.mrf.mxu0  ;;  %11026 = vmatmul.mubr.msk.f32.gmra.mxu1 %vm469_vm7, %v12475_v32  ;;  %11096 = vmatmul.mubr.msk.f32.gmra.mxu0 %vm469_vm7, %v4169_v51 }
 0x208   : > { %v2373_v14 = vadd.f32 %v10711_v63, %v12468_v7  ;;  %11028 = vmatprep.mubr.msk.f32.mxu1 %vm469_vm7, %v3736_v59  ;;  %11098 = vmatprep.mubr.msk.f32.mxu0 %vm469_vm7, %v4170_v35  ;;  %v4571_v63 = vld [vmem:[#allocation2 + $0x2e] sm:$0xff] }
 0x209   : > { %v2225_v39 = vpop.f32.mrf.mxu1  ;;  %v12694_v56 = vpop.f32.mrf.mxu0 }
 0x20a   : > { %v12696_v1 = vadd.f32 %v10781_v33, %v2373_v14  ;;  %v12699_v0 = vadd.f32 %v2225_v39, %v12473_v38 }
 0x20b   : > { %v10714_v54 = vpop.f32.mrf.mxu1  ;;  %v10784_v32 = vpop.f32.mrf.mxu0  ;;  %11029 = vmatmul.mubr.msk.f32.gmra.mxu1 %vm469_vm7, %v3737_v43  ;;  %11099 = vmatmul.mubr.msk.f32.gmra.mxu0 %vm469_vm7, %v4171_v49  ;;  %v4572_v43 = vld [vmem:[#allocation2 + $0x36] sm:$0xff] }
 0x20c   : > { %v2375_v7 = vadd.f32 %v10714_v54, %v12480_v45  ;;  %11117 = vmatprep.mubr.msk.f32.mxu1 %vm469_vm7, %v4570_v47  ;;  %5356 = vmatprep.mubr.f32.mxu0 %v12308_v9 }
 0x20d   : > { %v2235_v59 = vpop.f32.mrf.mxu1  ;;  %v12706_v35 = vpop.f32.mrf.mxu0 }
 0x20e   : > { %v12708_v51 = vadd.f32 %v10784_v32, %v2375_v7  ;;  %v12711_v38 = vadd.f32 %v2235_v59, %v12485_v37  ;;  %v4573_v37 = vld [vmem:[#allocation2 + $0x3e] sm:$0xff]  ;;  %v4574_v7 = vld [vmem:[#allocation2 + $0x46] sm:$0xff] }
 0x20f   : > { %v10717_v33 = vpop.f32.mrf.mxu1  ;;  %v10787_v14 = vpop.f32.mrf.mxu0  ;;  %11118 = vmatmul.mubr.msk.f32.vlgmr.msra.gmra.mxu1 %vm469_vm7, %v4571_v63 }
 0x210   : > { %v2377_v45 = vadd.f32 %v10717_v33, %v12493_v31  ;;  %11120 = vmatprep.mubr.msk.f32.mxu1 %vm469_vm7, %v4572_v43 }
 0x211   : > { %v2245_v49 = vpop.f32.mrf.mxu1  ;;  %v12716_v9 = vpop.f32.mrf.mxu0 }
 0x212   : > { %17127 = vst [vmem:[#allocation47_spill] sm:$0xff] %v12716_v9  ;;  %v12718_v39 = vadd.f32 %v10787_v14, %v2377_v45  ;;  %v12721_v54 = vadd.f32 %v2245_v49, %v12499_v11  ;;  %v4575_v11 = vld [vmem:[#allocation2 + $0x4e] sm:$0xff]  ;;  %v4576_v49 = vld [vmem:[#allocation2 + $0x56] sm:$0xff] }
 0x213   : > { %v10720_v32 = vpop.f32.mrf.mxu1  ;;  %v10790_v47 = vpop.f32.mrf.mxu0  ;;  %11121 = vmatmul.mubr.msk.f32.gmra.mxu1 %vm469_vm7, %v4573_v37  ;;  %v9806_v9 = vld [vmem:[%s16979_s6 + $0x298] sm:$0xff] }
 0x214   : > { %17128 = vst [vmem:[#allocation48_spill] sm:$0xff] %v12721_v54  ;;  %v2379_v59 = vadd.f32 %v10720_v32, %v12507_v20  ;;  %11123 = vmatprep.mubr.msk.f32.mxu1 %vm469_vm7, %v4574_v7 }
 0x215   : > { %v2255_v31 = vpop.f32.mrf.mxu1  ;;  %v12726_v63 = vpop.f32.mrf.mxu0 }
 0x216   : > { %17129 = vst [vmem:[#allocation49_spill] sm:$0xff] %v12726_v63  ;;  %v12728_v33 = vadd.f32 %v10790_v47, %v2379_v59  ;;  %v12731_v14 = vadd.f32 %v2255_v31, %v12512_v16  ;;  %v4577_v16 = vld [vmem:[#allocation2 + $0x5e] sm:$0xff]  ;;  %v9765_v63 = vld [vmem:[%s16979_s6 + $0x150] sm:$0xff] }
 0x217   : > { %v10723_v43 = vpop.f32.mrf.mxu1  ;;  %v10793_v45 = vpop.f32.mrf.mxu0  ;;  %11124 = vmatmul.mubr.msk.f32.gmra.mxu1 %vm469_vm7, %v4575_v11 }
 0x218   : > { %17130 = vst [vmem:[#allocation50_spill] sm:$0xff] %v12731_v14  ;;  %v2381_v37 = vadd.f32 %v10723_v43, %v12520_v29  ;;  %11126 = vmatprep.mubr.msk.f32.mxu1 %vm469_vm7, %v4576_v49 }
 0x219   : > { %v2265_v20 = vpop.f32.mrf.mxu1  ;;  %v12736_v32 = vpop.f32.mrf.mxu0 }
 0x21a   : > { %17131 = vst [vmem:[#allocation51_spill] sm:$0xff] %v12736_v32  ;;  %v12738_v7 = vadd.f32 %v10793_v45, %v2381_v37  ;;  %v12741_v47 = vadd.f32 %v2265_v20, %v12525_v18  ;;  %v4579_v18 = vld [vmem:[#allocation2 + $0x6e] sm:$0xff] }
 0x21b   : > { %v10726_v59 = vpop.f32.mrf.mxu1  ;;  %v10796_v31 = vpop.f32.mrf.mxu0  ;;  %11127 = vmatmul.mubr.msk.f32.gmra.mxu1 %vm469_vm7, %v4577_v16 }
 0x21c   : > { %17132 = vst [vmem:[#allocation52_spill] sm:$0xff] %v12741_v47  ;;  %v2383_v11 = vadd.f32 %v10726_v59, %v12533_v42  ;;  %11129 = vmatprep.mubr.msk.f32.mxu1 %vm469_vm7, %v4578_v10 }
 0x21d   : > { %v2275_v29 = vpop.f32.mrf.mxu1  ;;  %v12746_v43 = vpop.f32.mrf.mxu0 }
 0x21e   : > { %17133 = vst [vmem:[#allocation53_spill] sm:$0xff] %v12746_v43  ;;  %v12748_v49 = vadd.f32 %v10796_v31, %v2383_v11  ;;  %v12751_v45 = vadd.f32 %v2275_v29, %v12538_v46  ;;  %v4581_v46 = vld [vmem:[#allocation2 + $0x7e] sm:$0xff]  ;;  %v4603_v43 = vld [vmem:[#allocation2 + $0x12e] sm:$0xff] }
 0x21f   : > { %v10729_v37 = vpop.f32.mrf.mxu1  ;;  %v10799_v20 = vpop.f32.mrf.mxu0  ;;  %11130 = vmatmul.mubr.msk.f32.gmra.mxu1 %vm469_vm7, %v4579_v18 }
 0x220   : > { %17134 = vst [vmem:[#allocation54_spill] sm:$0xff] %v12751_v45  ;;  %v2385_v16 = vadd.f32 %v10729_v37, %v12546_v34  ;;  %11132 = vmatprep.mubr.msk.f32.mxu1 %vm469_vm7, %v4580_v4  ;;  %v9766_v45 = vld [vmem:[%s16979_s6 + $0x158] sm:$0xff] }
 0x221   : > { %v2285_v42 = vpop.f32.mrf.mxu1  ;;  %v12756_v10 = vpop.f32.mrf.mxu0 }
 0x222   : > { %17135 = vst [vmem:[#allocation55_spill] sm:$0xff] %v12756_v10  ;;  %v12758_v59 = vadd.f32 %v10799_v20, %v2385_v16  ;;  %v12761_v31 = vadd.f32 %v2285_v42, %v12551_v57  ;;  %v4583_v57 = vld [vmem:[#allocation2 + $0x8e] sm:$0xff]  ;;  %v4584_v10 = vld [vmem:[#allocation2 + $0x96] sm:$0xff] }
 0x223   : > { %v10732_v11 = vpop.f32.mrf.mxu1  ;;  %v10802_v29 = vpop.f32.mrf.mxu0  ;;  %11133 = vmatmul.mubr.msk.f32.gmra.mxu1 %vm469_vm7, %v4581_v46 }
 0x224   : > { %17136 = vst [vmem:[#allocation56_spill] sm:$0xff] %v12761_v31  ;;  %v2387_v18 = vadd.f32 %v10732_v11, %v12559_v30  ;;  %11135 = vmatprep.mubr.msk.f32.mxu1 %vm469_vm7, %v4582_v19 }
 0x225   : > { %v2295_v34 = vpop.f32.mrf.mxu1  ;;  %v12766_v4 = vpop.f32.mrf.mxu0 }
 0x226   : > { %17137 = vst [vmem:[#allocation57_spill] sm:$0xff] %v12766_v4  ;;  %v12768_v37 = vadd.f32 %v10802_v29, %v2387_v18  ;;  %v12771_v20 = vadd.f32 %v2295_v34, %v12564_v6  ;;  %v4585_v6 = vld [vmem:[#allocation2 + $0x9e] sm:$0xff]  ;;  %v4586_v4 = vld [vmem:[#allocation2 + $0xa6] sm:$0xff] }
 0x227   : > { %v10735_v16 = vpop.f32.mrf.mxu1  ;;  %v10805_v42 = vpop.f32.mrf.mxu0  ;;  %11136 = vmatmul.mubr.msk.f32.gmra.mxu1 %vm469_vm7, %v4583_v57 }
 0x228   : > { %17138 = vst [vmem:[#allocation58_spill] sm:$0xff] %v12771_v20  ;;  %v2389_v46 = vadd.f32 %v10735_v16, %v12572_v8  ;;  %11138 = vmatprep.mubr.msk.f32.mxu1 %vm469_vm7, %v4584_v10  ;;  %v4602_v20 = vld [vmem:[#allocation2 + $0x126] sm:$0xff] }
 0x229   : > { %v2305_v30 = vpop.f32.mrf.mxu1  ;;  %v12776_v19 = vpop.f32.mrf.mxu0 }
 0x22a   : > { %17139 = vst [vmem:[#allocation59_spill] sm:$0xff] %v12776_v19  ;;  %v12778_v11 = vadd.f32 %v10805_v42, %v2389_v46  ;;  %v12781_v29 = vadd.f32 %v2305_v30, %v12577_v36  ;;  %v4587_v36 = vld [vmem:[#allocation2 + $0xae] sm:$0xff]  ;;  %v4588_v19 = vld [vmem:[#allocation2 + $0xb6] sm:$0xff] }
 0x22b   : > { %v10738_v18 = vpop.f32.mrf.mxu1  ;;  %v10808_v34 = vpop.f32.mrf.mxu0  ;;  %11139 = vmatmul.mubr.msk.f32.gmra.mxu1 %vm469_vm7, %v4585_v6 }
 0x22c   : > { %17140 = vst [vmem:[#allocation60_spill] sm:$0xff] %v12781_v29  ;;  %v2391_v57 = vadd.f32 %v10738_v18, %v12582_v50  ;;  %11141 = vmatprep.mubr.msk.f32.mxu1 %vm469_vm7, %v4586_v4  ;;  %v9786_v50 = vld [vmem:[%s16979_s6 + $0x1f8] sm:$0xff] }
 0x22d   : > { %v2315_v8 = vpop.f32.mrf.mxu1  ;;  %v12786_v10 = vpop.f32.mrf.mxu0  ;;  %5292 = vmatprep.subr.mxu0 %v9786_v50  ;;  %11171 = vmatprep.subr.mxu1 %v9786_v50 }
 0x22e   : > { %17141 = vst [vmem:[#allocation61_spill] sm:$0xff] %v12786_v10  ;;  %v12788_v16 = vadd.f32 %v10808_v34, %v2391_v57  ;;  %v12791_v42 = vadd.f32 %v2315_v8, %v12587_v17  ;;  %v4589_v57 = vld [vmem:[#allocation2 + $0xbe] sm:$0xff] }
 0x22f   : > { %v10741_v46 = vpop.f32.mrf.mxu1  ;;  %v10811_v30 = vpop.f32.mrf.mxu0  ;;  %11142 = vmatmul.mubr.msk.f32.gmra.mxu1 %vm469_vm7, %v4587_v36  ;;  %v4590_v36 = vld [vmem:[#allocation2 + $0xc6] sm:$0xff] }
 0x230   : > { %17142 = vst [vmem:[#allocation62_spill] sm:$0xff] %v12791_v42  ;;  %v2393_v6 = vadd.f32 %v10741_v46, %v12592_v27  ;;  %11144 = vmatprep.mubr.msk.f32.mxu1 %vm469_vm7, %v4588_v19  ;;  %v9785_v27 = vld [vmem:[%s16979_s6 + $0x1f0] sm:$0xff] }
 0x231   : > { %v2325_v4 = vpop.f32.mrf.mxu1  ;;  %v12799_v18 = vpop.f32.mrf.mxu0  ;;  %5293 = vmatpush1.msra.mxu0 %v9785_v27  ;;  %11187 = vmatpush1.msra.mxu1 %v9785_v27  ;;  %v4592_v27 = vld [vmem:[#allocation2 + $0xd6] sm:$0xff] }
 0x232   : > { %17143 = vst [vmem:[#allocation63_spill] sm:$0xff] %v12799_v18  ;;  %v12801_v17 = vadd.f32 %v10811_v30, %v2393_v6  ;;  %v12804_v34 = vadd.f32 %v2325_v4, %v12597_v61  ;;  %v4591_v4 = vld [vmem:[#allocation2 + $0xce] sm:$0xff] }
 0x233   : > { %v10744_v19 = vpop.f32.mrf.mxu1  ;;  %v10814_v8 = vpop.f32.mrf.mxu0  ;;  %11145 = vmatmul.mubr.msk.f32.gmra.mxu1 %vm469_vm7, %v4589_v57  ;;  %v9784_v57 = vld [vmem:[%s16979_s6 + $0x1e8] sm:$0xff] }
 0x234   : > { %17144 = vst [vmem:[#allocation64_spill] sm:$0xff] %v12804_v34  ;;  %v2395_v46 = vadd.f32 %v10744_v19, %v12602_v55  ;;  %11147 = vmatprep.mubr.msk.f32.mxu1 %vm469_vm7, %v4590_v36  ;;  %v9783_v55 = vld [vmem:[%s16979_s6 + $0x1e0] sm:$0xff]  ;;  %5294 = vmatprep.subr.mxu0 %v9784_v57 }
 0x235   : > { %v2335_v30 = vpop.f32.mrf.mxu1  ;;  %v12812_v6 = vpop.f32.mrf.mxu0  ;;  %5295 = vmatpush1.msra.mxu0 %v9783_v55  ;;  %11172 = vmatprep.subr.mxu1 %v9784_v57 }
 0x236   : > { %17145 = vst [vmem:[#allocation65_spill] sm:$0xff] %v12812_v6  ;;  %v12814_v61 = vadd.f32 %v10814_v8, %v2395_v46  ;;  %v12817_v50 = vadd.f32 %v2335_v30, %v12607_v53  ;;  %v4593_v6 = vld [vmem:[#allocation2 + $0xde] sm:$0xff]  ;;  %11188 = vmatpush1.msra.mxu1 %v9783_v55  ;;  %v9780_v55 = vld [vmem:[%s16979_s6 + $0x1c8] sm:$0xff] }
 0x237   : > { %v10747_v19 = vpop.f32.mrf.mxu1  ;;  %v10817_v36 = vpop.f32.mrf.mxu0  ;;  %11148 = vmatmul.mubr.msk.f32.gmra.mxu1 %vm469_vm7, %v4591_v4  ;;  %v9781_v4 = vld [vmem:[%s16979_s6 + $0x1d0] sm:$0xff] }
 0x238   : > { %17146 = vst [vmem:[#allocation66_spill] sm:$0xff] %v12817_v50  ;;  %v2397_v8 = vadd.f32 %v10747_v19, %v12612_v28  ;;  %11150 = vmatprep.mubr.msk.f32.mxu1 %vm469_vm7, %v4592_v27  ;;  %v9782_v50 = vld [vmem:[%s16979_s6 + $0x1d8] sm:$0xff]  ;;  %v4594_v27 = vld [vmem:[#allocation2 + $0xe6] sm:$0xff] }
 0x239   : > { %v12828_v53 = vpop.f32.mrf.mxu1  ;;  %v12830_v46 = vpop.f32.mrf.mxu0  ;;  %5296 = vmatprep.subr.mxu0 %v9782_v50  ;;  %11173 = vmatprep.subr.mxu1 %v9782_v50  ;;  %v9779_v50 = vld [vmem:[%s16979_s6 + $0x1c0] sm:$0xff] }
 0x23a   : > { %17147 = vst [vmem:[#allocation67_spill] sm:$0xff] %v12828_v53  ;;  %17148 = vst [vmem:[#allocation68_spill] sm:$0xff] %v12830_v46  ;;  %v12832_v30 = vadd.f32 %v10817_v36, %v2397_v8  ;;  %5297 = vmatpush1.msra.mxu0 %v9781_v4  ;;  %v4595_v53 = vld [vmem:[#allocation2 + $0xee] sm:$0xff]  ;;  %11189 = vmatpush1.msra.mxu1 %v9781_v4 }
 0x23b   : > { %v10750_v28 = vpop.f32.mrf.mxu1  ;;  %v10820_v19 = vpop.f32.mrf.mxu0  ;;  %11151 = vmatmul.mubr.msk.f32.gmra.mxu1 %vm469_vm7, %v4593_v6  ;;  %5298 = vmatprep.subr.mxu0 %v9780_v55 }
 0x23c   : > { %v2399_v57 = vadd.f32 %v10750_v28, %v12624_v3  ;;  %11153 = vmatprep.mubr.msk.f32.mxu1 %vm469_vm7, %v4594_v27  ;;  %v4596_v3 = vld [vmem:[#allocation2 + $0xf6] sm:$0xff]  ;;  %11174 = vmatprep.subr.mxu1 %v9780_v55 }
 0x23d   : > { %v12843_v36 = vpop.f32.mrf.mxu1  ;;  %v12845_v8 = vpop.f32.mrf.mxu0  ;;  %5299 = vmatpush1.msra.mxu0 %v9779_v50  ;;  %11190 = vmatpush1.msra.mxu1 %v9779_v50 }
 0x23e   : > { %17149 = vst [vmem:[#allocation69_spill] sm:$0xff] %v12843_v36  ;;  %17150 = vst [vmem:[#allocation70_spill] sm:$0xff] %v12845_v8  ;;  %v12847_v46 = vadd.f32 %v10820_v19, %v2399_v57 }
 0x23f   : > { %v10839_v6 = vpop.f32.mrf.mxu1  ;;  %v10909_v18 = vpop.f32.mrf.mxu0  ;;  %11154 = vmatmul.mubr.msk.f32.gmra.mxu1 %vm469_vm7, %v4595_v53  ;;  %v4597_v53 = vld [vmem:[#allocation2 + $0xfe] sm:$0xff] }
 0x240   : > { %v3233_v28 = vadd.f32 %v10839_v6, %v12644_v15  ;;  %11156 = vmatprep.mubr.msk.f32.mxu1 %vm469_vm7, %v4596_v3  ;;  %v9778_v15 = vld [vmem:[%s16979_s6 + $0x1b8] sm:$0xff]  ;;  %v4598_v3 = vld [vmem:[#allocation2 + $0x106] sm:$0xff] }
 0x241   : > { %v12858_v19 = vpop.f32.mrf.mxu1  ;;  %v12860_v27 = vpop.f32.mrf.mxu0  ;;  %5300 = vmatprep.subr.mxu0 %v9778_v15  ;;  %11175 = vmatprep.subr.mxu1 %v9778_v15  ;;  %v4600_v15 = vld [vmem:[#allocation2 + $0x116] sm:$0xff] }
 0x242   : > { %v12862_v4 = vadd.f32 %v10909_v18, %v3233_v28  ;;  %v9777_v18 = vld [vmem:[%s16979_s6 + $0x1b0] sm:$0xff] }
 0x243   : > { %v10842_v57 = vpop.f32.mrf.mxu1  ;;  %v10912_v6 = vpop.f32.mrf.mxu0  ;;  %11157 = vmatmul.mubr.msk.f32.gmra.mxu1 %vm469_vm7, %v4597_v53  ;;  %5301 = vmatpush1.msra.mxu0 %v9777_v18  ;;  %v4599_v53 = vld [vmem:[#allocation2 + $0x10e] sm:$0xff] }
 0x244   : > { %v3235_v55 = vadd.f32 %v10842_v57, %v12655_v12  ;;  %11159 = vmatprep.mubr.msk.f32.mxu1 %vm469_vm7, %v4598_v3  ;;  %11191 = vmatpush1.msra.mxu1 %v9777_v18  ;;  %v9776_v12 = vld [vmem:[%s16979_s6 + $0x1a8] sm:$0xff]  ;;  %v9775_v57 = vld [vmem:[%s16979_s6 + $0x1a0] sm:$0xff] }
 0x245   : > { %v12873_v28 = vpop.f32.mrf.mxu1  ;;  %v12875_v50 = vpop.f32.mrf.mxu0  ;;  %5302 = vmatprep.subr.mxu0 %v9776_v12  ;;  %11176 = vmatprep.subr.mxu1 %v9776_v12  ;;  %v9769_v12 = vld [vmem:[%s16979_s6 + $0x170] sm:$0xff] }
 0x246   : > { %v12877_v8 = vadd.f32 %v10912_v6, %v3235_v55  ;;  %5303 = vmatpush1.msra.mxu0 %v9775_v57  ;;  %v9774_v6 = vld [vmem:[%s16979_s6 + $0x198] sm:$0xff]  ;;  %v9773_v55 = vld [vmem:[%s16979_s6 + $0x190] sm:$0xff]  ;;  %11192 = vmatpush1.msra.mxu1 %v9775_v57  ;;  %v9768_v57 = vld [vmem:[%s16979_s6 + $0x168] sm:$0xff] }
 0x247   : > { %v10845_v3 = vpop.f32.mrf.mxu1  ;;  %v10915_v36 = vpop.f32.mrf.mxu0  ;;  %11160 = vmatmul.mubr.msk.f32.gmra.mxu1 %vm469_vm7, %v4599_v53  ;;  %5304 = vmatprep.subr.mxu0 %v9774_v6 }
 0x248   : > { %v3237_v34 = vadd.f32 %v10845_v3, %v12669_v58  ;;  %11162 = vmatprep.mubr.msk.f32.mxu1 %vm469_vm7, %v4600_v15  ;;  %v4601_v58 = vld [vmem:[#allocation2 + $0x11e] sm:$0xff]  ;;  %5305 = vmatpush1.msra.mxu0 %v9773_v55  ;;  %v9772_v3 = vld [vmem:[%s16979_s6 + $0x188] sm:$0xff] }
 0x249   : > { %v12894_v18 = vpop.f32.mrf.mxu1  ;;  %v12896_v10 = vpop.f32.mrf.mxu0  ;;  %v9771_v15 = vld [vmem:[%s16979_s6 + $0x180] sm:$0xff]  ;;  %5306 = vmatprep.subr.mxu0 %v9772_v3  ;;  %11177 = vmatprep.subr.mxu1 %v9774_v6 }
 0x24a   : > { %v12898_v53 = vadd.f32 %v10915_v36, %v3237_v34  ;;  %5307 = vmatpush1.msra.mxu0 %v9771_v15  ;;  %v9770_v36 = vld [vmem:[%s16979_s6 + $0x178] sm:$0xff]  ;;  %11193 = vmatpush1.msra.mxu1 %v9773_v55 }
 0x24b   : > { %v10848_v42 = vpop.f32.mrf.mxu1  ;;  %v10918_v29 = vpop.f32.mrf.mxu0  ;;  %11163 = vmatmul.mubr.msk.f32.gmra.mxu1 %vm469_vm7, %v4601_v58  ;;  %5308 = vmatprep.subr.mxu0 %v9770_v36 }
 0x24c   : > { %v3239_v34 = vadd.f32 %v10848_v42, %v12683_v5  ;;  %11165 = vmatprep.mubr.msk.f32.mxu1 %vm469_vm7, %v4602_v20  ;;  %v4604_v5 = vld [vmem:[#allocation2 + $0x136] sm:$0xff]  ;;  %v9767_v20 = vld [vmem:[%s16979_s6 + $0x160] sm:$0xff]  ;;  %5309 = vmatpush1.msra.mxu0 %v9769_v12 }
 0x24d   : > { %v12918_v58 = vpop.f32.mrf.mxu1  ;;  %v12920_v31 = vpop.f32.mrf.mxu0  ;;  %5310 = vmatprep.subr.mxu0 %v9768_v57  ;;  %11178 = vmatprep.subr.mxu1 %v9772_v3 }
 0x24e   : > { %v12925_v42 = vadd.f32 %v10918_v29, %v3239_v34  ;;  %v4605_v29 = vld [vmem:[#allocation2 + $0x13e] sm:$0xff]  ;;  %5311 = vmatpush1.msra.mxu0 %v9767_v20  ;;  %11194 = vmatpush1.msra.mxu1 %v9771_v15 }
 0x24f   : > { %v10851_v32 = vpop.f32.mrf.mxu1  ;;  %v10921_v47 = vpop.f32.mrf.mxu0  ;;  %11166 = vmatmul.mubr.msk.f32.gmra.mxu1 %vm469_vm7, %v4603_v43  ;;  %5312 = vmatprep.subr.mxu0 %v9766_v45 }
 0x250   : > { %v3241_v6 = vadd.f32 %v10851_v32, %v12696_v1  ;;  %11168 = vmatprep.mubr.msk.f32.mxu1 %vm469_vm7, %v4604_v5  ;;  %5313 = vmatpush1.msra.mxu0 %v9765_v63  ;;  %v12944_v32 = vld [vmem:[#allocation3] sm:$0xff] }
 0x251   : > { %v12936_v34 = vpop.f32.mrf.mxu1  ;;  %v12938_v14 = vpop.f32.mrf.mxu0  ;;  %11179 = vmatprep.subr.mxu1 %v9770_v36  ;;  %17151 = vst [vmem:[#allocation71_spill] sm:$0xff] %v12944_v32  ;;  %v9764_v36 = vld [vmem:[%s16979_s6 + $0x148] sm:$0xff] }
 0x252   : > { %v12940_v55 = vadd.f32 %v10921_v47, %v3241_v6  ;;  %11195 = vmatpush1.msra.mxu1 %v9769_v12  ;;  %5314 = vmatprep.subr.mxu0 %v9764_v36 }
 0x253   : > { %v10854_v43 = vpop.f32.mrf.mxu1  ;;  %v10924_v26 = vpop.f32.mrf.mxu0  ;;  %11169 = vmatmul.mubr.msk.f32.gmra.mxu1 %vm469_vm7, %v4605_v29  ;;  %11180 = vmatprep.subr.mxu1 %v9768_v57  ;;  %v9762_v57 = vld [vmem:[%s16979_s6 + $0x138] sm:$0xff] }
 0x254   : > { %v3243_v1 = vadd.f32 %v10854_v43, %v12708_v51  ;;  %5476 = vmatprep.mubr.f32.mxu1 %v12944_v32  ;;  %11196 = vmatpush1.msra.mxu1 %v9767_v20  ;;  %v9763_v51 = vld [vmem:[%s16979_s6 + $0x140] sm:$0xff]  ;;  %v9761_v20 = vld [vmem:[%s16979_s6 + $0x130] sm:$0xff] }
 0x255   : > { %v12947_v5 = vpop.f32.mrf.mxu1  ;;  %v12949_v22 = vpop.f32.mrf.mxu0  ;;  %11181 = vmatprep.subr.mxu1 %v9766_v45  ;;  %5315 = vmatpush1.msra.mxu0 %v9763_v51  ;;  %v9760_v45 = vld [vmem:[%s16979_s6 + $0x128] sm:$0xff]  ;;  %v9759_v43 = vld [vmem:[%s16979_s6 + $0x120] sm:$0xff] }
 0x256   : > { %17152 = vst [vmem:[#allocation72_spill] sm:$0xff] %v12949_v22  ;;  %v12951_v47 = vadd.f32 %v10924_v26, %v3243_v1  ;;  %11197 = vmatpush1.msra.mxu1 %v9765_v63  ;;  %5316 = vmatprep.subr.mxu0 %v9762_v57 }
 0x257   : > { %v10857_v3 = vpop.f32.mrf.mxu1  ;;  %v10927_v15 = vpop.f32.mrf.mxu0  ;;  %11182 = vmatprep.subr.mxu1 %v9764_v36  ;;  %5317 = vmatpush1.msra.mxu0 %v9761_v20  ;;  %v9758_v36 = vld [vmem:[%s16979_s6 + $0x118] sm:$0xff] }
 0x258   : > { %v3245_v12 = vadd.f32 %v10857_v3, %v12718_v39  ;;  %11198 = vmatpush1.msra.mxu1 %v9763_v51  ;;  %5318 = vmatprep.subr.mxu0 %v9760_v45  ;;  %v9757_v51 = vld [vmem:[%s16979_s6 + $0x110] sm:$0xff] }
 0x259   : > { %v12960_v6 = vpop.f32.mrf.mxu1  ;;  %v12962_v26 = vpop.f32.mrf.mxu0  ;;  %11183 = vmatprep.subr.mxu1 %v9762_v57  ;;  %5319 = vmatpush1.msra.mxu0 %v9759_v43 }
 0x25a   : > { %17153 = vst [vmem:[#allocation73_spill] sm:$0xff] %v12960_v6  ;;  %17154 = vst [vmem:[#allocation74_spill] sm:$0xff] %v12962_v26  ;;  %v12970_v29 = vadd.f32 %v10927_v15, %v3245_v12  ;;  %11199 = vmatpush1.msra.mxu1 %v9761_v20  ;;  %5320 = vmatprep.subr.mxu0 %v9758_v36  ;;  %v9756_v20 = vld [vmem:[%s16979_s6 + $0x108] sm:$0xff] }
 0x25b   : > { %v10860_v39 = vpop.f32.mrf.mxu1  ;;  %v10930_v63 = vpop.f32.mrf.mxu0  ;;  %11184 = vmatprep.subr.mxu1 %v9760_v45  ;;  %5321 = vmatpush1.msra.mxu0 %v9757_v51  ;;  %v9808_v6 = vld [vmem:[%s16979_s6 + $0x2a8] sm:$0xff] }
 0x25c   : > { %v3247_v1 = vadd.f32 %v10860_v39, %v12728_v33  ;;  %11200 = vmatpush1.msra.mxu1 %v9759_v43  ;;  %v9755_v39 = vld [vmem:[%s16979_s6 + $0x100] sm:$0xff]  ;;  %5322 = vmatprep.subr.mxu0 %v9756_v20  ;;  %v5223_v43 = vld [vmem:[#allocation3 + $0x1] sm:$0xff] }
 0x25d   : > { %v12979_v3 = vpop.f32.mrf.mxu1  ;;  %v12981_v15 = vpop.f32.mrf.mxu0  ;;  %11185 = vmatprep.subr.mxu1 %v9758_v36  ;;  %5323 = vmatpush1.msra.mxu0 %v9755_v39 }
 0x25e   : > { %17155 = vst [vmem:[#allocation75_spill] sm:$0xff] %v12979_v3  ;;  %17156 = vst [vmem:[#allocation76_spill] sm:$0xff] %v12981_v15  ;;  %v12989_v12 = vadd.f32 %v10930_v63, %v3247_v1  ;;  %11201 = vmatpush1.msra.mxu1 %v9757_v51  ;;  %5357 = vmatmul.mubr.f32.vlgmr.msra.gmra.mxu0 %v5223_v43 }
 0x25f   : > { %v10863_v33 = vpop.f32.mrf.mxu1  ;;  %v10933_v57 = vpop.f32.mrf.mxu0  ;;  %11186 = vmatprep.subr.mxu1 %v9756_v20  ;;  %5362 = vmatprep.mubr.f32.mxu0 %v12944_v32 }
 0x260   : > { %v3249_v15 = vadd.f32 %v10863_v33, %v12738_v7  ;;  %11202 = vmatpush1.msra.mxu1 %v9755_v39  ;;  %v5224_v33 = vld [vmem:[#allocation3 + $0x9] sm:$0xff] }
 0x261   : > { %v12998_v63 = vpop.f32.mrf.mxu1  ;;  %v13000_v45 = vpop.f32.mrf.mxu0 }
 0x262   : > { %17157 = vst [vmem:[#allocation77_spill] sm:$0xff] %v12998_v63  ;;  %17158 = vst [vmem:[#allocation78_spill] sm:$0xff] %v13000_v45  ;;  %v13002_v1 = vadd.f32 %v10933_v57, %v3249_v15  ;;  %5363 = vmatmul.mubr.f32.gmra.mxu0 %v5224_v33 }
 0x263   : > { %v10866_v3 = vpop.f32.mrf.mxu1  ;;  %v10936_v26 = vpop.f32.mrf.mxu0  ;;  %5368 = vmatprep.mubr.f32.mxu0 %v12944_v32 }
 0x264   : > { %v3251_v36 = vadd.f32 %v10866_v3, %v12748_v49 }
 0x265   : > { %v13006_v7 = vpop.f32.mrf.mxu1  ;;  %v13008_v51 = vpop.f32.mrf.mxu0 }
 0x266   : > { %17159 = vst [vmem:[#allocation79_spill] sm:$0xff] %v13006_v7  ;;  %17160 = vst [vmem:[#allocation80_spill] sm:$0xff] %v13008_v51  ;;  %v13010_v63 = vadd.f32 %v10936_v26, %v3251_v36 }
 0x267   : > { %v10869_v45 = vpop.f32.mrf.mxu1  ;;  %v10939_v20 = vpop.f32.mrf.mxu0 }
 0x268   : > { %v3253_v15 = vadd.f32 %v10869_v45, %v12758_v59 }
 0x269   : > { %v13014_v57 = vpop.f32.mrf.mxu1  ;;  %v13016_v39 = vpop.f32.mrf.mxu0 }
 0x26a   : > { %17161 = vst [vmem:[#allocation81_spill] sm:$0xff] %v13014_v57  ;;  %17162 = vst [vmem:[#allocation82_spill] sm:$0xff] %v13016_v39  ;;  %v13018_v43 = vadd.f32 %v10939_v20, %v3253_v15 }
 0x26b   : > { %v10872_v49 = vpop.f32.mrf.mxu1  ;;  %v10942_v3 = vpop.f32.mrf.mxu0 }
 0x26c   : > { %v3255_v51 = vadd.f32 %v10872_v49, %v12768_v37 }
 0x26d   : > { %v13021_v7 = vpop.f32.mrf.mxu1  ;;  %v13023_v26 = vpop.f32.mrf.mxu0 }
 0x26e   : > { %17163 = vst [vmem:[#allocation83_spill] sm:$0xff] %v13021_v7  ;;  %17164 = vst [vmem:[#allocation84_spill] sm:$0xff] %v13023_v26  ;;  %v13025_v36 = vadd.f32 %v10942_v3, %v3255_v51 }
 0x26f   : > { %v10875_v33 = vpop.f32.mrf.mxu1  ;;  %v10945_v32 = vpop.f32.mrf.mxu0 }
 0x270   : > { %v3257_v59 = vadd.f32 %v10875_v33, %v12778_v11 }
 0x271   : > { %v13028_v45 = vpop.f32.mrf.mxu1  ;;  %v13030_v57 = vpop.f32.mrf.mxu0 }
 0x272   : > { %17165 = vst [vmem:[#allocation85_spill] sm:$0xff] %v13028_v45  ;;  %17166 = vst [vmem:[#allocation86_spill] sm:$0xff] %v13030_v57  ;;  %v13032_v20 = vadd.f32 %v10945_v32, %v3257_v59 }
 0x273   : > { %v10878_v15 = vpop.f32.mrf.mxu1  ;;  %v10948_v39 = vpop.f32.mrf.mxu0 }
 0x274   : > { %v3259_v37 = vadd.f32 %v10878_v15, %v12788_v16 }
 0x275   : > { %v13035_v49 = vpop.f32.mrf.mxu1  ;;  %v13037_v7 = vpop.f32.mrf.mxu0 }
 0x276   : > { %17167 = vst [vmem:[#allocation87_spill] sm:$0xff] %v13035_v49  ;;  %17168 = vst [vmem:[#allocation88_spill] sm:$0xff] %v13037_v7  ;;  %v13039_v51 = vadd.f32 %v10948_v39, %v3259_v37  ;;  %v9818_v39 = vld [vmem:[%s16979_s6 + $0x2f8] sm:$0xff]  ;;  %v9809_v7 = vld [vmem:[%s16979_s6 + $0x2b0] sm:$0xff] }
 0x277   : > { %v10881_v3 = vpop.f32.mrf.mxu1  ;;  %v10951_v26 = vpop.f32.mrf.mxu0  ;;  %5923 = vmatprep.subr.mxu0 %v9818_v39 }
 0x278   : > { %v3261_v11 = vadd.f32 %v10881_v3, %v12801_v17 }
 0x279   : > { %v13042_v33 = vpop.f32.mrf.mxu1  ;;  %v13044_v45 = vpop.f32.mrf.mxu0 }
 0x27a   : > { %17169 = vst [vmem:[#allocation89_spill] sm:$0xff] %v13042_v33  ;;  %17170 = vst [vmem:[#allocation90_spill] sm:$0xff] %v13044_v45  ;;  %v13046_v32 = vadd.f32 %v10951_v26, %v3261_v11  ;;  %v9817_v26 = vld [vmem:[%s16979_s6 + $0x2f0] sm:$0xff] }
 0x27b   : > { %v10884_v59 = vpop.f32.mrf.mxu1  ;;  %v10954_v57 = vpop.f32.mrf.mxu0  ;;  %5924 = vmatpush1.msra.mxu0 %v9817_v26 }
 0x27c   : > { %v3263_v16 = vadd.f32 %v10884_v59, %v12814_v61 }
 0x27d   : > { %v13049_v15 = vpop.f32.mrf.mxu1  ;;  %v13051_v49 = vpop.f32.mrf.mxu0 }
 0x27e   : > { %17171 = vst [vmem:[#allocation91_spill] sm:$0xff] %v13049_v15  ;;  %17172 = vst [vmem:[#allocation92_spill] sm:$0xff] %v13051_v49  ;;  %v13056_v37 = vadd.f32 %v10954_v57, %v3263_v16  ;;  %v9816_v57 = vld [vmem:[%s16979_s6 + $0x2e8] sm:$0xff]  ;;  %v9815_v16 = vld [vmem:[%s16979_s6 + $0x2e0] sm:$0xff] }
 0x27f   : > { %v10887_v17 = vpop.f32.mrf.mxu1  ;;  %v10957_v3 = vpop.f32.mrf.mxu0  ;;  %5925 = vmatprep.subr.mxu0 %v9816_v57 }
 0x280   : > { %v3265_v11 = vadd.f32 %v10887_v17, %v12832_v30  ;;  %5926 = vmatpush1.msra.mxu0 %v9815_v16  ;;  %v5222_v16 = vld [vmem:[%s16979_s6 + $0xf8] sm:$0xff] }
 0x281   : > { %v13062_v61 = vpop.f32.mrf.mxu1  ;;  %v13064_v59 = vpop.f32.mrf.mxu0  ;;  %5573 = vmatprep.subr.mxu1 %v5222_v16 }
 0x282   : > { %17173 = vst [vmem:[#allocation93_spill] sm:$0xff] %v13062_v61  ;;  %17174 = vst [vmem:[#allocation94_spill] sm:$0xff] %v13064_v59  ;;  %v13066_v49 = vadd.f32 %v10957_v3, %v3265_v11  ;;  %v9814_v59 = vld [vmem:[%s16979_s6 + $0x2d8] sm:$0xff] }
 0x283   : > { %v10890_v15 = vpop.f32.mrf.mxu1  ;;  %v10960_v45 = vpop.f32.mrf.mxu0  ;;  %5927 = vmatprep.subr.mxu0 %v9814_v59  ;;  %v9812_v59 = vld [vmem:[%s16979_s6 + $0x2c8] sm:$0xff] }
 0x284   : > { %v3267_v39 = vadd.f32 %v10890_v15, %v12847_v46  ;;  %v9813_v15 = vld [vmem:[%s16979_s6 + $0x2d0] sm:$0xff] }
 0x285   : > { %v13075_v30 = vpop.f32.mrf.mxu1  ;;  %v13077_v17 = vpop.f32.mrf.mxu0  ;;  %5928 = vmatpush1.msra.mxu0 %v9813_v15 }
 0x286   : > { %17175 = vst [vmem:[#allocation95_spill] sm:$0xff] %v13075_v30  ;;  %17176 = vst [vmem:[#allocation96_spill] sm:$0xff] %v13077_v17  ;;  %v13079_v3 = vadd.f32 %v10960_v45, %v3267_v39  ;;  %5929 = vmatprep.subr.mxu0 %v9812_v59 }
 0x287   : > { %v10979_v26 = vpop.f32.mrf.mxu1  ;;  %v13081_v11 = vpop.f32.mrf.mxu0 }
 0x288   : > { %v13087_v61 = vadd.f32 %v10979_v26, %v12862_v4  ;;  %v9811_v26 = vld [vmem:[%s16979_s6 + $0x2c0] sm:$0xff] }
 0x289   : > { %v13089_v46 = vpop.f32.mrf.mxu1  ;;  %v13094_v57 = vpop.f32.mrf.mxu0  ;;  %5930 = vmatpush1.msra.mxu0 %v9811_v26 }
 0x28b   : > { %v10982_v45 = vpop.f32.mrf.mxu1  ;;  %v13110_v15 = vpop.f32.mrf.mxu0 }
 0x28c   : > { %v13100_v39 = vadd.f32 %v10982_v45, %v12877_v8  ;;  %v9810_v45 = vld [vmem:[%s16979_s6 + $0x2b8] sm:$0xff] }
 0x28d   : > { %v13102_v4 = vpop.f32.mrf.mxu1  ;;  %v13120_v16 = vpop.f32.mrf.mxu0  ;;  %5931 = vmatprep.subr.mxu0 %v9810_v45  ;;  %v9807_v45 = vld [vmem:[%s16979_s6 + $0x2a0] sm:$0xff] }
 0x28e   : > { %5932 = vmatpush1.msra.mxu0 %v9809_v7 }
 0x28f   : > { %v10985_v17 = vpop.f32.mrf.mxu1  ;;  %5933 = vmatprep.subr.mxu0 %v9808_v6  ;;  %v9804_v6 = vld [vmem:[%s16979_s6 + $0x288] sm:$0xff] }
 0x290   : > { %v13113_v30 = vadd.f32 %v10985_v17, %v12898_v53  ;;  %v13130_v17 = vpop.f32.mrf.mxu0  ;;  %5934 = vmatpush1.msra.mxu0 %v9807_v45  ;;  %v9803_v45 = vld [vmem:[%s16979_s6 + $0x280] sm:$0xff] }
 0x291   : > { %v13115_v8 = vpop.f32.mrf.mxu1  ;;  %5935 = vmatprep.subr.mxu0 %v9806_v9  ;;  %v9802_v9 = vld [vmem:[%s16979_s6 + $0x278] sm:$0xff] }
 0x292   : > { %v13143_v7 = vpop.f32.mrf.mxu0 }
 0x293   : > { %v10988_v33 = vpop.f32.mrf.mxu1 }
 0x294   : > { %v13126_v59 = vadd.f32 %v10988_v33, %v12925_v42 }
 0x295   : > { %v13128_v53 = vpop.f32.mrf.mxu1 }
 0x297   : > { %v10991_v26 = vpop.f32.mrf.mxu1 }
 0x298   : > { %v13139_v22 = vadd.f32 %v10991_v26, %v12940_v55  ;;  %v9805_v55 = vld [vmem:[%s16979_s6 + $0x290] sm:$0xff]  ;;  %v13159_v26 = vpop.f32.mrf.mxu0 }
 0x299   : > { %v13141_v42 = vpop.f32.mrf.mxu1  ;;  %5936 = vmatpush1.msra.mxu0 %v9805_v55  ;;  %v9800_v55 = vld [vmem:[%s16979_s6 + $0x268] sm:$0xff] }
 0x29a   : > { %17177 = vst [vmem:[#allocation97_spill] sm:$0xff] %v13139_v22  ;;  %5937 = vmatprep.subr.mxu0 %v9804_v6  ;;  %v9799_v6 = vld [vmem:[%s16979_s6 + $0x260] sm:$0xff]  ;;  %v13181_v22 = vpop.f32.mrf.mxu0 }
 0x29b   : > { %v10994_v33 = vpop.f32.mrf.mxu1  ;;  %5938 = vmatpush1.msra.mxu0 %v9803_v45  ;;  %v9797_v45 = vld [vmem:[%s16979_s6 + $0x250] sm:$0xff] }
 0x29c   : > { %v13149_v54 = vadd.f32 %v10994_v33, %v12951_v47  ;;  %v9801_v33 = vld [vmem:[%s16979_s6 + $0x270] sm:$0xff]  ;;  %5939 = vmatprep.subr.mxu0 %v9802_v9  ;;  %v9796_v9 = vld [vmem:[%s16979_s6 + $0x248] sm:$0xff] }
 0x29d   : > { %v13151_v24 = vpop.f32.mrf.mxu1  ;;  %5940 = vmatpush1.msra.mxu0 %v9801_v33  ;;  %v9795_v33 = vld [vmem:[%s16979_s6 + $0x240] sm:$0xff] }
 0x29e   : > { %17178 = vst [vmem:[#allocation98_spill] sm:$0xff] %v13149_v54  ;;  %17179 = vst [vmem:[#allocation99_spill] sm:$0xff] %v13151_v24  ;;  %5941 = vmatprep.subr.mxu0 %v9800_v55  ;;  %v13200_v55 = vpop.f32.mrf.mxu0 }
 0x29f   : > { %v10997_v47 = vpop.f32.mrf.mxu1  ;;  %5942 = vmatpush1.msra.mxu0 %v9799_v6  ;;  %17184 = vst [vmem:[#allocation104_spill] sm:$0xff] %v13200_v55  ;;  %v9793_v6 = vld [vmem:[%s16979_s6 + $0x230] sm:$0xff] }
 0x2a0   : > { %v13171_v54 = vadd.f32 %v10997_v47, %v12970_v29  ;;  %v9798_v29 = vld [vmem:[%s16979_s6 + $0x258] sm:$0xff] }
 0x2a1   : > { %v13176_v24 = vpop.f32.mrf.mxu1  ;;  %5943 = vmatprep.subr.mxu0 %v9798_v29  ;;  %v9792_v29 = vld [vmem:[%s16979_s6 + $0x228] sm:$0xff] }
 0x2a2   : > { %17180 = vst [vmem:[#allocation100_spill] sm:$0xff] %v13171_v54  ;;  %17181 = vst [vmem:[#allocation101_spill] sm:$0xff] %v13176_v24  ;;  %5944 = vmatpush1.msra.mxu0 %v9797_v45  ;;  %v9791_v45 = vld [vmem:[%s16979_s6 + $0x220] sm:$0xff] }
 0x2a3   : > { %v11000_v47 = vpop.f32.mrf.mxu1  ;;  %5945 = vmatprep.subr.mxu0 %v9796_v9  ;;  %v13219_v9 = vpop.f32.mrf.mxu0 }
 0x2a4   : > { %v13190_v54 = vadd.f32 %v11000_v47, %v12989_v12  ;;  %v9794_v12 = vld [vmem:[%s16979_s6 + $0x238] sm:$0xff]  ;;  %5946 = vmatpush1.msra.mxu0 %v9795_v33  ;;  %17187 = vst [vmem:[#allocation107_spill] sm:$0xff] %v13219_v9  ;;  %v9789_v33 = vld [vmem:[%s16979_s6 + $0x210] sm:$0xff] }
 0x2a5   : > { %v13195_v24 = vpop.f32.mrf.mxu1  ;;  %5947 = vmatprep.subr.mxu0 %v9794_v12  ;;  %v9788_v12 = vld [vmem:[%s16979_s6 + $0x208] sm:$0xff] }
 0x2a6   : > { %17182 = vst [vmem:[#allocation102_spill] sm:$0xff] %v13190_v54  ;;  %17183 = vst [vmem:[#allocation103_spill] sm:$0xff] %v13195_v24  ;;  %5948 = vmatpush1.msra.mxu0 %v9793_v6  ;;  %v9787_v6 = vld [vmem:[%s16979_s6 + $0x200] sm:$0xff] }
 0x2a7   : > { %v11003_v47 = vpop.f32.mrf.mxu1  ;;  %5949 = vmatprep.subr.mxu0 %v9792_v29  ;;  %v13238_v29 = vpop.f32.mrf.mxu0 }
 0x2a8   : > { %v13209_v54 = vadd.f32 %v11003_v47, %v13002_v1  ;;  %v9790_v1 = vld [vmem:[%s16979_s6 + $0x218] sm:$0xff]  ;;  %5950 = vmatpush1.msra.mxu0 %v9791_v45  ;;  %17190 = vst [vmem:[#allocation110_spill] sm:$0xff] %v13238_v29 }
 0x2a9   : > { %v13214_v24 = vpop.f32.mrf.mxu1  ;;  %5951 = vmatprep.subr.mxu0 %v9790_v1 }
 0x2aa   : > { %17185 = vst [vmem:[#allocation105_spill] sm:$0xff] %v13209_v54  ;;  %17186 = vst [vmem:[#allocation106_spill] sm:$0xff] %v13214_v24  ;;  %5952 = vmatpush1.msra.mxu0 %v9789_v33 }
 0x2ab   : > { %v11006_v47 = vpop.f32.mrf.mxu1  ;;  %5953 = vmatprep.subr.mxu0 %v9788_v12 }
 0x2ac   : > { %v13228_v54 = vadd.f32 %v11006_v47, %v13010_v63  ;;  %5954 = vmatpush1.msra.mxu0 %v9787_v6  ;;  %v13245_v47 = vpop.f32.mrf.mxu0 }
 0x2ad   : > { %v13233_v24 = vpop.f32.mrf.mxu1 }
 0x2ae   : > { %17188 = vst [vmem:[#allocation108_spill] sm:$0xff] %v13228_v54  ;;  %17189 = vst [vmem:[#allocation109_spill] sm:$0xff] %v13233_v24  ;;  %v13252_v55 = vpop.f32.mrf.mxu0 }
 0x2af   : > { %v11009_v9 = vpop.f32.mrf.mxu1 }
 0x2b0   : > { %v13241_v63 = vadd.f32 %v11009_v9, %v13018_v43  ;;  %v13259_v43 = vpop.f32.mrf.mxu0 }
 0x2b1   : > { %v13243_v45 = vpop.f32.mrf.mxu1 }
 0x2b2   : > { %17191 = vst [vmem:[#allocation111_spill] sm:$0xff] %v13241_v63 }
 0x2b3   : > { %v11012_v54 = vpop.f32.mrf.mxu1 }
 0x2b4   : > { %v13248_v1 = vadd.f32 %v11012_v54, %v13025_v36  ;;  %v1788_v54 = vadd.f32 %v12417_v13, %v12415_v62  ;;  %v13268_v36 = vpop.f32.mrf.mxu0 }
 0x2b5   : > { %v13250_v24 = vpop.f32.mrf.mxu1 }
 0x2b6   : > { %17192 = vst [vmem:[#allocation112_spill] sm:$0xff] %v13248_v1  ;;  %17193 = vst [vmem:[#allocation113_spill] sm:$0xff] %v13250_v24  ;;  %v2364_v24 = vadd.f32 %v12640_v41, %v1788_v54  ;;  %v9882_v41 = vld [vmem:[%s16979_s6 + $0x4f8] sm:$0xff]  ;;  %v2802_v54 = vadd.f32 %v12667_v48, %v12672_v52  ;;  %v2804_v48 = vadd.f32 %v12681_v2, %v12686_v44 }
 0x2b7   : > { %v11015_v29 = vpop.f32.mrf.mxu1  ;;  %6767 = vmatprep.subr.mxu0 %v9882_v41 }
 0x2b8   : > { %v13255_v33 = vadd.f32 %v11015_v29, %v13032_v20 }
 0x2b9   : > { %v13257_v12 = vpop.f32.mrf.mxu1 }
 0x2ba   : > { %17194 = vst [vmem:[#allocation114_spill] sm:$0xff] %v13255_v33  ;;  %17195 = vst [vmem:[#allocation115_spill] sm:$0xff] %v13257_v12  ;;  %v13276_v33 = vpop.f32.mrf.mxu0 }
 0x2bb   : > { %v11018_v9 = vpop.f32.mrf.mxu1 }
 0x2bc   : > { %v13262_v6 = vadd.f32 %v11018_v9, %v13039_v51  ;;  %v2798_v51 = vadd.f32 %v12642_v60, %v2364_v24  ;;  %v13285_v62 = vpop.f32.mrf.mxu0 }
 0x2bd   : > { %v13264_v63 = vpop.f32.mrf.mxu1 }
 0x2be   : > { %17196 = vst [vmem:[#allocation116_spill] sm:$0xff] %v13262_v6  ;;  %v3232_v13 = vadd.f32 %v12858_v19, %v2798_v51 }
 0x2bf   : > { %v11021_v1 = vpop.f32.mrf.mxu1 }
 0x2c0   : > { %v13272_v20 = vadd.f32 %v11021_v1, %v13046_v32  ;;  %v2800_v1 = vadd.f32 %v12653_v21, %v12658_v40  ;;  %v3236_v21 = vadd.f32 %v12894_v18, %v2802_v54 }
 0x2c1   : > { %v13274_v29 = vpop.f32.mrf.mxu1 }
 0x2c2   : > { %v3234_v19 = vadd.f32 %v12873_v28, %v2800_v1 }
 0x2c3   : > { %v11024_v12 = vpop.f32.mrf.mxu1 }
 0x2c4   : > { %v13280_v9 = vadd.f32 %v11024_v12, %v13056_v37  ;;  %v3666_v37 = vadd.f32 %v12860_v27, %v3232_v13  ;;  %v13299_v12 = vpop.f32.mrf.mxu0  ;;  %v4535_v27 = vadd.f32 %v13081_v11, %v13087_v61  ;;  %v3238_v61 = vadd.f32 %v12918_v58, %v2804_v48 }
 0x2c5   : > { %v13282_v6 = vpop.f32.mrf.mxu1 }
 0x2c6   : > { %17197 = vst [vmem:[#allocation117_spill] sm:$0xff] %v13280_v9  ;;  %v4100_v41 = vadd.f32 %v13089_v46, %v3666_v37  ;;  %v13313_v28 = vpop.f32.mrf.mxu0  ;;  %v2806_v37 = vadd.f32 %v12694_v56, %v12699_v0 }
 0x2c7   : > { %v11027_v32 = vpop.f32.mrf.mxu1 }
 0x2c8   : > { %v13293_v24 = vadd.f32 %v11027_v32, %v13066_v49  ;;  %v3668_v49 = vadd.f32 %v12875_v50, %v3234_v19  ;;  %v4534_v18 = vadd.f32 %v13094_v57, %v4100_v41  ;;  %v3670_v50 = vadd.f32 %v12896_v10, %v3236_v21  ;;  %v13328_v2 = vpop.f32.mrf.mxu0 }
 0x2c9   : > { %v13295_v60 = vpop.f32.mrf.mxu1  ;;  %v4537_v32 = vadd.f32 %v13110_v15, %v13100_v39  ;;  %v3240_v39 = vadd.f32 %v12936_v34, %v2806_v37  ;;  %v4539_v15 = vadd.f32 %v13130_v17, %v13113_v30 }
 0x2ca   : > { %v4102_v46 = vadd.f32 %v13102_v4, %v3668_v49  ;;  %v4104_v57 = vadd.f32 %v13115_v8, %v3670_v50  ;;  %v13340_v21 = vpop.f32.mrf.mxu0  ;;  %v2808_v49 = vadd.f32 %v12706_v35, %v12711_v38  ;;  %v4541_v35 = vadd.f32 %v13159_v26, %v13126_v59 }
 0x2cb   : > { %v11030_v51 = vpop.f32.mrf.mxu1 }
 0x2cc   : > { %v13305_v9 = vadd.f32 %v11030_v51, %v13079_v3  ;;  %v13320_v3 = vld [vmem:[%s16978_s5] ss:$0 sm:$0xff]  ;;  %v4536_v19 = vadd.f32 %v13120_v16, %v4102_v46  ;;  %v3672_v51 = vadd.f32 %v12920_v31, %v3238_v61  ;;  %v4538_v31 = vadd.f32 %v13143_v7, %v4104_v57  ;;  %v13356_v7 = vpop.f32.mrf.mxu0 }
 0x2cd   : > { %v13308_v40 = vpop.f32.mrf.mxu1  ;;  %v3242_v46 = vadd.f32 %v12947_v5, %v2808_v49 }
 0x2ce   : > { %v4106_v34 = vadd.f32 %v13128_v53, %v3672_v51  ;;  %v9932_v53 = vld [vmem:[%s16979_s6 + $0x688] sm:$0xff] }
 0x2cf   : > { %v11119_v52 = vpop.f32.mrf.mxu1 }
 0x2d0   : > { %v4969_v13 = vadd.f32 %v11119_v52, %v4535_v27 }
 0x2d1   : > { %v4789_v11 = vpop.f32.mrf.mxu1 }
 0x2d2   : > { %v5012_v44 = vadd.f32 %v13320_v3, %v4969_v13  ;;  %v4968_v1 = vadd.f32 %v4789_v11, %v4534_v18  ;;  %v3674_v18 = vadd.f32 %v12938_v14, %v3240_v39  ;;  %v4540_v14 = vadd.f32 %v13181_v22, %v4106_v34  ;;  %v17204_v39 = vld [vmem:[#allocation97_spill] sm:$0xff] }
 0x2d3   : > { %v11122_v4 = vpop.f32.mrf.mxu1  ;;  %v17208_v34 = vld [vmem:[#allocation49_spill] sm:$0xff] }
 0x2d4   : > { %v5048_v10 = vmax.f32 %v5012_v44, 0.0  ;;  %v5011_v58 = vadd.f32 %v13320_v3, %v4968_v1  ;;  %v4971_v54 = vadd.f32 %v11122_v4, %v4537_v32  ;;  %v17199_v32 = vld [vmem:[#allocation48_spill] sm:$0xff]  ;;  %v17200_v44 = vld [vmem:[#allocation47_spill] sm:$0xff]  ;;  %v4108_v5 = vadd.f32 %v13141_v42, %v3674_v18 }
 0x2d5   : > { %v4799_v41 = vpop.f32.mrf.mxu1  ;;  %v2810_v1 = vadd.f32 %v17200_v44, %v17199_v32  ;;  %v17213_v44 = vld [vmem:[#allocation75_spill] sm:$0xff] }
 0x2d6   : > { %v5084_v56 = vsel %vm1064_vm4, %v5048_v10, 0.0  ;;  %v5047_v0 = vmax.f32 %v5011_v58, 0.0  ;;  %v5014_v8 = vadd.f32 %v13320_v3, %v4971_v54  ;;  %v4970_v16 = vadd.f32 %v4799_v41, %v4536_v19  ;;  %v17202_v10 = vld [vmem:[#allocation72_spill] sm:$0xff]  ;;  %v17203_v54 = vld [vmem:[#allocation73_spill] sm:$0xff] }
 0x2d7   : > { %5120 = vst [vmem:[#allocation3 + $0x1b] sm:$0xff] %v5084_v56  ;;  %v11125_v27 = vpop.f32.mrf.mxu1  ;;  %v3676_v58 = vadd.f32 %v17202_v10, %v3242_v46  ;;  %v3244_v51 = vadd.f32 %v17203_v54, %v2810_v1  ;;  %v13372_v56 = vpop.f32.mrf.mxu0 }
 0x2d8   : > { %v5083_v30 = vsel %vm1063_vm9, %v5047_v0, 0.0  ;;  %v5050_v17 = vmax.f32 %v5014_v8, 0.0  ;;  %v5013_v48 = vadd.f32 %v13320_v3, %v4970_v16  ;;  %v4973_v52 = vadd.f32 %v11125_v27, %v4539_v15  ;;  %v17205_v15 = vld [vmem:[#allocation104_spill] sm:$0xff] }
 0x2d9   : > { %5119 = vst [vmem:[#allocation3 + $0x13] sm:$0xff] %v5083_v30  ;;  %v4809_v38 = vpop.f32.mrf.mxu1  ;;  %v4543_v41 = vadd.f32 %v17205_v15, %v17204_v39  ;;  %v17209_v30 = vld [vmem:[#allocation107_spill] sm:$0xff] }
 0x2da   : > { %v5086_v13 = vsel %vm1066_vm10, %v5050_v17, 0.0  ;;  %v5049_v50 = vmax.f32 %v5013_v48, 0.0  ;;  %v5016_v61 = vadd.f32 %v13320_v3, %v4973_v52  ;;  %v4972_v11 = vadd.f32 %v4809_v38, %v4538_v31  ;;  %v17207_v31 = vld [vmem:[#allocation50_spill] sm:$0xff]  ;;  %v17210_v48 = vld [vmem:[#allocation99_spill] sm:$0xff] }
 0x2db   : > { %5122 = vst [vmem:[#allocation3 + $0x2b] sm:$0xff] %v5086_v13  ;;  %v11128_v59 = vpop.f32.mrf.mxu1  ;;  %v2812_v27 = vadd.f32 %v17208_v34, %v17207_v31  ;;  %v4542_v17 = vadd.f32 %v17209_v30, %v4108_v5  ;;  %v4110_v52 = vadd.f32 %v17210_v48, %v3676_v58  ;;  %v17217_v39 = vld [vmem:[#allocation71_spill] sm:$0xff] }
 0x2dc   : > { %v5085_v37 = vsel %vm1065_vm11, %v5049_v50, 0.0  ;;  %v5052_v57 = vmax.f32 %v5016_v61, 0.0  ;;  %v5015_v4 = vadd.f32 %v13320_v3, %v4972_v11  ;;  %v4975_v19 = vadd.f32 %v11128_v59, %v4541_v35  ;;  %v17212_v11 = vld [vmem:[#allocation74_spill] sm:$0xff]  ;;  %v17219_v15 = vld [vmem:[#allocation51_spill] sm:$0xff] }
 0x2dd   : > { %5121 = vst [vmem:[#allocation3 + $0x23] sm:$0xff] %v5085_v37  ;;  %v4819_v22 = vpop.f32.mrf.mxu1  ;;  %v3678_v32 = vadd.f32 %v17212_v11, %v3244_v51  ;;  %v3246_v1 = vadd.f32 %v17213_v44, %v2812_v27  ;;  %v17215_v59 = vld [vmem:[#allocation110_spill] sm:$0xff]  ;;  %v17218_v51 = vld [vmem:[#allocation52_spill] sm:$0xff] }
 0x2de   : > { %v5088_v0 = vsel %vm1068_vm12, %v5052_v57, 0.0  ;;  %v5051_v8 = vmax.f32 %v5015_v4, 0.0  ;;  %v5018_v16 = vadd.f32 %v13320_v3, %v4975_v19  ;;  %v4974_v49 = vadd.f32 %v4819_v22, %v4540_v14  ;;  %v17214_v14 = vld [vmem:[#allocation98_spill] sm:$0xff]  ;;  %v13388_v57 = vpop.f32.mrf.mxu0  ;;  %v9934_v4 = vld [vmem:[%s16979_s6 + $0x698] sm:$0xff] }
 0x2df   : > { %5124 = vst [vmem:[#allocation3 + $0x3b] sm:$0xff] %v5088_v0  ;;  %v11131_v18 = vpop.f32.mrf.mxu1  ;;  %v4545_v37 = vadd.f32 %v17215_v59, %v17214_v14  ;;  %v4544_v22 = vadd.f32 %v13245_v47, %v4110_v52  ;;  %v17220_v0 = vld [vmem:[#allocation101_spill] sm:$0xff] }
 0x2e0   : > { %v5087_v35 = vsel %vm1067_vm13, %v5051_v8, 0.0  ;;  %v5054_v38 = vmax.f32 %v5018_v16, 0.0  ;;  %v5017_v13 = vadd.f32 %v13320_v3, %v4974_v49  ;;  %v4977_v50 = vadd.f32 %v11131_v18, %v4543_v41  ;;  %v5225_v61 = vld [vmem:[#allocation3 + $0x11] sm:$0xff]  ;;  %v5226_v48 = vld [vmem:[#allocation3 + $0x19] sm:$0xff]  ;;  %v13405_v52 = vpop.f32.mrf.mxu0 }
 0x2e1   : > { %5123 = vst [vmem:[#allocation3 + $0x33] sm:$0xff] %v5087_v35  ;;  %v4829_v5 = vpop.f32.mrf.mxu1  ;;  %5369 = vmatmul.mubr.f32.gmra.mxu0 %v5225_v61  ;;  %v2814_v41 = vadd.f32 %v17219_v15, %v17218_v51  ;;  %v4112_v8 = vadd.f32 %v17220_v0, %v3678_v32  ;;  %v17223_v35 = vld [vmem:[#allocation77_spill] sm:$0xff] }
 0x2e2   : > { %v5090_v19 = vsel %vm1070_vm14, %v5054_v38, 0.0  ;;  %v5053_v10 = vmax.f32 %v5017_v13, 0.0  ;;  %v5020_v58 = vadd.f32 %v13320_v3, %v4977_v50  ;;  %v4976_v54 = vadd.f32 %v4829_v5, %v4542_v17  ;;  %5374 = vmatprep.mubr.f32.mxu0 %v17217_v39  ;;  %v17222_v17 = vld [vmem:[#allocation76_spill] sm:$0xff]  ;;  %v17227_v59 = vld [vmem:[#allocation53_spill] sm:$0xff] }
 0x2e3   : > { %5126 = vst [vmem:[#allocation3 + $0x4b] sm:$0xff] %v5090_v19  ;;  %v11134_v16 = vpop.f32.mrf.mxu1  ;;  %v3680_v18 = vadd.f32 %v17222_v17, %v3246_v1  ;;  %v3248_v38 = vadd.f32 %v17223_v35, %v2814_v41  ;;  %v17224_v13 = vld [vmem:[#allocation100_spill] sm:$0xff]  ;;  %v17226_v1 = vld [vmem:[#allocation54_spill] sm:$0xff]  ;;  %v4546_v5 = vadd.f32 %v13259_v43, %v4112_v8  ;;  %v13422_v8 = vpop.f32.mrf.mxu0 }
 0x2e4   : > { %v5089_v31 = vsel %vm1069_vm15, %v5053_v10, 0.0  ;;  %v5056_v34 = vmax.f32 %v5020_v58, 0.0  ;;  %v5019_v27 = vadd.f32 %v13320_v3, %v4976_v54  ;;  %v4979_v30 = vadd.f32 %v11134_v16, %v4545_v37  ;;  %v5227_v0 = vld [vmem:[#allocation3 + $0x21] sm:$0xff] }
 0x2e5   : > { %v4547_v50 = vadd.f32 %v13252_v55, %v17224_v13  ;;  %5125 = vst [vmem:[#allocation3 + $0x43] sm:$0xff] %v5089_v31  ;;  %v4839_v47 = vpop.f32.mrf.mxu1  ;;  %5375 = vmatmul.mubr.f32.gmra.mxu0 %v5226_v48  ;;  %v2816_v37 = vadd.f32 %v17227_v59, %v17226_v1  ;;  %v17228_v55 = vld [vmem:[#allocation103_spill] sm:$0xff]  ;;  %v9936_v48 = vld [vmem:[%s16979_s6 + $0x6a8] sm:$0xff] }
 0x2e6   : > { %v5092_v11 = vsel %vm1072_vm0, %v5056_v34, 0.0  ;;  %v5055_v32 = vmax.f32 %v5019_v27, 0.0  ;;  %v5022_v44 = vadd.f32 %v13320_v3, %v4979_v30  ;;  %v4978_v14 = vadd.f32 %v4839_v47, %v4544_v22  ;;  %5380 = vmatprep.mubr.f32.mxu0 %v17217_v39  ;;  %v17230_v22 = vld [vmem:[#allocation78_spill] sm:$0xff]  ;;  %v17231_v31 = vld [vmem:[#allocation79_spill] sm:$0xff] }
 0x2e7   : > { %v4114_v19 = vadd.f32 %v17228_v55, %v3680_v18  ;;  %5128 = vst [vmem:[#allocation3 + $0x5b] sm:$0xff] %v5092_v11  ;;  %v11137_v10 = vpop.f32.mrf.mxu1  ;;  %v3682_v16 = vadd.f32 %v17230_v22, %v3248_v38  ;;  %v3250_v34 = vadd.f32 %v17231_v31, %v2816_v37  ;;  %v17232_v27 = vld [vmem:[#allocation102_spill] sm:$0xff]  ;;  %v17234_v38 = vld [vmem:[#allocation56_spill] sm:$0xff] }
 0x2e8   : > { %v5091_v54 = vsel %vm1071_vm1, %v5055_v32, 0.0  ;;  %v5058_v51 = vmax.f32 %v5022_v44, 0.0  ;;  %v5021_v15 = vadd.f32 %v13320_v3, %v4978_v14  ;;  %v4981_v41 = vadd.f32 %v11137_v10, %v4547_v50  ;;  %v17235_v50 = vld [vmem:[#allocation55_spill] sm:$0xff]  ;;  %v6702_v22 = vld [vmem:[#allocation3 + $0x33] sm:$0xff]  ;;  %v6703_v61 = vld [vmem:[#allocation3 + $0x3b] sm:$0xff] }
 0x2e9   : > { %v4549_v30 = vadd.f32 %v13268_v36, %v17232_v27  ;;  %5127 = vst [vmem:[#allocation3 + $0x53] sm:$0xff] %v5091_v54  ;;  %v4849_v43 = vpop.f32.mrf.mxu1  ;;  %5381 = vmatmul.mubr.f32.gmra.mxu0 %v5227_v0  ;;  %v2818_v47 = vadd.f32 %v17235_v50, %v17234_v38  ;;  %v4548_v11 = vadd.f32 %v13276_v33, %v4114_v19  ;;  %v17236_v36 = vld [vmem:[#allocation106_spill] sm:$0xff]  ;;  %v13439_v19 = vpop.f32.mrf.mxu0  ;;  %v17245_v38 = vld [vmem:[#allocation20_spill] sm:$0xff] }
 0x2ea   : > { %v5094_v17 = vsel %vm1074_vm2, %v5058_v51, 0.0  ;;  %v5057_v18 = vmax.f32 %v5021_v15, 0.0  ;;  %v5024_v35 = vadd.f32 %v13320_v3, %v4981_v41  ;;  %v4980_v13 = vadd.f32 %v4849_v43, %v4546_v5  ;;  %5386 = vmatprep.mubr.f32.mxu0 %v17217_v39  ;;  %v5228_v10 = vld [vmem:[#allocation3 + $0x29] sm:$0xff]  ;;  %v17238_v5 = vld [vmem:[#allocation80_spill] sm:$0xff]  ;;  %v17239_v51 = vld [vmem:[#allocation81_spill] sm:$0xff] }
 0x2eb   : > { %v4116_v32 = vadd.f32 %v17236_v36, %v3682_v16  ;;  %5130 = vst [vmem:[#allocation3 + $0x6b] sm:$0xff] %v5094_v17  ;;  %v11140_v44 = vpop.f32.mrf.mxu1  ;;  %v3684_v54 = vadd.f32 %v17238_v5, %v3250_v34  ;;  %v3252_v15 = vadd.f32 %v17239_v51, %v2818_v47  ;;  %v17240_v41 = vld [vmem:[#allocation105_spill] sm:$0xff]  ;;  %v17242_v34 = vld [vmem:[#allocation58_spill] sm:$0xff]  ;;  %vm17246_vm7 = vcmp.eq.s32.totalorder %v17245_v38, 1  ;;  %v6705_v26 = vld [vmem:[#allocation3 + $0x4b] sm:$0xff] }
 0x2ec   : > { %v5093_v1 = vsel %vm1073_vm3, %v5057_v18, 0.0  ;;  %v5060_v59 = vmax.f32 %v5024_v35, 0.0  ;;  %v5023_v37 = vadd.f32 %v13320_v3, %v4980_v13  ;;  %v4983_v55 = vadd.f32 %v11140_v44, %v4549_v30  ;;  %v17243_v43 = vld [vmem:[#allocation57_spill] sm:$0xff]  ;;  %v6704_v42 = vld [vmem:[#allocation3 + $0x43] sm:$0xff] }
 0x2ed   : > { %v4551_v0 = vadd.f32 %v13285_v62, %v17240_v41  ;;  %5129 = vst [vmem:[#allocation3 + $0x63] sm:$0xff] %v5093_v1  ;;  %v4859_v33 = vpop.f32.mrf.mxu1  ;;  %5387 = vmatmul.mubr.f32.gmra.mxu0 %v5228_v10  ;;  %v2820_v17 = vadd.f32 %v17243_v43, %v17242_v34  ;;  %v4550_v18 = vadd.f32 %v13299_v12, %v4116_v32  ;;  %v17244_v62 = vld [vmem:[#allocation109_spill] sm:$0xff]  ;;  %v5229_v1 = vld [vmem:[#allocation3 + $0x31] sm:$0xff]  ;;  %v13456_v32 = vpop.f32.mrf.mxu0  ;;  %v17254_v34 = vld [vmem:[#allocation22_spill] sm:$0xff] }
 0x2ee   : > { %v5096_v16 = vsel %vm1076_vm5, %v5060_v59, 0.0  ;;  %v5059_v31 = vmax.f32 %v5023_v37, 0.0  ;;  %v5026_v27 = vadd.f32 %v13320_v3, %v4983_v55  ;;  %v4982_v30 = vadd.f32 %v4859_v33, %v4548_v11  ;;  %5392 = vmatprep.mubr.f32.mxu0 %v17217_v39  ;;  %v17247_v11 = vld [vmem:[#allocation82_spill] sm:$0xff]  ;;  %v17248_v37 = vld [vmem:[#allocation83_spill] sm:$0xff]  ;;  %v17249_v10 = vld [vmem:[#allocation108_spill] sm:$0xff] }
 0x2ef   : > { %v4118_v35 = vadd.f32 %v17244_v62, %v3684_v54  ;;  %5132 = vst [vmem:[#allocation3 + $0x7b] sm:$0xff] %v5096_v16  ;;  %v11143_v13 = vpop.f32.mrf.mxu1  ;;  %v3686_v59 = vadd.f32 %v17247_v11, %v3252_v15  ;;  %v3254_v55 = vadd.f32 %v17248_v37, %v2820_v17  ;;  %v4553_v5 = vadd.f32 %v13313_v28, %v17249_v10  ;;  %v17250_v54 = vld [vmem:[#allocation21_spill] sm:$0xff]  ;;  %v17252_v15 = vld [vmem:[#allocation60_spill] sm:$0xff]  ;;  %v17253_v16 = vld [vmem:[#allocation59_spill] sm:$0xff] }
 0x2f0   : > { %v5095_v50 = vsel %vm17246_vm7, %v5059_v31, 0.0  ;;  %v5062_v47 = vmax.f32 %v5026_v27, 0.0  ;;  %v5025_v36 = vadd.f32 %v13320_v3, %v4982_v30  ;;  %v4985_v44 = vadd.f32 %v11143_v13, %v4551_v0 }
 0x2f1   : > { %5131 = vst [vmem:[#allocation3 + $0x73] sm:$0xff] %v5095_v50  ;;  %v4869_v12 = vpop.f32.mrf.mxu1  ;;  %5393 = vmatmul.mubr.f32.gmra.mxu0 %v5229_v1  ;;  %vm17251_vm6 = vcmp.eq.s32.totalorder %v17250_v54, 1  ;;  %v2822_v31 = vadd.f32 %v17253_v16, %v17252_v15  ;;  %v4552_v27 = vadd.f32 %v13328_v2, %v4118_v35  ;;  %v4120_v28 = vadd.f32 %v13243_v45, %v3686_v59  ;;  %v5230_v50 = vld [vmem:[#allocation3 + $0x39] sm:$0xff]  ;;  %v17258_v1 = vld [vmem:[#allocation111_spill] sm:$0xff]  ;;  %v13473_v45 = vpop.f32.mrf.mxu0 }
 0x2f2   : > { %v5098_v51 = vsel %vm17251_vm6, %v5062_v47, 0.0  ;;  %v5061_v41 = vmax.f32 %v5025_v36, 0.0  ;;  %v5028_v33 = vadd.f32 %v13320_v3, %v4985_v44  ;;  %v4984_v0 = vadd.f32 %v4869_v12, %v4550_v18  ;;  %5398 = vmatprep.mubr.f32.mxu0 %v17217_v39  ;;  %v17256_v18 = vld [vmem:[#allocation84_spill] sm:$0xff]  ;;  %v17257_v36 = vld [vmem:[#allocation85_spill] sm:$0xff]  ;;  %v17259_v35 = vld [vmem:[#allocation23_spill] sm:$0xff] }
 0x2f3   : > { %5134 = vst [vmem:[#allocation3 + $0x8b] sm:$0xff] %v5098_v51  ;;  %v11146_v30 = vpop.f32.mrf.mxu1  ;;  %vm17255_vm7 = vcmp.eq.s32.totalorder %v17254_v34, 1  ;;  %v3688_v47 = vadd.f32 %v17256_v18, %v3254_v55  ;;  %v3256_v44 = vadd.f32 %v17257_v36, %v2822_v31  ;;  %v4555_v11 = vadd.f32 %v13340_v21, %v17258_v1  ;;  %v17261_v55 = vld [vmem:[#allocation62_spill] sm:$0xff]  ;;  %v17262_v12 = vld [vmem:[#allocation61_spill] sm:$0xff]  ;;  %v17264_v15 = vld [vmem:[#allocation24_spill] sm:$0xff] }
 0x2f4   : > { %v5097_v43 = vsel %vm17255_vm7, %v5061_v41, 0.0  ;;  %v5064_v17 = vmax.f32 %v5028_v33, 0.0  ;;  %v5027_v62 = vadd.f32 %v13320_v3, %v4984_v0  ;;  %v4987_v13 = vadd.f32 %v11146_v30, %v4553_v5  ;;  %v17263_v21 = vld [vmem:[#allocation113_spill] sm:$0xff]  ;;  %v17268_v18 = vld [vmem:[#allocation112_spill] sm:$0xff] }
 0x2f5   : > { %5133 = vst [vmem:[#allocation3 + $0x83] sm:$0xff] %v5097_v43  ;;  %v4879_v2 = vpop.f32.mrf.mxu1  ;;  %5399 = vmatmul.mubr.f32.gmra.mxu0 %v5230_v50  ;;  %vm17260_vm6 = vcmp.eq.s32.totalorder %v17259_v35, 1  ;;  %v2824_v51 = vadd.f32 %v17262_v12, %v17261_v55  ;;  %v4554_v41 = vadd.f32 %v13356_v7, %v4120_v28  ;;  %v4122_v33 = vadd.f32 %v17263_v21, %v3688_v47  ;;  %v13490_v28 = vpop.f32.mrf.mxu0  ;;  %v17269_v47 = vld [vmem:[#allocation25_spill] sm:$0xff]  ;;  %v6701_v35 = vld [vmem:[#allocation3 + $0x2b] sm:$0xff] }
 0x2f6   : > { %v5100_v59 = vsel %vm17260_vm6, %v5064_v17, 0.0  ;;  %v5063_v37 = vmax.f32 %v5027_v62, 0.0  ;;  %v5030_v10 = vadd.f32 %v13320_v3, %v4987_v13  ;;  %v4986_v5 = vadd.f32 %v4879_v2, %v4552_v27  ;;  %5404 = vmatprep.mubr.f32.mxu0 %v17217_v39  ;;  %v5231_v17 = vld [vmem:[#allocation3 + $0x41] sm:$0xff]  ;;  %v17267_v13 = vld [vmem:[#allocation87_spill] sm:$0xff] }
 0x2f7   : > { %5136 = vst [vmem:[#allocation3 + $0x9b] sm:$0xff] %v5100_v59  ;;  %v11149_v0 = vpop.f32.mrf.mxu1  ;;  %vm17265_vm7 = vcmp.eq.s32.totalorder %v17264_v15, 1  ;;  %v17266_v27 = vld [vmem:[#allocation86_spill] sm:$0xff]  ;;  %v3258_v50 = vadd.f32 %v17267_v13, %v2824_v51  ;;  %v4557_v36 = vadd.f32 %v13372_v56, %v17268_v18  ;;  %vm17270_vm6 = vcmp.eq.s32.totalorder %v17269_v47, 1  ;;  %v17273_v56 = vld [vmem:[#allocation115_spill] sm:$0xff]  ;;  %v17279_v13 = vld [vmem:[#allocation89_spill] sm:$0xff] }
 0x2f8   : > { %v5099_v16 = vsel %vm17265_vm7, %v5063_v37, 0.0  ;;  %v5066_v31 = vmax.f32 %v5030_v10, 0.0  ;;  %v5029_v30 = vadd.f32 %v13320_v3, %v4986_v5  ;;  %v4989_v43 = vadd.f32 %v11149_v0, %v4555_v11  ;;  %v17272_v37 = vld [vmem:[#allocation63_spill] sm:$0xff]  ;;  %v17274_v51 = vld [vmem:[#allocation26_spill] sm:$0xff]  ;;  %v9939_v15 = vld [vmem:[%s16979_s6 + $0x6c0] sm:$0xff] }
 0x2f9   : > { %v3690_v62 = vadd.f32 %v17266_v27, %v3256_v44  ;;  %5135 = vst [vmem:[#allocation3 + $0x93] sm:$0xff] %v5099_v16  ;;  %v4889_v7 = vpop.f32.mrf.mxu1  ;;  %5405 = vmatmul.mubr.f32.gmra.mxu0 %v5231_v17  ;;  %v17271_v44 = vld [vmem:[#allocation64_spill] sm:$0xff]  ;;  %v4556_v5 = vadd.f32 %v13388_v57, %v4122_v33  ;;  %vm17275_vm7 = vcmp.eq.s32.totalorder %v17274_v51, 1  ;;  %v17280_v57 = vld [vmem:[#allocation114_spill] sm:$0xff] }
 0x2fa   : > { %v5102_v1 = vsel %vm17270_vm6, %v5066_v31, 0.0  ;;  %v5065_v2 = vmax.f32 %v5029_v30, 0.0  ;;  %v5032_v59 = vadd.f32 %v13320_v3, %v4989_v43  ;;  %v4988_v11 = vadd.f32 %v4889_v7, %v4554_v41  ;;  %5410 = vmatprep.mubr.f32.mxu0 %v17217_v39  ;;  %v5232_v30 = vld [vmem:[#allocation3 + $0x49] sm:$0xff]  ;;  %v17277_v43 = vld [vmem:[#allocation44_spill] sm:$0xff]  ;;  %v13509_v7 = vpop.f32.mrf.mxu0 }
 0x2fb   : > { %v2826_v10 = vadd.f32 %v17272_v37, %v17271_v44  ;;  %v4124_v55 = vadd.f32 %v17273_v56, %v3690_v62  ;;  %5138 = vst [vmem:[#allocation3 + $0xab] sm:$0xff] %v5102_v1  ;;  %v11152_v12 = vpop.f32.mrf.mxu1  ;;  %v17276_v41 = vld [vmem:[#allocation43_spill] sm:$0xff]  ;;  %v17278_v17 = vld [vmem:[#allocation88_spill] sm:$0xff]  ;;  %v4559_v33 = vadd.f32 %v13405_v52, %v17280_v57  ;;  %v13514_v44 = vld [vmem:[#allocation3] sm:$0xff] }
 0x2fc   : > { %v5101_v21 = vsel %vm17275_vm7, %v5065_v2, 0.0  ;;  %v5068_v0 = vmax.f32 %v5032_v59, 0.0  ;;  %v5031_v16 = vadd.f32 %v13320_v3, %v4988_v11  ;;  %v4991_v31 = vadd.f32 %v11152_v12, %v4557_v36  ;;  %v17281_v1 = vld [vmem:[#allocation27_spill] sm:$0xff]  ;;  %v17284_v37 = vld [vmem:[#allocation65_spill] sm:$0xff] }
 0x2fd   : > { %v1948_v39 = vadd.f32 %v17277_v43, %v17276_v41  ;;  %v3692_v27 = vadd.f32 %v17278_v17, %v3258_v50  ;;  %v3260_v18 = vadd.f32 %v17279_v13, %v2826_v10  ;;  %5137 = vst [vmem:[#allocation3 + $0xa3] sm:$0xff] %v5101_v21  ;;  %v4899_v62 = vpop.f32.mrf.mxu1  ;;  %5411 = vmatmul.mubr.f32.gmra.mxu0 %v5232_v30  ;;  %vm17282_vm6 = vcmp.eq.s32.totalorder %v17281_v1, 1  ;;  %v17283_v50 = vld [vmem:[#allocation66_spill] sm:$0xff]  ;;  %v17285_v52 = vld [vmem:[#allocation67_spill] sm:$0xff]  ;;  %v17288_v17 = vld [vmem:[#allocation45_spill] sm:$0xff] }
 0x2fe   : > { %v5104_v2 = vsel %vm17282_vm6, %v5068_v0, 0.0  ;;  %v5067_v36 = vmax.f32 %v5031_v16, 0.0  ;;  %v5034_v59 = vadd.f32 %v13320_v3, %v4991_v31  ;;  %v4990_v11 = vadd.f32 %v4899_v62, %v4556_v5  ;;  %5416 = vmatprep.mubr.f32.mxu0 %v13514_v44  ;;  %v17286_v0 = vld [vmem:[#allocation28_spill] sm:$0xff]  ;;  %v17289_v13 = vld [vmem:[#allocation46_spill] sm:$0xff] }
 0x2ff   : > { %v2828_v10 = vadd.f32 %v17284_v37, %v17283_v50  ;;  %v2396_v56 = vadd.f32 %v17285_v52, %v1948_v39  ;;  %v4558_v12 = vadd.f32 %v13422_v8, %v4124_v55  ;;  %v4126_v21 = vadd.f32 %v13264_v63, %v3692_v27  ;;  %5140 = vst [vmem:[#allocation3 + $0xbb] sm:$0xff] %v5104_v2  ;;  %v11155_v30 = vpop.f32.mrf.mxu1  ;;  %v5233_v43 = vld [vmem:[#allocation3 + $0x51] sm:$0xff]  ;;  %v17290_v62 = vld [vmem:[#allocation90_spill] sm:$0xff]  ;;  %v13531_v27 = vpop.f32.mrf.mxu0  ;;  %v17293_v2 = vld [vmem:[#allocation29_spill] sm:$0xff] }
 0x300   : > { %vm17287_vm7 = vcmp.eq.s32.totalorder %v17286_v0, 1  ;;  %v5070_v31 = vmax.f32 %v5034_v59, 0.0  ;;  %v5033_v5 = vadd.f32 %v13320_v3, %v4990_v11  ;;  %v4993_v41 = vadd.f32 %v11155_v30, %v4559_v33  ;;  %v17291_v39 = vld [vmem:[#allocation91_spill] sm:$0xff]  ;;  %v17292_v8 = vld [vmem:[#allocation116_spill] sm:$0xff]  ;;  %v6699_v1 = vld [vmem:[#allocation3 + $0x1b] sm:$0xff] }
 0x301   : > { %v5103_v16 = vsel %vm17287_vm7, %v5067_v36, 0.0  ;;  %v1958_v57 = vadd.f32 %v17289_v13, %v17288_v17  ;;  %v3694_v50 = vadd.f32 %v17290_v62, %v3260_v18  ;;  %v3262_v37 = vadd.f32 %v17291_v39, %v2828_v10  ;;  %v4909_v55 = vpop.f32.mrf.mxu1  ;;  %5417 = vmatmul.mubr.f32.gmra.mxu0 %v5233_v43  ;;  %v17295_v18 = vld [vmem:[#allocation68_spill] sm:$0xff]  ;;  %v17296_v10 = vld [vmem:[#allocation69_spill] sm:$0xff]  ;;  %v6700_v47 = vld [vmem:[#allocation3 + $0x23] sm:$0xff] }
 0x302   : > { %v4561_v63 = vadd.f32 %v13439_v19, %v17292_v8  ;;  %5139 = vst [vmem:[#allocation3 + $0xb3] sm:$0xff] %v5103_v16  ;;  %vm17294_vm6 = vcmp.eq.s32.totalorder %v17293_v2, 1  ;;  %v5069_v33 = vmax.f32 %v5033_v5, 0.0  ;;  %v5036_v59 = vadd.f32 %v13320_v3, %v4993_v41  ;;  %5422 = vmatprep.mubr.f32.mxu0 %v13514_v44  ;;  %v17297_v5 = vld [vmem:[#allocation30_spill] sm:$0xff]  ;;  %v9943_v0 = vld [vmem:[%s16979_s6 + $0x6e0] sm:$0xff]  ;;  %v9938_v54 = vld [vmem:[%s16979_s6 + $0x6b8] sm:$0xff] }
 0x303   : > { %v5106_v36 = vsel %vm17294_vm6, %v5070_v31, 0.0  ;;  %v4992_v11 = vadd.f32 %v4909_v55, %v4558_v12  ;;  %v2830_v52 = vadd.f32 %v17295_v18, %v2396_v56  ;;  %v2398_v30 = vadd.f32 %v17296_v10, %v1958_v57  ;;  %v11158_v43 = vpop.f32.mrf.mxu1  ;;  %v5221_v31 = vld [vmem:[%s16979_s6 + $0xf0] sm:$0xff]  ;;  %v5234_v56 = vld [vmem:[#allocation3 + $0x59] sm:$0xff]  ;;  %v11097_v55 = vpop.f32.mrf.mxu0 }
 0x304   : > { %v4560_v19 = vadd.f32 %v13456_v32, %v4126_v21  ;;  %v4128_v16 = vadd.f32 %v13274_v29, %v3694_v50  ;;  %5142 = vst [vmem:[#allocation3 + $0xcb] sm:$0xff] %v5106_v36  ;;  %vm17298_vm7 = vcmp.eq.s32.totalorder %v17297_v5, 1  ;;  %v5072_v12 = vmax.f32 %v5036_v59, 0.0  ;;  %v5243_v62 = vld [vmem:[#allocation3 + $0xa1] sm:$0xff]  ;;  %v17299_v29 = vld [vmem:[#allocation92_spill] sm:$0xff]  ;;  %v17301_v36 = vld [vmem:[#allocation31_spill] sm:$0xff] }
 0x305   : > { %v5105_v41 = vsel %vm17298_vm7, %v5069_v33, 0.0  ;;  %v5035_v17 = vadd.f32 %v13320_v3, %v4992_v11  ;;  %v4995_v13 = vadd.f32 %v11158_v43, %v4561_v63  ;;  %v5220_v32 = vld [vmem:[%s16979_s6 + $0xe8] sm:$0xff]  ;;  %v3696_v21 = vadd.f32 %v17299_v29, %v3262_v37  ;;  %v4919_v8 = vpop.f32.mrf.mxu1  ;;  %5423 = vmatmul.mubr.f32.gmra.mxu0 %v5234_v56  ;;  %5477 = vmatmul.mubr.f32.vlgmr.msra.gmra.mxu1 %v5243_v62  ;;  %v5219_v63 = vld [vmem:[%s16979_s6 + $0xe0] sm:$0xff]  ;;  %v9941_v51 = vld [vmem:[%s16979_s6 + $0x6d0] sm:$0xff] }
 0x306   : > { %v17300_v57 = vld [vmem:[#allocation93_spill] sm:$0xff]  ;;  %v4563_v39 = vadd.f32 %v13473_v45, %v13272_v20  ;;  %5141 = vst [vmem:[#allocation3 + $0xc3] sm:$0xff] %v5105_v41  ;;  %vm17302_vm6 = vcmp.eq.s32.totalorder %v17301_v36, 1  ;;  %v4994_v11 = vadd.f32 %v4919_v8, %v4560_v19  ;;  %5574 = vmatpush1.msra.mxu1 %v5221_v31  ;;  %5428 = vmatprep.mubr.f32.mxu0 %v13514_v44  ;;  %v17303_v20 = vld [vmem:[#allocation70_spill] sm:$0xff]  ;;  %v17304_v43 = vld [vmem:[#allocation32_spill] sm:$0xff] }
 0x307   : > { %v3264_v50 = vadd.f32 %v17300_v57, %v2830_v52  ;;  %v5108_v33 = vsel %vm17302_vm6, %v5072_v12, 0.0  ;;  %v5071_v59 = vmax.f32 %v5035_v17, 0.0  ;;  %v5038_v37 = vadd.f32 %v13320_v3, %v4995_v13  ;;  %v11161_v10 = vpop.f32.mrf.mxu1  ;;  %5482 = vmatprep.mubr.f32.mxu1 %v13514_v44  ;;  %5575 = vmatprep.subr.mxu1 %v5220_v32  ;;  %v5235_v17 = vld [vmem:[#allocation3 + $0x61] sm:$0xff]  ;;  %v5244_v13 = vld [vmem:[#allocation3 + $0xa9] sm:$0xff]  ;;  %v4515_v57 = vpop.f32.mrf.mxu0 }
 0x308   : > { %v2832_v45 = vadd.f32 %v17303_v20, %v2398_v30  ;;  %v4562_v18 = vadd.f32 %v13490_v28, %v4128_v16  ;;  %v4130_v52 = vadd.f32 %v13282_v6, %v3696_v21  ;;  %5144 = vst [vmem:[#allocation3 + $0xdb] sm:$0xff] %v5108_v33  ;;  %vm17305_vm7 = vcmp.eq.s32.totalorder %v17304_v43, 1  ;;  %5576 = vmatpush1.msra.mxu1 %v5219_v63  ;;  %v5218_v28 = vld [vmem:[%s16979_s6 + $0xd8] sm:$0xff]  ;;  %v17306_v6 = vld [vmem:[#allocation94_spill] sm:$0xff]  ;;  %v17308_v62 = vld [vmem:[#allocation117_spill] sm:$0xff] }
 0x309   : > { %v5107_v41 = vsel %vm17305_vm7, %v5071_v59, 0.0  ;;  %v5074_v12 = vmax.f32 %v5038_v37, 0.0  ;;  %v5037_v19 = vadd.f32 %v13320_v3, %v4994_v11  ;;  %v4997_v31 = vadd.f32 %v11161_v10, %v4563_v39  ;;  %v17307_v16 = vld [vmem:[#allocation95_spill] sm:$0xff]  ;;  %v4929_v29 = vpop.f32.mrf.mxu1  ;;  %5429 = vmatmul.mubr.f32.gmra.mxu0 %v5235_v17  ;;  %5483 = vmatmul.mubr.f32.gmra.mxu1 %v5244_v13  ;;  %v17309_v39 = vld [vmem:[#allocation33_spill] sm:$0xff]  ;;  %v11100_v11 = vpop.f32.mrf.mxu0  ;;  %v17311_v20 = vld [vmem:[#allocation34_spill] sm:$0xff] }
 0x30a   : > { %v3698_v30 = vadd.f32 %v17306_v6, %v3264_v50  ;;  %v3266_v56 = vadd.f32 %v17307_v16, %v2832_v45  ;;  %v4565_v32 = vadd.f32 %v13509_v7, %v17308_v62  ;;  %5143 = vst [vmem:[#allocation3 + $0xd3] sm:$0xff] %v5107_v41  ;;  %v5217_v21 = vld [vmem:[%s16979_s6 + $0xd0] sm:$0xff]  ;;  %vm17310_vm6 = vcmp.eq.s32.totalorder %v17309_v39, 1  ;;  %5434 = vmatprep.mubr.f32.mxu0 %v13514_v44  ;;  %v5215_v13 = vld [vmem:[%s16979_s6 + $0xc0] sm:$0xff] }
 0x30b   : > { %v5110_v8 = vsel %vm17310_vm6, %v5074_v12, 0.0  ;;  %v5073_v63 = vmax.f32 %v5037_v19, 0.0  ;;  %v5040_v50 = vadd.f32 %v13320_v3, %v4997_v31  ;;  %v4996_v33 = vadd.f32 %v4929_v29, %v4562_v18  ;;  %5488 = vmatprep.mubr.f32.mxu1 %v13514_v44  ;;  %v11164_v37 = vpop.f32.mrf.mxu1  ;;  %5577 = vmatprep.subr.mxu1 %v5218_v28  ;;  %v5236_v18 = vld [vmem:[#allocation3 + $0x69] sm:$0xff]  ;;  %v5245_v19 = vld [vmem:[#allocation3 + $0xb1] sm:$0xff] }
 0x30c   : > { %v4564_v7 = vadd.f32 %v13531_v27, %v4130_v52  ;;  %v4132_v59 = vadd.f32 %v13295_v60, %v3698_v30  ;;  %5146 = vst [vmem:[#allocation3 + $0xeb] sm:$0xff] %v5110_v8  ;;  %vm17312_vm7 = vcmp.eq.s32.totalorder %v17311_v20, 1  ;;  %v4999_v12 = vadd.f32 %v11164_v37, %v4565_v32  ;;  %5578 = vmatpush1.msra.mxu1 %v5217_v21  ;;  %v5216_v27 = vld [vmem:[%s16979_s6 + $0xc8] sm:$0xff]  ;;  %v17313_v52 = vld [vmem:[#allocation96_spill] sm:$0xff]  ;;  %v17314_v28 = vld [vmem:[#allocation35_spill] sm:$0xff]  ;;  %v4525_v32 = vpop.f32.mrf.mxu0 }
 0x30d   : > { %v5109_v45 = vsel %vm17312_vm7, %v5073_v63, 0.0  ;;  %v5076_v10 = vmax.f32 %v5040_v50, 0.0  ;;  %v5039_v41 = vadd.f32 %v13320_v3, %v4996_v33  ;;  %v3700_v60 = vadd.f32 %v17313_v52, %v3266_v56  ;;  %v4939_v17 = vpop.f32.mrf.mxu1  ;;  %5435 = vmatmul.mubr.f32.gmra.mxu0 %v5236_v18  ;;  %5489 = vmatmul.mubr.f32.gmra.mxu1 %v5245_v19  ;;  %v17316_v29 = vld [vmem:[#allocation36_spill] sm:$0xff]  ;;  %v5213_v37 = vld [vmem:[%s16979_s6 + $0xb0] sm:$0xff] }
 0x30e   : > { %v4567_v31 = vadd.f32 %v11097_v55, %v13293_v24  ;;  %5145 = vst [vmem:[#allocation3 + $0xe3] sm:$0xff] %v5109_v45  ;;  %vm17315_vm6 = vcmp.eq.s32.totalorder %v17314_v28, 1  ;;  %v5042_v16 = vadd.f32 %v13320_v3, %v4999_v12  ;;  %v4998_v62 = vadd.f32 %v4939_v17, %v4564_v7  ;;  %5440 = vmatprep.mubr.f32.mxu0 %v13514_v44  ;;  %v5237_v33 = vld [vmem:[#allocation3 + $0x71] sm:$0xff]  ;;  %v5246_v7 = vld [vmem:[#allocation3 + $0xb9] sm:$0xff]  ;;  %v17320_v19 = vld [vmem:[#allocation38_spill] sm:$0xff] }
 0x30f   : > { %v5112_v6 = vsel %vm17315_vm6, %v5076_v10, 0.0  ;;  %v5075_v30 = vmax.f32 %v5039_v41, 0.0  ;;  %5494 = vmatprep.mubr.f32.mxu1 %v13514_v44  ;;  %v4566_v24 = vadd.f32 %v4515_v57, %v4132_v59  ;;  %v4134_v55 = vadd.f32 %v13308_v40, %v3700_v60  ;;  %v11167_v56 = vpop.f32.mrf.mxu1  ;;  %5579 = vmatprep.subr.mxu1 %v5216_v27  ;;  %v5214_v57 = vld [vmem:[%s16979_s6 + $0xb8] sm:$0xff]  ;;  %v17318_v45 = vld [vmem:[#allocation37_spill] sm:$0xff]  ;;  %v9945_v43 = vld [vmem:[%s16979_s6 + $0x6f0] sm:$0xff] }
 0x310   : > { %5148 = vst [vmem:[#allocation3 + $0xfb] sm:$0xff] %v5112_v6  ;;  %vm17317_vm7 = vcmp.eq.s32.totalorder %v17316_v29, 1  ;;  %v5078_v8 = vmax.f32 %v5042_v16, 0.0  ;;  %v5041_v63 = vadd.f32 %v13320_v3, %v4998_v62  ;;  %v5001_v50 = vadd.f32 %v11167_v56, %v4567_v31  ;;  %5580 = vmatpush1.msra.mxu1 %v5215_v13  ;;  %v5238_v17 = vld [vmem:[#allocation3 + $0x79] sm:$0xff]  ;;  %v5247_v13 = vld [vmem:[#allocation3 + $0xc1] sm:$0xff]  ;;  %v17322_v62 = vld [vmem:[#allocation39_spill] sm:$0xff] }
 0x311   : > { %v5111_v21 = vsel %vm17317_vm7, %v5075_v30, 0.0  ;;  %v4569_v40 = vadd.f32 %v11100_v11, %v13305_v9  ;;  %v4949_v59 = vpop.f32.mrf.mxu1  ;;  %5441 = vmatmul.mubr.f32.gmra.mxu0 %v5237_v33  ;;  %5495 = vmatmul.mubr.f32.gmra.mxu1 %v5246_v7  ;;  %vm17319_vm6 = vcmp.eq.s32.totalorder %v17318_v45, 1  ;;  %v4568_v9 = vadd.f32 %v4525_v32, %v4134_v55  ;;  %v5212_v6 = vld [vmem:[%s16979_s6 + $0xa8] sm:$0xff]  ;;  %v5211_v16 = vld [vmem:[%s16979_s6 + $0xa0] sm:$0xff]  ;;  %v5248_v7 = vld [vmem:[#allocation3 + $0xc9] sm:$0xff] }
 0x312   : > { %5147 = vst [vmem:[#allocation3 + $0xf3] sm:$0xff] %v5111_v21  ;;  %v5114_v10 = vsel %vm17319_vm6, %v5078_v8, 0.0  ;;  %v5077_v41 = vmax.f32 %v5041_v63, 0.0  ;;  %v5044_v12 = vadd.f32 %v13320_v3, %v5001_v50  ;;  %v5000_v18 = vadd.f32 %v4949_v59, %v4566_v24  ;;  %5446 = vmatprep.mubr.f32.mxu0 %v13514_v44  ;;  %5500 = vmatprep.mubr.f32.mxu1 %v13514_v44  ;;  %v17324_v21 = vld [vmem:[#allocation40_spill] sm:$0xff]  ;;  %v5239_v33 = vld [vmem:[#allocation3 + $0x81] sm:$0xff] }
 0x313   : > { %5150 = vst [vmem:[#allocation3 + $0x10b] sm:$0xff] %v5114_v10  ;;  %v11170_v11 = vpop.f32.mrf.mxu1  ;;  %5581 = vmatprep.subr.mxu1 %v5214_v57  ;;  %vm17321_vm7 = vcmp.eq.s32.totalorder %v17320_v19, 1  ;;  %vm17323_vm6 = vcmp.eq.s32.totalorder %v17322_v62, 1  ;;  %v5210_v57 = vld [vmem:[%s16979_s6 + $0x98] sm:$0xff] }
 0x314   : > { %v5113_v27 = vsel %vm17321_vm7, %v5077_v41, 0.0  ;;  %v5080_v52 = vmax.f32 %v5044_v12, 0.0  ;;  %v5043_v60 = vadd.f32 %v13320_v3, %v5000_v18  ;;  %v5003_v31 = vadd.f32 %v11170_v11, %v4569_v40  ;;  %5582 = vmatpush1.msra.mxu1 %v5213_v37  ;;  %v5209_v40 = vld [vmem:[%s16979_s6 + $0x90] sm:$0xff]  ;;  %v5249_v18 = vld [vmem:[#allocation3 + $0xd1] sm:$0xff] }
 0x315   : > { %5149 = vst [vmem:[#allocation3 + $0x103] sm:$0xff] %v5113_v27  ;;  %v4959_v30 = vpop.f32.mrf.mxu1  ;;  %5447 = vmatmul.mubr.f32.gmra.mxu0 %v5238_v17  ;;  %5501 = vmatmul.mubr.f32.gmra.mxu1 %v5247_v13  ;;  %vm17325_vm7 = vcmp.eq.s32.totalorder %v17324_v21, 1  ;;  %v5240_v12 = vld [vmem:[#allocation3 + $0x89] sm:$0xff]  ;;  %v5207_v11 = vld [vmem:[%s16979_s6 + $0x80] sm:$0xff]  ;;  %v5204_v17 = vld [vmem:[%s16979_s6 + $0x68] sm:$0xff] }
 0x316   : > { %v5116_v24 = vsel %vm17323_vm6, %v5080_v52, 0.0  ;;  %v5079_v55 = vmax.f32 %v5043_v60, 0.0  ;;  %v5046_v56 = vadd.f32 %v13320_v3, %v5003_v31  ;;  %v5002_v32 = vadd.f32 %v4959_v30, %v4568_v9  ;;  %5452 = vmatprep.mubr.f32.mxu0 %v13514_v44  ;;  %5506 = vmatprep.mubr.f32.mxu1 %v13514_v44  ;;  %v5208_v9 = vld [vmem:[%s16979_s6 + $0x88] sm:$0xff]  ;;  %v5241_v27 = vld [vmem:[#allocation3 + $0x91] sm:$0xff]  ;;  %v5205_v31 = vld [vmem:[%s16979_s6 + $0x70] sm:$0xff] }
 0x317   : > { %5152 = vst [vmem:[#allocation3 + $0x11b] sm:$0xff] %v5116_v24  ;;  %5583 = vmatprep.subr.mxu1 %v5212_v6  ;;  %v5250_v52 = vld [vmem:[#allocation3 + $0xd9] sm:$0xff]  ;;  %v5206_v60 = vld [vmem:[%s16979_s6 + $0x78] sm:$0xff]  ;;  %v5251_v6 = vld [vmem:[#allocation3 + $0xe1] sm:$0xff] }
 0x318   : > { %v5115_v8 = vsel %vm17325_vm7, %v5079_v55, 0.0  ;;  %v5082_v63 = vmax.f32 %v5046_v56, 0.0  ;;  %v5045_v50 = vadd.f32 %v13320_v3, %v5002_v32  ;;  %5584 = vmatpush1.msra.mxu1 %v5211_v16  ;;  %v17327_v3 = vld [vmem:[#allocation42_spill] sm:$0xff]  ;;  %v5242_v13 = vld [vmem:[#allocation3 + $0x99] sm:$0xff]  ;;  %v5202_v16 = vld [vmem:[%s16979_s6 + $0x58] sm:$0xff] }
 0x319   : > { %5151 = vst [vmem:[#allocation3 + $0x113] sm:$0xff] %v5115_v8  ;;  %5453 = vmatmul.mubr.f32.gmra.mxu0 %v5239_v33  ;;  %5507 = vmatmul.mubr.f32.gmra.mxu1 %v5248_v7  ;;  %vm17328_vm6 = vcmp.eq.s32.totalorder %v17327_v3, 1  ;;  %v5203_v30 = vld [vmem:[%s16979_s6 + $0x60] sm:$0xff]  ;;  %v5854_v24 = vld [vmem:[#allocation3 + $0x2] sm:$0xff]  ;;  %v5185_v5 = vld [vmem:[#allocation3 + $0xf0] sm:$0xff] }
 0x31a   : > { %v5118_v37 = vsel %vm1098_vm8, %v5082_v63, 0.0  ;;  %v5081_v10 = vmax.f32 %v5045_v50, 0.0  ;;  %5458 = vmatprep.mubr.f32.mxu0 %v13514_v44  ;;  %5512 = vmatprep.mubr.f32.mxu1 %v13514_v44  ;;  %v5252_v55 = vld [vmem:[#allocation3 + $0xe9] sm:$0xff]  ;;  %v5200_v8 = vld [vmem:[%s16979_s6 + $0x48] sm:$0xff]  ;;  %v5253_v33 = vld [vmem:[#allocation3 + $0xf1] sm:$0xff] }
 0x31b   : > { %5154 = vst [vmem:[#allocation3 + $0x12b] sm:$0xff] %v5118_v37  ;;  %5585 = vmatprep.subr.mxu1 %v5210_v57  ;;  %v5201_v56 = vld [vmem:[%s16979_s6 + $0x50] sm:$0xff]  ;;  %v9880_v63 = vld [vmem:[%s16979_s6 + $0x4e8] sm:$0xff]  ;;  %v5199_v7 = vld [vmem:[%s16979_s6 + $0x40] sm:$0xff] }
 0x31c   : > { %v5117_v41 = vsel %vm17328_vm6, %v5081_v10, 0.0  ;;  %5586 = vmatpush1.msra.mxu1 %v5209_v40  ;;  %v9881_v32 = vld [vmem:[%s16979_s6 + $0x4f0] sm:$0xff]  ;;  %v9879_v57 = vld [vmem:[%s16979_s6 + $0x4e0] sm:$0xff]  ;;  %v5198_v40 = vld [vmem:[%s16979_s6 + $0x38] sm:$0xff] }
 0x31d   : > { %5153 = vst [vmem:[#allocation3 + $0x123] sm:$0xff] %v5117_v41  ;;  %5459 = vmatmul.mubr.f32.gmra.mxu0 %v5240_v12  ;;  %5513 = vmatmul.mubr.f32.gmra.mxu1 %v5249_v18  ;;  %v5855_v50 = vld [vmem:[#allocation3 + $0xa] sm:$0xff]  ;;  %v5254_v41 = vld [vmem:[#allocation3 + $0xf9] sm:$0xff] }
 0x31e   : > { %5464 = vmatprep.mubr.f32.mxu0 %v13514_v44  ;;  %5518 = vmatprep.mubr.f32.mxu1 %v13514_v44  ;;  %v9878_v37 = vld [vmem:[%s16979_s6 + $0x4d8] sm:$0xff]  ;;  %v5197_v10 = vld [vmem:[%s16979_s6 + $0x30] sm:$0xff] }
 0x31f   : > { %5587 = vmatprep.subr.mxu1 %v5208_v9  ;;  %v13704_v12 = vld [vmem:[#allocation3 + $0x12] sm:$0xff]  ;;  %v9877_v18 = vld [vmem:[%s16979_s6 + $0x4d0] sm:$0xff]  ;;  %v5196_v9 = vld [vmem:[%s16979_s6 + $0x28] sm:$0xff] }
 0x320   : > { %5588 = vmatpush1.msra.mxu1 %v5207_v11  ;;  %v9876_v11 = vld [vmem:[%s16979_s6 + $0x4c8] sm:$0xff]  ;;  %v5884_v59 = vld [vmem:[#allocation3 + $0xf2] sm:$0xff]  ;;  %v5188_v34 = vld [vmem:[#allocation3 + $0x108] sm:$0xff] }
 0x321   : > { %5465 = vmatmul.mubr.f32.gmra.mxu0 %v5241_v27  ;;  %5519 = vmatmul.mubr.f32.gmra.mxu1 %v5250_v52  ;;  %v5195_v27 = vld [vmem:[%s16979_s6 + $0x20] sm:$0xff]  ;;  %v5255_v52 = vld [vmem:[#allocation3 + $0x101] sm:$0xff]  ;;  %v5189_v14 = vld [vmem:[#allocation3 + $0x110] sm:$0xff] }
 0x322   : > { %5470 = vmatprep.mubr.f32.mxu0 %v13514_v44  ;;  %5524 = vmatprep.mubr.f32.mxu1 %v13514_v44  ;;  %v5190_v49 = vld [vmem:[#allocation3 + $0x118] sm:$0xff] }
 0x323   : > { %5589 = vmatprep.subr.mxu1 %v5206_v60  ;;  %v13721_v60 = vld [vmem:[#allocation3 + $0x1a] sm:$0xff] }
 0x324   : > { %5590 = vmatpush1.msra.mxu1 %v5205_v31  ;;  %v9875_v31 = vld [vmem:[%s16979_s6 + $0x4c0] sm:$0xff] }
 0x325   : > { %5471 = vmatmul.mubr.f32.gmra.mxu0 %v5242_v13  ;;  %5525 = vmatmul.mubr.f32.gmra.mxu1 %v5251_v6  ;;  %v9874_v13 = vld [vmem:[%s16979_s6 + $0x4b8] sm:$0xff]  ;;  %v5193_v6 = vld [vmem:[%s16979_s6 + $0x10] sm:$0xff] }
 0x326   : > { %5530 = vmatprep.mubr.f32.mxu1 %v13514_v44  ;;  %5591 = vmatprep.subr.mxu1 %v5204_v17  ;;  %v5194_v17 = vld [vmem:[%s16979_s6 + $0x18] sm:$0xff] }
 0x327   : > { %5987 = vmatprep.mubr.f32.mxu0 %v13514_v44  ;;  %5592 = vmatpush1.msra.mxu1 %v5203_v30  ;;  %v5256_v30 = vld [vmem:[#allocation3 + $0x109] sm:$0xff] }
 0x328   : > { %5593 = vmatprep.subr.mxu1 %v5202_v16  ;;  %v13738_v16 = vld [vmem:[#allocation3 + $0x22] sm:$0xff] }
 0x329   : > { %5531 = vmatmul.mubr.f32.gmra.mxu1 %v5252_v55  ;;  %5988 = vmatmul.mubr.f32.vlgmr.msra.gmra.mxu0 %v5854_v24  ;;  %v9873_v24 = vld [vmem:[%s16979_s6 + $0x4b0] sm:$0xff]  ;;  %v5192_v55 = vld [vmem:[%s16979_s6 + $0x8] sm:$0xff] }
 0x32a   : > { %5536 = vmatprep.mubr.f32.mxu1 %v13514_v44  ;;  %5993 = vmatprep.mubr.f32.mxu0 %v13514_v44 }
 0x32b   : > { %5594 = vmatpush1.msra.mxu1 %v5201_v56  ;;  %6768 = vmatpush1.msra.mxu0 %v9881_v32  ;;  %v9872_v56 = vld [vmem:[%s16979_s6 + $0x4a8] sm:$0xff]  ;;  %v5191_v32 = vld [vmem:[%s16979_s6] sm:$0xff] }
 0x32c   : > { %5595 = vmatprep.subr.mxu1 %v5200_v8  ;;  %6769 = vmatprep.subr.mxu0 %v9880_v63  ;;  %v5257_v8 = vld [vmem:[#allocation3 + $0x111] sm:$0xff] }
 0x32d   : > { %5537 = vmatmul.mubr.f32.gmra.mxu1 %v5253_v33  ;;  %5994 = vmatmul.mubr.f32.gmra.mxu0 %v5855_v50  ;;  %v13755_v63 = vld [vmem:[#allocation3 + $0x2a] sm:$0xff]  ;;  %v9871_v50 = vld [vmem:[%s16979_s6 + $0x4a0] sm:$0xff] }
 0x32e   : > { %5542 = vmatprep.mubr.f32.mxu1 %v13514_v44  ;;  %5999 = vmatprep.mubr.f32.mxu0 %v13514_v44  ;;  %v9850_v33 = vld [vmem:[%s16979_s6 + $0x3f8] sm:$0xff] }
 0x32f   : > { %5596 = vmatpush1.msra.mxu1 %v5199_v7  ;;  %6770 = vmatpush1.msra.mxu0 %v9879_v57  ;;  %v9870_v7 = vld [vmem:[%s16979_s6 + $0x498] sm:$0xff]  ;;  %v5258_v57 = vld [vmem:[#allocation3 + $0x119] sm:$0xff] }
 0x330   : > { %5597 = vmatprep.subr.mxu1 %v5198_v40  ;;  %6771 = vmatprep.subr.mxu0 %v9878_v37  ;;  %v13769_v40 = vld [vmem:[#allocation3 + $0x32] sm:$0xff]  ;;  %v9869_v37 = vld [vmem:[%s16979_s6 + $0x490] sm:$0xff] }
 0x331   : > { %5543 = vmatmul.mubr.f32.gmra.mxu1 %v5254_v41  ;;  %6000 = vmatmul.mubr.f32.gmra.mxu0 %v13704_v12  ;;  %v9849_v41 = vld [vmem:[%s16979_s6 + $0x3f0] sm:$0xff] }
 0x332   : > { %5548 = vmatprep.mubr.f32.mxu1 %v13514_v44  ;;  %6005 = vmatprep.mubr.f32.mxu0 %v13514_v44 }
 0x333   : > { %5598 = vmatpush1.msra.mxu1 %v5197_v10  ;;  %6772 = vmatpush1.msra.mxu0 %v9877_v18  ;;  %v9868_v10 = vld [vmem:[%s16979_s6 + $0x488] sm:$0xff] }
 0x334   : > { %5599 = vmatprep.subr.mxu1 %v5196_v9  ;;  %6773 = vmatprep.subr.mxu0 %v9876_v11  ;;  %v13783_v18 = vld [vmem:[#allocation3 + $0x3a] sm:$0xff] }
 0x335   : > { %5549 = vmatmul.mubr.f32.gmra.mxu1 %v5255_v52  ;;  %6006 = vmatmul.mubr.f32.gmra.mxu0 %v13721_v60  ;;  %v9848_v9 = vld [vmem:[%s16979_s6 + $0x3e8] sm:$0xff]  ;;  %v9847_v11 = vld [vmem:[%s16979_s6 + $0x3e0] sm:$0xff] }
 0x336   : > { %5554 = vmatprep.mubr.f32.mxu1 %v13514_v44  ;;  %6011 = vmatprep.mubr.f32.mxu0 %v13514_v44  ;;  %v13798_v52 = vld [vmem:[#allocation3 + $0x42] sm:$0xff] }
 0x337   : > { %5600 = vmatpush1.msra.mxu1 %v5195_v27  ;;  %6774 = vmatpush1.msra.mxu0 %v9875_v31  ;;  %v9867_v27 = vld [vmem:[%s16979_s6 + $0x480] sm:$0xff]  ;;  %v9846_v31 = vld [vmem:[%s16979_s6 + $0x3d8] sm:$0xff] }
 0x338   : > { %5601 = vmatprep.subr.mxu1 %v5194_v17  ;;  %6775 = vmatprep.subr.mxu0 %v9874_v13  ;;  %v9866_v17 = vld [vmem:[%s16979_s6 + $0x478] sm:$0xff]  ;;  %v9845_v13 = vld [vmem:[%s16979_s6 + $0x3d0] sm:$0xff] }
 0x339   : > { %5555 = vmatmul.mubr.f32.gmra.mxu1 %v5256_v30  ;;  %6012 = vmatmul.mubr.f32.gmra.mxu0 %v13738_v16  ;;  %v9844_v30 = vld [vmem:[%s16979_s6 + $0x3c8] sm:$0xff] }
 0x33a   : > { %5560 = vmatprep.mubr.f32.mxu1 %v13514_v44  ;;  %6017 = vmatprep.mubr.f32.mxu0 %v13514_v44 }
 0x33b   : > { %5602 = vmatpush1.msra.mxu1 %v5193_v6  ;;  %6776 = vmatpush1.msra.mxu0 %v9873_v24  ;;  %v9865_v6 = vld [vmem:[%s16979_s6 + $0x470] sm:$0xff]  ;;  %v5157_v24 = vld [vmem:[#allocation3 + $0x10] sm:$0xff] }
 0x33c   : > { %5603 = vmatprep.subr.mxu1 %v5192_v55  ;;  %6777 = vmatprep.subr.mxu0 %v9872_v56  ;;  %v13819_v55 = vld [vmem:[#allocation3 + $0x4a] sm:$0xff]  ;;  %v9864_v56 = vld [vmem:[%s16979_s6 + $0x468] sm:$0xff] }
 0x33d   : > { %5561 = vmatmul.mubr.f32.gmra.mxu1 %v5257_v8  ;;  %6018 = vmatmul.mubr.f32.gmra.mxu0 %v13755_v63  ;;  %v9863_v8 = vld [vmem:[%s16979_s6 + $0x460] sm:$0xff] }
 0x33e   : > { %5566 = vmatprep.mubr.f32.mxu1 %v13514_v44  ;;  %6023 = vmatprep.mubr.f32.mxu0 %v13514_v44 }
 0x33f   : > { %5604 = vmatpush1.msra.mxu1 %v5191_v32  ;;  %6778 = vmatpush1.msra.mxu0 %v9871_v50  ;;  %v9843_v32 = vld [vmem:[%s16979_s6 + $0x3c0] sm:$0xff] }
 0x340   : > { %6345 = vmatprep.subr.mxu1 %v9850_v33  ;;  %6779 = vmatprep.subr.mxu0 %v9870_v7  ;;  %v5158_v50 = vld [vmem:[#allocation3 + $0x18] sm:$0xff]  ;;  %v9842_v7 = vld [vmem:[%s16979_s6 + $0x3b8] sm:$0xff] }
 0x341   : > { %5567 = vmatmul.mubr.f32.gmra.mxu1 %v5258_v57  ;;  %6024 = vmatmul.mubr.f32.gmra.mxu0 %v13769_v40  ;;  %v13833_v33 = vld [vmem:[#allocation3 + $0x52] sm:$0xff] }
 0x342   : > { %5637 = vmatprep.mubr.f32.mxu1 %v13514_v44  ;;  %6029 = vmatprep.mubr.f32.mxu0 %v13514_v44  ;;  %v9862_v57 = vld [vmem:[%s16979_s6 + $0x458] sm:$0xff] }
 0x343   : > { %6780 = vmatpush1.msra.mxu0 %v9869_v37  ;;  %v9841_v37 = vld [vmem:[%s16979_s6 + $0x3b0] sm:$0xff] }
 0x344   : > { %6781 = vmatprep.subr.mxu0 %v9868_v10  ;;  %v9861_v10 = vld [vmem:[%s16979_s6 + $0x450] sm:$0xff] }
 0x345   : > { %5638 = vmatmul.mubr.f32.vlgmr.msra.gmra.mxu1 %v13514_v44  ;;  %6030 = vmatmul.mubr.f32.gmra.mxu0 %v13783_v18 }
 0x346   : > { %6346 = vmatpush1.msra.mxu1 %v9849_v41  ;;  %5643 = vmatprep.mubr.f32.mxu1 %v13514_v44  ;;  %v5159_v41 = vld [vmem:[#allocation3 + $0x20] sm:$0xff] }
 0x347   : > { %6035 = vmatprep.mubr.f32.mxu0 %v13514_v44  ;;  %6347 = vmatprep.subr.mxu1 %v9848_v9  ;;  %v13850_v9 = vld [vmem:[#allocation3 + $0x5a] sm:$0xff] }
 0x348   : > { %6348 = vmatpush1.msra.mxu1 %v9847_v11  ;;  %6782 = vmatpush1.msra.mxu0 %v9867_v27  ;;  %v9840_v11 = vld [vmem:[%s16979_s6 + $0x3a8] sm:$0xff] }
 0x349   : > { %5644 = vmatmul.mubr.f32.gmra.mxu1 %v13514_v44  ;;  %6036 = vmatmul.mubr.f32.gmra.mxu0 %v13798_v52  ;;  %v9860_v27 = vld [vmem:[%s16979_s6 + $0x448] sm:$0xff] }
 0x34a   : > { %5649 = vmatprep.mubr.f32.mxu1 %v13514_v44  ;;  %6041 = vmatprep.mubr.f32.mxu0 %v13514_v44 }
 0x34b   : > { %6349 = vmatprep.subr.mxu1 %v9846_v31  ;;  %6783 = vmatprep.subr.mxu0 %v9866_v17  ;;  %v9839_v31 = vld [vmem:[%s16979_s6 + $0x3a0] sm:$0xff] }
 0x34c   : > { %6350 = vmatpush1.msra.mxu1 %v9845_v13  ;;  %6784 = vmatpush1.msra.mxu0 %v9865_v6  ;;  %v9859_v17 = vld [vmem:[%s16979_s6 + $0x440] sm:$0xff]  ;;  %v5160_v13 = vld [vmem:[#allocation3 + $0x28] sm:$0xff] }
 0x34d   : > { %5650 = vmatmul.mubr.f32.gmra.mxu1 %v5157_v24  ;;  %6042 = vmatmul.mubr.f32.gmra.mxu0 %v13819_v55  ;;  %v13867_v6 = vld [vmem:[#allocation3 + $0x62] sm:$0xff]  ;;  %v9858_v24 = vld [vmem:[%s16979_s6 + $0x438] sm:$0xff] }
 0x34e   : > { %5655 = vmatprep.mubr.f32.mxu1 %v13514_v44  ;;  %6047 = vmatprep.mubr.f32.mxu0 %v13514_v44 }
 0x34f   : > { %6351 = vmatprep.subr.mxu1 %v9844_v30  ;;  %6785 = vmatprep.subr.mxu0 %v9864_v56  ;;  %v9838_v30 = vld [vmem:[%s16979_s6 + $0x398] sm:$0xff]  ;;  %v9837_v56 = vld [vmem:[%s16979_s6 + $0x390] sm:$0xff] }
 0x350   : > { %6352 = vmatpush1.msra.mxu1 %v9843_v32  ;;  %6786 = vmatpush1.msra.mxu0 %v9863_v8  ;;  %v9857_v32 = vld [vmem:[%s16979_s6 + $0x430] sm:$0xff]  ;;  %v5161_v8 = vld [vmem:[#allocation3 + $0x30] sm:$0xff] }
 0x351   : > { %5656 = vmatmul.mubr.f32.gmra.mxu1 %v5158_v50  ;;  %6048 = vmatmul.mubr.f32.gmra.mxu0 %v13833_v33  ;;  %v13884_v50 = vld [vmem:[#allocation3 + $0x6a] sm:$0xff] }
 0x352   : > { %5661 = vmatprep.mubr.f32.mxu1 %v13514_v44  ;;  %6053 = vmatprep.mubr.f32.mxu0 %v13514_v44 }
 0x353   : > { %6353 = vmatprep.subr.mxu1 %v9842_v7  ;;  %6787 = vmatprep.subr.mxu0 %v9862_v57  ;;  %v9836_v7 = vld [vmem:[%s16979_s6 + $0x388] sm:$0xff] }
 0x354   : > { %6354 = vmatpush1.msra.mxu1 %v9841_v37  ;;  %6788 = vmatpush1.msra.mxu0 %v9861_v10  ;;  %v9856_v57 = vld [vmem:[%s16979_s6 + $0x428] sm:$0xff]  ;;  %v9835_v37 = vld [vmem:[%s16979_s6 + $0x380] sm:$0xff] }
 0x355   : > { %5662 = vmatmul.mubr.f32.gmra.mxu1 %v5159_v41  ;;  %6054 = vmatmul.mubr.f32.gmra.mxu0 %v13850_v9  ;;  %v9855_v10 = vld [vmem:[%s16979_s6 + $0x420] sm:$0xff] }
 0x356   : > { %5667 = vmatprep.mubr.f32.mxu1 %v13514_v44  ;;  %6059 = vmatprep.mubr.f32.mxu0 %v13514_v44  ;;  %v5162_v41 = vld [vmem:[#allocation3 + $0x38] sm:$0xff] }
 0x357   : > { %6355 = vmatprep.subr.mxu1 %v9840_v11  ;;  %6789 = vmatprep.subr.mxu0 %v9860_v27  ;;  %v13901_v11 = vld [vmem:[#allocation3 + $0x72] sm:$0xff] }
 0x358   : > { %6356 = vmatpush1.msra.mxu1 %v9839_v31  ;;  %6790 = vmatpush1.msra.mxu0 %v9859_v17  ;;  %v9834_v27 = vld [vmem:[%s16979_s6 + $0x378] sm:$0xff]  ;;  %v9833_v17 = vld [vmem:[%s16979_s6 + $0x370] sm:$0xff] }
 0x359   : > { %5668 = vmatmul.mubr.f32.gmra.mxu1 %v5160_v13  ;;  %6060 = vmatmul.mubr.f32.gmra.mxu0 %v13867_v6  ;;  %v9854_v31 = vld [vmem:[%s16979_s6 + $0x418] sm:$0xff]  ;;  %v9853_v13 = vld [vmem:[%s16979_s6 + $0x410] sm:$0xff] }
 0x35a   : > { %5673 = vmatprep.mubr.f32.mxu1 %v13514_v44  ;;  %6065 = vmatprep.mubr.f32.mxu0 %v13514_v44 }
 0x35b   : > { %6357 = vmatprep.subr.mxu1 %v9838_v30  ;;  %6791 = vmatprep.subr.mxu0 %v9858_v24  ;;  %v5163_v30 = vld [vmem:[#allocation3 + $0x40] sm:$0xff] }
 0x35c   : > { %6358 = vmatpush1.msra.mxu1 %v9837_v56  ;;  %6792 = vmatpush1.msra.mxu0 %v9857_v32  ;;  %v13918_v24 = vld [vmem:[#allocation3 + $0x7a] sm:$0xff] }
 0x35d   : > { %5674 = vmatmul.mubr.f32.gmra.mxu1 %v5161_v8  ;;  %6066 = vmatmul.mubr.f32.gmra.mxu0 %v13884_v50  ;;  %v9832_v56 = vld [vmem:[%s16979_s6 + $0x368] sm:$0xff]  ;;  %v9831_v8 = vld [vmem:[%s16979_s6 + $0x360] sm:$0xff] }
 0x35e   : > { %5679 = vmatprep.mubr.f32.mxu1 %v13514_v44  ;;  %6071 = vmatprep.mubr.f32.mxu0 %v13514_v44  ;;  %v9852_v32 = vld [vmem:[%s16979_s6 + $0x408] sm:$0xff] }
 0x35f   : > { %6359 = vmatprep.subr.mxu1 %v9836_v7  ;;  %6793 = vmatprep.subr.mxu0 %v9856_v57  ;;  %v9851_v7 = vld [vmem:[%s16979_s6 + $0x400] sm:$0xff]  ;;  %v5164_v57 = vld [vmem:[#allocation3 + $0x48] sm:$0xff] }
 0x360   : > { %6360 = vmatpush1.msra.mxu1 %v9835_v37  ;;  %6794 = vmatpush1.msra.mxu0 %v9855_v10  ;;  %v13935_v37 = vld [vmem:[#allocation3 + $0x82] sm:$0xff]  ;;  %v9830_v10 = vld [vmem:[%s16979_s6 + $0x358] sm:$0xff] }
 0x361   : > { %5680 = vmatmul.mubr.f32.gmra.mxu1 %v5162_v41  ;;  %6072 = vmatmul.mubr.f32.gmra.mxu0 %v13901_v11  ;;  %v9946_v41 = vld [vmem:[%s16979_s6 + $0x6f8] sm:$0xff] }
 0x362   : > { %5685 = vmatprep.mubr.f32.mxu1 %v13514_v44  ;;  %6077 = vmatprep.mubr.f32.mxu0 %v13514_v44 }
 0x363   : > { %6361 = vmatprep.subr.mxu1 %v9834_v27  ;;  %6795 = vmatprep.subr.mxu0 %v9854_v31  ;;  %v9829_v27 = vld [vmem:[%s16979_s6 + $0x350] sm:$0xff]  ;;  %v5165_v31 = vld [vmem:[#allocation3 + $0x50] sm:$0xff] }
 0x364   : > { %6362 = vmatpush1.msra.mxu1 %v9833_v17  ;;  %6796 = vmatpush1.msra.mxu0 %v9853_v13  ;;  %v13949_v17 = vld [vmem:[#allocation3 + $0x8a] sm:$0xff]  ;;  %v9828_v13 = vld [vmem:[%s16979_s6 + $0x348] sm:$0xff] }
 0x365   : > { %5686 = vmatmul.mubr.f32.gmra.mxu1 %v5163_v30  ;;  %6078 = vmatmul.mubr.f32.gmra.mxu0 %v13918_v24  ;;  %v9827_v30 = vld [vmem:[%s16979_s6 + $0x340] sm:$0xff] }
 0x366   : > { %5691 = vmatprep.mubr.f32.mxu1 %v13514_v44  ;;  %6083 = vmatprep.mubr.f32.mxu0 %v13514_v44 }
 0x367   : > { %6363 = vmatprep.subr.mxu1 %v9832_v56  ;;  %6797 = vmatprep.subr.mxu0 %v9852_v32  ;;  %v5166_v56 = vld [vmem:[#allocation3 + $0x58] sm:$0xff] }
 0x368   : > { %6364 = vmatpush1.msra.mxu1 %v9831_v8  ;;  %6798 = vmatpush1.msra.mxu0 %v9851_v7  ;;  %v13960_v32 = vld [vmem:[#allocation3 + $0x92] sm:$0xff]  ;;  %v9825_v7 = vld [vmem:[%s16979_s6 + $0x330] sm:$0xff] }
 0x369   : > { %5692 = vmatmul.mubr.f32.gmra.mxu1 %v5164_v57  ;;  %6084 = vmatmul.mubr.f32.gmra.mxu0 %v13935_v37  ;;  %v9826_v8 = vld [vmem:[%s16979_s6 + $0x338] sm:$0xff]  ;;  %v5167_v57 = vld [vmem:[#allocation3 + $0x60] sm:$0xff] }
 0x36a   : > { %5697 = vmatprep.mubr.f32.mxu1 %v13514_v44  ;;  %6089 = vmatprep.mubr.f32.mxu0 %v13514_v44 }
 0x36b   : > { %6365 = vmatprep.subr.mxu1 %v9830_v10  ;;  %7611 = vmatprep.subr.mxu0 %v9946_v41  ;;  %v13971_v10 = vld [vmem:[#allocation3 + $0x9a] sm:$0xff] }
 0x36c   : > { %6366 = vmatpush1.msra.mxu1 %v9829_v27  ;;  %v9824_v41 = vld [vmem:[%s16979_s6 + $0x328] sm:$0xff]  ;;  %v9823_v27 = vld [vmem:[%s16979_s6 + $0x320] sm:$0xff] }
 0x36d   : > { %5698 = vmatmul.mubr.f32.gmra.mxu1 %v5165_v31  ;;  %6090 = vmatmul.mubr.f32.gmra.mxu0 %v13949_v17  ;;  %v5168_v31 = vld [vmem:[#allocation3 + $0x68] sm:$0xff] }
 0x36e   : > { %5703 = vmatprep.mubr.f32.mxu1 %v13514_v44  ;;  %6095 = vmatprep.mubr.f32.mxu0 %v13514_v44 }
 0x36f   : > { %6367 = vmatprep.subr.mxu1 %v9828_v13  ;;  %v5874_v13 = vld [vmem:[#allocation3 + $0xa2] sm:$0xff] }
 0x370   : > { %6368 = vmatpush1.msra.mxu1 %v9827_v30  ;;  %v9822_v30 = vld [vmem:[%s16979_s6 + $0x318] sm:$0xff] }
 0x371   : > { %5704 = vmatmul.mubr.f32.gmra.mxu1 %v5166_v56  ;;  %6096 = vmatmul.mubr.f32.gmra.mxu0 %v13960_v32  ;;  %v9821_v56 = vld [vmem:[%s16979_s6 + $0x310] sm:$0xff] }
 0x372   : > { %5709 = vmatprep.mubr.f32.mxu1 %v13514_v44  ;;  %6101 = vmatprep.mubr.f32.mxu0 %v13514_v44 }
 0x373   : > { %6369 = vmatprep.subr.mxu1 %v9826_v8  ;;  %v5169_v8 = vld [vmem:[#allocation3 + $0x70] sm:$0xff] }
 0x374   : > { %6370 = vmatpush1.msra.mxu1 %v9825_v7  ;;  %v5875_v7 = vld [vmem:[#allocation3 + $0xaa] sm:$0xff] }
 0x375   : > { %5710 = vmatmul.mubr.f32.gmra.mxu1 %v5167_v57  ;;  %6102 = vmatmul.mubr.f32.gmra.mxu0 %v13971_v10  ;;  %v9820_v57 = vld [vmem:[%s16979_s6 + $0x308] sm:$0xff] }
 0x376   : > { %5715 = vmatprep.mubr.f32.mxu1 %v13514_v44  ;;  %6107 = vmatprep.mubr.f32.mxu0 %v13514_v44 }
 0x377   : > { %6371 = vmatprep.subr.mxu1 %v9824_v41  ;;  %v9819_v41 = vld [vmem:[%s16979_s6 + $0x300] sm:$0xff] }
 0x378   : > { %6372 = vmatpush1.msra.mxu1 %v9823_v27  ;;  %v5170_v27 = vld [vmem:[#allocation3 + $0x78] sm:$0xff] }
 0x379   : > { %5716 = vmatmul.mubr.f32.gmra.mxu1 %v5168_v31  ;;  %6108 = vmatmul.mubr.f32.gmra.mxu0 %v5874_v13  ;;  %v5876_v31 = vld [vmem:[#allocation3 + $0xb2] sm:$0xff] }
 0x37a   : > { %5721 = vmatprep.mubr.f32.mxu1 %v13514_v44  ;;  %6113 = vmatprep.mubr.f32.mxu0 %v13514_v44  ;;  %v9914_v13 = vld [vmem:[%s16979_s6 + $0x5f8] sm:$0xff] }
 0x37b   : > { %6373 = vmatprep.subr.mxu1 %v9822_v30  ;;  %v5171_v30 = vld [vmem:[#allocation3 + $0x80] sm:$0xff] }
 0x37c   : > { %6374 = vmatpush1.msra.mxu1 %v9821_v56  ;;  %v5877_v56 = vld [vmem:[#allocation3 + $0xba] sm:$0xff] }
 0x37d   : > { %5722 = vmatmul.mubr.f32.gmra.mxu1 %v5169_v8  ;;  %6114 = vmatmul.mubr.f32.gmra.mxu0 %v5875_v7  ;;  %v5172_v8 = vld [vmem:[#allocation3 + $0x88] sm:$0xff] }
 0x37e   : > { %5727 = vmatprep.mubr.f32.mxu1 %v13514_v44  ;;  %6119 = vmatprep.mubr.f32.mxu0 %v13514_v44  ;;  %v5878_v7 = vld [vmem:[#allocation3 + $0xc2] sm:$0xff] }
 0x37f   : > { %6375 = vmatprep.subr.mxu1 %v9820_v57  ;;  %v14005_v57 = vld [vmem:[#allocation3] sm:$0xff] }
 0x380   : > { %6376 = vmatpush1.msra.mxu1 %v9819_v41  ;;  %v5173_v41 = vld [vmem:[#allocation3 + $0x90] sm:$0xff] }
 0x381   : > { %5728 = vmatmul.mubr.f32.gmra.mxu1 %v5170_v27  ;;  %6120 = vmatmul.mubr.f32.gmra.mxu0 %v5876_v31  ;;  %v5879_v27 = vld [vmem:[#allocation3 + $0xca] sm:$0xff]  ;;  %v5174_v31 = vld [vmem:[#allocation3 + $0x98] sm:$0xff] }
 0x382   : > { %5733 = vmatprep.mubr.f32.mxu1 %v13514_v44  ;;  %6125 = vmatprep.mubr.f32.mxu0 %v13514_v44 }
 0x383   : > { %7189 = vmatprep.subr.mxu1 %v9914_v13  ;;  %v14011_v13 = vpop.f32.mrf.mxu0 }
 0x385   : > { %5734 = vmatmul.mubr.f32.gmra.mxu1 %v5171_v30  ;;  %6126 = vmatmul.mubr.f32.gmra.mxu0 %v5877_v56  ;;  %v5175_v30 = vld [vmem:[#allocation3 + $0xa0] sm:$0xff] }
 0x386   : > { %5739 = vmatprep.mubr.f32.mxu1 %v13514_v44  ;;  %6131 = vmatprep.mubr.f32.mxu0 %v13514_v44  ;;  %v5880_v44 = vld [vmem:[#allocation3 + $0xd2] sm:$0xff]  ;;  %v5881_v56 = vld [vmem:[#allocation3 + $0xda] sm:$0xff] }
 0x389   : > { %5740 = vmatmul.mubr.f32.gmra.mxu1 %v5172_v8  ;;  %6132 = vmatmul.mubr.f32.gmra.mxu0 %v5878_v7  ;;  %v14015_v8 = vpop.f32.mrf.mxu0  ;;  %v5176_v7 = vld [vmem:[#allocation3 + $0xa8] sm:$0xff] }
 0x38a   : > { %5745 = vmatprep.mubr.f32.mxu1 %v14005_v57  ;;  %6137 = vmatprep.mubr.f32.mxu0 %v14005_v57 }
 0x38d   : > { %5746 = vmatmul.mubr.f32.gmra.mxu1 %v5173_v41  ;;  %6138 = vmatmul.mubr.f32.gmra.mxu0 %v5879_v27  ;;  %v5882_v41 = vld [vmem:[#allocation3 + $0xe2] sm:$0xff]  ;;  %v14019_v27 = vpop.f32.mrf.mxu0 }
 0x38e   : > { %5751 = vmatprep.mubr.f32.mxu1 %v14005_v57  ;;  %6143 = vmatprep.mubr.f32.mxu0 %v14005_v57 }
 0x391   : > { %5752 = vmatmul.mubr.f32.gmra.mxu1 %v5174_v31  ;;  %6144 = vmatmul.mubr.f32.gmra.mxu0 %v5880_v44  ;;  %v5177_v31 = vld [vmem:[#allocation3 + $0xb0] sm:$0xff] }
 0x392   : > { %5757 = vmatprep.mubr.f32.mxu1 %v14005_v57  ;;  %6149 = vmatprep.mubr.f32.mxu0 %v14005_v57  ;;  %v5883_v44 = vld [vmem:[#allocation3 + $0xea] sm:$0xff] }
 0x395   : > { %5758 = vmatmul.mubr.f32.gmra.mxu1 %v5175_v30  ;;  %6150 = vmatmul.mubr.f32.gmra.mxu0 %v5881_v56  ;;  %v14023_v30 = vpop.f32.mrf.mxu0  ;;  %v5178_v56 = vld [vmem:[#allocation3 + $0xb8] sm:$0xff] }
 0x396   : > { %5763 = vmatprep.mubr.f32.mxu1 %v14005_v57  ;;  %6155 = vmatprep.mubr.f32.mxu0 %v14005_v57 }
 0x399   : > { %5764 = vmatmul.mubr.f32.gmra.mxu1 %v5176_v7  ;;  %6156 = vmatmul.mubr.f32.gmra.mxu0 %v5882_v41 }
 0x39a   : > { %5769 = vmatprep.mubr.f32.mxu1 %v14005_v57  ;;  %6161 = vmatprep.mubr.f32.mxu0 %v14005_v57 }
 0x39d   : > { %5770 = vmatmul.mubr.f32.gmra.mxu1 %v5177_v31  ;;  %6162 = vmatmul.mubr.f32.gmra.mxu0 %v5883_v44  ;;  %v5179_v31 = vld [vmem:[#allocation3 + $0xc0] sm:$0xff] }
 0x39e   : > { %5775 = vmatprep.mubr.f32.mxu1 %v14005_v57  ;;  %6167 = vmatprep.mubr.f32.mxu0 %v14005_v57  ;;  %v5885_v44 = vld [vmem:[#allocation3 + $0xfa] sm:$0xff] }
 0x3a1   : > { %v14027_v7 = vpop.f32.mrf.mxu0  ;;  %5776 = vmatmul.mubr.f32.gmra.mxu1 %v5178_v56  ;;  %6168 = vmatmul.mubr.f32.gmra.mxu0 %v5884_v59  ;;  %v5180_v56 = vld [vmem:[#allocation3 + $0xc8] sm:$0xff] }
 0x3a2   : > { %5781 = vmatprep.mubr.f32.mxu1 %v14005_v57  ;;  %6173 = vmatprep.mubr.f32.mxu0 %v14005_v57  ;;  %v5886_v59 = vld [vmem:[#allocation3 + $0x102] sm:$0xff] }
 0x3a3   : > { %v14031_v41 = vpop.f32.mrf.mxu0 }
 0x3a5   : > { %v14033_v3 = vpop.f32.mrf.mxu0  ;;  %5782 = vmatmul.mubr.f32.gmra.mxu1 %v5179_v31  ;;  %6174 = vmatmul.mubr.f32.gmra.mxu0 %v5885_v44  ;;  %v5181_v31 = vld [vmem:[#allocation3 + $0xd0] sm:$0xff] }
 0x3a6   : > { %5787 = vmatprep.mubr.f32.mxu1 %v14005_v57  ;;  %6179 = vmatprep.mubr.f32.mxu0 %v14005_v57  ;;  %v5887_v44 = vld [vmem:[#allocation3 + $0x10a] sm:$0xff] }
 0x3a7   : > { %v14037_v62 = vpop.f32.mrf.mxu0 }
 0x3a9   : > { %v14039_v21 = vpop.f32.mrf.mxu0  ;;  %5788 = vmatmul.mubr.f32.gmra.mxu1 %v5180_v56  ;;  %6180 = vmatmul.mubr.f32.gmra.mxu0 %v5886_v59  ;;  %v5182_v56 = vld [vmem:[#allocation3 + $0xd8] sm:$0xff] }
 0x3aa   : > { %5793 = vmatprep.mubr.f32.mxu1 %v14005_v57  ;;  %6185 = vmatprep.mubr.f32.mxu0 %v14005_v57  ;;  %v5888_v59 = vld [vmem:[#allocation3 + $0x112] sm:$0xff] }
 0x3ab   : > { %v14043_v45 = vpop.f32.mrf.mxu0 }
 0x3ad   : > { %v14045_v19 = vpop.f32.mrf.mxu0  ;;  %5794 = vmatmul.mubr.f32.gmra.mxu1 %v5181_v31  ;;  %6186 = vmatmul.mubr.f32.gmra.mxu0 %v5887_v44  ;;  %v5183_v31 = vld [vmem:[#allocation3 + $0xe0] sm:$0xff] }
 0x3ae   : > { %5799 = vmatprep.mubr.f32.mxu1 %v14005_v57  ;;  %6191 = vmatprep.mubr.f32.mxu0 %v14005_v57  ;;  %v5889_v44 = vld [vmem:[#allocation3 + $0x11a] sm:$0xff] }
 0x3af   : > { %v14049_v28 = vpop.f32.mrf.mxu0 }
 0x3b1   : > { %v14051_v29 = vpop.f32.mrf.mxu0  ;;  %5800 = vmatmul.mubr.f32.gmra.mxu1 %v5182_v56  ;;  %6192 = vmatmul.mubr.f32.gmra.mxu0 %v5888_v59  ;;  %v5184_v56 = vld [vmem:[#allocation3 + $0xe8] sm:$0xff]  ;;  %v6698_v59 = vld [vmem:[#allocation3 + $0x13] sm:$0xff] }
 0x3b2   : > { %5805 = vmatprep.mubr.f32.mxu1 %v14005_v57  ;;  %6197 = vmatprep.mubr.f32.mxu0 %v14005_v57 }
 0x3b3   : > { %v14055_v39 = vpop.f32.mrf.mxu0 }
 0x3b5   : > { %v14057_v20 = vpop.f32.mrf.mxu0  ;;  %5806 = vmatmul.mubr.f32.gmra.mxu1 %v5183_v31  ;;  %6198 = vmatmul.mubr.f32.gmra.mxu0 %v5889_v44  ;;  %v9944_v31 = vld [vmem:[%s16979_s6 + $0x6e8] sm:$0xff] }
 0x3b6   : > { %5811 = vmatprep.mubr.f32.mxu1 %v14005_v57  ;;  %6831 = vmatprep.mubr.f32.mxu0 %v14005_v57 }
 0x3b7   : > { %v14061_v36 = vpop.f32.mrf.mxu0 }
 0x3b9   : > { %v14066_v2 = vpop.f32.mrf.mxu0  ;;  %5812 = vmatmul.mubr.f32.gmra.mxu1 %v5184_v56  ;;  %6832 = vmatmul.mubr.f32.vlgmr.msra.gmra.mxu0 %v6698_v59  ;;  %v9942_v59 = vld [vmem:[%s16979_s6 + $0x6d8] sm:$0xff] }
 0x3ba   : > { %5817 = vmatprep.mubr.f32.mxu1 %v14005_v57  ;;  %6837 = vmatprep.mubr.f32.mxu0 %v14005_v57 }
 0x3bb   : > { %v14073_v44 = vpop.f32.mrf.mxu0  ;;  %7612 = vmatpush1.msra.mxu0 %v9945_v43 }
 0x3bc   : > { %7613 = vmatprep.subr.mxu0 %v9944_v31  ;;  %v5186_v31 = vld [vmem:[#allocation3 + $0xf8] sm:$0xff] }
 0x3bd   : > { %v14078_v56 = vpop.f32.mrf.mxu0  ;;  %5818 = vmatmul.mubr.f32.gmra.mxu1 %v5185_v5  ;;  %6838 = vmatmul.mubr.f32.gmra.mxu0 %v6699_v1  ;;  %v9940_v1 = vld [vmem:[%s16979_s6 + $0x6c8] sm:$0xff] }
 0x3be   : > { %5823 = vmatprep.mubr.f32.mxu1 %v14005_v57  ;;  %6843 = vmatprep.mubr.f32.mxu0 %v14005_v57 }
 0x3bf   : > { %v14085_v43 = vpop.f32.mrf.mxu0  ;;  %7614 = vmatpush1.msra.mxu0 %v9943_v0 }
 0x3c0   : > { %7615 = vmatprep.subr.mxu0 %v9942_v59  ;;  %v5187_v59 = vld [vmem:[#allocation3 + $0x100] sm:$0xff] }
 0x3c1   : > { %v14090_v5 = vpop.f32.mrf.mxu0  ;;  %5824 = vmatmul.mubr.f32.gmra.mxu1 %v5186_v31  ;;  %6844 = vmatmul.mubr.f32.gmra.mxu0 %v6700_v47 }
 0x3c2   : > { %5829 = vmatprep.mubr.f32.mxu1 %v14005_v57  ;;  %6849 = vmatprep.mubr.f32.mxu0 %v14005_v57 }
 0x3c3   : > { %v14097_v0 = vpop.f32.mrf.mxu0  ;;  %7616 = vmatpush1.msra.mxu0 %v9941_v51 }
 0x3c4   : > { %7617 = vmatprep.subr.mxu0 %v9940_v1 }
 0x3c5   : > { %v14102_v31 = vpop.f32.mrf.mxu0  ;;  %v14104_v47 = vpop.f32.mrf.mxu1  ;;  %5830 = vmatmul.mubr.f32.gmra.mxu1 %v5187_v59  ;;  %6850 = vmatmul.mubr.f32.gmra.mxu0 %v6701_v35  ;;  %v9937_v35 = vld [vmem:[%s16979_s6 + $0x6b0] sm:$0xff] }
 0x3c6   : > { %17329 = vst [vmem:[#allocation48_spill] sm:$0xff] %v14104_v47  ;;  %5835 = vmatprep.mubr.f32.mxu1 %v14005_v57  ;;  %6855 = vmatprep.mubr.f32.mxu0 %v14005_v57 }
 0x3c7   : > { %v14111_v51 = vpop.f32.mrf.mxu0  ;;  %v14113_v1 = vpop.f32.mrf.mxu1  ;;  %7618 = vmatpush1.msra.mxu0 %v9939_v15 }
 0x3c8   : > { %17330 = vst [vmem:[#allocation47_spill] sm:$0xff] %v14113_v1  ;;  %7619 = vmatprep.subr.mxu0 %v9938_v54 }
 0x3c9   : > { %v14118_v59 = vpop.f32.mrf.mxu0  ;;  %v14120_v38 = vpop.f32.mrf.mxu1  ;;  %5836 = vmatmul.mubr.f32.gmra.mxu1 %v5188_v34  ;;  %6856 = vmatmul.mubr.f32.gmra.mxu0 %v6702_v22  ;;  %v9935_v22 = vld [vmem:[%s16979_s6 + $0x6a0] sm:$0xff] }
 0x3ca   : > { %17331 = vst [vmem:[#allocation72_spill] sm:$0xff] %v14120_v38  ;;  %5841 = vmatprep.mubr.f32.mxu1 %v14005_v57  ;;  %6861 = vmatprep.mubr.f32.mxu0 %v14005_v57 }
 0x3cb   : > { %v14127_v15 = vpop.f32.mrf.mxu0  ;;  %v14129_v54 = vpop.f32.mrf.mxu1  ;;  %7620 = vmatpush1.msra.mxu0 %v9937_v35 }
 0x3cc   : > { %17332 = vst [vmem:[#allocation73_spill] sm:$0xff] %v14129_v54  ;;  %7621 = vmatprep.subr.mxu0 %v9936_v48 }
 0x3cd   : > { %v14134_v34 = vpop.f32.mrf.mxu0  ;;  %v14136_v58 = vpop.f32.mrf.mxu1  ;;  %5842 = vmatmul.mubr.f32.gmra.mxu1 %v5189_v14  ;;  %6862 = vmatmul.mubr.f32.gmra.mxu0 %v6703_v61  ;;  %v9933_v61 = vld [vmem:[%s16979_s6 + $0x690] sm:$0xff] }
 0x3ce   : > { %17333 = vst [vmem:[#allocation97_spill] sm:$0xff] %v14136_v58  ;;  %5847 = vmatprep.mubr.f32.mxu1 %v14005_v57  ;;  %6867 = vmatprep.mubr.f32.mxu0 %v14005_v57 }
 0x3cf   : > { %v14143_v35 = vpop.f32.mrf.mxu0  ;;  %v14145_v48 = vpop.f32.mrf.mxu1  ;;  %7622 = vmatpush1.msra.mxu0 %v9935_v22 }
 0x3d0   : > { %17334 = vst [vmem:[#allocation104_spill] sm:$0xff] %v14145_v48  ;;  %7623 = vmatprep.subr.mxu0 %v9934_v4 }
 0x3d1   : > { %v14150_v14 = vpop.f32.mrf.mxu0  ;;  %v14152_v46 = vpop.f32.mrf.mxu1  ;;  %5848 = vmatmul.mubr.f32.gmra.mxu1 %v5190_v49  ;;  %6868 = vmatmul.mubr.f32.gmra.mxu0 %v6704_v42  ;;  %v9912_v42 = vld [vmem:[%s16979_s6 + $0x5e8] sm:$0xff] }
 0x3d2   : > { %17335 = vst [vmem:[#allocation50_spill] sm:$0xff] %v14152_v46  ;;  %6409 = vmatprep.mubr.f32.mxu1 %v14005_v57  ;;  %6873 = vmatprep.mubr.f32.mxu0 %v14005_v57 }
 0x3d3   : > { %v14159_v22 = vpop.f32.mrf.mxu0  ;;  %v14161_v4 = vpop.f32.mrf.mxu1  ;;  %7624 = vmatpush1.msra.mxu0 %v9933_v61  ;;  %v9931_v61 = vld [vmem:[%s16979_s6 + $0x680] sm:$0xff] }
 0x3d4   : > { %17336 = vst [vmem:[#allocation49_spill] sm:$0xff] %v14161_v4  ;;  %7625 = vmatprep.subr.mxu0 %v9932_v53  ;;  %v9911_v4 = vld [vmem:[%s16979_s6 + $0x5e0] sm:$0xff] }
 0x3d5   : > { %v14169_v49 = vpop.f32.mrf.mxu0  ;;  %v14171_v23 = vpop.f32.mrf.mxu1  ;;  %6410 = vmatmul.mubr.f32.vlgmr.msra.gmra.mxu1 %v13704_v12  ;;  %6874 = vmatmul.mubr.f32.gmra.mxu0 %v6705_v26  ;;  %v6706_v12 = vld [vmem:[#allocation3 + $0x53] sm:$0xff] }
 0x3d6   : > { %17337 = vst [vmem:[#allocation107_spill] sm:$0xff] %v14171_v23  ;;  %7190 = vmatpush1.msra.mxu1 %v9913_v25  ;;  %6415 = vmatprep.mubr.f32.mxu1 %v14005_v57  ;;  %v9910_v26 = vld [vmem:[%s16979_s6 + $0x5d8] sm:$0xff] }
 0x3d7   : > { %v14181_v46 = vpop.f32.mrf.mxu0  ;;  %v14183_v53 = vpop.f32.mrf.mxu1  ;;  %6879 = vmatprep.mubr.f32.mxu0 %v14005_v57  ;;  %7191 = vmatprep.subr.mxu1 %v9912_v42  ;;  %v9930_v25 = vld [vmem:[%s16979_s6 + $0x678] sm:$0xff]  ;;  %v9929_v42 = vld [vmem:[%s16979_s6 + $0x670] sm:$0xff] }
 0x3d8   : > { %17338 = vst [vmem:[#allocation99_spill] sm:$0xff] %v14183_v53  ;;  %7192 = vmatpush1.msra.mxu1 %v9911_v4  ;;  %7626 = vmatpush1.msra.mxu0 %v9931_v61  ;;  %v9909_v4 = vld [vmem:[%s16979_s6 + $0x5d0] sm:$0xff] }
 0x3d9   : > { %v14192_v23 = vpop.f32.mrf.mxu0  ;;  %v14194_v48 = vpop.f32.mrf.mxu1  ;;  %6416 = vmatmul.mubr.f32.gmra.mxu1 %v13721_v60  ;;  %6880 = vmatmul.mubr.f32.gmra.mxu0 %v6706_v12  ;;  %v6707_v60 = vld [vmem:[#allocation3 + $0x5b] sm:$0xff] }
 0x3da   : > { %17339 = vst [vmem:[#allocation74_spill] sm:$0xff] %v14194_v48  ;;  %6421 = vmatprep.mubr.f32.mxu1 %v14005_v57  ;;  %6885 = vmatprep.mubr.f32.mxu0 %v14005_v57  ;;  %v9908_v12 = vld [vmem:[%s16979_s6 + $0x5c8] sm:$0xff] }
 0x3db   : > { %v14205_v61 = vpop.f32.mrf.mxu0  ;;  %v14207_v53 = vpop.f32.mrf.mxu1  ;;  %7193 = vmatprep.subr.mxu1 %v9910_v26  ;;  %7627 = vmatprep.subr.mxu0 %v9930_v25  ;;  %v9928_v48 = vld [vmem:[%s16979_s6 + $0x668] sm:$0xff]  ;;  %v9907_v26 = vld [vmem:[%s16979_s6 + $0x5c0] sm:$0xff] }
 0x3dc   : > { %17340 = vst [vmem:[#allocation75_spill] sm:$0xff] %v14205_v61  ;;  %17341 = vst [vmem:[#allocation98_spill] sm:$0xff] %v14207_v53  ;;  %7194 = vmatpush1.msra.mxu1 %v9909_v4  ;;  %7628 = vmatpush1.msra.mxu0 %v9929_v42  ;;  %v9927_v25 = vld [vmem:[%s16979_s6 + $0x660] sm:$0xff] }
 0x3dd   : > { %v14215_v58 = vpop.f32.mrf.mxu0  ;;  %v14217_v54 = vpop.f32.mrf.mxu1  ;;  %6422 = vmatmul.mubr.f32.gmra.mxu1 %v13738_v16  ;;  %6886 = vmatmul.mubr.f32.gmra.mxu0 %v6707_v60  ;;  %v6708_v16 = vld [vmem:[#allocation3 + $0x63] sm:$0xff]  ;;  %v9906_v60 = vld [vmem:[%s16979_s6 + $0x5b8] sm:$0xff] }
 0x3de   : > { %17342 = vst [vmem:[#allocation110_spill] sm:$0xff] %v14215_v58  ;;  %17343 = vst [vmem:[#allocation71_spill] sm:$0xff] %v14217_v54  ;;  %6427 = vmatprep.mubr.f32.mxu1 %v14005_v57  ;;  %6891 = vmatprep.mubr.f32.mxu0 %v14005_v57  ;;  %v9926_v54 = vld [vmem:[%s16979_s6 + $0x658] sm:$0xff] }
 0x3df   : > { %v14228_v4 = vpop.f32.mrf.mxu0  ;;  %v14230_v42 = vpop.f32.mrf.mxu1  ;;  %7195 = vmatprep.subr.mxu1 %v9908_v12  ;;  %7629 = vmatprep.subr.mxu0 %v9928_v48  ;;  %v9905_v48 = vld [vmem:[%s16979_s6 + $0x5b0] sm:$0xff]  ;;  %v6718_v61 = vld [vmem:[#allocation3 + $0xb3] sm:$0xff] }
 0x3e0   : > { %17344 = vst [vmem:[#allocation52_spill] sm:$0xff] %v14228_v4  ;;  %17345 = vst [vmem:[#allocation51_spill] sm:$0xff] %v14230_v42  ;;  %7196 = vmatpush1.msra.mxu1 %v9907_v26  ;;  %7630 = vmatpush1.msra.mxu0 %v9927_v25  ;;  %v9925_v12 = vld [vmem:[%s16979_s6 + $0x650] sm:$0xff]  ;;  %v9887_v4 = vld [vmem:[%s16979_s6 + $0x520] sm:$0xff] }
 0x3e1   : > { %v14238_v53 = vpop.f32.mrf.mxu0  ;;  %v14240_v38 = vpop.f32.mrf.mxu1  ;;  %6428 = vmatmul.mubr.f32.gmra.mxu1 %v13755_v63  ;;  %6892 = vmatmul.mubr.f32.gmra.mxu0 %v6708_v16  ;;  %v6709_v63 = vld [vmem:[#allocation3 + $0x6b] sm:$0xff]  ;;  %v9904_v16 = vld [vmem:[%s16979_s6 + $0x5a8] sm:$0xff] }
 0x3e2   : > { %17346 = vst [vmem:[#allocation101_spill] sm:$0xff] %v14238_v53  ;;  %17347 = vst [vmem:[#allocation76_spill] sm:$0xff] %v14240_v38  ;;  %6433 = vmatprep.mubr.f32.mxu1 %v14005_v57  ;;  %6897 = vmatprep.mubr.f32.mxu0 %v14005_v57  ;;  %v9924_v38 = vld [vmem:[%s16979_s6 + $0x648] sm:$0xff] }
 0x3e3   : > { %v14251_v26 = vpop.f32.mrf.mxu0  ;;  %v14253_v25 = vpop.f32.mrf.mxu1  ;;  %7197 = vmatprep.subr.mxu1 %v9906_v60  ;;  %7631 = vmatprep.subr.mxu0 %v9926_v54  ;;  %v9903_v54 = vld [vmem:[%s16979_s6 + $0x5a0] sm:$0xff] }
 0x3e4   : > { %17348 = vst [vmem:[#allocation77_spill] sm:$0xff] %v14251_v26  ;;  %17349 = vst [vmem:[#allocation100_spill] sm:$0xff] %v14253_v25  ;;  %7198 = vmatpush1.msra.mxu1 %v9905_v48  ;;  %7632 = vmatpush1.msra.mxu0 %v9925_v12  ;;  %v9923_v60 = vld [vmem:[%s16979_s6 + $0x640] sm:$0xff] }
 0x3e5   : > { %v14261_v42 = vpop.f32.mrf.mxu0  ;;  %v14263_v1 = vpop.f32.mrf.mxu1  ;;  %6434 = vmatmul.mubr.f32.gmra.mxu1 %v13769_v40  ;;  %6898 = vmatmul.mubr.f32.gmra.mxu0 %v6709_v63  ;;  %v6710_v40 = vld [vmem:[#allocation3 + $0x73] sm:$0xff] }
 0x3e6   : > { %17350 = vst [vmem:[#allocation54_spill] sm:$0xff] %v14261_v42  ;;  %17351 = vst [vmem:[#allocation53_spill] sm:$0xff] %v14263_v1  ;;  %6439 = vmatprep.mubr.f32.mxu1 %v14005_v57  ;;  %6903 = vmatprep.mubr.f32.mxu0 %v14005_v57  ;;  %v9902_v63 = vld [vmem:[%s16979_s6 + $0x598] sm:$0xff] }
 0x3e7   : > { %v14274_v48 = vpop.f32.mrf.mxu0  ;;  %v14276_v12 = vpop.f32.mrf.mxu1  ;;  %7199 = vmatprep.subr.mxu1 %v9904_v16  ;;  %7633 = vmatprep.subr.mxu0 %v9924_v38  ;;  %v9922_v1 = vld [vmem:[%s16979_s6 + $0x638] sm:$0xff]  ;;  %v9901_v38 = vld [vmem:[%s16979_s6 + $0x590] sm:$0xff] }
 0x3e8   : > { %17352 = vst [vmem:[#allocation103_spill] sm:$0xff] %v14274_v48  ;;  %17353 = vst [vmem:[#allocation78_spill] sm:$0xff] %v14276_v12  ;;  %7200 = vmatpush1.msra.mxu1 %v9903_v54  ;;  %7634 = vmatpush1.msra.mxu0 %v9923_v60  ;;  %v9921_v16 = vld [vmem:[%s16979_s6 + $0x630] sm:$0xff] }
 0x3e9   : > { %v14284_v25 = vpop.f32.mrf.mxu1  ;;  %v14286_v47 = vpop.f32.mrf.mxu0  ;;  %6440 = vmatmul.mubr.f32.gmra.mxu1 %v13783_v18  ;;  %6904 = vmatmul.mubr.f32.gmra.mxu0 %v6710_v40  ;;  %v6711_v18 = vld [vmem:[#allocation3 + $0x7b] sm:$0xff] }
 0x3ea   : > { %17354 = vst [vmem:[#allocation79_spill] sm:$0xff] %v14284_v25  ;;  %6445 = vmatprep.mubr.f32.mxu1 %v14005_v57  ;;  %6909 = vmatprep.mubr.f32.mxu0 %v14005_v57  ;;  %v9900_v40 = vld [vmem:[%s16979_s6 + $0x588] sm:$0xff] }
 0x3eb   : > { %v14297_v54 = vpop.f32.mrf.mxu1  ;;  %v14299_v60 = vpop.f32.mrf.mxu0  ;;  %7201 = vmatprep.subr.mxu1 %v9902_v63  ;;  %7635 = vmatprep.subr.mxu0 %v9922_v1  ;;  %v9920_v25 = vld [vmem:[%s16979_s6 + $0x628] sm:$0xff]  ;;  %v9899_v1 = vld [vmem:[%s16979_s6 + $0x580] sm:$0xff] }
 0x3ec   : > { %17355 = vst [vmem:[#allocation102_spill] sm:$0xff] %v14297_v54  ;;  %7202 = vmatpush1.msra.mxu1 %v9901_v38  ;;  %7636 = vmatpush1.msra.mxu0 %v9921_v16  ;;  %v9919_v63 = vld [vmem:[%s16979_s6 + $0x620] sm:$0xff] }
 0x3ed   : > { %v14307_v12 = vpop.f32.mrf.mxu1  ;;  %v14309_v48 = vpop.f32.mrf.mxu0  ;;  %6446 = vmatmul.mubr.f32.gmra.mxu1 %v13798_v52  ;;  %6910 = vmatmul.mubr.f32.gmra.mxu0 %v6711_v18  ;;  %v6712_v52 = vld [vmem:[#allocation3 + $0x83] sm:$0xff]  ;;  %v9898_v18 = vld [vmem:[%s16979_s6 + $0x578] sm:$0xff] }
 0x3ee   : > { %17356 = vst [vmem:[#allocation56_spill] sm:$0xff] %v14307_v12  ;;  %6451 = vmatprep.mubr.f32.mxu1 %v14005_v57  ;;  %6915 = vmatprep.mubr.f32.mxu0 %v14005_v57  ;;  %v9918_v12 = vld [vmem:[%s16979_s6 + $0x618] sm:$0xff] }
 0x3ef   : > { %v14320_v38 = vpop.f32.mrf.mxu1  ;;  %v14322_v16 = vpop.f32.mrf.mxu0  ;;  %7203 = vmatprep.subr.mxu1 %v9900_v40  ;;  %7637 = vmatprep.subr.mxu0 %v9920_v25  ;;  %v9897_v25 = vld [vmem:[%s16979_s6 + $0x570] sm:$0xff] }
 0x3f0   : > { %17357 = vst [vmem:[#allocation55_spill] sm:$0xff] %v14320_v38  ;;  %7204 = vmatpush1.msra.mxu1 %v9899_v1  ;;  %7638 = vmatpush1.msra.mxu0 %v9919_v63  ;;  %v9917_v40 = vld [vmem:[%s16979_s6 + $0x610] sm:$0xff] }
 0x3f1   : > { %v14330_v54 = vpop.f32.mrf.mxu1  ;;  %v14332_v42 = vpop.f32.mrf.mxu0  ;;  %6452 = vmatmul.mubr.f32.gmra.mxu1 %v13819_v55  ;;  %6916 = vmatmul.mubr.f32.gmra.mxu0 %v6712_v52  ;;  %v6713_v55 = vld [vmem:[#allocation3 + $0x8b] sm:$0xff]  ;;  %v9896_v52 = vld [vmem:[%s16979_s6 + $0x568] sm:$0xff] }
 0x3f2   : > { %17358 = vst [vmem:[#allocation106_spill] sm:$0xff] %v14330_v54  ;;  %6457 = vmatprep.mubr.f32.mxu1 %v14005_v57  ;;  %6921 = vmatprep.mubr.f32.mxu0 %v14005_v57  ;;  %v9916_v54 = vld [vmem:[%s16979_s6 + $0x608] sm:$0xff] }
 0x3f3   : > { %v14343_v1 = vpop.f32.mrf.mxu1  ;;  %v14345_v63 = vpop.f32.mrf.mxu0  ;;  %7205 = vmatprep.subr.mxu1 %v9898_v18  ;;  %7639 = vmatprep.subr.mxu0 %v9918_v12  ;;  %v9895_v12 = vld [vmem:[%s16979_s6 + $0x560] sm:$0xff] }
 0x3f4   : > { %17359 = vst [vmem:[#allocation80_spill] sm:$0xff] %v14343_v1  ;;  %7206 = vmatpush1.msra.mxu1 %v9897_v25  ;;  %7640 = vmatpush1.msra.mxu0 %v9917_v40  ;;  %v9915_v18 = vld [vmem:[%s16979_s6 + $0x600] sm:$0xff] }
 0x3f5   : > { %v14353_v38 = vpop.f32.mrf.mxu1  ;;  %v14355_v26 = vpop.f32.mrf.mxu0  ;;  %6458 = vmatmul.mubr.f32.gmra.mxu1 %v13833_v33  ;;  %6922 = vmatmul.mubr.f32.gmra.mxu0 %v6713_v55  ;;  %v6714_v33 = vld [vmem:[#allocation3 + $0x93] sm:$0xff] }
 0x3f6   : > { %17360 = vst [vmem:[#allocation81_spill] sm:$0xff] %v14353_v38  ;;  %6463 = vmatprep.mubr.f32.mxu1 %v14005_v57  ;;  %6927 = vmatprep.mubr.f32.mxu0 %v14005_v57  ;;  %v9894_v55 = vld [vmem:[%s16979_s6 + $0x558] sm:$0xff] }
 0x3f7   : > { %v14366_v25 = vpop.f32.mrf.mxu1  ;;  %v14368_v40 = vpop.f32.mrf.mxu0  ;;  %7207 = vmatprep.subr.mxu1 %v9896_v52  ;;  %7641 = vmatprep.subr.mxu0 %v9916_v54  ;;  %v10010_v38 = vld [vmem:[%s16979_s6 + $0x8f8] sm:$0xff]  ;;  %v9893_v54 = vld [vmem:[%s16979_s6 + $0x550] sm:$0xff] }
 0x3f8   : > { %17361 = vst [vmem:[#allocation105_spill] sm:$0xff] %v14366_v25  ;;  %7208 = vmatpush1.msra.mxu1 %v9895_v12  ;;  %7642 = vmatpush1.msra.mxu0 %v9915_v18  ;;  %v6715_v18 = vld [vmem:[#allocation3 + $0x9b] sm:$0xff]  ;;  %v6717_v25 = vld [vmem:[#allocation3 + $0xab] sm:$0xff] }
 0x3f9   : > { %v14376_v1 = vpop.f32.mrf.mxu1  ;;  %v14378_v53 = vpop.f32.mrf.mxu0  ;;  %6464 = vmatmul.mubr.f32.gmra.mxu1 %v13850_v9  ;;  %6928 = vmatmul.mubr.f32.gmra.mxu0 %v6714_v33  ;;  %v9892_v9 = vld [vmem:[%s16979_s6 + $0x548] sm:$0xff] }
 0x3fa   : > { %17362 = vst [vmem:[#allocation58_spill] sm:$0xff] %v14376_v1  ;;  %6469 = vmatprep.mubr.f32.mxu1 %v14005_v57  ;;  %6933 = vmatprep.mubr.f32.mxu0 %v14005_v57 }
 0x3fb   : > { %v14386_v52 = vpop.f32.mrf.mxu1  ;;  %v14388_v12 = vpop.f32.mrf.mxu0  ;;  %7209 = vmatprep.subr.mxu1 %v9894_v55  ;;  %8455 = vmatprep.subr.mxu0 %v10010_v38 }
 0x3fc   : > { %17363 = vst [vmem:[#allocation57_spill] sm:$0xff] %v14386_v52  ;;  %7210 = vmatpush1.msra.mxu1 %v9893_v54  ;;  %v9891_v52 = vld [vmem:[%s16979_s6 + $0x540] sm:$0xff]  ;;  %v6716_v54 = vld [vmem:[#allocation3 + $0xa3] sm:$0xff] }
 0x3fd   : > { %v14393_v33 = vpop.f32.mrf.mxu1  ;;  %v14395_v1 = vpop.f32.mrf.mxu0  ;;  %6470 = vmatmul.mubr.f32.gmra.mxu1 %v13867_v6  ;;  %6934 = vmatmul.mubr.f32.gmra.mxu0 %v6715_v18  ;;  %v9890_v6 = vld [vmem:[%s16979_s6 + $0x538] sm:$0xff] }
 0x3fe   : > { %17364 = vst [vmem:[#allocation109_spill] sm:$0xff] %v14393_v33  ;;  %6475 = vmatprep.mubr.f32.mxu1 %v14005_v57  ;;  %6939 = vmatprep.mubr.f32.mxu0 %v14005_v57 }
 0x3ff   : > { %v14403_v38 = vpop.f32.mrf.mxu1  ;;  %v14405_v55 = vpop.f32.mrf.mxu0  ;;  %7211 = vmatprep.subr.mxu1 %v9892_v9 }
 0x400   : > { %17365 = vst [vmem:[#allocation82_spill] sm:$0xff] %v14403_v38  ;;  %7212 = vmatpush1.msra.mxu1 %v9891_v52  ;;  %v9889_v38 = vld [vmem:[%s16979_s6 + $0x530] sm:$0xff] }
 0x401   : > { %v14410_v18 = vpop.f32.mrf.mxu1  ;;  %v14412_v33 = vpop.f32.mrf.mxu0  ;;  %6476 = vmatmul.mubr.f32.gmra.mxu1 %v13884_v50  ;;  %6940 = vmatmul.mubr.f32.gmra.mxu0 %v6716_v54  ;;  %v9888_v50 = vld [vmem:[%s16979_s6 + $0x528] sm:$0xff] }
 0x402   : > { %17366 = vst [vmem:[#allocation83_spill] sm:$0xff] %v14410_v18  ;;  %6481 = vmatprep.mubr.f32.mxu1 %v14005_v57  ;;  %6945 = vmatprep.mubr.f32.mxu0 %v14005_v57 }
 0x403   : > { %v14420_v52 = vpop.f32.mrf.mxu1  ;;  %v14422_v9 = vpop.f32.mrf.mxu0  ;;  %7213 = vmatprep.subr.mxu1 %v9890_v6 }
 0x404   : > { %17367 = vst [vmem:[#allocation108_spill] sm:$0xff] %v14420_v52  ;;  %7214 = vmatpush1.msra.mxu1 %v9889_v38 }
 0x405   : > { %v5639_v54 = vpop.f32.mrf.mxu1  ;;  %v14427_v18 = vpop.f32.mrf.mxu0  ;;  %6482 = vmatmul.mubr.f32.gmra.mxu1 %v13901_v11  ;;  %6946 = vmatmul.mubr.f32.gmra.mxu0 %v6717_v25  ;;  %v9886_v11 = vld [vmem:[%s16979_s6 + $0x518] sm:$0xff] }
 0x406   : > { %v5640_v52 = vadd.f32 %v5639_v54, %v14011_v13  ;;  %6487 = vmatprep.mubr.f32.mxu1 %v14005_v57  ;;  %6951 = vmatprep.mubr.f32.mxu0 %v14005_v57 }
 0x407   : > { %v5641_v38 = vpop.f32.mrf.mxu1  ;;  %v14436_v6 = vpop.f32.mrf.mxu0  ;;  %7215 = vmatprep.subr.mxu1 %v9888_v50  ;;  %v9885_v50 = vld [vmem:[%s16979_s6 + $0x510] sm:$0xff] }
 0x408   : > { %v5642_v58 = vadd.f32 %v5641_v38, %v14015_v8  ;;  %7216 = vmatpush1.msra.mxu1 %v9887_v4  ;;  %v14443_v25 = vadd.f32 %v14286_v47, %v5640_v52  ;;  %v9884_v38 = vld [vmem:[%s16979_s6 + $0x508] sm:$0xff] }
 0x409   : > { %v5645_v13 = vpop.f32.mrf.mxu1  ;;  %v14445_v54 = vpop.f32.mrf.mxu0  ;;  %6488 = vmatmul.mubr.f32.gmra.mxu1 %v13918_v24  ;;  %6952 = vmatmul.mubr.f32.gmra.mxu0 %v6718_v61  ;;  %v6719_v61 = vld [vmem:[#allocation3 + $0xbb] sm:$0xff] }
 0x40a   : > { %17368 = vst [vmem:[#allocation60_spill] sm:$0xff] %v14443_v25  ;;  %v5646_v8 = vadd.f32 %v5645_v13, %v14019_v27  ;;  %6493 = vmatprep.mubr.f32.mxu1 %v14005_v57  ;;  %6957 = vmatprep.mubr.f32.mxu0 %v14005_v57  ;;  %v14455_v4 = vadd.f32 %v14299_v60, %v5642_v58  ;;  %v9883_v58 = vld [vmem:[%s16979_s6 + $0x500] sm:$0xff] }
 0x40b   : > { %v5647_v47 = vpop.f32.mrf.mxu1  ;;  %v14457_v52 = vpop.f32.mrf.mxu0  ;;  %7217 = vmatprep.subr.mxu1 %v9886_v11 }
 0x40c   : > { %v5648_v24 = vadd.f32 %v5647_v47, %v14023_v30  ;;  %7218 = vmatpush1.msra.mxu1 %v9885_v50  ;;  %v14464_v27 = vadd.f32 %v14309_v48, %v5646_v8  ;;  %v6720_v50 = vld [vmem:[#allocation3 + $0xc3] sm:$0xff]  ;;  %v9978_v8 = vld [vmem:[%s16979_s6 + $0x7f8] sm:$0xff] }
 0x40d   : > { %v5651_v13 = vpop.f32.mrf.mxu1  ;;  %v14466_v25 = vpop.f32.mrf.mxu0  ;;  %6494 = vmatmul.mubr.f32.gmra.mxu1 %v13935_v37  ;;  %6958 = vmatmul.mubr.f32.gmra.mxu0 %v6719_v61 }
 0x40e   : > { %v5652_v30 = vadd.f32 %v5651_v13, %v14027_v7  ;;  %6499 = vmatprep.mubr.f32.mxu1 %v14005_v57  ;;  %6963 = vmatprep.mubr.f32.mxu0 %v14005_v57  ;;  %v14476_v60 = vadd.f32 %v14322_v16, %v5648_v24  ;;  %v6721_v13 = vld [vmem:[#allocation3 + $0xcb] sm:$0xff] }
 0x40f   : > { %v5653_v48 = vpop.f32.mrf.mxu1  ;;  %v14478_v11 = vpop.f32.mrf.mxu0  ;;  %7219 = vmatprep.subr.mxu1 %v9884_v38 }
 0x410   : > { %v5654_v37 = vadd.f32 %v5653_v48, %v14031_v41  ;;  %7220 = vmatpush1.msra.mxu1 %v9883_v58  ;;  %v14485_v7 = vadd.f32 %v14332_v42, %v5652_v30 }
 0x411   : > { %v5657_v47 = vpop.f32.mrf.mxu1  ;;  %v14487_v61 = vpop.f32.mrf.mxu0  ;;  %6500 = vmatmul.mubr.f32.gmra.mxu1 %v13949_v17  ;;  %6964 = vmatmul.mubr.f32.gmra.mxu0 %v6720_v50 }
 0x412   : > { %v5658_v16 = vadd.f32 %v5657_v47, %v14033_v3  ;;  %6505 = vmatprep.mubr.f32.mxu1 %v14005_v57  ;;  %6969 = vmatprep.mubr.f32.mxu0 %v14005_v57  ;;  %v14494_v41 = vadd.f32 %v14345_v63, %v5654_v37  ;;  %v6722_v37 = vld [vmem:[#allocation3 + $0xd3] sm:$0xff] }
 0x413   : > { %v5659_v24 = vpop.f32.mrf.mxu1  ;;  %v14496_v38 = vpop.f32.mrf.mxu0  ;;  %8033 = vmatprep.subr.mxu1 %v9978_v8 }
 0x414   : > { %v5660_v42 = vadd.f32 %v5659_v24, %v14037_v62  ;;  %v14500_v58 = vadd.f32 %v14355_v26, %v5658_v16  ;;  %v6294_v16 = vld [vmem:[#allocation3 + $0xa2] sm:$0xff] }
 0x415   : > { %v5663_v17 = vpop.f32.mrf.mxu1  ;;  %v14502_v30 = vpop.f32.mrf.mxu0  ;;  %6506 = vmatmul.mubr.f32.gmra.mxu1 %v13960_v32  ;;  %6970 = vmatmul.mubr.f32.gmra.mxu0 %v6721_v13  ;;  %v6723_v24 = vld [vmem:[#allocation3 + $0xdb] sm:$0xff] }
 0x416   : > { %v5664_v3 = vadd.f32 %v5663_v17, %v14039_v21  ;;  %6511 = vmatprep.mubr.f32.mxu1 %v14005_v57  ;;  %6975 = vmatprep.mubr.f32.mxu0 %v14005_v57  ;;  %v14509_v63 = vadd.f32 %v14368_v40, %v5660_v42 }
 0x417   : > { %v5665_v62 = vpop.f32.mrf.mxu1  ;;  %v14511_v48 = vpop.f32.mrf.mxu0 }
 0x418   : > { %v5666_v26 = vadd.f32 %v5665_v62, %v14043_v45  ;;  %v14515_v50 = vadd.f32 %v14378_v53, %v5664_v3  ;;  %v6295_v3 = vld [vmem:[#allocation3 + $0xaa] sm:$0xff] }
 0x419   : > { %v5669_v32 = vpop.f32.mrf.mxu1  ;;  %v14517_v8 = vpop.f32.mrf.mxu0  ;;  %6512 = vmatmul.mubr.f32.gmra.mxu1 %v13971_v10  ;;  %6976 = vmatmul.mubr.f32.gmra.mxu0 %v6722_v37  ;;  %v6724_v62 = vld [vmem:[#allocation3 + $0xe3] sm:$0xff] }
 0x41a   : > { %v5670_v21 = vadd.f32 %v5669_v32, %v14045_v19  ;;  %6517 = vmatprep.mubr.f32.mxu1 %v14005_v57  ;;  %6981 = vmatprep.mubr.f32.mxu0 %v14005_v57  ;;  %v14524_v40 = vadd.f32 %v14388_v12, %v5666_v26 }
 0x41b   : > { %v5671_v45 = vpop.f32.mrf.mxu1  ;;  %v14526_v47 = vpop.f32.mrf.mxu0 }
 0x41c   : > { %v5672_v53 = vadd.f32 %v5671_v45, %v14049_v28  ;;  %v14530_v42 = vadd.f32 %v14395_v1, %v5670_v21  ;;  %v6296_v45 = vld [vmem:[#allocation3 + $0xb2] sm:$0xff] }
 0x41d   : > { %v5675_v10 = vpop.f32.mrf.mxu1  ;;  %v14532_v13 = vpop.f32.mrf.mxu0  ;;  %6518 = vmatmul.mubr.f32.gmra.mxu1 %v6294_v16  ;;  %6982 = vmatmul.mubr.f32.gmra.mxu0 %v6723_v24 }
 0x41e   : > { %v5676_v19 = vadd.f32 %v5675_v10, %v14051_v29  ;;  %6523 = vmatprep.mubr.f32.mxu1 %v14005_v57  ;;  %6987 = vmatprep.mubr.f32.mxu0 %v14005_v57  ;;  %v14538_v12 = vadd.f32 %v14405_v55, %v5672_v53  ;;  %v6725_v53 = vld [vmem:[#allocation3 + $0xeb] sm:$0xff] }
 0x41f   : > { %v5677_v28 = vpop.f32.mrf.mxu1  ;;  %v14540_v17 = vpop.f32.mrf.mxu0 }
 0x420   : > { %v5678_v1 = vadd.f32 %v5677_v28, %v14055_v39  ;;  %v14544_v26 = vadd.f32 %v14412_v33, %v5676_v19  ;;  %v6297_v28 = vld [vmem:[#allocation3 + $0xba] sm:$0xff] }
 0x421   : > { %v5681_v37 = vpop.f32.mrf.mxu1  ;;  %v14546_v32 = vpop.f32.mrf.mxu0  ;;  %6524 = vmatmul.mubr.f32.gmra.mxu1 %v6295_v3  ;;  %6988 = vmatmul.mubr.f32.gmra.mxu0 %v6724_v62 }
 0x422   : > { %v5682_v29 = vadd.f32 %v5681_v37, %v14057_v20  ;;  %6529 = vmatprep.mubr.f32.mxu1 %v14005_v57  ;;  %6993 = vmatprep.mubr.f32.mxu0 %v14005_v57  ;;  %v14552_v55 = vadd.f32 %v14422_v9, %v5678_v1  ;;  %v6726_v1 = vld [vmem:[#allocation3 + $0xf3] sm:$0xff] }
 0x423   : > { %v5683_v39 = vpop.f32.mrf.mxu1  ;;  %v14554_v21 = vpop.f32.mrf.mxu0 }
 0x424   : > { %v5684_v33 = vadd.f32 %v5683_v39, %v14061_v36  ;;  %v14558_v16 = vadd.f32 %v14427_v18, %v5682_v29  ;;  %v6298_v39 = vld [vmem:[#allocation3 + $0xc2] sm:$0xff] }
 0x425   : > { %v5687_v24 = vpop.f32.mrf.mxu1  ;;  %v14560_v10 = vpop.f32.mrf.mxu0  ;;  %6530 = vmatmul.mubr.f32.gmra.mxu1 %v6296_v45  ;;  %6994 = vmatmul.mubr.f32.gmra.mxu0 %v6725_v53 }
 0x426   : > { %v5688_v20 = vadd.f32 %v5687_v24, %v14066_v2  ;;  %6535 = vmatprep.mubr.f32.mxu1 %v14005_v57  ;;  %6999 = vmatprep.mubr.f32.mxu0 %v14005_v57  ;;  %v14566_v9 = vadd.f32 %v14436_v6, %v5684_v33  ;;  %v6727_v33 = vld [vmem:[#allocation3 + $0xfb] sm:$0xff] }
 0x427   : > { %v5689_v36 = vpop.f32.mrf.mxu1  ;;  %v14568_v19 = vpop.f32.mrf.mxu0 }
 0x428   : > { %v5690_v18 = vadd.f32 %v5689_v36, %v14073_v44  ;;  %v14572_v3 = vadd.f32 %v14445_v54, %v5688_v20  ;;  %v6299_v36 = vld [vmem:[#allocation3 + $0xca] sm:$0xff] }
 0x429   : > { %v5693_v62 = vpop.f32.mrf.mxu1  ;;  %v14574_v37 = vpop.f32.mrf.mxu0  ;;  %6536 = vmatmul.mubr.f32.gmra.mxu1 %v6297_v28  ;;  %7000 = vmatmul.mubr.f32.gmra.mxu0 %v6726_v1 }
 0x42a   : > { %v5694_v2 = vadd.f32 %v5693_v62, %v14078_v56  ;;  %6541 = vmatprep.mubr.f32.mxu1 %v14005_v57  ;;  %7005 = vmatprep.mubr.f32.mxu0 %v14005_v57  ;;  %v14580_v6 = vadd.f32 %v14457_v52, %v5690_v18  ;;  %v14591_v56 = vld [vmem:[#allocation3] sm:$0xff] }
 0x42b   : > { %v5695_v44 = vpop.f32.mrf.mxu1  ;;  %v14582_v29 = vpop.f32.mrf.mxu0  ;;  %v6728_v18 = vld [vmem:[#allocation3 + $0x103] sm:$0xff] }
 0x42c   : > { %v5696_v54 = vadd.f32 %v5695_v44, %v14085_v43  ;;  %v14586_v45 = vadd.f32 %v14466_v25, %v5694_v2  ;;  %v6300_v44 = vld [vmem:[#allocation3 + $0xd2] sm:$0xff] }
 0x42d   : > { %v5699_v53 = vpop.f32.mrf.mxu1  ;;  %v14588_v24 = vpop.f32.mrf.mxu0  ;;  %6542 = vmatmul.mubr.f32.gmra.mxu1 %v6298_v39  ;;  %7006 = vmatmul.mubr.f32.gmra.mxu0 %v6727_v33 }
 0x42e   : > { %v5700_v57 = vadd.f32 %v5699_v53, %v14090_v5  ;;  %6547 = vmatprep.mubr.f32.mxu1 %v14591_v56  ;;  %7011 = vmatprep.mubr.f32.mxu0 %v14591_v56  ;;  %v14596_v43 = vadd.f32 %v14478_v11, %v5696_v54  ;;  %v6729_v54 = vld [vmem:[#allocation3 + $0x10b] sm:$0xff] }
 0x42f   : > { %v5701_v52 = vpop.f32.mrf.mxu1  ;;  %v14598_v20 = vpop.f32.mrf.mxu0 }
 0x430   : > { %v5702_v25 = vadd.f32 %v5701_v52, %v14097_v0  ;;  %v14602_v28 = vadd.f32 %v14487_v61, %v5700_v57  ;;  %v6301_v52 = vld [vmem:[#allocation3 + $0xda] sm:$0xff] }
 0x431   : > { %v5705_v5 = vpop.f32.mrf.mxu1  ;;  %v14604_v1 = vpop.f32.mrf.mxu0  ;;  %6548 = vmatmul.mubr.f32.gmra.mxu1 %v6299_v36  ;;  %7012 = vmatmul.mubr.f32.gmra.mxu0 %v6728_v18 }
 0x432   : > { %v5706_v62 = vadd.f32 %v5705_v5, %v14102_v31  ;;  %6553 = vmatprep.mubr.f32.mxu1 %v14591_v56  ;;  %7017 = vmatprep.mubr.f32.mxu0 %v14591_v56  ;;  %v14610_v11 = vadd.f32 %v14496_v38, %v5702_v25  ;;  %v6730_v25 = vld [vmem:[#allocation3 + $0x113] sm:$0xff] }
 0x433   : > { %v5707_v0 = vpop.f32.mrf.mxu1  ;;  %v14612_v2 = vpop.f32.mrf.mxu0 }
 0x434   : > { %v5708_v61 = vadd.f32 %v5707_v0, %v14111_v51  ;;  %v14616_v39 = vadd.f32 %v14502_v30, %v5706_v62  ;;  %v6302_v0 = vld [vmem:[#allocation3 + $0xe2] sm:$0xff] }
 0x435   : > { %v5711_v33 = vpop.f32.mrf.mxu1  ;;  %v14618_v53 = vpop.f32.mrf.mxu0  ;;  %6554 = vmatmul.mubr.f32.gmra.mxu1 %v6300_v44  ;;  %7018 = vmatmul.mubr.f32.gmra.mxu0 %v6729_v54 }
 0x436   : > { %v5712_v31 = vadd.f32 %v5711_v33, %v14118_v59  ;;  %6559 = vmatprep.mubr.f32.mxu1 %v14591_v56  ;;  %7023 = vmatprep.mubr.f32.mxu0 %v14591_v56  ;;  %v14624_v38 = vadd.f32 %v14511_v48, %v5708_v61  ;;  %v6731_v61 = vld [vmem:[#allocation3 + $0x11b] sm:$0xff] }
 0x437   : > { %v5713_v51 = vpop.f32.mrf.mxu1  ;;  %v14626_v57 = vpop.f32.mrf.mxu0 }
 0x438   : > { %v5714_v30 = vadd.f32 %v5713_v51, %v14127_v15  ;;  %v14630_v36 = vadd.f32 %v14517_v8, %v5712_v31  ;;  %v6303_v51 = vld [vmem:[#allocation3 + $0xea] sm:$0xff] }
 0x439   : > { %v5717_v18 = vpop.f32.mrf.mxu1  ;;  %v14632_v5 = vpop.f32.mrf.mxu0  ;;  %6560 = vmatmul.mubr.f32.gmra.mxu1 %v6301_v52  ;;  %7024 = vmatmul.mubr.f32.gmra.mxu0 %v6730_v25 }
 0x43a   : > { %v5718_v59 = vadd.f32 %v5717_v18, %v14134_v34  ;;  %6565 = vmatprep.mubr.f32.mxu1 %v14591_v56  ;;  %7029 = vmatprep.mubr.f32.mxu0 %v14591_v56  ;;  %v14638_v48 = vadd.f32 %v14526_v47, %v5714_v30  ;;  %v6732_v30 = vld [vmem:[#allocation3 + $0x123] sm:$0xff] }
 0x43b   : > { %v5719_v15 = vpop.f32.mrf.mxu1  ;;  %v14640_v62 = vpop.f32.mrf.mxu0 }
 0x43c   : > { %17369 = vst [vmem:[#allocation59_spill] sm:$0xff] %v14638_v48  ;;  %v5720_v8 = vadd.f32 %v5719_v15, %v14143_v35  ;;  %v14644_v44 = vadd.f32 %v14532_v13, %v5718_v59  ;;  %v6304_v15 = vld [vmem:[#allocation3 + $0xf2] sm:$0xff]  ;;  %v14875_v48 = vld [vmem:[#allocation3 + $0x64] sm:$0xff] }
 0x43d   : > { %v5723_v54 = vpop.f32.mrf.mxu1  ;;  %v14646_v33 = vpop.f32.mrf.mxu0  ;;  %6566 = vmatmul.mubr.f32.gmra.mxu1 %v6302_v0  ;;  %7030 = vmatmul.mubr.f32.gmra.mxu0 %v6731_v61 }
 0x43e   : > { %17370 = vst [vmem:[#allocation84_spill] sm:$0xff] %v14644_v44  ;;  %v5724_v34 = vadd.f32 %v5723_v54, %v14150_v14  ;;  %6571 = vmatprep.mubr.f32.mxu1 %v14591_v56  ;;  %7035 = vmatprep.mubr.f32.mxu0 %v14591_v56  ;;  %v14652_v47 = vadd.f32 %v14540_v17, %v5720_v8  ;;  %v6733_v8 = vld [vmem:[#allocation3 + $0x12b] sm:$0xff] }
 0x43f   : > { %v5725_v35 = vpop.f32.mrf.mxu1  ;;  %v14654_v31 = vpop.f32.mrf.mxu0 }
 0x440   : > { %17371 = vst [vmem:[#allocation85_spill] sm:$0xff] %v14652_v47  ;;  %v5726_v13 = vadd.f32 %v5725_v35, %v14159_v22  ;;  %v14658_v52 = vadd.f32 %v14546_v32, %v5724_v34  ;;  %v17376_v35 = vld [vmem:[#allocation75_spill] sm:$0xff]  ;;  %v14849_v47 = vld [vmem:[#allocation3 + $0x5c] sm:$0xff] }
 0x441   : > { %v5729_v25 = vpop.f32.mrf.mxu1  ;;  %v14660_v18 = vpop.f32.mrf.mxu0  ;;  %6572 = vmatmul.mubr.f32.gmra.mxu1 %v6303_v51  ;;  %7036 = vmatmul.mubr.f32.gmra.mxu0 %v6732_v30  ;;  %v14685_v51 = vld [vmem:[#allocation3 + $0x24] sm:$0xff] }
 0x442   : > { %17372 = vst [vmem:[#allocation111_spill] sm:$0xff] %v14658_v52  ;;  %v5730_v14 = vadd.f32 %v5729_v25, %v14169_v49  ;;  %6577 = vmatprep.mubr.f32.mxu1 %v14591_v56  ;;  %7041 = vmatprep.mubr.f32.mxu0 %v14591_v56  ;;  %v14666_v17 = vadd.f32 %v14554_v21, %v5726_v13  ;;  %v6305_v13 = vld [vmem:[#allocation3 + $0xfa] sm:$0xff]  ;;  %v10009_v30 = vld [vmem:[%s16979_s6 + $0x8f0] sm:$0xff] }
 0x443   : > { %v5731_v22 = vpop.f32.mrf.mxu1  ;;  %v14668_v59 = vpop.f32.mrf.mxu0 }
 0x444   : > { %17373 = vst [vmem:[#allocation62_spill] sm:$0xff] %v14666_v17  ;;  %v5732_v32 = vadd.f32 %v5731_v22, %v14181_v46  ;;  %v14672_v0 = vadd.f32 %v14560_v10, %v5730_v14  ;;  %v17378_v22 = vld [vmem:[#allocation110_spill] sm:$0xff] }
 0x445   : > { %v5735_v61 = vpop.f32.mrf.mxu1  ;;  %v14674_v54 = vpop.f32.mrf.mxu0  ;;  %6578 = vmatmul.mubr.f32.gmra.mxu1 %v6304_v15  ;;  %7042 = vmatmul.mubr.f32.gmra.mxu0 %v6733_v8 }
 0x446   : > { %17374 = vst [vmem:[#allocation61_spill] sm:$0xff] %v14672_v0  ;;  %v5736_v49 = vadd.f32 %v5735_v61, %v14192_v23  ;;  %6583 = vmatprep.mubr.f32.mxu1 %v14591_v56  ;;  %7675 = vmatprep.mubr.f32.mxu0 %v14591_v56  ;;  %v14680_v21 = vadd.f32 %v14568_v19, %v5732_v32  ;;  %v10008_v19 = vld [vmem:[%s16979_s6 + $0x8e8] sm:$0xff]  ;;  %v17380_v61 = vld [vmem:[#allocation52_spill] sm:$0xff] }
 0x447   : > { %v5737_v46 = vpop.f32.mrf.mxu1  ;;  %v14682_v34 = vpop.f32.mrf.mxu0 }
 0x448   : > { %17375 = vst [vmem:[#allocation113_spill] sm:$0xff] %v14680_v21  ;;  %v5738_v10 = vadd.f32 %v5737_v46, %v17376_v35  ;;  %v14691_v23 = vadd.f32 %v14574_v37, %v5736_v49  ;;  %v6306_v46 = vld [vmem:[#allocation3 + $0x102] sm:$0xff]  ;;  %v14708_v35 = vld [vmem:[#allocation3 + $0x2c] sm:$0xff] }
 0x449   : > { %v5741_v25 = vpop.f32.mrf.mxu1  ;;  %v14693_v14 = vpop.f32.mrf.mxu0  ;;  %6584 = vmatmul.mubr.f32.gmra.mxu1 %v6305_v13  ;;  %7676 = vmatmul.mubr.f32.vlgmr.msra.gmra.mxu0 %v14685_v51  ;;  %v10007_v13 = vld [vmem:[%s16979_s6 + $0x8e0] sm:$0xff] }
 0x44a   : > { %17377 = vst [vmem:[#allocation86_spill] sm:$0xff] %v14691_v23  ;;  %v5742_v32 = vadd.f32 %v5741_v25, %v17378_v22  ;;  %6589 = vmatprep.mubr.f32.mxu1 %v14591_v56  ;;  %7681 = vmatprep.mubr.f32.mxu0 %v14591_v56  ;;  %v14703_v15 = vadd.f32 %v14582_v29, %v5738_v10  ;;  %v10006_v10 = vld [vmem:[%s16979_s6 + $0x8d8] sm:$0xff] }
 0x44b   : > { %v5743_v37 = vpop.f32.mrf.mxu1  ;;  %v14705_v8 = vpop.f32.mrf.mxu0  ;;  %8456 = vmatpush1.msra.mxu0 %v10009_v30  ;;  %v17382_v30 = vld [vmem:[#allocation101_spill] sm:$0xff] }
 0x44c   : > { %17379 = vst [vmem:[#allocation87_spill] sm:$0xff] %v14703_v15  ;;  %v5744_v49 = vadd.f32 %v5743_v37, %v17380_v61  ;;  %8457 = vmatprep.subr.mxu0 %v10008_v19  ;;  %v14714_v25 = vadd.f32 %v14588_v24, %v5742_v32  ;;  %v17384_v61 = vld [vmem:[#allocation77_spill] sm:$0xff] }
 0x44d   : > { %v5747_v22 = vpop.f32.mrf.mxu1  ;;  %v14716_v29 = vpop.f32.mrf.mxu0  ;;  %6590 = vmatmul.mubr.f32.gmra.mxu1 %v6306_v46  ;;  %7682 = vmatmul.mubr.f32.gmra.mxu0 %v14708_v35  ;;  %v14731_v15 = vld [vmem:[#allocation3 + $0x34] sm:$0xff] }
 0x44e   : > { %17381 = vst [vmem:[#allocation112_spill] sm:$0xff] %v14714_v25  ;;  %v5748_v37 = vadd.f32 %v5747_v22, %v17382_v30  ;;  %6595 = vmatprep.mubr.f32.mxu1 %v14591_v56  ;;  %7687 = vmatprep.mubr.f32.mxu0 %v14591_v56  ;;  %v14726_v19 = vadd.f32 %v14598_v20, %v5744_v49  ;;  %v6307_v25 = vld [vmem:[#allocation3 + $0x10a] sm:$0xff]  ;;  %v10004_v49 = vld [vmem:[%s16979_s6 + $0x8c8] sm:$0xff] }
 0x44f   : > { %v5749_v24 = vpop.f32.mrf.mxu1  ;;  %v14728_v32 = vpop.f32.mrf.mxu0  ;;  %8458 = vmatpush1.msra.mxu0 %v10007_v13  ;;  %v10005_v22 = vld [vmem:[%s16979_s6 + $0x8d0] sm:$0xff] }
 0x450   : > { %17383 = vst [vmem:[#allocation64_spill] sm:$0xff] %v14726_v19  ;;  %v5750_v46 = vadd.f32 %v5749_v24, %v17384_v61  ;;  %8459 = vmatprep.subr.mxu0 %v10006_v10  ;;  %v14737_v30 = vadd.f32 %v14604_v1, %v5748_v37  ;;  %v17386_v13 = vld [vmem:[#allocation54_spill] sm:$0xff] }
 0x451   : > { %v5753_v23 = vpop.f32.mrf.mxu1  ;;  %v14739_v20 = vpop.f32.mrf.mxu0  ;;  %6596 = vmatmul.mubr.f32.gmra.mxu1 %v6307_v25  ;;  %7688 = vmatmul.mubr.f32.gmra.mxu0 %v14731_v15  ;;  %v17388_v25 = vld [vmem:[#allocation103_spill] sm:$0xff]  ;;  %v14754_v19 = vld [vmem:[#allocation3 + $0x3c] sm:$0xff] }
 0x452   : > { %17385 = vst [vmem:[#allocation63_spill] sm:$0xff] %v14737_v30  ;;  %v5754_v24 = vadd.f32 %v5753_v23, %v17386_v13  ;;  %6601 = vmatprep.mubr.f32.mxu1 %v14591_v56  ;;  %7693 = vmatprep.mubr.f32.mxu0 %v14591_v56  ;;  %v14749_v10 = vadd.f32 %v14612_v2, %v5750_v46  ;;  %v6308_v30 = vld [vmem:[#allocation3 + $0x112] sm:$0xff] }
 0x453   : > { %v5755_v1 = vpop.f32.mrf.mxu1  ;;  %v14751_v37 = vpop.f32.mrf.mxu0  ;;  %8460 = vmatpush1.msra.mxu0 %v10005_v22  ;;  %v10003_v23 = vld [vmem:[%s16979_s6 + $0x8c0] sm:$0xff]  ;;  %v10002_v46 = vld [vmem:[%s16979_s6 + $0x8b8] sm:$0xff] }
 0x454   : > { %17387 = vst [vmem:[#allocation115_spill] sm:$0xff] %v14749_v10  ;;  %v5756_v61 = vadd.f32 %v5755_v1, %v17388_v25  ;;  %8461 = vmatprep.subr.mxu0 %v10004_v49  ;;  %v14760_v13 = vadd.f32 %v14618_v53, %v5754_v24  ;;  %v17390_v22 = vld [vmem:[#allocation48_spill] sm:$0xff]  ;;  %v14777_v10 = vld [vmem:[#allocation3 + $0x44] sm:$0xff] }
 0x455   : > { %v5759_v21 = vpop.f32.mrf.mxu1  ;;  %v14762_v2 = vpop.f32.mrf.mxu0  ;;  %6602 = vmatmul.mubr.f32.gmra.mxu1 %v6308_v30  ;;  %7694 = vmatmul.mubr.f32.gmra.mxu0 %v14754_v19  ;;  %v17392_v30 = vld [vmem:[#allocation47_spill] sm:$0xff] }
 0x456   : > { %17389 = vst [vmem:[#allocation43_spill] sm:$0xff] %v14760_v13  ;;  %v5760_v1 = vadd.f32 %v5759_v21, %v17390_v22  ;;  %6607 = vmatprep.mubr.f32.mxu1 %v14591_v56  ;;  %7699 = vmatprep.mubr.f32.mxu0 %v14591_v56  ;;  %v14772_v49 = vadd.f32 %v14626_v57, %v5756_v61  ;;  %v6309_v13 = vld [vmem:[#allocation3 + $0x11a] sm:$0xff]  ;;  %v10001_v21 = vld [vmem:[%s16979_s6 + $0x8b0] sm:$0xff] }
 0x457   : > { %v5761_v53 = vpop.f32.mrf.mxu1  ;;  %v14774_v24 = vpop.f32.mrf.mxu0  ;;  %8462 = vmatpush1.msra.mxu0 %v10003_v23  ;;  %v10000_v61 = vld [vmem:[%s16979_s6 + $0x8a8] sm:$0xff]  ;;  %v17394_v23 = vld [vmem:[#allocation72_spill] sm:$0xff] }
 0x458   : > { %17391 = vst [vmem:[#allocation44_spill] sm:$0xff] %v14772_v49  ;;  %v5762_v25 = vadd.f32 %v5761_v53, %v17392_v30  ;;  %8463 = vmatprep.subr.mxu0 %v10002_v46  ;;  %v14783_v22 = vadd.f32 %v14632_v5, %v5760_v1  ;;  %v14800_v49 = vld [vmem:[#allocation3 + $0x4c] sm:$0xff] }
 0x459   : > { %v5765_v0 = vpop.f32.mrf.mxu1  ;;  %v14785_v57 = vpop.f32.mrf.mxu0  ;;  %6608 = vmatmul.mubr.f32.gmra.mxu1 %v6309_v13  ;;  %7700 = vmatmul.mubr.f32.gmra.mxu0 %v14777_v10  ;;  %v17396_v13 = vld [vmem:[#allocation73_spill] sm:$0xff] }
 0x45a   : > { %17393 = vst [vmem:[#allocation88_spill] sm:$0xff] %v14783_v22  ;;  %v5766_v53 = vadd.f32 %v5765_v0, %v17394_v23  ;;  %6613 = vmatprep.mubr.f32.mxu1 %v14591_v56  ;;  %7705 = vmatprep.mubr.f32.mxu0 %v14591_v56  ;;  %v14795_v46 = vadd.f32 %v14640_v62, %v5762_v25  ;;  %v6310_v22 = vld [vmem:[#allocation3 + $0x122] sm:$0xff]  ;;  %v9999_v0 = vld [vmem:[%s16979_s6 + $0x8a0] sm:$0xff]  ;;  %v9998_v25 = vld [vmem:[%s16979_s6 + $0x898] sm:$0xff] }
 0x45b   : > { %v5767_v5 = vpop.f32.mrf.mxu1  ;;  %v14797_v1 = vpop.f32.mrf.mxu0  ;;  %8464 = vmatpush1.msra.mxu0 %v10001_v21  ;;  %v17398_v21 = vld [vmem:[#allocation97_spill] sm:$0xff] }
 0x45c   : > { %17395 = vst [vmem:[#allocation89_spill] sm:$0xff] %v14795_v46  ;;  %v5768_v30 = vadd.f32 %v5767_v5, %v17396_v13  ;;  %8465 = vmatprep.subr.mxu0 %v10000_v61  ;;  %v14806_v23 = vadd.f32 %v14646_v33, %v5766_v53  ;;  %v14823_v46 = vld [vmem:[#allocation3 + $0x54] sm:$0xff] }
 0x45d   : > { %v5771_v17 = vpop.f32.mrf.mxu1  ;;  %v14808_v62 = vpop.f32.mrf.mxu0  ;;  %6614 = vmatmul.mubr.f32.gmra.mxu1 %v6310_v22  ;;  %7706 = vmatmul.mubr.f32.gmra.mxu0 %v14800_v49  ;;  %v17400_v22 = vld [vmem:[#allocation104_spill] sm:$0xff] }
 0x45e   : > { %17397 = vst [vmem:[#allocation114_spill] sm:$0xff] %v14806_v23  ;;  %v5772_v5 = vadd.f32 %v5771_v17, %v17398_v21  ;;  %6619 = vmatprep.mubr.f32.mxu1 %v14591_v56  ;;  %7711 = vmatprep.mubr.f32.mxu0 %v14591_v56  ;;  %v14818_v61 = vadd.f32 %v14654_v31, %v5768_v30  ;;  %v6311_v23 = vld [vmem:[#allocation3 + $0x12a] sm:$0xff]  ;;  %v9996_v30 = vld [vmem:[%s16979_s6 + $0x888] sm:$0xff] }
 0x45f   : > { %v5773_v33 = vpop.f32.mrf.mxu1  ;;  %v14820_v53 = vpop.f32.mrf.mxu0  ;;  %8466 = vmatpush1.msra.mxu0 %v9999_v0  ;;  %v9997_v17 = vld [vmem:[%s16979_s6 + $0x890] sm:$0xff] }
 0x460   : > { %17399 = vst [vmem:[#allocation66_spill] sm:$0xff] %v14818_v61  ;;  %v5774_v13 = vadd.f32 %v5773_v33, %v17400_v22  ;;  %8467 = vmatprep.subr.mxu0 %v9998_v25  ;;  %v14829_v21 = vadd.f32 %v14660_v18, %v5772_v5  ;;  %v17402_v0 = vld [vmem:[#allocation50_spill] sm:$0xff]  ;;  %v17404_v22 = vld [vmem:[#allocation49_spill] sm:$0xff] }
 0x461   : > { %v5777_v52 = vpop.f32.mrf.mxu1  ;;  %v14831_v31 = vpop.f32.mrf.mxu0  ;;  %6620 = vmatmul.mubr.f32.gmra.mxu1 %v6311_v23  ;;  %7712 = vmatmul.mubr.f32.gmra.mxu0 %v14823_v46  ;;  %v9977_v23 = vld [vmem:[%s16979_s6 + $0x7f0] sm:$0xff]  ;;  %v7120_v61 = vld [vmem:[#allocation3 + $0x14] sm:$0xff] }
 0x462   : > { %17401 = vst [vmem:[#allocation65_spill] sm:$0xff] %v14829_v21  ;;  %v5778_v33 = vadd.f32 %v5777_v52, %v17402_v0  ;;  %7253 = vmatprep.mubr.f32.mxu1 %v14591_v56  ;;  %7717 = vmatprep.mubr.f32.mxu0 %v14591_v56  ;;  %v14841_v25 = vadd.f32 %v14668_v59, %v5774_v13  ;;  %v9976_v52 = vld [vmem:[%s16979_s6 + $0x7e8] sm:$0xff] }
 0x463   : > { %v5779_v18 = vpop.f32.mrf.mxu1  ;;  %v14843_v5 = vpop.f32.mrf.mxu0  ;;  %8468 = vmatpush1.msra.mxu0 %v9997_v17  ;;  %v9975_v17 = vld [vmem:[%s16979_s6 + $0x7e0] sm:$0xff] }
 0x464   : > { %17403 = vst [vmem:[#allocation67_spill] sm:$0xff] %v14841_v25  ;;  %v5780_v21 = vadd.f32 %v5779_v18, %v17404_v22  ;;  %8469 = vmatprep.subr.mxu0 %v9996_v30  ;;  %v14855_v59 = vadd.f32 %v14674_v54, %v5778_v33  ;;  %v9995_v18 = vld [vmem:[%s16979_s6 + $0x880] sm:$0xff]  ;;  %v17406_v22 = vld [vmem:[#allocation107_spill] sm:$0xff] }
 0x465   : > { %v5783_v13 = vpop.f32.mrf.mxu1  ;;  %v14857_v0 = vpop.f32.mrf.mxu0  ;;  %7254 = vmatmul.mubr.f32.vlgmr.msra.gmra.mxu1 %v7120_v61  ;;  %7718 = vmatmul.mubr.f32.gmra.mxu0 %v14849_v47  ;;  %v7121_v33 = vld [vmem:[#allocation3 + $0x1c] sm:$0xff] }
 0x466   : > { %17405 = vst [vmem:[#allocation45_spill] sm:$0xff] %v14855_v59  ;;  %v5784_v25 = vadd.f32 %v5783_v13, %v17406_v22  ;;  %8034 = vmatpush1.msra.mxu1 %v9977_v23  ;;  %7259 = vmatprep.mubr.f32.mxu1 %v14591_v56  ;;  %v14869_v54 = vadd.f32 %v14682_v34, %v5780_v21  ;;  %v17408_v59 = vld [vmem:[#allocation99_spill] sm:$0xff] }
 0x467   : > { %v5785_v30 = vpop.f32.mrf.mxu1  ;;  %v14871_v61 = vpop.f32.mrf.mxu0  ;;  %7723 = vmatprep.mubr.f32.mxu0 %v14591_v56  ;;  %8035 = vmatprep.subr.mxu1 %v9976_v52  ;;  %v9974_v23 = vld [vmem:[%s16979_s6 + $0x7d8] sm:$0xff]  ;;  %v9973_v52 = vld [vmem:[%s16979_s6 + $0x7d0] sm:$0xff] }
 0x468   : > { %17407 = vst [vmem:[#allocation46_spill] sm:$0xff] %v14869_v54  ;;  %v5786_v44 = vadd.f32 %v5785_v30, %v17408_v59  ;;  %8036 = vmatpush1.msra.mxu1 %v9975_v17  ;;  %8470 = vmatpush1.msra.mxu0 %v9995_v18  ;;  %v9994_v34 = vld [vmem:[%s16979_s6 + $0x878] sm:$0xff]  ;;  %v14884_v21 = vadd.f32 %v14693_v14, %v5784_v25  ;;  %v9993_v59 = vld [vmem:[%s16979_s6 + $0x870] sm:$0xff] }
 0x469   : > { %v5789_v13 = vpop.f32.mrf.mxu1  ;;  %v14886_v22 = vpop.f32.mrf.mxu0  ;;  %7260 = vmatmul.mubr.f32.gmra.mxu1 %v7121_v33  ;;  %7724 = vmatmul.mubr.f32.gmra.mxu0 %v14875_v48  ;;  %v17410_v17 = vld [vmem:[#allocation74_spill] sm:$0xff]  ;;  %v14904_v54 = vld [vmem:[#allocation3 + $0x6c] sm:$0xff] }
 0x46a   : > { %17409 = vst [vmem:[#allocation90_spill] sm:$0xff] %v14884_v21  ;;  %v5790_v18 = vadd.f32 %v5789_v13, %v17410_v17  ;;  %7265 = vmatprep.mubr.f32.mxu1 %v14591_v56  ;;  %7729 = vmatprep.mubr.f32.mxu0 %v14591_v56  ;;  %v14899_v14 = vadd.f32 %v14705_v8, %v5786_v44  ;;  %v17412_v33 = vld [vmem:[#allocation98_spill] sm:$0xff] }
 0x46b   : > { %v5791_v25 = vpop.f32.mrf.mxu1  ;;  %v14901_v30 = vpop.f32.mrf.mxu0  ;;  %8037 = vmatprep.subr.mxu1 %v9974_v23  ;;  %8471 = vmatprep.subr.mxu0 %v9994_v34  ;;  %v9972_v13 = vld [vmem:[%s16979_s6 + $0x7c8] sm:$0xff]  ;;  %v9971_v34 = vld [vmem:[%s16979_s6 + $0x7c0] sm:$0xff] }
 0x46c   : > { %17411 = vst [vmem:[#allocation91_spill] sm:$0xff] %v14899_v14  ;;  %v5792_v21 = vadd.f32 %v5791_v25, %v17412_v33  ;;  %8038 = vmatpush1.msra.mxu1 %v9973_v52  ;;  %8472 = vmatpush1.msra.mxu0 %v9993_v59  ;;  %v9992_v44 = vld [vmem:[%s16979_s6 + $0x868] sm:$0xff]  ;;  %v14913_v8 = vadd.f32 %v14716_v29, %v5790_v18  ;;  %v9991_v52 = vld [vmem:[%s16979_s6 + $0x860] sm:$0xff]  ;;  %v17414_v59 = vld [vmem:[#allocation71_spill] sm:$0xff] }
 0x46d   : > { %v5795_v17 = vpop.f32.mrf.mxu1  ;;  %v14915_v23 = vpop.f32.mrf.mxu0  ;;  %7266 = vmatmul.mubr.f32.gmra.mxu1 %v14685_v51  ;;  %7730 = vmatmul.mubr.f32.gmra.mxu0 %v14904_v54  ;;  %v17416_v33 = vld [vmem:[#allocation51_spill] sm:$0xff]  ;;  %v14934_v14 = vld [vmem:[#allocation3 + $0x74] sm:$0xff] }
 0x46e   : > { %17413 = vst [vmem:[#allocation116_spill] sm:$0xff] %v14913_v8  ;;  %v5796_v25 = vadd.f32 %v5795_v17, %v17414_v59  ;;  %7271 = vmatprep.mubr.f32.mxu1 %v14591_v56  ;;  %7735 = vmatprep.mubr.f32.mxu0 %v14591_v56  ;;  %v14929_v29 = vadd.f32 %v14728_v32, %v5792_v21  ;;  %v9970_v17 = vld [vmem:[%s16979_s6 + $0x7b8] sm:$0xff] }
 0x46f   : > { %v5797_v51 = vpop.f32.mrf.mxu1  ;;  %v14931_v18 = vpop.f32.mrf.mxu0  ;;  %8039 = vmatprep.subr.mxu1 %v9972_v13  ;;  %8473 = vmatprep.subr.mxu0 %v9992_v44  ;;  %v9990_v32 = vld [vmem:[%s16979_s6 + $0x858] sm:$0xff]  ;;  %v9969_v44 = vld [vmem:[%s16979_s6 + $0x7b0] sm:$0xff] }
 0x470   : > { %17415 = vst [vmem:[#allocation68_spill] sm:$0xff] %v14929_v29  ;;  %v5798_v8 = vadd.f32 %v5797_v51, %v17416_v33  ;;  %8040 = vmatpush1.msra.mxu1 %v9971_v34  ;;  %8474 = vmatpush1.msra.mxu0 %v9991_v52  ;;  %v14943_v21 = vadd.f32 %v14739_v20, %v5796_v25  ;;  %v9989_v34 = vld [vmem:[%s16979_s6 + $0x850] sm:$0xff]  ;;  %v17418_v52 = vld [vmem:[#allocation76_spill] sm:$0xff]  ;;  %v14964_v29 = vld [vmem:[#allocation3 + $0x7c] sm:$0xff] }
 0x471   : > { %v5801_v59 = vpop.f32.mrf.mxu1  ;;  %v14945_v13 = vpop.f32.mrf.mxu0  ;;  %7272 = vmatmul.mubr.f32.gmra.mxu1 %v14708_v35  ;;  %7736 = vmatmul.mubr.f32.gmra.mxu0 %v14934_v14  ;;  %v17420_v33 = vld [vmem:[#allocation100_spill] sm:$0xff] }
 0x472   : > { %17417 = vst [vmem:[#allocation69_spill] sm:$0xff] %v14943_v21  ;;  %v5802_v51 = vadd.f32 %v5801_v59, %v17418_v52  ;;  %7277 = vmatprep.mubr.f32.mxu1 %v14591_v56  ;;  %7741 = vmatprep.mubr.f32.mxu0 %v14591_v56  ;;  %v14959_v20 = vadd.f32 %v14751_v37, %v5798_v8  ;;  %v9968_v59 = vld [vmem:[%s16979_s6 + $0x7a8] sm:$0xff] }
 0x473   : > { %v5803_v35 = vpop.f32.mrf.mxu1  ;;  %v14961_v25 = vpop.f32.mrf.mxu0  ;;  %8041 = vmatprep.subr.mxu1 %v9970_v17  ;;  %8475 = vmatprep.subr.mxu0 %v9990_v32  ;;  %v9988_v37 = vld [vmem:[%s16979_s6 + $0x848] sm:$0xff]  ;;  %v9967_v32 = vld [vmem:[%s16979_s6 + $0x7a0] sm:$0xff] }
 0x474   : > { %17419 = vst [vmem:[#allocation92_spill] sm:$0xff] %v14959_v20  ;;  %v5804_v21 = vadd.f32 %v5803_v35, %v17420_v33  ;;  %8042 = vmatpush1.msra.mxu1 %v9969_v44  ;;  %8476 = vmatpush1.msra.mxu0 %v9989_v34  ;;  %v14973_v8 = vadd.f32 %v14762_v2, %v5802_v51  ;;  %v9987_v44 = vld [vmem:[%s16979_s6 + $0x840] sm:$0xff]  ;;  %v17424_v33 = vld [vmem:[#allocation78_spill] sm:$0xff] }
 0x475   : > { %v5807_v52 = vpop.f32.mrf.mxu1  ;;  %v14975_v17 = vpop.f32.mrf.mxu0  ;;  %7278 = vmatmul.mubr.f32.gmra.mxu1 %v14731_v15  ;;  %7742 = vmatmul.mubr.f32.gmra.mxu0 %v14964_v29  ;;  %v17422_v34 = vld [vmem:[#allocation53_spill] sm:$0xff]  ;;  %v14994_v20 = vld [vmem:[#allocation3 + $0x84] sm:$0xff] }
 0x476   : > { %17421 = vst [vmem:[#allocation93_spill] sm:$0xff] %v14973_v8  ;;  %v5808_v35 = vadd.f32 %v5807_v52, %v17422_v34  ;;  %7283 = vmatprep.mubr.f32.mxu1 %v14591_v56  ;;  %7747 = vmatprep.mubr.f32.mxu0 %v14591_v56  ;;  %v14989_v2 = vadd.f32 %v14774_v24, %v5804_v21  ;;  %v9966_v52 = vld [vmem:[%s16979_s6 + $0x798] sm:$0xff] }
 0x477   : > { %v5809_v15 = vpop.f32.mrf.mxu1  ;;  %v14991_v51 = vpop.f32.mrf.mxu0  ;;  %8043 = vmatprep.subr.mxu1 %v9968_v59  ;;  %8477 = vmatprep.subr.mxu0 %v9988_v37  ;;  %v9986_v24 = vld [vmem:[%s16979_s6 + $0x838] sm:$0xff]  ;;  %v9965_v37 = vld [vmem:[%s16979_s6 + $0x790] sm:$0xff] }
 0x478   : > { %17423 = vst [vmem:[#allocation70_spill] sm:$0xff] %v14989_v2  ;;  %v5810_v8 = vadd.f32 %v5809_v15, %v17424_v33  ;;  %8044 = vmatpush1.msra.mxu1 %v9967_v32  ;;  %8478 = vmatpush1.msra.mxu0 %v9987_v44  ;;  %v15003_v21 = vadd.f32 %v14785_v57, %v5808_v35  ;;  %v9985_v32 = vld [vmem:[%s16979_s6 + $0x830] sm:$0xff] }
 0x479   : > { %v5813_v34 = vpop.f32.mrf.mxu1  ;;  %v15005_v59 = vpop.f32.mrf.mxu0  ;;  %7284 = vmatmul.mubr.f32.gmra.mxu1 %v14754_v19  ;;  %7748 = vmatmul.mubr.f32.gmra.mxu0 %v14994_v20  ;;  %v17426_v44 = vld [vmem:[#allocation79_spill] sm:$0xff]  ;;  %v17428_v33 = vld [vmem:[#allocation102_spill] sm:$0xff] }
 0x47a   : > { %17425 = vst [vmem:[#allocation94_spill] sm:$0xff] %v15003_v21  ;;  %v5814_v15 = vadd.f32 %v5813_v34, %v17426_v44  ;;  %7289 = vmatprep.mubr.f32.mxu1 %v14591_v56  ;;  %7753 = vmatprep.mubr.f32.mxu0 %v14591_v56  ;;  %v15019_v57 = vadd.f32 %v14797_v1, %v5810_v8  ;;  %v15024_v2 = vld [vmem:[#allocation3 + $0x8c] sm:$0xff]  ;;  %v9964_v34 = vld [vmem:[%s16979_s6 + $0x788] sm:$0xff] }
 0x47b   : > { %v5815_v19 = vpop.f32.mrf.mxu1  ;;  %v15021_v35 = vpop.f32.mrf.mxu0  ;;  %8045 = vmatprep.subr.mxu1 %v9966_v52  ;;  %8479 = vmatprep.subr.mxu0 %v9986_v24  ;;  %v9984_v1 = vld [vmem:[%s16979_s6 + $0x828] sm:$0xff]  ;;  %v9963_v24 = vld [vmem:[%s16979_s6 + $0x780] sm:$0xff] }
 0x47c   : > { %17427 = vst [vmem:[#allocation95_spill] sm:$0xff] %v15019_v57  ;;  %v5816_v21 = vadd.f32 %v5815_v19, %v17428_v33  ;;  %8046 = vmatpush1.msra.mxu1 %v9965_v37  ;;  %8480 = vmatpush1.msra.mxu0 %v9985_v32  ;;  %v15033_v8 = vadd.f32 %v14808_v62, %v5814_v15  ;;  %v9983_v37 = vld [vmem:[%s16979_s6 + $0x820] sm:$0xff]  ;;  %v17432_v33 = vld [vmem:[#allocation55_spill] sm:$0xff] }
 0x47d   : > { %v5819_v44 = vpop.f32.mrf.mxu1  ;;  %v15035_v52 = vpop.f32.mrf.mxu0  ;;  %7290 = vmatmul.mubr.f32.gmra.mxu1 %v14777_v10  ;;  %7754 = vmatmul.mubr.f32.gmra.mxu0 %v15024_v2  ;;  %v17430_v32 = vld [vmem:[#allocation56_spill] sm:$0xff] }
 0x47e   : > { %17429 = vst [vmem:[#allocation117_spill] sm:$0xff] %v15033_v8  ;;  %v5820_v19 = vadd.f32 %v5819_v44, %v17430_v32  ;;  %7295 = vmatprep.mubr.f32.mxu1 %v14591_v56  ;;  %7759 = vmatprep.mubr.f32.mxu0 %v14591_v56  ;;  %v15049_v62 = vadd.f32 %v14820_v53, %v5816_v21  ;;  %v15054_v57 = vld [vmem:[#allocation3 + $0x94] sm:$0xff] }
 0x47f   : > { %v5821_v10 = vpop.f32.mrf.mxu1  ;;  %v15051_v15 = vpop.f32.mrf.mxu0  ;;  %8047 = vmatprep.subr.mxu1 %v9964_v34  ;;  %8481 = vmatprep.subr.mxu0 %v9984_v1  ;;  %v9962_v44 = vld [vmem:[%s16979_s6 + $0x778] sm:$0xff]  ;;  %v9961_v1 = vld [vmem:[%s16979_s6 + $0x770] sm:$0xff] }
 0x480   : > { %17431 = vst [vmem:[#allocation96_spill] sm:$0xff] %v15049_v62  ;;  %v5822_v8 = vadd.f32 %v5821_v10, %v17432_v33  ;;  %8048 = vmatpush1.msra.mxu1 %v9963_v24  ;;  %8482 = vmatpush1.msra.mxu0 %v9983_v37  ;;  %v9982_v53 = vld [vmem:[%s16979_s6 + $0x818] sm:$0xff]  ;;  %v15063_v21 = vadd.f32 %v14831_v31, %v5820_v19  ;;  %v9981_v24 = vld [vmem:[%s16979_s6 + $0x810] sm:$0xff]  ;;  %v15084_v62 = vld [vmem:[#allocation3 + $0x9c] sm:$0xff] }
 0x481   : > { %v5825_v32 = vpop.f32.mrf.mxu1  ;;  %v15065_v34 = vpop.f32.mrf.mxu0  ;;  %7296 = vmatmul.mubr.f32.gmra.mxu1 %v14800_v49  ;;  %7760 = vmatmul.mubr.f32.gmra.mxu0 %v15054_v57  ;;  %v17434_v37 = vld [vmem:[#allocation106_spill] sm:$0xff]  ;;  %v17436_v33 = vld [vmem:[#allocation80_spill] sm:$0xff] }
 0x482   : > { %17433 = vst [vmem:[#allocation75_spill] sm:$0xff] %v15063_v21  ;;  %v5826_v10 = vadd.f32 %v5825_v32, %v17434_v37  ;;  %7301 = vmatprep.mubr.f32.mxu1 %v14591_v56  ;;  %7765 = vmatprep.mubr.f32.mxu0 %v14591_v56  ;;  %v15079_v31 = vadd.f32 %v14843_v5, %v5822_v8  ;;  %v9960_v32 = vld [vmem:[%s16979_s6 + $0x768] sm:$0xff] }
 0x483   : > { %v5827_v49 = vpop.f32.mrf.mxu1  ;;  %v15081_v19 = vpop.f32.mrf.mxu0  ;;  %8049 = vmatprep.subr.mxu1 %v9962_v44  ;;  %8483 = vmatprep.subr.mxu0 %v9982_v53  ;;  %v9980_v5 = vld [vmem:[%s16979_s6 + $0x808] sm:$0xff]  ;;  %v9959_v53 = vld [vmem:[%s16979_s6 + $0x760] sm:$0xff] }
 0x484   : > { %17435 = vst [vmem:[#allocation110_spill] sm:$0xff] %v15079_v31  ;;  %v5828_v21 = vadd.f32 %v5827_v49, %v17436_v33  ;;  %8050 = vmatpush1.msra.mxu1 %v9961_v1  ;;  %8484 = vmatpush1.msra.mxu0 %v9981_v24  ;;  %v15093_v8 = vadd.f32 %v14857_v0, %v5826_v10  ;;  %v9979_v1 = vld [vmem:[%s16979_s6 + $0x800] sm:$0xff]  ;;  %v15114_v31 = vld [vmem:[#allocation3 + $0xa4] sm:$0xff] }
 0x485   : > { %v5831_v37 = vpop.f32.mrf.mxu1  ;;  %v15095_v44 = vpop.f32.mrf.mxu0  ;;  %7302 = vmatmul.mubr.f32.gmra.mxu1 %v14823_v46  ;;  %7766 = vmatmul.mubr.f32.gmra.mxu0 %v15084_v62  ;;  %v17438_v24 = vld [vmem:[#allocation81_spill] sm:$0xff] }
 0x486   : > { %17437 = vst [vmem:[#allocation52_spill] sm:$0xff] %v15093_v8  ;;  %v5832_v49 = vadd.f32 %v5831_v37, %v17438_v24  ;;  %7307 = vmatprep.mubr.f32.mxu1 %v14591_v56  ;;  %7771 = vmatprep.mubr.f32.mxu0 %v14591_v56  ;;  %v15109_v0 = vadd.f32 %v14871_v61, %v5828_v21  ;;  %v17440_v33 = vld [vmem:[#allocation105_spill] sm:$0xff]  ;;  %v9958_v37 = vld [vmem:[%s16979_s6 + $0x758] sm:$0xff] }
 0x487   : > { %v5833_v46 = vpop.f32.mrf.mxu1  ;;  %v15111_v10 = vpop.f32.mrf.mxu0  ;;  %8051 = vmatprep.subr.mxu1 %v9960_v32  ;;  %8485 = vmatprep.subr.mxu0 %v9980_v5  ;;  %v9957_v32 = vld [vmem:[%s16979_s6 + $0x750] sm:$0xff] }
 0x488   : > { %17439 = vst [vmem:[#allocation101_spill] sm:$0xff] %v15109_v0  ;;  %v5834_v8 = vadd.f32 %v5833_v46, %v17440_v33  ;;  %8052 = vmatpush1.msra.mxu1 %v9959_v53  ;;  %8486 = vmatpush1.msra.mxu0 %v9979_v1  ;;  %v15120_v24 = vadd.f32 %v14886_v22, %v5832_v49  ;;  %v17442_v5 = vld [vmem:[#allocation58_spill] sm:$0xff]  ;;  %v15138_v33 = vld [vmem:[#allocation3 + $0xac] sm:$0xff] }
 0x489   : > { %v5837_v61 = vpop.f32.mrf.mxu1  ;;  %v15122_v21 = vpop.f32.mrf.mxu0  ;;  %7308 = vmatmul.mubr.f32.gmra.mxu1 %v14849_v47  ;;  %7772 = vmatmul.mubr.f32.gmra.mxu0 %v15114_v31  ;;  %v17444_v47 = vld [vmem:[#allocation57_spill] sm:$0xff] }
 0x48a   : > { %17441 = vst [vmem:[#allocation77_spill] sm:$0xff] %v15120_v24  ;;  %v5838_v53 = vadd.f32 %v5837_v61, %v17442_v5  ;;  %7313 = vmatprep.mubr.f32.mxu1 %v14591_v56  ;;  %7777 = vmatprep.mubr.f32.mxu0 %v14591_v56  ;;  %v15133_v22 = vadd.f32 %v14901_v30, %v5834_v8  ;;  %v9956_v61 = vld [vmem:[%s16979_s6 + $0x748] sm:$0xff]  ;;  %v9955_v30 = vld [vmem:[%s16979_s6 + $0x740] sm:$0xff] }
 0x48b   : > { %v5839_v1 = vpop.f32.mrf.mxu1  ;;  %v15135_v49 = vpop.f32.mrf.mxu0  ;;  %8053 = vmatprep.subr.mxu1 %v9958_v37  ;;  %v17446_v8 = vld [vmem:[#allocation109_spill] sm:$0xff] }
 0x48c   : > { %17443 = vst [vmem:[#allocation54_spill] sm:$0xff] %v15133_v22  ;;  %v5840_v46 = vadd.f32 %v5839_v1, %v17444_v47  ;;  %8054 = vmatpush1.msra.mxu1 %v9957_v32  ;;  %v15144_v5 = vadd.f32 %v14915_v23, %v5838_v53  ;;  %v15162_v47 = vld [vmem:[#allocation3 + $0xb4] sm:$0xff] }
 0x48d   : > { %v5843_v24 = vpop.f32.mrf.mxu1  ;;  %v15146_v0 = vpop.f32.mrf.mxu0  ;;  %7314 = vmatmul.mubr.f32.gmra.mxu1 %v14875_v48  ;;  %7778 = vmatmul.mubr.f32.gmra.mxu0 %v15138_v33  ;;  %v17448_v48 = vld [vmem:[#allocation82_spill] sm:$0xff] }
 0x48e   : > { %17445 = vst [vmem:[#allocation103_spill] sm:$0xff] %v15144_v5  ;;  %v5844_v37 = vadd.f32 %v5843_v24, %v17446_v8  ;;  %7319 = vmatprep.mubr.f32.mxu1 %v14591_v56  ;;  %7783 = vmatprep.mubr.f32.mxu0 %v14591_v56  ;;  %v15157_v23 = vadd.f32 %v14931_v18, %v5840_v46  ;;  %v9954_v24 = vld [vmem:[%s16979_s6 + $0x738] sm:$0xff]  ;;  %v9953_v18 = vld [vmem:[%s16979_s6 + $0x730] sm:$0xff] }
 0x48f   : > { %v5845_v32 = vpop.f32.mrf.mxu1  ;;  %v15159_v53 = vpop.f32.mrf.mxu0  ;;  %8055 = vmatprep.subr.mxu1 %v9956_v61  ;;  %v17450_v46 = vld [vmem:[#allocation83_spill] sm:$0xff] }
 0x490   : > { %17447 = vst [vmem:[#allocation48_spill] sm:$0xff] %v15157_v23  ;;  %v5846_v1 = vadd.f32 %v5845_v32, %v17448_v48  ;;  %8056 = vmatpush1.msra.mxu1 %v9955_v30  ;;  %v15168_v8 = vadd.f32 %v14945_v13, %v5844_v37  ;;  %v15186_v48 = vld [vmem:[#allocation3 + $0xbc] sm:$0xff] }
 0x491   : > { %v5849_v5 = vpop.f32.mrf.mxu1  ;;  %v15170_v22 = vpop.f32.mrf.mxu0  ;;  %7320 = vmatmul.mubr.f32.gmra.mxu1 %v14904_v54  ;;  %7784 = vmatmul.mubr.f32.gmra.mxu0 %v15162_v47  ;;  %v17451_v54 = vld [vmem:[#allocation108_spill] sm:$0xff] }
 0x492   : > { %17449 = vst [vmem:[#allocation47_spill] sm:$0xff] %v15168_v8  ;;  %v5850_v61 = vadd.f32 %v5849_v5, %v17450_v46  ;;  %7325 = vmatprep.mubr.f32.mxu1 %v14591_v56  ;;  %7789 = vmatprep.mubr.f32.mxu0 %v14591_v56  ;;  %v15181_v13 = vadd.f32 %v14961_v25, %v5846_v1  ;;  %v9952_v5 = vld [vmem:[%s16979_s6 + $0x728] sm:$0xff]  ;;  %v9951_v25 = vld [vmem:[%s16979_s6 + $0x720] sm:$0xff] }
 0x493   : > { %v5851_v30 = vpop.f32.mrf.mxu1  ;;  %v15183_v37 = vpop.f32.mrf.mxu0  ;;  %8057 = vmatprep.subr.mxu1 %v9954_v24  ;;  %v17453_v1 = vld [vmem:[#allocation60_spill] sm:$0xff] }
 0x494   : > { %v5852_v32 = vadd.f32 %v5851_v30, %v17451_v54  ;;  %8058 = vmatpush1.msra.mxu1 %v9953_v18  ;;  %v15192_v46 = vadd.f32 %v14975_v17, %v5850_v61  ;;  %v15210_v30 = vld [vmem:[#allocation3 + $0xc4] sm:$0xff] }
 0x495   : > { %v6411_v8 = vpop.f32.mrf.mxu1  ;;  %v15194_v23 = vpop.f32.mrf.mxu0  ;;  %7326 = vmatmul.mubr.f32.gmra.mxu1 %v14934_v14  ;;  %7790 = vmatmul.mubr.f32.gmra.mxu0 %v15186_v48 }
 0x496   : > { %17452 = vst [vmem:[#allocation72_spill] sm:$0xff] %v15192_v46  ;;  %v6626_v24 = vadd.f32 %v6411_v8, %v17453_v1  ;;  %7331 = vmatprep.mubr.f32.mxu1 %v14591_v56  ;;  %7795 = vmatprep.mubr.f32.mxu0 %v14591_v56  ;;  %v15205_v17 = vadd.f32 %v14991_v51, %v5852_v32  ;;  %v9950_v8 = vld [vmem:[%s16979_s6 + $0x718] sm:$0xff] }
 0x497   : > { %v6413_v18 = vpop.f32.mrf.mxu1  ;;  %v15207_v61 = vpop.f32.mrf.mxu0  ;;  %8059 = vmatprep.subr.mxu1 %v9952_v5 }
 0x498   : > { %v6627_v14 = vadd.f32 %v6413_v18, %v14455_v4  ;;  %8060 = vmatpush1.msra.mxu1 %v9951_v25  ;;  %v15216_v54 = vadd.f32 %v15005_v59, %v6626_v24  ;;  %v9949_v4 = vld [vmem:[%s16979_s6 + $0x710] sm:$0xff] }
 0x499   : > { %v6417_v1 = vpop.f32.mrf.mxu1  ;;  %v15218_v46 = vpop.f32.mrf.mxu0  ;;  %7332 = vmatmul.mubr.f32.gmra.mxu1 %v14964_v29  ;;  %7796 = vmatmul.mubr.f32.gmra.mxu0 %v15210_v30  ;;  %v15234_v25 = vld [vmem:[#allocation3 + $0xcc] sm:$0xff] }
 0x49a   : > { %v6628_v51 = vadd.f32 %v6417_v1, %v14464_v27  ;;  %7337 = vmatprep.mubr.f32.mxu1 %v14591_v56  ;;  %7801 = vmatprep.mubr.f32.mxu0 %v14591_v56  ;;  %v15229_v59 = vadd.f32 %v15021_v35, %v6627_v14  ;;  %v9948_v27 = vld [vmem:[%s16979_s6 + $0x708] sm:$0xff] }
 0x49b   : > { %v6419_v32 = vpop.f32.mrf.mxu1  ;;  %v15231_v5 = vpop.f32.mrf.mxu0  ;;  %8061 = vmatprep.subr.mxu1 %v9950_v8 }
 0x49c   : > { %v6629_v29 = vadd.f32 %v6419_v32, %v14476_v60  ;;  %8062 = vmatpush1.msra.mxu1 %v9949_v4  ;;  %v15240_v24 = vadd.f32 %v15035_v52, %v6628_v51  ;;  %v9947_v60 = vld [vmem:[%s16979_s6 + $0x700] sm:$0xff] }
 0x49d   : > { %v6423_v18 = vpop.f32.mrf.mxu1  ;;  %v15242_v1 = vpop.f32.mrf.mxu0  ;;  %7338 = vmatmul.mubr.f32.gmra.mxu1 %v14994_v20  ;;  %7802 = vmatmul.mubr.f32.gmra.mxu0 %v15234_v25  ;;  %v15258_v4 = vld [vmem:[#allocation3 + $0xd4] sm:$0xff] }
 0x49e   : > { %v6630_v35 = vadd.f32 %v6423_v18, %v14485_v7  ;;  %7343 = vmatprep.mubr.f32.mxu1 %v14591_v56  ;;  %7807 = vmatprep.mubr.f32.mxu0 %v14591_v56  ;;  %v15253_v52 = vadd.f32 %v15051_v15, %v6629_v29  ;;  %v15268_v15 = vld [vmem:[#allocation3] sm:$0xff] }
 0x49f   : > { %v6425_v14 = vpop.f32.mrf.mxu1  ;;  %v15255_v8 = vpop.f32.mrf.mxu0  ;;  %8063 = vmatprep.subr.mxu1 %v9948_v27  ;;  %v15278_v18 = vld [vmem:[#allocation3 + $0xdc] sm:$0xff] }
 0x4a0   : > { %v6631_v20 = vadd.f32 %v6425_v14, %v14494_v41  ;;  %8064 = vmatpush1.msra.mxu1 %v9947_v60  ;;  %v15261_v51 = vadd.f32 %v15065_v34, %v6630_v35 }
 0x4a1   : > { %v6429_v7 = vpop.f32.mrf.mxu1  ;;  %v15263_v32 = vpop.f32.mrf.mxu0  ;;  %7344 = vmatmul.mubr.f32.gmra.mxu1 %v15024_v2  ;;  %7808 = vmatmul.mubr.f32.gmra.mxu0 %v15258_v4 }
 0x4a2   : > { %v6632_v56 = vadd.f32 %v6429_v7, %v14500_v58  ;;  %7349 = vmatprep.mubr.f32.mxu1 %v15268_v15  ;;  %7813 = vmatprep.mubr.f32.mxu0 %v15268_v15  ;;  %v15273_v41 = vadd.f32 %v15081_v19, %v6631_v20  ;;  %v15296_v20 = vld [vmem:[#allocation3 + $0xe4] sm:$0xff] }
 0x4a3   : > { %v6431_v34 = vpop.f32.mrf.mxu1  ;;  %v15275_v29 = vpop.f32.mrf.mxu0 }
 0x4a4   : > { %v6633_v27 = vadd.f32 %v6431_v34, %v14509_v63  ;;  %v15281_v2 = vadd.f32 %v15095_v44, %v6632_v56 }
 0x4a5   : > { %v6435_v58 = vpop.f32.mrf.mxu1  ;;  %v15283_v60 = vpop.f32.mrf.mxu0  ;;  %7350 = vmatmul.mubr.f32.gmra.mxu1 %v15054_v57  ;;  %7814 = vmatmul.mubr.f32.gmra.mxu0 %v15278_v18 }
 0x4a6   : > { %v6634_v19 = vadd.f32 %v6435_v58, %v14515_v50  ;;  %7355 = vmatprep.mubr.f32.mxu1 %v15268_v15  ;;  %7819 = vmatprep.mubr.f32.mxu0 %v15268_v15  ;;  %v15291_v63 = vadd.f32 %v15111_v10, %v6633_v27  ;;  %v15314_v27 = vld [vmem:[#allocation3 + $0xec] sm:$0xff] }
 0x4a7   : > { %v6437_v35 = vpop.f32.mrf.mxu1  ;;  %v15293_v14 = vpop.f32.mrf.mxu0 }
 0x4a8   : > { %v6635_v44 = vadd.f32 %v6437_v35, %v14524_v40  ;;  %v15299_v57 = vadd.f32 %v15122_v21, %v6634_v19 }
 0x4a9   : > { %v6441_v7 = vpop.f32.mrf.mxu1  ;;  %v15301_v56 = vpop.f32.mrf.mxu0  ;;  %7356 = vmatmul.mubr.f32.gmra.mxu1 %v15084_v62  ;;  %7820 = vmatmul.mubr.f32.gmra.mxu0 %v15296_v20 }
 0x4aa   : > { %v6636_v50 = vadd.f32 %v6441_v7, %v14530_v42  ;;  %7361 = vmatprep.mubr.f32.mxu1 %v15268_v15  ;;  %7825 = vmatprep.mubr.f32.mxu0 %v15268_v15  ;;  %v15309_v40 = vadd.f32 %v15135_v49, %v6635_v44  ;;  %v15332_v44 = vld [vmem:[#allocation3 + $0xf4] sm:$0xff] }
 0x4ab   : > { %v6443_v10 = vpop.f32.mrf.mxu1  ;;  %v15311_v34 = vpop.f32.mrf.mxu0 }
 0x4ac   : > { %v6637_v21 = vadd.f32 %v6443_v10, %v14538_v12  ;;  %v15317_v62 = vadd.f32 %v15146_v0, %v6636_v50 }
 0x4ad   : > { %v6447_v58 = vpop.f32.mrf.mxu1  ;;  %v15319_v19 = vpop.f32.mrf.mxu0  ;;  %7362 = vmatmul.mubr.f32.gmra.mxu1 %v15114_v31  ;;  %7826 = vmatmul.mubr.f32.gmra.mxu0 %v15314_v27 }
 0x4ae   : > { %v6638_v42 = vadd.f32 %v6447_v58, %v14544_v26  ;;  %7367 = vmatprep.mubr.f32.mxu1 %v15268_v15  ;;  %7831 = vmatprep.mubr.f32.mxu0 %v15268_v15  ;;  %v15327_v12 = vadd.f32 %v15159_v53, %v6637_v21  ;;  %v15350_v21 = vld [vmem:[#allocation3 + $0xfc] sm:$0xff] }
 0x4af   : > { %v6449_v49 = vpop.f32.mrf.mxu1  ;;  %v15329_v35 = vpop.f32.mrf.mxu0 }
 0x4b0   : > { %v6639_v0 = vadd.f32 %v6449_v49, %v14552_v55  ;;  %v15335_v31 = vadd.f32 %v15170_v22, %v6638_v42 }
 0x4b1   : > { %v6453_v7 = vpop.f32.mrf.mxu1  ;;  %v15337_v50 = vpop.f32.mrf.mxu0  ;;  %7368 = vmatmul.mubr.f32.gmra.mxu1 %v15138_v33  ;;  %7832 = vmatmul.mubr.f32.gmra.mxu0 %v15332_v44 }
 0x4b2   : > { %v6640_v26 = vadd.f32 %v6453_v7, %v14558_v16  ;;  %7373 = vmatprep.mubr.f32.mxu1 %v15268_v15  ;;  %7837 = vmatprep.mubr.f32.mxu0 %v15268_v15  ;;  %v15345_v55 = vadd.f32 %v15183_v37, %v6639_v0  ;;  %v15368_v0 = vld [vmem:[#allocation3 + $0x104] sm:$0xff] }
 0x4b3   : > { %v6455_v53 = vpop.f32.mrf.mxu1  ;;  %v15347_v10 = vpop.f32.mrf.mxu0 }
 0x4b4   : > { %v6641_v22 = vadd.f32 %v6455_v53, %v14566_v9  ;;  %v15353_v33 = vadd.f32 %v15194_v23, %v6640_v26 }
 0x4b5   : > { %v6459_v58 = vpop.f32.mrf.mxu1  ;;  %v15355_v42 = vpop.f32.mrf.mxu0  ;;  %7374 = vmatmul.mubr.f32.gmra.mxu1 %v15162_v47  ;;  %7838 = vmatmul.mubr.f32.gmra.mxu0 %v15350_v21 }
 0x4b6   : > { %v6642_v16 = vadd.f32 %v6459_v58, %v14572_v3  ;;  %7379 = vmatprep.mubr.f32.mxu1 %v15268_v15  ;;  %7843 = vmatprep.mubr.f32.mxu0 %v15268_v15  ;;  %v15363_v9 = vadd.f32 %v15207_v61, %v6641_v22  ;;  %v15386_v22 = vld [vmem:[#allocation3 + $0x10c] sm:$0xff] }
 0x4b7   : > { %v6461_v37 = vpop.f32.mrf.mxu1  ;;  %v15365_v49 = vpop.f32.mrf.mxu0 }
 0x4b8   : > { %v6643_v23 = vadd.f32 %v6461_v37, %v14580_v6  ;;  %v15371_v47 = vadd.f32 %v15218_v46, %v6642_v16 }
 0x4b9   : > { %v6465_v7 = vpop.f32.mrf.mxu1  ;;  %v15373_v26 = vpop.f32.mrf.mxu0  ;;  %7380 = vmatmul.mubr.f32.gmra.mxu1 %v15186_v48  ;;  %7844 = vmatmul.mubr.f32.gmra.mxu0 %v15368_v0 }
 0x4ba   : > { %v6644_v3 = vadd.f32 %v6465_v7, %v14586_v45  ;;  %7385 = vmatprep.mubr.f32.mxu1 %v15268_v15  ;;  %7849 = vmatprep.mubr.f32.mxu0 %v15268_v15  ;;  %v15381_v6 = vadd.f32 %v15231_v5, %v6643_v23  ;;  %v15404_v23 = vld [vmem:[#allocation3 + $0x114] sm:$0xff] }
 0x4bb   : > { %v6467_v61 = vpop.f32.mrf.mxu1  ;;  %v15383_v53 = vpop.f32.mrf.mxu0 }
 0x4bc   : > { %v6645_v46 = vadd.f32 %v6467_v61, %v14596_v43  ;;  %v15389_v48 = vadd.f32 %v15242_v1, %v6644_v3 }
 0x4bd   : > { %v6471_v58 = vpop.f32.mrf.mxu1  ;;  %v15391_v16 = vpop.f32.mrf.mxu0  ;;  %7386 = vmatmul.mubr.f32.gmra.mxu1 %v15210_v30  ;;  %7850 = vmatmul.mubr.f32.gmra.mxu0 %v15386_v22 }
 0x4be   : > { %v6646_v45 = vadd.f32 %v6471_v58, %v14602_v28  ;;  %7391 = vmatprep.mubr.f32.mxu1 %v15268_v15  ;;  %7855 = vmatprep.mubr.f32.mxu0 %v15268_v15  ;;  %v15399_v43 = vadd.f32 %v15255_v8, %v6645_v46  ;;  %v15422_v46 = vld [vmem:[#allocation3 + $0x11c] sm:$0xff] }
 0x4bf   : > { %v6473_v5 = vpop.f32.mrf.mxu1  ;;  %v15401_v37 = vpop.f32.mrf.mxu0 }
 0x4c0   : > { %v6647_v1 = vadd.f32 %v6473_v5, %v14610_v11  ;;  %v15407_v30 = vadd.f32 %v15263_v32, %v6646_v45 }
 0x4c1   : > { %v6477_v7 = vpop.f32.mrf.mxu1  ;;  %v15409_v3 = vpop.f32.mrf.mxu0  ;;  %7392 = vmatmul.mubr.f32.gmra.mxu1 %v15234_v25  ;;  %7856 = vmatmul.mubr.f32.gmra.mxu0 %v15404_v23 }
 0x4c2   : > { %v6648_v28 = vadd.f32 %v6477_v7, %v14616_v39  ;;  %7397 = vmatprep.mubr.f32.mxu1 %v15268_v15  ;;  %7861 = vmatprep.mubr.f32.mxu0 %v15268_v15  ;;  %v15417_v11 = vadd.f32 %v15275_v29, %v6647_v1  ;;  %v15440_v7 = vld [vmem:[#allocation3 + $0x124] sm:$0xff] }
 0x4c3   : > { %v6479_v8 = vpop.f32.mrf.mxu1  ;;  %v15419_v61 = vpop.f32.mrf.mxu0 }
 0x4c4   : > { %v6649_v32 = vadd.f32 %v6479_v8, %v14624_v38  ;;  %v15425_v25 = vadd.f32 %v15283_v60, %v6648_v28  ;;  %v17455_v60 = vld [vmem:[#allocation59_spill] sm:$0xff] }
 0x4c5   : > { %v6483_v58 = vpop.f32.mrf.mxu1  ;;  %v15427_v45 = vpop.f32.mrf.mxu0  ;;  %7398 = vmatmul.mubr.f32.gmra.mxu1 %v15258_v4  ;;  %7862 = vmatmul.mubr.f32.gmra.mxu0 %v15422_v46 }
 0x4c6   : > { %v6650_v39 = vadd.f32 %v6483_v58, %v14630_v36  ;;  %7403 = vmatprep.mubr.f32.mxu1 %v15268_v15  ;;  %7867 = vmatprep.mubr.f32.mxu0 %v15268_v15  ;;  %v15435_v38 = vadd.f32 %v15293_v14, %v6649_v32  ;;  %v17457_v36 = vld [vmem:[#allocation84_spill] sm:$0xff] }
 0x4c7   : > { %v6485_v29 = vpop.f32.mrf.mxu1  ;;  %v15437_v5 = vpop.f32.mrf.mxu0 }
 0x4c8   : > { %17454 = vst [vmem:[#allocation73_spill] sm:$0xff] %v15435_v38  ;;  %v6651_v1 = vadd.f32 %v6485_v29, %v17455_v60  ;;  %v15443_v4 = vadd.f32 %v15301_v56, %v6650_v39  ;;  %v17459_v56 = vld [vmem:[#allocation85_spill] sm:$0xff]  ;;  %v15458_v60 = vld [vmem:[#allocation3 + $0x12c] sm:$0xff] }
 0x4c9   : > { %v6489_v28 = vpop.f32.mrf.mxu1  ;;  %v15445_v8 = vpop.f32.mrf.mxu0  ;;  %7404 = vmatmul.mubr.f32.gmra.mxu1 %v15278_v18  ;;  %7868 = vmatmul.mubr.f32.gmra.mxu0 %v15440_v7 }
 0x4ca   : > { %17456 = vst [vmem:[#allocation97_spill] sm:$0xff] %v15443_v4  ;;  %v6652_v14 = vadd.f32 %v6489_v28, %v17457_v36  ;;  %7409 = vmatprep.mubr.f32.mxu1 %v15268_v15  ;;  %7873 = vmatprep.mubr.f32.mxu0 %v15268_v15  ;;  %v15453_v32 = vadd.f32 %v15311_v34, %v6651_v1  ;;  %v17461_v28 = vld [vmem:[#allocation111_spill] sm:$0xff]  ;;  %v7576_v1 = vld [vmem:[#allocation3 + $0x134] sm:$0xff] }
 0x4cb   : > { %v6491_v58 = vpop.f32.mrf.mxu1  ;;  %v15455_v29 = vpop.f32.mrf.mxu0 }
 0x4cc   : > { %17458 = vst [vmem:[#allocation104_spill] sm:$0xff] %v15453_v32  ;;  %v6653_v39 = vadd.f32 %v6491_v58, %v17459_v56  ;;  %v15461_v18 = vadd.f32 %v15319_v19, %v6652_v14  ;;  %v17462_v14 = vld [vmem:[#allocation62_spill] sm:$0xff] }
 0x4cd   : > { %v6495_v4 = vpop.f32.mrf.mxu1  ;;  %v15463_v38 = vpop.f32.mrf.mxu0  ;;  %7410 = vmatmul.mubr.f32.gmra.mxu1 %v15296_v20  ;;  %7874 = vmatmul.mubr.f32.gmra.mxu0 %v15458_v60 }
 0x4ce   : > { %17460 = vst [vmem:[#allocation50_spill] sm:$0xff] %v15461_v18  ;;  %v6654_v34 = vadd.f32 %v6495_v4, %v17461_v28  ;;  %7415 = vmatprep.mubr.f32.mxu1 %v15268_v15  ;;  %7879 = vmatprep.mubr.f32.mxu0 %v15268_v15  ;;  %v15471_v36 = vadd.f32 %v15329_v35, %v6653_v39  ;;  %v17464_v4 = vld [vmem:[#allocation61_spill] sm:$0xff] }
 0x4cf   : > { %v6497_v58 = vpop.f32.mrf.mxu1  ;;  %v15473_v19 = vpop.f32.mrf.mxu0  ;;  %v7577_v35 = vld [vmem:[#allocation3 + $0x13c] sm:$0xff] }
 0x4d0   : > { %v6655_v56 = vadd.f32 %v6497_v58, %v17462_v14  ;;  %v15477_v18 = vadd.f32 %v15337_v50, %v6654_v34  ;;  %v17465_v50 = vld [vmem:[#allocation113_spill] sm:$0xff] }
 0x4d1   : > { %v6501_v20 = vpop.f32.mrf.mxu1  ;;  %v15479_v32 = vpop.f32.mrf.mxu0  ;;  %7416 = vmatmul.mubr.f32.gmra.mxu1 %v15314_v27  ;;  %7880 = vmatmul.mubr.f32.gmra.mxu0 %v7576_v1 }
 0x4d2   : > { %17463 = vst [vmem:[#allocation49_spill] sm:$0xff] %v15477_v18  ;;  %v6656_v28 = vadd.f32 %v6501_v20, %v17464_v4  ;;  %7421 = vmatprep.mubr.f32.mxu1 %v15268_v15  ;;  %7885 = vmatprep.mubr.f32.mxu0 %v15268_v15  ;;  %v15486_v39 = vadd.f32 %v15347_v10, %v6655_v56  ;;  %v17467_v20 = vld [vmem:[#allocation86_spill] sm:$0xff] }
 0x4d3   : > { %v6503_v58 = vpop.f32.mrf.mxu1  ;;  %v15488_v14 = vpop.f32.mrf.mxu0 }
 0x4d4   : > { %v6657_v34 = vadd.f32 %v6503_v58, %v17465_v50  ;;  %v15492_v18 = vadd.f32 %v15355_v42, %v6656_v28  ;;  %v17468_v42 = vld [vmem:[#allocation87_spill] sm:$0xff] }
 0x4d5   : > { %v6507_v27 = vpop.f32.mrf.mxu1  ;;  %v15494_v1 = vpop.f32.mrf.mxu0  ;;  %7422 = vmatmul.mubr.f32.gmra.mxu1 %v15332_v44  ;;  %7886 = vmatmul.mubr.f32.gmra.mxu0 %v7577_v35  ;;  %v8386_v50 = vld [vmem:[#allocation3 + $0x26] sm:$0xff] }
 0x4d6   : > { %17466 = vst [vmem:[#allocation107_spill] sm:$0xff] %v15492_v18  ;;  %v6658_v4 = vadd.f32 %v6507_v27, %v17467_v20  ;;  %7427 = vmatprep.mubr.f32.mxu1 %v15268_v15  ;;  %8519 = vmatprep.mubr.f32.mxu0 %v15268_v15  ;;  %v15501_v10 = vadd.f32 %v15365_v49, %v6657_v34  ;;  %v17470_v27 = vld [vmem:[#allocation112_spill] sm:$0xff] }
 0x4d7   : > { %v6509_v56 = vpop.f32.mrf.mxu1  ;;  %v15503_v58 = vpop.f32.mrf.mxu0 }
 0x4d8   : > { %v6659_v28 = vadd.f32 %v6509_v56, %v17468_v42  ;;  %v15507_v18 = vadd.f32 %v15373_v26, %v6658_v4  ;;  %v17471_v26 = vld [vmem:[#allocation64_spill] sm:$0xff] }
 0x4d9   : > { %v6513_v44 = vpop.f32.mrf.mxu1  ;;  %v15509_v35 = vpop.f32.mrf.mxu0  ;;  %7428 = vmatmul.mubr.f32.gmra.mxu1 %v15350_v21  ;;  %8520 = vmatmul.mubr.f32.vlgmr.msra.gmra.mxu0 %v8386_v50  ;;  %v8387_v42 = vld [vmem:[#allocation3 + $0x2e] sm:$0xff] }
 0x4da   : > { %17469 = vst [vmem:[#allocation99_spill] sm:$0xff] %v15507_v18  ;;  %v6660_v20 = vadd.f32 %v6513_v44, %v17470_v27  ;;  %7433 = vmatprep.mubr.f32.mxu1 %v15268_v15  ;;  %8525 = vmatprep.mubr.f32.mxu0 %v15268_v15  ;;  %v15516_v49 = vadd.f32 %v15383_v53, %v6659_v28  ;;  %v17473_v44 = vld [vmem:[#allocation63_spill] sm:$0xff] }
 0x4db   : > { %v6515_v34 = vpop.f32.mrf.mxu1  ;;  %v15518_v56 = vpop.f32.mrf.mxu0 }
 0x4dc   : > { %v6661_v4 = vadd.f32 %v6515_v34, %v17471_v26  ;;  %v15522_v18 = vadd.f32 %v15391_v16, %v6660_v20  ;;  %v17474_v16 = vld [vmem:[#allocation115_spill] sm:$0xff]  ;;  %v8388_v26 = vld [vmem:[#allocation3 + $0x36] sm:$0xff] }
 0x4dd   : > { %v6519_v21 = vpop.f32.mrf.mxu1  ;;  %v15524_v50 = vpop.f32.mrf.mxu0  ;;  %7434 = vmatmul.mubr.f32.gmra.mxu1 %v15368_v0  ;;  %8526 = vmatmul.mubr.f32.gmra.mxu0 %v8387_v42 }
 0x4de   : > { %17472 = vst [vmem:[#allocation74_spill] sm:$0xff] %v15522_v18  ;;  %v6662_v27 = vadd.f32 %v6519_v21, %v17473_v44  ;;  %7439 = vmatprep.mubr.f32.mxu1 %v15268_v15  ;;  %8531 = vmatprep.mubr.f32.mxu0 %v15268_v15  ;;  %v15531_v53 = vadd.f32 %v15401_v37, %v6661_v4  ;;  %v17476_v21 = vld [vmem:[#allocation43_spill] sm:$0xff] }
 0x4df   : > { %v6521_v28 = vpop.f32.mrf.mxu1  ;;  %v15533_v34 = vpop.f32.mrf.mxu0 }
 0x4e0   : > { %v6663_v20 = vadd.f32 %v6521_v28, %v17474_v16  ;;  %v15537_v18 = vadd.f32 %v15409_v3, %v6662_v27  ;;  %v17477_v3 = vld [vmem:[#allocation44_spill] sm:$0xff]  ;;  %v8389_v16 = vld [vmem:[#allocation3 + $0x3e] sm:$0xff] }
 0x4e1   : > { %v6525_v0 = vpop.f32.mrf.mxu1  ;;  %v15539_v42 = vpop.f32.mrf.mxu0  ;;  %7440 = vmatmul.mubr.f32.gmra.mxu1 %v15386_v22  ;;  %8532 = vmatmul.mubr.f32.gmra.mxu0 %v8388_v26 }
 0x4e2   : > { %17475 = vst [vmem:[#allocation98_spill] sm:$0xff] %v15537_v18  ;;  %v6664_v44 = vadd.f32 %v6525_v0, %v17476_v21  ;;  %7445 = vmatprep.mubr.f32.mxu1 %v15268_v15  ;;  %8537 = vmatprep.mubr.f32.mxu0 %v15268_v15  ;;  %v15546_v37 = vadd.f32 %v15419_v61, %v6663_v20  ;;  %v17479_v0 = vld [vmem:[#allocation88_spill] sm:$0xff] }
 0x4e3   : > { %v6527_v4 = vpop.f32.mrf.mxu1  ;;  %v15548_v28 = vpop.f32.mrf.mxu0 }
 0x4e4   : > { %v6665_v27 = vadd.f32 %v6527_v4, %v17477_v3  ;;  %v15552_v18 = vadd.f32 %v15427_v45, %v6664_v44  ;;  %v17480_v45 = vld [vmem:[#allocation89_spill] sm:$0xff]  ;;  %v8390_v3 = vld [vmem:[#allocation3 + $0x46] sm:$0xff] }
 0x4e5   : > { %v6531_v22 = vpop.f32.mrf.mxu1  ;;  %v15554_v26 = vpop.f32.mrf.mxu0  ;;  %7446 = vmatmul.mubr.f32.gmra.mxu1 %v15404_v23  ;;  %8538 = vmatmul.mubr.f32.gmra.mxu0 %v8389_v16 }
 0x4e6   : > { %17478 = vst [vmem:[#allocation71_spill] sm:$0xff] %v15552_v18  ;;  %v6666_v21 = vadd.f32 %v6531_v22, %v17479_v0  ;;  %7451 = vmatprep.mubr.f32.mxu1 %v15268_v15  ;;  %8543 = vmatprep.mubr.f32.mxu0 %v15268_v15  ;;  %v15561_v61 = vadd.f32 %v15437_v5, %v6665_v27  ;;  %v17482_v22 = vld [vmem:[#allocation114_spill] sm:$0xff] }
 0x4e7   : > { %v6533_v20 = vpop.f32.mrf.mxu1  ;;  %v15563_v4 = vpop.f32.mrf.mxu0 }
 0x4e8   : > { %v6667_v44 = vadd.f32 %v6533_v20, %v17480_v45  ;;  %v15567_v18 = vadd.f32 %v15445_v8, %v6666_v21  ;;  %v17483_v8 = vld [vmem:[#allocation66_spill] sm:$0xff]  ;;  %v8391_v45 = vld [vmem:[#allocation3 + $0x4e] sm:$0xff] }
 0x4e9   : > { %v6537_v23 = vpop.f32.mrf.mxu1  ;;  %v15569_v16 = vpop.f32.mrf.mxu0  ;;  %7452 = vmatmul.mubr.f32.gmra.mxu1 %v15422_v46  ;;  %8544 = vmatmul.mubr.f32.gmra.mxu0 %v8390_v3 }
 0x4ea   : > { %17481 = vst [vmem:[#allocation51_spill] sm:$0xff] %v15567_v18  ;;  %v6668_v0 = vadd.f32 %v6537_v23, %v17482_v22  ;;  %7457 = vmatprep.mubr.f32.mxu1 %v15268_v15  ;;  %8549 = vmatprep.mubr.f32.mxu0 %v15268_v15  ;;  %v15576_v5 = vadd.f32 %v15455_v29, %v6667_v44  ;;  %v17485_v23 = vld [vmem:[#allocation65_spill] sm:$0xff] }
 0x4eb   : > { %v6539_v27 = vpop.f32.mrf.mxu1  ;;  %v15578_v20 = vpop.f32.mrf.mxu0 }
 0x4ec   : > { %v6669_v21 = vadd.f32 %v6539_v27, %v17483_v8  ;;  %v15582_v18 = vadd.f32 %v15463_v38, %v6668_v0  ;;  %v17487_v38 = vld [vmem:[#allocation67_spill] sm:$0xff]  ;;  %v8392_v8 = vld [vmem:[#allocation3 + $0x56] sm:$0xff] }
 0x4ed   : > { %v6543_v46 = vpop.f32.mrf.mxu1  ;;  %v15584_v3 = vpop.f32.mrf.mxu0  ;;  %7458 = vmatmul.mubr.f32.gmra.mxu1 %v15440_v7  ;;  %8550 = vmatmul.mubr.f32.gmra.mxu0 %v8391_v45 }
 0x4ee   : > { %17484 = vst [vmem:[#allocation76_spill] sm:$0xff] %v15582_v18  ;;  %v6670_v22 = vadd.f32 %v6543_v46, %v17485_v23  ;;  %7463 = vmatprep.mubr.f32.mxu1 %v15268_v15  ;;  %8555 = vmatprep.mubr.f32.mxu0 %v15268_v15  ;;  %v15591_v29 = vadd.f32 %v15473_v19, %v6669_v21  ;;  %v17489_v46 = vld [vmem:[#allocation45_spill] sm:$0xff] }
 0x4ef   : > { %v6545_v44 = vpop.f32.mrf.mxu1  ;;  %v15593_v27 = vpop.f32.mrf.mxu0 }
 0x4f0   : > { %17486 = vst [vmem:[#allocation100_spill] sm:$0xff] %v15591_v29  ;;  %v6671_v0 = vadd.f32 %v6545_v44, %v17487_v38  ;;  %v15597_v18 = vadd.f32 %v15479_v32, %v6670_v22  ;;  %v17491_v32 = vld [vmem:[#allocation46_spill] sm:$0xff] }
 0x4f1   : > { %v6549_v7 = vpop.f32.mrf.mxu1  ;;  %v15599_v45 = vpop.f32.mrf.mxu0  ;;  %7464 = vmatmul.mubr.f32.gmra.mxu1 %v15458_v60  ;;  %8556 = vmatmul.mubr.f32.gmra.mxu0 %v8392_v8  ;;  %v7964_v38 = vld [vmem:[#allocation3 + $0x25] sm:$0xff] }
 0x4f2   : > { %17488 = vst [vmem:[#allocation53_spill] sm:$0xff] %v15597_v18  ;;  %v6672_v23 = vadd.f32 %v6549_v7, %v17489_v46  ;;  %8097 = vmatprep.mubr.f32.mxu1 %v15268_v15  ;;  %8561 = vmatprep.mubr.f32.mxu0 %v15268_v15  ;;  %v15606_v19 = vadd.f32 %v15488_v14, %v6671_v0  ;;  %v8393_v18 = vld [vmem:[#allocation3 + $0x5e] sm:$0xff] }
 0x4f3   : > { %v6551_v21 = vpop.f32.mrf.mxu1  ;;  %v15608_v44 = vpop.f32.mrf.mxu0  ;;  %v17493_v7 = vld [vmem:[#allocation90_spill] sm:$0xff] }
 0x4f4   : > { %17490 = vst [vmem:[#allocation78_spill] sm:$0xff] %v15606_v19  ;;  %v6673_v22 = vadd.f32 %v6551_v21, %v17491_v32  ;;  %v15612_v29 = vadd.f32 %v15494_v1, %v6672_v23  ;;  %v17495_v32 = vld [vmem:[#allocation91_spill] sm:$0xff] }
 0x4f5   : > { %v6555_v60 = vpop.f32.mrf.mxu1  ;;  %v15614_v8 = vpop.f32.mrf.mxu0  ;;  %8098 = vmatmul.mubr.f32.vlgmr.msra.gmra.mxu1 %v7964_v38  ;;  %8562 = vmatmul.mubr.f32.gmra.mxu0 %v8393_v18  ;;  %v7965_v23 = vld [vmem:[#allocation3 + $0x2d] sm:$0xff] }
 0x4f6   : > { %17492 = vst [vmem:[#allocation79_spill] sm:$0xff] %v15612_v29  ;;  %v6674_v46 = vadd.f32 %v6555_v60, %v17493_v7  ;;  %8103 = vmatprep.mubr.f32.mxu1 %v15268_v15  ;;  %8567 = vmatprep.mubr.f32.mxu0 %v15268_v15  ;;  %v15620_v14 = vadd.f32 %v15503_v58, %v6673_v22  ;;  %v8394_v29 = vld [vmem:[#allocation3 + $0x66] sm:$0xff]  ;;  %v17497_v60 = vld [vmem:[#allocation116_spill] sm:$0xff] }
 0x4f7   : > { %v6557_v0 = vpop.f32.mrf.mxu1  ;;  %v15622_v21 = vpop.f32.mrf.mxu0 }
 0x4f8   : > { %17494 = vst [vmem:[#allocation102_spill] sm:$0xff] %v15620_v14  ;;  %v6675_v1 = vadd.f32 %v6557_v0, %v17495_v32  ;;  %v15626_v19 = vadd.f32 %v15509_v35, %v6674_v46  ;;  %v17499_v32 = vld [vmem:[#allocation68_spill] sm:$0xff] }
 0x4f9   : > { %v6561_v18 = vpop.f32.mrf.mxu1  ;;  %v15628_v38 = vpop.f32.mrf.mxu0  ;;  %8104 = vmatmul.mubr.f32.gmra.mxu1 %v7965_v23  ;;  %8568 = vmatmul.mubr.f32.gmra.mxu0 %v8394_v29  ;;  %v7966_v46 = vld [vmem:[#allocation3 + $0x35] sm:$0xff] }
 0x4fa   : > { %17496 = vst [vmem:[#allocation56_spill] sm:$0xff] %v15626_v19  ;;  %v6676_v7 = vadd.f32 %v6561_v18, %v17497_v60  ;;  %8109 = vmatprep.mubr.f32.mxu1 %v15268_v15  ;;  %8573 = vmatprep.mubr.f32.mxu0 %v15268_v15  ;;  %v15634_v58 = vadd.f32 %v15518_v56, %v6675_v1  ;;  %v8395_v19 = vld [vmem:[#allocation3 + $0x6e] sm:$0xff]  ;;  %v17501_v18 = vld [vmem:[#allocation69_spill] sm:$0xff] }
 0x4fb   : > { %v6563_v22 = vpop.f32.mrf.mxu1  ;;  %v15636_v0 = vpop.f32.mrf.mxu0 }
 0x4fc   : > { %17498 = vst [vmem:[#allocation55_spill] sm:$0xff] %v15634_v58  ;;  %v6677_v35 = vadd.f32 %v6563_v22, %v17499_v32  ;;  %v15640_v14 = vadd.f32 %v15524_v50, %v6676_v7  ;;  %v17503_v32 = vld [vmem:[#allocation92_spill] sm:$0xff]  ;;  %v7967_v7 = vld [vmem:[#allocation3 + $0x3d] sm:$0xff] }
 0x4fd   : > { %v6567_v29 = vpop.f32.mrf.mxu1  ;;  %v15642_v23 = vpop.f32.mrf.mxu0  ;;  %8110 = vmatmul.mubr.f32.gmra.mxu1 %v7966_v46  ;;  %8574 = vmatmul.mubr.f32.gmra.mxu0 %v8395_v19 }
 0x4fe   : > { %17500 = vst [vmem:[#allocation106_spill] sm:$0xff] %v15640_v14  ;;  %v6678_v60 = vadd.f32 %v6567_v29, %v17501_v18  ;;  %8115 = vmatprep.mubr.f32.mxu1 %v15268_v15  ;;  %8579 = vmatprep.mubr.f32.mxu0 %v15268_v15  ;;  %v15648_v56 = vadd.f32 %v15533_v34, %v6677_v35  ;;  %v8396_v14 = vld [vmem:[#allocation3 + $0x76] sm:$0xff] }
 0x4ff   : > { %v6569_v1 = vpop.f32.mrf.mxu1  ;;  %v15650_v22 = vpop.f32.mrf.mxu0  ;;  %v17505_v29 = vld [vmem:[#allocation93_spill] sm:$0xff] }
 0x500   : > { %17502 = vst [vmem:[#allocation80_spill] sm:$0xff] %v15648_v56  ;;  %v6679_v50 = vadd.f32 %v6569_v1, %v17503_v32  ;;  %v15654_v58 = vadd.f32 %v15539_v42, %v6678_v60  ;;  %v17507_v32 = vld [vmem:[#allocation70_spill] sm:$0xff] }
 0x501   : > { %v6573_v19 = vpop.f32.mrf.mxu1  ;;  %v15656_v46 = vpop.f32.mrf.mxu0  ;;  %8116 = vmatmul.mubr.f32.gmra.mxu1 %v7967_v7  ;;  %8580 = vmatmul.mubr.f32.gmra.mxu0 %v8396_v14  ;;  %v7968_v60 = vld [vmem:[#allocation3 + $0x45] sm:$0xff] }
 0x502   : > { %17504 = vst [vmem:[#allocation81_spill] sm:$0xff] %v15654_v58  ;;  %v6680_v18 = vadd.f32 %v6573_v19, %v17505_v29  ;;  %8121 = vmatprep.mubr.f32.mxu1 %v15268_v15  ;;  %8585 = vmatprep.mubr.f32.mxu0 %v15268_v15  ;;  %v15662_v34 = vadd.f32 %v15548_v28, %v6679_v50  ;;  %v8397_v58 = vld [vmem:[#allocation3 + $0x7e] sm:$0xff] }
 0x503   : > { %v6575_v35 = vpop.f32.mrf.mxu1  ;;  %v15664_v1 = vpop.f32.mrf.mxu0  ;;  %v17509_v19 = vld [vmem:[#allocation94_spill] sm:$0xff] }
 0x504   : > { %17506 = vst [vmem:[#allocation105_spill] sm:$0xff] %v15662_v34  ;;  %v6681_v42 = vadd.f32 %v6575_v35, %v17507_v32  ;;  %v15668_v56 = vadd.f32 %v15554_v26, %v6680_v18  ;;  %v17511_v32 = vld [vmem:[#allocation95_spill] sm:$0xff] }
 0x505   : > { %v6579_v14 = vpop.f32.mrf.mxu1  ;;  %v15670_v7 = vpop.f32.mrf.mxu0  ;;  %8122 = vmatmul.mubr.f32.gmra.mxu1 %v7968_v60  ;;  %8586 = vmatmul.mubr.f32.gmra.mxu0 %v8397_v58  ;;  %v7969_v18 = vld [vmem:[#allocation3 + $0x4d] sm:$0xff] }
 0x506   : > { %17508 = vst [vmem:[#allocation58_spill] sm:$0xff] %v15668_v56  ;;  %v6682_v29 = vadd.f32 %v6579_v14, %v17509_v19  ;;  %8127 = vmatprep.mubr.f32.mxu1 %v15268_v15  ;;  %8591 = vmatprep.mubr.f32.mxu0 %v15268_v15  ;;  %v15676_v28 = vadd.f32 %v15563_v4, %v6681_v42  ;;  %v8398_v56 = vld [vmem:[#allocation3 + $0x86] sm:$0xff]  ;;  %v17513_v14 = vld [vmem:[#allocation117_spill] sm:$0xff] }
 0x507   : > { %v6581_v50 = vpop.f32.mrf.mxu1  ;;  %v15678_v35 = vpop.f32.mrf.mxu0 }
 0x508   : > { %17510 = vst [vmem:[#allocation57_spill] sm:$0xff] %v15676_v28  ;;  %v6683_v26 = vadd.f32 %v6581_v50, %v17511_v32  ;;  %v15682_v34 = vadd.f32 %v15569_v16, %v6682_v29  ;;  %v17515_v32 = vld [vmem:[#allocation96_spill] sm:$0xff] }
 0x509   : > { %v6585_v58 = vpop.f32.mrf.mxu1  ;;  %v15684_v60 = vpop.f32.mrf.mxu0  ;;  %8128 = vmatmul.mubr.f32.gmra.mxu1 %v7969_v18  ;;  %8592 = vmatmul.mubr.f32.gmra.mxu0 %v8398_v56  ;;  %v7970_v29 = vld [vmem:[#allocation3 + $0x55] sm:$0xff] }
 0x50a   : > { %17512 = vst [vmem:[#allocation109_spill] sm:$0xff] %v15682_v34  ;;  %v6684_v19 = vadd.f32 %v6585_v58, %v17513_v14  ;;  %8133 = vmatprep.mubr.f32.mxu1 %v15268_v15  ;;  %8597 = vmatprep.mubr.f32.mxu0 %v15268_v15  ;;  %v15690_v4 = vadd.f32 %v15578_v20, %v6683_v26  ;;  %v8399_v34 = vld [vmem:[#allocation3 + $0x8e] sm:$0xff] }
 0x50b   : > { %v6587_v42 = vpop.f32.mrf.mxu1  ;;  %v15692_v50 = vpop.f32.mrf.mxu0  ;;  %v17517_v58 = vld [vmem:[#allocation75_spill] sm:$0xff] }
 0x50c   : > { %17514 = vst [vmem:[#allocation82_spill] sm:$0xff] %v15690_v4  ;;  %v6685_v16 = vadd.f32 %v6587_v42, %v17515_v32  ;;  %v15696_v28 = vadd.f32 %v15584_v3, %v6684_v19  ;;  %v17519_v32 = vld [vmem:[#allocation110_spill] sm:$0xff] }
 0x50d   : > { %v6591_v56 = vpop.f32.mrf.mxu1  ;;  %v15698_v18 = vpop.f32.mrf.mxu0  ;;  %8134 = vmatmul.mubr.f32.gmra.mxu1 %v7970_v29  ;;  %8598 = vmatmul.mubr.f32.gmra.mxu0 %v8399_v34  ;;  %v7971_v19 = vld [vmem:[#allocation3 + $0x5d] sm:$0xff] }
 0x50e   : > { %17516 = vst [vmem:[#allocation83_spill] sm:$0xff] %v15696_v28  ;;  %v6686_v14 = vadd.f32 %v6591_v56, %v17517_v58  ;;  %8139 = vmatprep.mubr.f32.mxu1 %v15268_v15  ;;  %8603 = vmatprep.mubr.f32.mxu0 %v15268_v15  ;;  %v15704_v20 = vadd.f32 %v15593_v27, %v6685_v16  ;;  %v8400_v28 = vld [vmem:[#allocation3 + $0x96] sm:$0xff] }
 0x50f   : > { %v6593_v26 = vpop.f32.mrf.mxu1  ;;  %v15706_v42 = vpop.f32.mrf.mxu0  ;;  %v17521_v56 = vld [vmem:[#allocation52_spill] sm:$0xff] }
 0x510   : > { %17518 = vst [vmem:[#allocation108_spill] sm:$0xff] %v15704_v20  ;;  %v6687_v3 = vadd.f32 %v6593_v26, %v17519_v32  ;;  %v15710_v4 = vadd.f32 %v15599_v45, %v6686_v14  ;;  %v17523_v32 = vld [vmem:[#allocation101_spill] sm:$0xff]  ;;  %v7972_v14 = vld [vmem:[#allocation3 + $0x65] sm:$0xff] }
 0x511   : > { %v6597_v34 = vpop.f32.mrf.mxu1  ;;  %v15712_v29 = vpop.f32.mrf.mxu0  ;;  %8140 = vmatmul.mubr.f32.gmra.mxu1 %v7971_v19  ;;  %8604 = vmatmul.mubr.f32.gmra.mxu0 %v8400_v28 }
 0x512   : > { %17520 = vst [vmem:[#allocation60_spill] sm:$0xff] %v15710_v4  ;;  %v6688_v58 = vadd.f32 %v6597_v34, %v17521_v56  ;;  %8145 = vmatprep.mubr.f32.mxu1 %v15268_v15  ;;  %8609 = vmatprep.mubr.f32.mxu0 %v15268_v15  ;;  %v15718_v27 = vadd.f32 %v15608_v44, %v6687_v3  ;;  %v8401_v4 = vld [vmem:[#allocation3 + $0x9e] sm:$0xff] }
 0x513   : > { %v6599_v16 = vpop.f32.mrf.mxu1  ;;  %v15720_v26 = vpop.f32.mrf.mxu0  ;;  %v17525_v34 = vld [vmem:[#allocation77_spill] sm:$0xff] }
 0x514   : > { %17522 = vst [vmem:[#allocation59_spill] sm:$0xff] %v15718_v27  ;;  %v6689_v45 = vadd.f32 %v6599_v16, %v17523_v32  ;;  %v15724_v20 = vadd.f32 %v15614_v8, %v6688_v58  ;;  %v17527_v32 = vld [vmem:[#allocation54_spill] sm:$0xff]  ;;  %v7973_v58 = vld [vmem:[#allocation3 + $0x6d] sm:$0xff] }
 0x515   : > { %v6603_v28 = vpop.f32.mrf.mxu1  ;;  %v15726_v19 = vpop.f32.mrf.mxu0  ;;  %8146 = vmatmul.mubr.f32.gmra.mxu1 %v7972_v14  ;;  %8610 = vmatmul.mubr.f32.gmra.mxu0 %v8401_v4 }
 0x516   : > { %17524 = vst [vmem:[#allocation84_spill] sm:$0xff] %v15724_v20  ;;  %v6690_v56 = vadd.f32 %v6603_v28, %v17525_v34  ;;  %8151 = vmatprep.mubr.f32.mxu1 %v15268_v15  ;;  %8615 = vmatprep.mubr.f32.mxu0 %v15268_v15  ;;  %v15732_v44 = vadd.f32 %v15622_v21, %v6689_v45  ;;  %v8402_v20 = vld [vmem:[#allocation3 + $0xa6] sm:$0xff] }
 0x517   : > { %v6605_v3 = vpop.f32.mrf.mxu1  ;;  %v15734_v16 = vpop.f32.mrf.mxu0  ;;  %v17529_v28 = vld [vmem:[#allocation103_spill] sm:$0xff] }
 0x518   : > { %17526 = vst [vmem:[#allocation85_spill] sm:$0xff] %v15732_v44  ;;  %v6691_v8 = vadd.f32 %v6605_v3, %v17527_v32  ;;  %v15738_v27 = vadd.f32 %v15628_v38, %v6690_v56  ;;  %v17530_v32 = vld [vmem:[#allocation48_spill] sm:$0xff] }
 0x519   : > { %v6609_v4 = vpop.f32.mrf.mxu1  ;;  %v15740_v14 = vpop.f32.mrf.mxu0  ;;  %8152 = vmatmul.mubr.f32.gmra.mxu1 %v7973_v58  ;;  %8616 = vmatmul.mubr.f32.gmra.mxu0 %v8402_v20  ;;  %v7974_v56 = vld [vmem:[#allocation3 + $0x75] sm:$0xff] }
 0x51a   : > { %17528 = vst [vmem:[#allocation111_spill] sm:$0xff] %v15738_v27  ;;  %v6692_v34 = vadd.f32 %v6609_v4, %v17529_v28  ;;  %8157 = vmatprep.mubr.f32.mxu1 %v15268_v15  ;;  %8621 = vmatprep.mubr.f32.mxu0 %v15268_v15  ;;  %v15746_v21 = vadd.f32 %v15636_v0, %v6691_v8  ;;  %v8403_v27 = vld [vmem:[#allocation3 + $0xae] sm:$0xff] }
 0x51b   : > { %v6611_v45 = vpop.f32.mrf.mxu1  ;;  %v15748_v3 = vpop.f32.mrf.mxu0  ;;  %v17532_v4 = vld [vmem:[#allocation47_spill] sm:$0xff] }
 0x51c   : > { %v6693_v38 = vadd.f32 %v6611_v45, %v17530_v32  ;;  %v15752_v44 = vadd.f32 %v15642_v23, %v6692_v34  ;;  %v7975_v34 = vld [vmem:[#allocation3 + $0x7d] sm:$0xff] }
 0x51d   : > { %v6615_v20 = vpop.f32.mrf.mxu1  ;;  %v15754_v58 = vpop.f32.mrf.mxu0  ;;  %8158 = vmatmul.mubr.f32.gmra.mxu1 %v7974_v56  ;;  %8622 = vmatmul.mubr.f32.gmra.mxu0 %v8403_v27  ;;  %v8404_v32 = vld [vmem:[#allocation3 + $0xb6] sm:$0xff] }
 0x51e   : > { %17531 = vst [vmem:[#allocation62_spill] sm:$0xff] %v15752_v44  ;;  %v6694_v28 = vadd.f32 %v6615_v20, %v17532_v4  ;;  %8163 = vmatprep.mubr.f32.mxu1 %v15268_v15  ;;  %8627 = vmatprep.mubr.f32.mxu0 %v15268_v15  ;;  %v15760_v0 = vadd.f32 %v15650_v22, %v6693_v38  ;;  %v17534_v20 = vld [vmem:[#allocation72_spill] sm:$0xff] }
 0x51f   : > { %v6617_v8 = vpop.f32.mrf.mxu1  ;;  %v15762_v45 = vpop.f32.mrf.mxu0 }
 0x520   : > { %v6695_v23 = vadd.f32 %v6617_v8, %v15181_v13  ;;  %v15766_v44 = vadd.f32 %v15656_v46, %v6694_v28  ;;  %v7976_v28 = vld [vmem:[#allocation3 + $0x85] sm:$0xff] }
 0x521   : > { %v6621_v27 = vpop.f32.mrf.mxu1  ;;  %v15768_v56 = vpop.f32.mrf.mxu0  ;;  %8164 = vmatmul.mubr.f32.gmra.mxu1 %v7975_v34  ;;  %8628 = vmatmul.mubr.f32.gmra.mxu0 %v8404_v32  ;;  %v8405_v8 = vld [vmem:[#allocation3 + $0xbe] sm:$0xff] }
 0x522   : > { %17533 = vst [vmem:[#allocation61_spill] sm:$0xff] %v15766_v44  ;;  %v6696_v4 = vadd.f32 %v6621_v27, %v17534_v20  ;;  %8169 = vmatprep.mubr.f32.mxu1 %v15268_v15  ;;  %8633 = vmatprep.mubr.f32.mxu0 %v15268_v15  ;;  %v15774_v22 = vadd.f32 %v15664_v1, %v6695_v23  ;;  %v7977_v20 = vld [vmem:[#allocation3 + $0x8d] sm:$0xff] }
 0x523   : > { %v6623_v13 = vpop.f32.mrf.mxu1  ;;  %v15776_v38 = vpop.f32.mrf.mxu0 }
 0x524   : > { %v6697_v46 = vadd.f32 %v6623_v13, %v15205_v17  ;;  %v15780_v44 = vadd.f32 %v15670_v7, %v6696_v4  ;;  %v8406_v4 = vld [vmem:[#allocation3 + $0xc6] sm:$0xff] }
 0x525   : > { %v7255_v34 = vpop.f32.mrf.mxu1  ;;  %v15782_v32 = vpop.f32.mrf.mxu0  ;;  %8170 = vmatmul.mubr.f32.gmra.mxu1 %v7976_v28  ;;  %8634 = vmatmul.mubr.f32.gmra.mxu0 %v8405_v8 }
 0x526   : > { %v7470_v27 = vadd.f32 %v7255_v34, %v15216_v54  ;;  %8175 = vmatprep.mubr.f32.mxu1 %v15268_v15  ;;  %8639 = vmatprep.mubr.f32.mxu0 %v15268_v15  ;;  %v15788_v1 = vadd.f32 %v15678_v35, %v6697_v46  ;;  %v7978_v34 = vld [vmem:[#allocation3 + $0x95] sm:$0xff] }
 0x527   : > { %v7257_v17 = vpop.f32.mrf.mxu1  ;;  %v15790_v23 = vpop.f32.mrf.mxu0 }
 0x528   : > { %v7471_v7 = vadd.f32 %v7257_v17, %v15229_v59  ;;  %v15794_v13 = vadd.f32 %v15684_v60, %v7470_v27  ;;  %v8407_v27 = vld [vmem:[#allocation3 + $0xce] sm:$0xff] }
 0x529   : > { %v7261_v28 = vpop.f32.mrf.mxu1  ;;  %v15796_v8 = vpop.f32.mrf.mxu0  ;;  %8176 = vmatmul.mubr.f32.gmra.mxu1 %v7977_v20  ;;  %8640 = vmatmul.mubr.f32.gmra.mxu0 %v8406_v4 }
 0x52a   : > { %v7472_v54 = vadd.f32 %v7261_v28, %v15240_v24  ;;  %8181 = vmatprep.mubr.f32.mxu1 %v15268_v15  ;;  %8645 = vmatprep.mubr.f32.mxu0 %v15268_v15  ;;  %v15802_v35 = vadd.f32 %v15692_v50, %v7471_v7  ;;  %v7979_v28 = vld [vmem:[#allocation3 + $0x9d] sm:$0xff] }
 0x52b   : > { %v7263_v59 = vpop.f32.mrf.mxu1  ;;  %v15804_v46 = vpop.f32.mrf.mxu0 }
 0x52c   : > { %v7473_v60 = vadd.f32 %v7263_v59, %v15253_v52  ;;  %v15808_v17 = vadd.f32 %v15698_v18, %v7472_v54  ;;  %v8408_v54 = vld [vmem:[#allocation3 + $0xd6] sm:$0xff] }
 0x52d   : > { %v7267_v20 = vpop.f32.mrf.mxu1  ;;  %v15810_v4 = vpop.f32.mrf.mxu0  ;;  %8182 = vmatmul.mubr.f32.gmra.mxu1 %v7978_v34  ;;  %8646 = vmatmul.mubr.f32.gmra.mxu0 %v8407_v27 }
 0x52e   : > { %v7474_v24 = vadd.f32 %v7267_v20, %v15261_v51  ;;  %8187 = vmatprep.mubr.f32.mxu1 %v15268_v15  ;;  %8651 = vmatprep.mubr.f32.mxu0 %v15268_v15  ;;  %v15816_v50 = vadd.f32 %v15706_v42, %v7473_v60  ;;  %v7980_v20 = vld [vmem:[#allocation3 + $0xa5] sm:$0xff] }
 0x52f   : > { %v7269_v52 = vpop.f32.mrf.mxu1  ;;  %v15818_v7 = vpop.f32.mrf.mxu0 }
 0x530   : > { %v7475_v18 = vadd.f32 %v7269_v52, %v15273_v41  ;;  %v15822_v59 = vadd.f32 %v15712_v29, %v7474_v24  ;;  %v8409_v24 = vld [vmem:[#allocation3 + $0xde] sm:$0xff] }
 0x531   : > { %v7273_v34 = vpop.f32.mrf.mxu1  ;;  %v15824_v27 = vpop.f32.mrf.mxu0  ;;  %8188 = vmatmul.mubr.f32.gmra.mxu1 %v7979_v28  ;;  %8652 = vmatmul.mubr.f32.gmra.mxu0 %v8408_v54 }
 0x532   : > { %v7476_v51 = vadd.f32 %v7273_v34, %v15281_v2  ;;  %8193 = vmatprep.mubr.f32.mxu1 %v15268_v15  ;;  %8657 = vmatprep.mubr.f32.mxu0 %v15268_v15  ;;  %v15830_v42 = vadd.f32 %v15720_v26, %v7475_v18  ;;  %v7981_v34 = vld [vmem:[#allocation3 + $0xad] sm:$0xff] }
 0x533   : > { %v7275_v41 = vpop.f32.mrf.mxu1  ;;  %v15832_v60 = vpop.f32.mrf.mxu0 }
 0x534   : > { %v7477_v29 = vadd.f32 %v7275_v41, %v15291_v63  ;;  %v15836_v52 = vadd.f32 %v15726_v19, %v7476_v51  ;;  %v8410_v51 = vld [vmem:[#allocation3 + $0xe6] sm:$0xff] }
 0x535   : > { %v7279_v28 = vpop.f32.mrf.mxu1  ;;  %v15838_v54 = vpop.f32.mrf.mxu0  ;;  %8194 = vmatmul.mubr.f32.gmra.mxu1 %v7980_v20  ;;  %8658 = vmatmul.mubr.f32.gmra.mxu0 %v8409_v24 }
 0x536   : > { %v7478_v2 = vadd.f32 %v7279_v28, %v15299_v57  ;;  %8199 = vmatprep.mubr.f32.mxu1 %v15268_v15  ;;  %8663 = vmatprep.mubr.f32.mxu0 %v15268_v15  ;;  %v15844_v26 = vadd.f32 %v15734_v16, %v7477_v29  ;;  %v15855_v57 = vld [vmem:[#allocation3] sm:$0xff]  ;;  %v7982_v28 = vld [vmem:[#allocation3 + $0xb5] sm:$0xff] }
 0x537   : > { %v7281_v63 = vpop.f32.mrf.mxu1  ;;  %v15846_v18 = vpop.f32.mrf.mxu0 }
 0x538   : > { %v7479_v19 = vadd.f32 %v7281_v63, %v15309_v40  ;;  %v15850_v41 = vadd.f32 %v15740_v14, %v7478_v2  ;;  %v8411_v2 = vld [vmem:[#allocation3 + $0xee] sm:$0xff] }
 0x539   : > { %v7285_v20 = vpop.f32.mrf.mxu1  ;;  %v15852_v24 = vpop.f32.mrf.mxu0  ;;  %8200 = vmatmul.mubr.f32.gmra.mxu1 %v7981_v34  ;;  %8664 = vmatmul.mubr.f32.gmra.mxu0 %v8410_v51 }
 0x53a   : > { %v7480_v15 = vadd.f32 %v7285_v20, %v15317_v62  ;;  %8205 = vmatprep.mubr.f32.mxu1 %v15855_v57  ;;  %8669 = vmatprep.mubr.f32.mxu0 %v15855_v57  ;;  %v15860_v40 = vadd.f32 %v15748_v3, %v7479_v19  ;;  %v7983_v20 = vld [vmem:[#allocation3 + $0xbd] sm:$0xff] }
 0x53b   : > { %v7287_v16 = vpop.f32.mrf.mxu1  ;;  %v15862_v29 = vpop.f32.mrf.mxu0 }
 0x53c   : > { %v7481_v14 = vadd.f32 %v7287_v16, %v15327_v12  ;;  %v15866_v63 = vadd.f32 %v15754_v58, %v7480_v15  ;;  %v8412_v15 = vld [vmem:[#allocation3 + $0xf6] sm:$0xff] }
 0x53d   : > { %v7291_v62 = vpop.f32.mrf.mxu1  ;;  %v15868_v34 = vpop.f32.mrf.mxu0  ;;  %8206 = vmatmul.mubr.f32.gmra.mxu1 %v7982_v28  ;;  %8670 = vmatmul.mubr.f32.gmra.mxu0 %v8411_v2 }
 0x53e   : > { %v7482_v51 = vadd.f32 %v7291_v62, %v15335_v31  ;;  %8211 = vmatprep.mubr.f32.mxu1 %v15855_v57  ;;  %8675 = vmatprep.mubr.f32.mxu0 %v15855_v57  ;;  %v15876_v12 = vadd.f32 %v15762_v45, %v7481_v14  ;;  %v7984_v62 = vld [vmem:[#allocation3 + $0xc5] sm:$0xff] }
 0x53f   : > { %v7293_v3 = vpop.f32.mrf.mxu1  ;;  %v15873_v19 = vpop.f32.mrf.mxu0 }
 0x540   : > { %v7483_v58 = vadd.f32 %v7293_v3, %v15345_v55  ;;  %v15880_v16 = vadd.f32 %v15768_v56, %v7482_v51  ;;  %v8413_v51 = vld [vmem:[#allocation3 + $0xfe] sm:$0xff] }
 0x541   : > { %v7297_v28 = vpop.f32.mrf.mxu1  ;;  %v15882_v2 = vpop.f32.mrf.mxu0  ;;  %8212 = vmatmul.mubr.f32.gmra.mxu1 %v7983_v20  ;;  %8676 = vmatmul.mubr.f32.gmra.mxu0 %v8412_v15 }
 0x542   : > { %v7484_v31 = vadd.f32 %v7297_v28, %v15353_v33  ;;  %8217 = vmatprep.mubr.f32.mxu1 %v15855_v57  ;;  %8681 = vmatprep.mubr.f32.mxu0 %v15855_v57  ;;  %v15888_v45 = vadd.f32 %v15776_v38, %v7483_v58  ;;  %v7985_v28 = vld [vmem:[#allocation3 + $0xcd] sm:$0xff] }
 0x543   : > { %v7299_v55 = vpop.f32.mrf.mxu1  ;;  %v15890_v14 = vpop.f32.mrf.mxu0 }
 0x544   : > { %v7485_v56 = vadd.f32 %v7299_v55, %v15363_v9  ;;  %v15894_v3 = vadd.f32 %v15782_v32, %v7484_v31  ;;  %v8414_v31 = vld [vmem:[#allocation3 + $0x106] sm:$0xff] }
 0x545   : > { %v7303_v20 = vpop.f32.mrf.mxu1  ;;  %v15896_v15 = vpop.f32.mrf.mxu0  ;;  %8218 = vmatmul.mubr.f32.gmra.mxu1 %v7984_v62  ;;  %8682 = vmatmul.mubr.f32.gmra.mxu0 %v8413_v51 }
 0x546   : > { %v7486_v33 = vadd.f32 %v7303_v20, %v15371_v47  ;;  %8223 = vmatprep.mubr.f32.mxu1 %v15855_v57  ;;  %8687 = vmatprep.mubr.f32.mxu0 %v15855_v57  ;;  %v15902_v38 = vadd.f32 %v15790_v23, %v7485_v56  ;;  %v7986_v20 = vld [vmem:[#allocation3 + $0xd5] sm:$0xff] }
 0x547   : > { %v7305_v9 = vpop.f32.mrf.mxu1  ;;  %v15904_v58 = vpop.f32.mrf.mxu0 }
 0x548   : > { %v7487_v32 = vadd.f32 %v7305_v9, %v15381_v6  ;;  %v15908_v55 = vadd.f32 %v15796_v8, %v7486_v33  ;;  %v8415_v33 = vld [vmem:[#allocation3 + $0x10e] sm:$0xff] }
 0x549   : > { %v7309_v62 = vpop.f32.mrf.mxu1  ;;  %v15910_v51 = vpop.f32.mrf.mxu0  ;;  %8224 = vmatmul.mubr.f32.gmra.mxu1 %v7985_v28  ;;  %8688 = vmatmul.mubr.f32.gmra.mxu0 %v8414_v31 }
 0x54a   : > { %v7488_v47 = vadd.f32 %v7309_v62, %v15389_v48  ;;  %8229 = vmatprep.mubr.f32.mxu1 %v15855_v57  ;;  %8693 = vmatprep.mubr.f32.mxu0 %v15855_v57  ;;  %v15916_v23 = vadd.f32 %v15804_v46, %v7487_v32  ;;  %v7987_v62 = vld [vmem:[#allocation3 + $0xdd] sm:$0xff] }
 0x54b   : > { %v7311_v6 = vpop.f32.mrf.mxu1  ;;  %v15918_v56 = vpop.f32.mrf.mxu0 }
 0x54c   : > { %v7489_v8 = vadd.f32 %v7311_v6, %v15399_v43  ;;  %v15922_v9 = vadd.f32 %v15810_v4, %v7488_v47  ;;  %v8416_v47 = vld [vmem:[#allocation3 + $0x116] sm:$0xff] }
 0x54d   : > { %v7315_v28 = vpop.f32.mrf.mxu1  ;;  %v15924_v31 = vpop.f32.mrf.mxu0  ;;  %8230 = vmatmul.mubr.f32.gmra.mxu1 %v7986_v20  ;;  %8694 = vmatmul.mubr.f32.gmra.mxu0 %v8415_v33 }
 0x54e   : > { %v7490_v48 = vadd.f32 %v7315_v28, %v15407_v30  ;;  %8235 = vmatprep.mubr.f32.mxu1 %v15855_v57  ;;  %8699 = vmatprep.mubr.f32.mxu0 %v15855_v57  ;;  %v15930_v46 = vadd.f32 %v15818_v7, %v7489_v8  ;;  %v17538_v28 = vld [vmem:[#allocation73_spill] sm:$0xff] }
 0x54f   : > { %v7317_v43 = vpop.f32.mrf.mxu1  ;;  %v15932_v32 = vpop.f32.mrf.mxu0 }
 0x550   : > { %17535 = vst [vmem:[#allocation113_spill] sm:$0xff] %v15930_v46  ;;  %v7491_v4 = vadd.f32 %v7317_v43, %v15417_v11  ;;  %v15936_v6 = vadd.f32 %v15824_v27, %v7490_v48  ;;  %v9149_v27 = vld [vmem:[%s16981_s8 + $0xf8] sm:$0xff]  ;;  %v7988_v43 = vld [vmem:[#allocation3 + $0xe5] sm:$0xff] }
 0x551   : > { %v7321_v20 = vpop.f32.mrf.mxu1  ;;  %v15938_v33 = vpop.f32.mrf.mxu0  ;;  %8236 = vmatmul.mubr.f32.gmra.mxu1 %v7987_v62  ;;  %8700 = vmatmul.mubr.f32.gmra.mxu0 %v8416_v47  ;;  %v8417_v62 = vld [vmem:[#allocation3 + $0x11e] sm:$0xff] }
 0x552   : > { %17536 = vst [vmem:[#allocation86_spill] sm:$0xff] %v15936_v6  ;;  %v7492_v30 = vadd.f32 %v7321_v20, %v15425_v25  ;;  %8241 = vmatprep.mubr.f32.mxu1 %v15855_v57  ;;  %8705 = vmatprep.mubr.f32.mxu0 %v15855_v57  ;;  %v15944_v7 = vadd.f32 %v15832_v60, %v7491_v4  ;;  %v9133_v25 = vld [vmem:[%s16981_s8 + $0x78] sm:$0xff]  ;;  %v17540_v20 = vld [vmem:[#allocation97_spill] sm:$0xff]  ;;  %v8418_v6 = vld [vmem:[#allocation3 + $0x126] sm:$0xff] }
 0x553   : > { %v7323_v11 = vpop.f32.mrf.mxu1  ;;  %v15946_v8 = vpop.f32.mrf.mxu0  ;;  %10448 = vmatprep.subr.mxu1 %v9149_v27 }
 0x554   : > { %17537 = vst [vmem:[#allocation87_spill] sm:$0xff] %v15944_v7  ;;  %v7493_v48 = vadd.f32 %v7323_v11, %v17538_v28  ;;  %v15956_v47 = vadd.f32 %v15838_v54, %v7492_v30  ;;  %10449 = vmatpush3.msra.mxu1 %v9133_v25  ;;  %v17541_v54 = vld [vmem:[#allocation104_spill] sm:$0xff] }
 0x555   : > { %v7327_v60 = vpop.f32.mrf.mxu1  ;;  %v15958_v4 = vpop.f32.mrf.mxu0  ;;  %8242 = vmatmul.mubr.f32.gmra.mxu1 %v7988_v43  ;;  %8706 = vmatmul.mubr.f32.gmra.mxu0 %v8417_v62 }
 0x556   : > { %17539 = vst [vmem:[#allocation112_spill] sm:$0xff] %v15956_v47  ;;  %v7494_v7 = vadd.f32 %v7327_v60, %v17540_v20  ;;  %8247 = vmatprep.mubr.f32.mxu1 %v15855_v57  ;;  %8711 = vmatprep.mubr.f32.mxu0 %v15855_v57  ;;  %v15964_v11 = vadd.f32 %v15846_v18, %v7493_v48  ;;  %v7989_v47 = vld [vmem:[#allocation3 + $0xed] sm:$0xff]  ;;  %v17542_v20 = vld [vmem:[#allocation50_spill] sm:$0xff] }
 0x557   : > { %v7329_v27 = vpop.f32.mrf.mxu1  ;;  %v15966_v28 = vpop.f32.mrf.mxu0 }
 0x558   : > { %v7495_v30 = vadd.f32 %v7329_v27, %v17541_v54  ;;  %v15970_v43 = vadd.f32 %v15852_v24, %v7494_v7  ;;  %v9148_v24 = vld [vmem:[%s16981_s8 + $0xf0] sm:$0xff] }
 0x559   : > { %v7333_v62 = vpop.f32.mrf.mxu1  ;;  %v15972_v60 = vpop.f32.mrf.mxu0  ;;  %8248 = vmatmul.mubr.f32.gmra.mxu1 %v7989_v47  ;;  %8712 = vmatmul.mubr.f32.gmra.mxu0 %v8418_v6  ;;  %v7990_v47 = vld [vmem:[#allocation3 + $0xf5] sm:$0xff] }
 0x55a   : > { %v7496_v46 = vadd.f32 %v7333_v62, %v17542_v20  ;;  %8253 = vmatprep.mubr.f32.mxu1 %v15855_v57  ;;  %8717 = vmatprep.mubr.f32.mxu0 %v15855_v57  ;;  %v15978_v18 = vadd.f32 %v15862_v29, %v7495_v30  ;;  %v8419_v6 = vld [vmem:[#allocation3 + $0x12e] sm:$0xff]  ;;  %v17545_v30 = vld [vmem:[#allocation49_spill] sm:$0xff] }
 0x55b   : > { %v7335_v48 = vpop.f32.mrf.mxu1  ;;  %v15980_v25 = vpop.f32.mrf.mxu0  ;;  %10450 = vmatprep.subr.mxu1 %v9148_v24  ;;  %v9132_v29 = vld [vmem:[%s16981_s8 + $0x70] sm:$0xff] }
 0x55c   : > { %17543 = vst [vmem:[#allocation64_spill] sm:$0xff] %v15978_v18  ;;  %v7497_v7 = vadd.f32 %v7335_v48, %v15471_v36  ;;  %v15987_v27 = vadd.f32 %v15868_v34, %v7496_v46  ;;  %v8420_v36 = vld [vmem:[#allocation3 + $0x136] sm:$0xff]  ;;  %10451 = vmatpush3.msra.mxu1 %v9132_v29 }
 0x55d   : > { %v7339_v54 = vpop.f32.mrf.mxu1  ;;  %v15989_v62 = vpop.f32.mrf.mxu0  ;;  %8254 = vmatmul.mubr.f32.gmra.mxu1 %v7990_v47  ;;  %8718 = vmatmul.mubr.f32.gmra.mxu0 %v8419_v6  ;;  %v7991_v47 = vld [vmem:[#allocation3 + $0xfd] sm:$0xff] }
 0x55e   : > { %17544 = vst [vmem:[#allocation63_spill] sm:$0xff] %v15987_v27  ;;  %v7498_v20 = vadd.f32 %v7339_v54, %v17545_v30  ;;  %8259 = vmatprep.mubr.f32.mxu1 %v15855_v57  ;;  %8723 = vmatprep.mubr.f32.mxu0 %v15855_v57  ;;  %v15998_v48 = vadd.f32 %v15873_v19, %v7497_v7  ;;  %v17546_v30 = vld [vmem:[#allocation107_spill] sm:$0xff]  ;;  %v8421_v19 = vld [vmem:[#allocation3 + $0x13e] sm:$0xff] }
 0x55f   : > { %v7341_v34 = vpop.f32.mrf.mxu1  ;;  %v16000_v46 = vpop.f32.mrf.mxu0 }
 0x560   : > { %v7499_v24 = vadd.f32 %v7341_v34, %v15486_v39  ;;  %v16004_v6 = vadd.f32 %v15882_v2, %v7498_v20  ;;  %v7992_v20 = vld [vmem:[#allocation3 + $0x105] sm:$0xff] }
 0x561   : > { %v7345_v27 = vpop.f32.mrf.mxu1  ;;  %v16006_v54 = vpop.f32.mrf.mxu0  ;;  %8260 = vmatmul.mubr.f32.gmra.mxu1 %v7991_v47  ;;  %8724 = vmatmul.mubr.f32.gmra.mxu0 %v8420_v36 }
 0x562   : > { %v7500_v18 = vadd.f32 %v7345_v27, %v17546_v30  ;;  %8265 = vmatprep.mubr.f32.mxu1 %v15855_v57  ;;  %8729 = vmatprep.mubr.f32.mxu0 %v15855_v57  ;;  %v16012_v7 = vadd.f32 %v15890_v14, %v7499_v24  ;;  %v9147_v27 = vld [vmem:[%s16981_s8 + $0xe8] sm:$0xff]  ;;  %v17549_v24 = vld [vmem:[#allocation99_spill] sm:$0xff] }
 0x563   : > { %v7347_v39 = vpop.f32.mrf.mxu1  ;;  %v16014_v29 = vpop.f32.mrf.mxu0  ;;  %v9131_v14 = vld [vmem:[%s16981_s8 + $0x68] sm:$0xff]  ;;  %10452 = vmatprep.subr.mxu1 %v9147_v27 }
 0x564   : > { %17547 = vst [vmem:[#allocation115_spill] sm:$0xff] %v16012_v7  ;;  %v7501_v2 = vadd.f32 %v7347_v39, %v15501_v10  ;;  %v16018_v34 = vadd.f32 %v15896_v15, %v7500_v18  ;;  %10453 = vmatpush3.msra.mxu1 %v9131_v14  ;;  %v7993_v39 = vld [vmem:[#allocation3 + $0x10d] sm:$0xff]  ;;  %v7994_v14 = vld [vmem:[#allocation3 + $0x115] sm:$0xff] }
 0x565   : > { %v7351_v36 = vpop.f32.mrf.mxu1  ;;  %v16020_v47 = vpop.f32.mrf.mxu0  ;;  %8266 = vmatmul.mubr.f32.gmra.mxu1 %v7992_v20  ;;  %8730 = vmatmul.mubr.f32.gmra.mxu0 %v8421_v19 }
 0x566   : > { %17548 = vst [vmem:[#allocation43_spill] sm:$0xff] %v16018_v34  ;;  %v7502_v30 = vadd.f32 %v7351_v36, %v17549_v24  ;;  %8271 = vmatprep.mubr.f32.mxu1 %v15855_v57  ;;  %v16031_v10 = vadd.f32 %v15904_v58, %v7501_v2  ;;  %v17550_v36 = vld [vmem:[#allocation74_spill] sm:$0xff] }
 0x567   : > { %v7353_v15 = vpop.f32.mrf.mxu1  ;;  %v16033_v18 = vpop.f32.mrf.mxu0 }
 0x568   : > { %v7503_v19 = vadd.f32 %v7353_v15, %v15516_v49  ;;  %v16037_v20 = vadd.f32 %v15910_v51, %v7502_v30 }
 0x569   : > { %v7357_v34 = vpop.f32.mrf.mxu1  ;;  %v16039_v7 = vpop.f32.mrf.mxu0  ;;  %8272 = vmatmul.mubr.f32.gmra.mxu1 %v7993_v39  ;;  %v17552_v39 = vld [vmem:[#allocation98_spill] sm:$0xff] }
 0x56a   : > { %v7504_v24 = vadd.f32 %v7357_v34, %v17550_v36  ;;  %8277 = vmatprep.mubr.f32.mxu1 %v15855_v57  ;;  %v16044_v58 = vadd.f32 %v15918_v56, %v7503_v19  ;;  %v9146_v34 = vld [vmem:[%s16981_s8 + $0xe0] sm:$0xff] }
 0x56b   : > { %v7359_v2 = vpop.f32.mrf.mxu1  ;;  %v16046_v27 = vpop.f32.mrf.mxu0  ;;  %10454 = vmatprep.subr.mxu1 %v9146_v34 }
 0x56c   : > { %v7505_v49 = vadd.f32 %v7359_v2, %v15531_v53  ;;  %v16050_v51 = vadd.f32 %v15924_v31, %v7504_v24  ;;  %v9130_v31 = vld [vmem:[%s16981_s8 + $0x60] sm:$0xff] }
 0x56d   : > { %v7363_v30 = vpop.f32.mrf.mxu1  ;;  %v16052_v15 = vpop.f32.mrf.mxu0  ;;  %8278 = vmatmul.mubr.f32.gmra.mxu1 %v7994_v14  ;;  %v7995_v2 = vld [vmem:[#allocation3 + $0x11d] sm:$0xff] }
 0x56e   : > { %17551 = vst [vmem:[#allocation44_spill] sm:$0xff] %v16050_v51  ;;  %v7506_v56 = vadd.f32 %v7363_v30, %v17552_v39  ;;  %8283 = vmatprep.mubr.f32.mxu1 %v15855_v57  ;;  %v16060_v19 = vadd.f32 %v15932_v32, %v7505_v49  ;;  %10455 = vmatpush3.msra.mxu1 %v9130_v31  ;;  %v17554_v32 = vld [vmem:[#allocation71_spill] sm:$0xff] }
 0x56f   : > { %v7365_v53 = vpop.f32.mrf.mxu1  ;;  %v16062_v36 = vpop.f32.mrf.mxu0 }
 0x570   : > { %17553 = vst [vmem:[#allocation88_spill] sm:$0xff] %v16060_v19  ;;  %v7507_v24 = vadd.f32 %v7365_v53, %v15546_v37  ;;  %v16069_v14 = vadd.f32 %v15938_v33, %v7506_v56  ;;  %v7996_v53 = vld [vmem:[#allocation3 + $0x125] sm:$0xff] }
 0x571   : > { %v7369_v30 = vpop.f32.mrf.mxu1  ;;  %v16071_v39 = vpop.f32.mrf.mxu0  ;;  %8284 = vmatmul.mubr.f32.gmra.mxu1 %v7995_v2  ;;  %v17557_v2 = vld [vmem:[#allocation51_spill] sm:$0xff] }
 0x572   : > { %v7508_v49 = vadd.f32 %v7369_v30, %v17554_v32  ;;  %8289 = vmatprep.mubr.f32.mxu1 %v15855_v57  ;;  %v16076_v34 = vadd.f32 %v15946_v8, %v7507_v24 }
 0x573   : > { %v7371_v19 = vpop.f32.mrf.mxu1  ;;  %v16078_v51 = vpop.f32.mrf.mxu0 }
 0x574   : > { %17555 = vst [vmem:[#allocation89_spill] sm:$0xff] %v16076_v34  ;;  %v7509_v37 = vadd.f32 %v7371_v19, %v15561_v61  ;;  %v16082_v33 = vadd.f32 %v15958_v4, %v7508_v49  ;;  %v9145_v61 = vld [vmem:[%s16981_s8 + $0xd8] sm:$0xff] }
 0x575   : > { %v7375_v56 = vpop.f32.mrf.mxu1  ;;  %v16084_v31 = vpop.f32.mrf.mxu0  ;;  %8290 = vmatmul.mubr.f32.gmra.mxu1 %v7996_v53  ;;  %v9129_v4 = vld [vmem:[%s16981_s8 + $0x58] sm:$0xff]  ;;  %10456 = vmatprep.subr.mxu1 %v9145_v61 }
 0x576   : > { %17556 = vst [vmem:[#allocation114_spill] sm:$0xff] %v16082_v33  ;;  %v7510_v30 = vadd.f32 %v7375_v56, %v17557_v2  ;;  %8295 = vmatprep.mubr.f32.mxu1 %v15855_v57  ;;  %v16089_v8 = vadd.f32 %v15966_v28, %v7509_v37  ;;  %v7997_v49 = vld [vmem:[#allocation3 + $0x12d] sm:$0xff]  ;;  %10457 = vmatpush3.msra.mxu1 %v9129_v4  ;;  %v7999_v4 = vld [vmem:[#allocation3 + $0x13d] sm:$0xff] }
 0x577   : > { %v7377_v24 = vpop.f32.mrf.mxu1  ;;  %v16091_v32 = vpop.f32.mrf.mxu0  ;;  %v17560_v56 = vld [vmem:[#allocation76_spill] sm:$0xff] }
 0x578   : > { %17558 = vst [vmem:[#allocation66_spill] sm:$0xff] %v16089_v8  ;;  %v7511_v19 = vadd.f32 %v7377_v24, %v15576_v5  ;;  %v16101_v53 = vadd.f32 %v15972_v60, %v7510_v30  ;;  %v7998_v8 = vld [vmem:[#allocation3 + $0x135] sm:$0xff] }
 0x579   : > { %v7381_v28 = vpop.f32.mrf.mxu1  ;;  %v16103_v37 = vpop.f32.mrf.mxu0  ;;  %8296 = vmatmul.mubr.f32.gmra.mxu1 %v7997_v49  ;;  %v17562_v24 = vld [vmem:[#allocation100_spill] sm:$0xff]  ;;  %v17564_v49 = vld [vmem:[#allocation53_spill] sm:$0xff] }
 0x57a   : > { %17559 = vst [vmem:[#allocation65_spill] sm:$0xff] %v16101_v53  ;;  %v7512_v2 = vadd.f32 %v7381_v28, %v17560_v56  ;;  %8301 = vmatprep.mubr.f32.mxu1 %v15855_v57  ;;  %v16108_v33 = vadd.f32 %v15980_v25, %v7511_v19 }
 0x57b   : > { %v7383_v34 = vpop.f32.mrf.mxu1  ;;  %v16110_v5 = vpop.f32.mrf.mxu0 }
 0x57c   : > { %17561 = vst [vmem:[#allocation67_spill] sm:$0xff] %v16108_v33  ;;  %v7513_v61 = vadd.f32 %v7383_v34, %v17562_v24  ;;  %v16114_v60 = vadd.f32 %v15989_v62, %v7512_v2  ;;  %v9144_v62 = vld [vmem:[%s16981_s8 + $0xd0] sm:$0xff] }
 0x57d   : > { %v7387_v30 = vpop.f32.mrf.mxu1  ;;  %v16116_v53 = vpop.f32.mrf.mxu0  ;;  %8302 = vmatmul.mubr.f32.gmra.mxu1 %v7998_v8  ;;  %v17566_v34 = vld [vmem:[#allocation78_spill] sm:$0xff]  ;;  %10458 = vmatprep.subr.mxu1 %v9144_v62 }
 0x57e   : > { %17563 = vst [vmem:[#allocation45_spill] sm:$0xff] %v16114_v60  ;;  %v7514_v28 = vadd.f32 %v7387_v30, %v17564_v49  ;;  %8307 = vmatprep.mubr.f32.mxu1 %v15855_v57  ;;  %v16121_v25 = vadd.f32 %v16000_v46, %v7513_v61  ;;  %v9128_v57 = vld [vmem:[%s16981_s8 + $0x50] sm:$0xff] }
 0x57f   : > { %v7389_v19 = vpop.f32.mrf.mxu1  ;;  %v16123_v56 = vpop.f32.mrf.mxu0  ;;  %v17568_v46 = vld [vmem:[#allocation79_spill] sm:$0xff]  ;;  %10459 = vmatpush3.msra.mxu1 %v9128_v57  ;;  %v17570_v62 = vld [vmem:[#allocation102_spill] sm:$0xff] }
 0x580   : > { %17565 = vst [vmem:[#allocation46_spill] sm:$0xff] %v16121_v25  ;;  %v7515_v2 = vadd.f32 %v7389_v19, %v17566_v34  ;;  %v16130_v8 = vadd.f32 %v16006_v54, %v7514_v28 }
 0x581   : > { %v7393_v24 = vpop.f32.mrf.mxu1  ;;  %v16132_v30 = vpop.f32.mrf.mxu0  ;;  %8308 = vmatmul.mubr.f32.gmra.mxu1 %v7999_v4 }
 0x582   : > { %17567 = vst [vmem:[#allocation90_spill] sm:$0xff] %v16130_v8  ;;  %v7516_v61 = vadd.f32 %v7393_v24, %v17568_v46  ;;  %v16139_v49 = vadd.f32 %v16014_v29, %v7515_v2  ;;  %v17572_v8 = vld [vmem:[#allocation56_spill] sm:$0xff]  ;;  %v17574_v29 = vld [vmem:[#allocation55_spill] sm:$0xff] }
 0x583   : > { %v7395_v25 = vpop.f32.mrf.mxu1  ;;  %v16141_v19 = vpop.f32.mrf.mxu0 }
 0x584   : > { %17569 = vst [vmem:[#allocation91_spill] sm:$0xff] %v16139_v49  ;;  %v7517_v54 = vadd.f32 %v7395_v25, %v17570_v62  ;;  %v16145_v28 = vadd.f32 %v16020_v47, %v7516_v61  ;;  %v9143_v47 = vld [vmem:[%s16981_s8 + $0xc8] sm:$0xff] }
 0x585   : > { %v7399_v34 = vpop.f32.mrf.mxu1  ;;  %v16147_v4 = vpop.f32.mrf.mxu0  ;;  %10460 = vmatprep.subr.mxu1 %v9143_v47 }
 0x586   : > { %17571 = vst [vmem:[#allocation116_spill] sm:$0xff] %v16145_v28  ;;  %v7518_v60 = vadd.f32 %v7399_v34, %v17572_v8  ;;  %v16151_v33 = vadd.f32 %v16033_v18, %v7517_v54  ;;  %v9127_v18 = vld [vmem:[%s16981_s8 + $0x48] sm:$0xff] }
 0x587   : > { %v7401_v24 = vpop.f32.mrf.mxu1  ;;  %v16153_v57 = vpop.f32.mrf.mxu0  ;;  %v17576_v8 = vld [vmem:[#allocation106_spill] sm:$0xff]  ;;  %10461 = vmatpush3.msra.mxu1 %v9127_v18  ;;  %v17580_v28 = vld [vmem:[#allocation81_spill] sm:$0xff] }
 0x588   : > { %17573 = vst [vmem:[#allocation68_spill] sm:$0xff] %v16151_v33  ;;  %v7519_v2 = vadd.f32 %v7401_v24, %v17574_v29  ;;  %v16157_v46 = vadd.f32 %v16039_v7, %v7518_v60  ;;  %v17578_v60 = vld [vmem:[#allocation80_spill] sm:$0xff] }
 0x589   : > { %v7405_v25 = vpop.f32.mrf.mxu1  ;;  %v16159_v62 = vpop.f32.mrf.mxu0 }
 0x58a   : > { %17575 = vst [vmem:[#allocation69_spill] sm:$0xff] %v16157_v46  ;;  %v7520_v61 = vadd.f32 %v7405_v25, %v17576_v8  ;;  %v16169_v54 = vadd.f32 %v16046_v27, %v7519_v2  ;;  %v17582_v2 = vld [vmem:[#allocation105_spill] sm:$0xff] }
 0x58b   : > { %v7407_v34 = vpop.f32.mrf.mxu1  ;;  %v16171_v7 = vpop.f32.mrf.mxu0 }
 0x58c   : > { %17577 = vst [vmem:[#allocation92_spill] sm:$0xff] %v16169_v54  ;;  %v7521_v24 = vadd.f32 %v7407_v34, %v17578_v60  ;;  %v16175_v29 = vadd.f32 %v16052_v15, %v7520_v61  ;;  %v9142_v15 = vld [vmem:[%s16981_s8 + $0xc0] sm:$0xff]  ;;  %v17584_v61 = vld [vmem:[#allocation58_spill] sm:$0xff] }
 0x58d   : > { %v7411_v46 = vpop.f32.mrf.mxu1  ;;  %v16177_v33 = vpop.f32.mrf.mxu0  ;;  %10462 = vmatprep.subr.mxu1 %v9142_v15 }
 0x58e   : > { %17579 = vst [vmem:[#allocation93_spill] sm:$0xff] %v16175_v29  ;;  %v7522_v49 = vadd.f32 %v7411_v46, %v17580_v28  ;;  %v16181_v25 = vadd.f32 %v16062_v36, %v7521_v24 }
 0x58f   : > { %v7413_v47 = vpop.f32.mrf.mxu1  ;;  %v16183_v27 = vpop.f32.mrf.mxu0 }
 0x590   : > { %17581 = vst [vmem:[#allocation70_spill] sm:$0xff] %v16181_v25  ;;  %v7523_v8 = vadd.f32 %v7413_v47, %v17582_v2  ;;  %v16187_v18 = vadd.f32 %v16071_v39, %v7522_v49  ;;  %v9126_v39 = vld [vmem:[%s16981_s8 + $0x40] sm:$0xff] }
 0x591   : > { %v7417_v34 = vpop.f32.mrf.mxu1  ;;  %v16189_v60 = vpop.f32.mrf.mxu0  ;;  %v17586_v49 = vld [vmem:[#allocation57_spill] sm:$0xff]  ;;  %10463 = vmatpush3.msra.mxu1 %v9126_v39 }
 0x592   : > { %17583 = vst [vmem:[#allocation94_spill] sm:$0xff] %v16187_v18  ;;  %v7524_v28 = vadd.f32 %v7417_v34, %v17584_v61  ;;  %v16196_v36 = vadd.f32 %v16078_v51, %v7523_v8  ;;  %v17588_v34 = vld [vmem:[#allocation109_spill] sm:$0xff] }
 0x593   : > { %v7419_v46 = vpop.f32.mrf.mxu1  ;;  %v16198_v24 = vpop.f32.mrf.mxu0 }
 0x594   : > { %17585 = vst [vmem:[#allocation95_spill] sm:$0xff] %v16196_v36  ;;  %v7525_v47 = vadd.f32 %v7419_v46, %v17586_v49  ;;  %v16205_v2 = vadd.f32 %v16084_v31, %v7524_v28  ;;  %v17590_v36 = vld [vmem:[#allocation82_spill] sm:$0xff]  ;;  %v17592_v31 = vld [vmem:[#allocation83_spill] sm:$0xff] }
 0x595   : > { %v7423_v18 = vpop.f32.mrf.mxu1  ;;  %v16207_v25 = vpop.f32.mrf.mxu0 }
 0x596   : > { %17587 = vst [vmem:[#allocation117_spill] sm:$0xff] %v16205_v2  ;;  %v7526_v15 = vadd.f32 %v7423_v18, %v17588_v34  ;;  %v16211_v51 = vadd.f32 %v16091_v32, %v7525_v47  ;;  %v9141_v32 = vld [vmem:[%s16981_s8 + $0xb8] sm:$0xff] }
 0x597   : > { %v7425_v8 = vpop.f32.mrf.mxu1  ;;  %v16213_v61 = vpop.f32.mrf.mxu0  ;;  %10464 = vmatprep.subr.mxu1 %v9141_v32 }
 0x598   : > { %17589 = vst [vmem:[#allocation96_spill] sm:$0xff] %v16211_v51  ;;  %v7527_v29 = vadd.f32 %v7425_v8, %v17590_v36  ;;  %v16217_v54 = vadd.f32 %v16103_v37, %v7526_v15  ;;  %v9125_v37 = vld [vmem:[%s16981_s8 + $0x38] sm:$0xff] }
 0x599   : > { %v7429_v46 = vpop.f32.mrf.mxu1  ;;  %v16219_v39 = vpop.f32.mrf.mxu0  ;;  %v17594_v36 = vld [vmem:[#allocation108_spill] sm:$0xff]  ;;  %10465 = vmatpush3.msra.mxu1 %v9125_v37  ;;  %v17597_v51 = vld [vmem:[#allocation59_spill] sm:$0xff] }
 0x59a   : > { %17591 = vst [vmem:[#allocation75_spill] sm:$0xff] %v16217_v54  ;;  %v7528_v28 = vadd.f32 %v7429_v46, %v17592_v31  ;;  %v16223_v49 = vadd.f32 %v16110_v5, %v7527_v29  ;;  %v17595_v29 = vld [vmem:[#allocation60_spill] sm:$0xff] }
 0x59b   : > { %v7431_v18 = vpop.f32.mrf.mxu1  ;;  %v16225_v34 = vpop.f32.mrf.mxu0 }
 0x59c   : > { %17593 = vst [vmem:[#allocation110_spill] sm:$0xff] %v16223_v49  ;;  %v7529_v47 = vadd.f32 %v7431_v18, %v17594_v36  ;;  %v16235_v15 = vadd.f32 %v16116_v53, %v7528_v28  ;;  %v17599_v28 = vld [vmem:[#allocation84_spill] sm:$0xff] }
 0x59d   : > { %v7435_v8 = vpop.f32.mrf.mxu1  ;;  %v16237_v5 = vpop.f32.mrf.mxu0 }
 0x59e   : > { %v7530_v46 = vadd.f32 %v7435_v8, %v17595_v29  ;;  %v16241_v31 = vadd.f32 %v16123_v56, %v7529_v47  ;;  %v9140_v56 = vld [vmem:[%s16981_s8 + $0xb0] sm:$0xff]  ;;  %v17601_v47 = vld [vmem:[#allocation85_spill] sm:$0xff] }
 0x59f   : > { %v7437_v49 = vpop.f32.mrf.mxu1  ;;  %v16243_v54 = vpop.f32.mrf.mxu0  ;;  %10466 = vmatprep.subr.mxu1 %v9140_v56 }
 0x5a0   : > { %17596 = vst [vmem:[#allocation52_spill] sm:$0xff] %v16241_v31  ;;  %v7531_v2 = vadd.f32 %v7437_v49, %v17597_v51  ;;  %v16247_v18 = vadd.f32 %v16132_v30, %v7530_v46  ;;  %v8810_v31 = vlaneseq }
 0x5a1   : > { %v7441_v32 = vpop.f32.mrf.mxu1  ;;  %v16249_v53 = vpop.f32.mrf.mxu0 }
 0x5a2   : > { %17598 = vst [vmem:[#allocation101_spill] sm:$0xff] %v16247_v18  ;;  %v7532_v36 = vadd.f32 %v7441_v32, %v17599_v28  ;;  %v16253_v37 = vadd.f32 %v16141_v19, %v7531_v2  ;;  %v9124_v19 = vld [vmem:[%s16981_s8 + $0x30] sm:$0xff] }
 0x5a3   : > { %v7443_v8 = vpop.f32.mrf.mxu1  ;;  %v16255_v29 = vpop.f32.mrf.mxu0  ;;  %v17603_v2 = vld [vmem:[#allocation111_spill] sm:$0xff]  ;;  %10467 = vmatpush3.msra.mxu1 %v9124_v19 }
 0x5a4   : > { %17600 = vst [vmem:[#allocation77_spill] sm:$0xff] %v16253_v37  ;;  %v7533_v51 = vadd.f32 %v7443_v8, %v17601_v47  ;;  %v16262_v30 = vadd.f32 %v16147_v4, %v7532_v36  ;;  %v17604_v47 = vld [vmem:[#allocation62_spill] sm:$0xff] }
 0x5a5   : > { %v7447_v49 = vpop.f32.mrf.mxu1  ;;  %v16264_v46 = vpop.f32.mrf.mxu0 }
 0x5a6   : > { %17602 = vst [vmem:[#allocation54_spill] sm:$0xff] %v16262_v30  ;;  %v7534_v32 = vadd.f32 %v7447_v49, %v17603_v2  ;;  %v16271_v28 = vadd.f32 %v16153_v57, %v7533_v51 }
 0x5a7   : > { %v7449_v37 = vpop.f32.mrf.mxu1  ;;  %v16273_v18 = vpop.f32.mrf.mxu0 }
 0x5a8   : > { %v7535_v8 = vadd.f32 %v7449_v37, %v15746_v21  ;;  %v16277_v4 = vadd.f32 %v16159_v62, %v7534_v32  ;;  %v9139_v37 = vld [vmem:[%s16981_s8 + $0xa8] sm:$0xff] }
 0x5a9   : > { %v7453_v36 = vpop.f32.mrf.mxu1  ;;  %v16279_v56 = vpop.f32.mrf.mxu0  ;;  %v17607_v32 = vld [vmem:[#allocation61_spill] sm:$0xff]  ;;  %10468 = vmatprep.subr.mxu1 %v9139_v37 }
 0x5aa   : > { %v7536_v30 = vadd.f32 %v7453_v36, %v17604_v47  ;;  %v16283_v49 = vadd.f32 %v16171_v7, %v7535_v8  ;;  %v9123_v7 = vld [vmem:[%s16981_s8 + $0x28] sm:$0xff]  ;;  %v8811_v36 = vshrl.u32 %v8810_v31, 7 }
 0x5ab   : > { %v7455_v19 = vpop.f32.mrf.mxu1  ;;  %v16285_v57 = vpop.f32.mrf.mxu0  ;;  %10469 = vmatpush3.msra.mxu1 %v9123_v7  ;;  %v8808_v7 = vld [vmem:[%s16980_s7] sm:$0x3] }
 0x5ac   : > { %17605 = vst [vmem:[#allocation103_spill] sm:$0xff] %v16283_v49  ;;  %v7537_v51 = vadd.f32 %v7455_v19, %v15760_v0  ;;  %v16289_v2 = vadd.f32 %v16177_v33, %v7536_v30  ;;  %v8812_v31 = vsub.s32 0, %v8811_v36 }
 0x5ad   : > { %v7459_v21 = vpop.f32.mrf.mxu1  ;;  %v16291_v62 = vpop.f32.mrf.mxu0 }
 0x5ae   : > { %17606 = vst [vmem:[#allocation48_spill] sm:$0xff] %v16289_v2  ;;  %v7538_v8 = vadd.f32 %v7459_v21, %v17607_v32  ;;  %v16301_v0 = vadd.f32 %v16183_v27, %v7537_v51 }
 0x5af   : > { %v7461_v33 = vpop.f32.mrf.mxu1  ;;  %v16303_v30 = vpop.f32.mrf.mxu0 }
 0x5b0   : > { %v7539_v47 = vadd.f32 %v7461_v33, %v15774_v22  ;;  %v16307_v19 = vadd.f32 %v16189_v60, %v7538_v8  ;;  %v8816_v60 = vsub.s32 1, %v8811_v36  ;;  %v16331_v33 = vrot.slane %v8808_v7, %v8812_v31 }
 0x5b1   : > { %v7465_v2 = vpop.f32.mrf.mxu1  ;;  %v16309_v49 = vpop.f32.mrf.mxu0 }
 0x5b2   : > { %v7540_v21 = vadd.f32 %v7465_v2, %v15780_v44  ;;  %v16313_v37 = vadd.f32 %v16198_v24, %v7539_v47  ;;  %v9138_v24 = vld [vmem:[%s16981_s8 + $0xa0] sm:$0xff] }
 0x5b3   : > { %v7467_v27 = vpop.f32.mrf.mxu1  ;;  %v16315_v51 = vpop.f32.mrf.mxu0  ;;  %10470 = vmatprep.subr.mxu1 %v9138_v24 }
 0x5b4   : > { %v7541_v22 = vadd.f32 %v7467_v27, %v15788_v1  ;;  %v16322_v32 = vadd.f32 %v16207_v25, %v7540_v21  ;;  %v9122_v25 = vld [vmem:[%s16981_s8 + $0x20] sm:$0xff] }
 0x5b5   : > { %v8099_v8 = vpop.f32.mrf.mxu1  ;;  %v16325_v44 = vpop.f32.mrf.mxu0  ;;  %10471 = vmatpush3.msra.mxu1 %v9122_v25 }
 0x5b6   : > { %17608 = vst [vmem:[#allocation47_spill] sm:$0xff] %v16322_v32  ;;  %v8314_v2 = vadd.f32 %v8099_v8, %v15794_v13  ;;  %v16334_v47 = vadd.f32 %v16213_v61, %v7541_v22  ;;  %v16343_v32 = vrot.slane %v8808_v7, %v8816_v60 }
 0x5b7   : > { %v8101_v1 = vpop.f32.mrf.mxu1  ;;  %v16336_v36 = vpop.f32.mrf.mxu0 }
 0x5b8   : > { %17609 = vst [vmem:[#allocation72_spill] sm:$0xff] %v16334_v47  ;;  %v8736_v21 = vadd.f32 %v16219_v39, %v8314_v2  ;;  %v8315_v27 = vadd.f32 %v8101_v1, %v15802_v35 }
 0x5b9   : > { %v8105_v13 = vpop.f32.mrf.mxu1  ;;  %v16350_v61 = vpop.f32.mrf.mxu0 }
 0x5ba   : > { %v8820_v31 = vadd.f32 %v16331_v33, %v8736_v21  ;;  %v8737_v22 = vadd.f32 %v16225_v34, %v8315_v27  ;;  %v8316_v39 = vadd.f32 %v8105_v13, %v15808_v17  ;;  %v9137_v21 = vld [vmem:[%s16981_s8 + $0x98] sm:$0xff] }
 0x5bb   : > { %v8107_v35 = vpop.f32.mrf.mxu1  ;;  %v16355_v7 = vpop.f32.mrf.mxu0  ;;  %10472 = vmatprep.subr.mxu1 %v9137_v21 }
 0x5bc   : > { %8892 = vst [vmem:[%s16348_s29] sm:$0xff] %v8820_v31  ;;  %v8821_v60 = vadd.f32 %v16343_v32, %v8737_v22  ;;  %v8738_v8 = vadd.f32 %v16237_v5, %v8316_v39  ;;  %v8317_v24 = vadd.f32 %v8107_v35, %v15816_v50  ;;  %v9121_v5 = vld [vmem:[%s16981_s8 + $0x18] sm:$0xff]  ;;  %v8964_v21 = vsel %vm1063_vm9, %v8820_v31, -inf }
 0x5bd   : > { %v8111_v2 = vpop.f32.mrf.mxu1  ;;  %v16361_v1 = vpop.f32.mrf.mxu0  ;;  %10473 = vmatpush3.msra.mxu1 %v9121_v5 }
 0x5be   : > { %8893 = vst [vmem:[%s16348_s29 + $0x8] sm:$0xff] %v8821_v60  ;;  %v8822_v34 = vadd.f32 %v16331_v33, %v8738_v8  ;;  %v8739_v17 = vadd.f32 %v16243_v54, %v8317_v24  ;;  %v8318_v25 = vadd.f32 %v8111_v2, %v15822_v59 }
 0x5bf   : > { %v8113_v50 = vpop.f32.mrf.mxu1  ;;  %v16373_v27 = vpop.f32.mrf.mxu0 }
 0x5c0   : > { %8894 = vst [vmem:[%s16348_s29 + $0x10] sm:$0xff] %v8822_v34  ;;  %v8823_v13 = vadd.f32 %v16343_v32, %v8739_v17  ;;  %v8740_v54 = vadd.f32 %v16249_v53, %v8318_v25  ;;  %v8319_v59 = vadd.f32 %v8113_v50, %v15830_v42 }
 0x5c1   : > { %v8117_v22 = vpop.f32.mrf.mxu1  ;;  %v16379_v39 = vpop.f32.mrf.mxu0 }
 0x5c2   : > { %8895 = vst [vmem:[%s16348_s29 + $0x18] sm:$0xff] %v8823_v13  ;;  %v8824_v35 = vadd.f32 %v16331_v33, %v8740_v54  ;;  %v8741_v8 = vadd.f32 %v16255_v29, %v8319_v59  ;;  %v8320_v24 = vadd.f32 %v8117_v22, %v15836_v52  ;;  %v8965_v52 = vsel %vm1063_vm9, %v8821_v60, -inf }
 0x5c3   : > { %v8119_v17 = vpop.f32.mrf.mxu1  ;;  %v16387_v47 = vpop.f32.mrf.mxu0 }
 0x5c4   : > { %8896 = vst [vmem:[%s16348_s29 + $0x20] sm:$0xff] %v8824_v35  ;;  %v8968_v53 = vsel %vm1065_vm11, %v8824_v35, -inf  ;;  %v8825_v25 = vadd.f32 %v16343_v32, %v8741_v8  ;;  %v8742_v5 = vadd.f32 %v16264_v46, %v8320_v24  ;;  %v8321_v50 = vadd.f32 %v8119_v17, %v15844_v26 }
 0x5c5   : > { %v9036_v29 = vmax.f32 %v8964_v21, %v8968_v53  ;;  %v8123_v54 = vpop.f32.mrf.mxu1  ;;  %v16397_v31 = vpop.f32.mrf.mxu0  ;;  %v8966_v26 = vsel %vm1064_vm4, %v8822_v34, -inf  ;;  %v9136_v21 = vld [vmem:[%s16981_s8 + $0x90] sm:$0xff]  ;;  %v8967_v34 = vsel %vm1064_vm4, %v8823_v13, -inf }
 0x5c6   : > { %8897 = vst [vmem:[%s16348_s29 + $0x28] sm:$0xff] %v8825_v25  ;;  %v8969_v59 = vsel %vm1065_vm11, %v8825_v25, -inf  ;;  %v8826_v22 = vadd.f32 %v16331_v33, %v8742_v5  ;;  %v8743_v35 = vadd.f32 %v16273_v18, %v8321_v50  ;;  %v8322_v46 = vadd.f32 %v8123_v54, %v15850_v41  ;;  %10474 = vmatprep.subr.mxu1 %v9136_v21 }
 0x5c7   : > { %v9077_v24 = vmax.f32 %v8965_v52, %v8969_v59  ;;  %v8125_v60 = vpop.f32.mrf.mxu1  ;;  %v16407_v2 = vpop.f32.mrf.mxu0 }
 0x5c8   : > { %8898 = vst [vmem:[%s16348_s29 + $0x30] sm:$0xff] %v8826_v22  ;;  %v8970_v42 = vsel %vm1066_vm10, %v8826_v22, -inf  ;;  %v8827_v18 = vadd.f32 %v16343_v32, %v8743_v35  ;;  %v8744_v41 = vadd.f32 %v16279_v56, %v8322_v46  ;;  %v8323_v53 = vadd.f32 %v8125_v60, %v15860_v40 }
 0x5c9   : > { %v9037_v25 = vmax.f32 %v8966_v26, %v8970_v42  ;;  %v8129_v5 = vpop.f32.mrf.mxu1  ;;  %v16420_v50 = vpop.f32.mrf.mxu0 }
 0x5ca   : > { %8899 = vst [vmem:[%s16348_s29 + $0x38] sm:$0xff] %v8827_v18  ;;  %v8971_v52 = vsel %vm1066_vm10, %v8827_v18, -inf  ;;  %v8828_v54 = vadd.f32 %v16331_v33, %v8744_v41  ;;  %v8745_v59 = vadd.f32 %v16285_v57, %v8323_v53  ;;  %v8324_v56 = vadd.f32 %v8129_v5, %v15866_v63 }
 0x5cb   : > { %v9078_v40 = vmax.f32 %v8967_v34, %v8971_v52  ;;  %v8131_v22 = vpop.f32.mrf.mxu1  ;;  %v16428_v35 = vpop.f32.mrf.mxu0 }
 0x5cc   : > { %8900 = vst [vmem:[%s16348_s29 + $0x40] sm:$0xff] %v8828_v54  ;;  %v8972_v46 = vsel %vm1067_vm13, %v8828_v54, -inf  ;;  %v8829_v8 = vadd.f32 %v16343_v32, %v8745_v59  ;;  %v8746_v26 = vadd.f32 %v16291_v62, %v8324_v56  ;;  %v8325_v60 = vadd.f32 %v8131_v22, %v15876_v12 }
 0x5cd   : > { %v16436_v21 = vmax.f32 %v9036_v29, %v8972_v46  ;;  %v8135_v57 = vpop.f32.mrf.mxu1  ;;  %v16438_v17 = vpop.f32.mrf.mxu0 }
 0x5ce   : > { %8901 = vst [vmem:[%s16348_s29 + $0x48] sm:$0xff] %v8829_v8  ;;  %v8973_v63 = vsel %vm1067_vm13, %v8829_v8, -inf  ;;  %v8830_v42 = vadd.f32 %v16331_v33, %v8746_v26  ;;  %v8747_v18 = vadd.f32 %v16303_v30, %v8325_v60  ;;  %v8326_v41 = vadd.f32 %v8135_v57, %v15880_v16 }
 0x5cf   : > { %v16446_v53 = vmax.f32 %v9077_v24, %v8973_v63  ;;  %v8137_v62 = vpop.f32.mrf.mxu1  ;;  %v16448_v12 = vpop.f32.mrf.mxu0 }
 0x5d0   : > { %8902 = vst [vmem:[%s16348_s29 + $0x50] sm:$0xff] %v8830_v42  ;;  %v8974_v34 = vsel %vm1068_vm12, %v8830_v42, -inf  ;;  %v8831_v5 = vadd.f32 %v16343_v32, %v8747_v18  ;;  %v8748_v52 = vadd.f32 %v16309_v49, %v8326_v41  ;;  %v8327_v54 = vadd.f32 %v8137_v62, %v15888_v45 }
 0x5d1   : > { %v16456_v59 = vmax.f32 %v9037_v25, %v8974_v34  ;;  %v8141_v30 = vpop.f32.mrf.mxu1  ;;  %v16458_v16 = vpop.f32.mrf.mxu0 }
 0x5d2   : > { %8903 = vst [vmem:[%s16348_s29 + $0x58] sm:$0xff] %v8831_v5  ;;  %v8975_v24 = vsel %vm1068_vm12, %v8831_v5, -inf  ;;  %v8832_v56 = vadd.f32 %v16331_v33, %v8748_v52  ;;  %v8749_v22 = vadd.f32 %v16315_v51, %v8327_v54  ;;  %v8328_v13 = vadd.f32 %v8141_v30, %v15894_v3  ;;  %v9134_v54 = vld [vmem:[%s16981_s8 + $0x80] sm:$0xff] }
 0x5d3   : > { %v16466_v46 = vmax.f32 %v9078_v40, %v8975_v24  ;;  %v8143_v49 = vpop.f32.mrf.mxu1  ;;  %v16468_v45 = vpop.f32.mrf.mxu0 }
 0x5d4   : > { %8904 = vst [vmem:[%s16348_s29 + $0x60] sm:$0xff] %v8832_v56  ;;  %v8976_v8 = vsel %vm1069_vm15, %v8832_v56, -inf  ;;  %v8833_v26 = vadd.f32 %v16343_v32, %v8749_v22  ;;  %v8750_v60 = vadd.f32 %v16325_v44, %v8328_v13  ;;  %v8329_v57 = vadd.f32 %v8143_v49, %v15902_v38  ;;  %v9120_v38 = vld [vmem:[%s16981_s8 + $0x10] sm:$0xff]  ;;  %v9118_v22 = vld [vmem:[%s16981_s8] sm:$0xff] }
 0x5d5   : > { %v9040_v51 = vmax.f32 %v16436_v21, %v8976_v8  ;;  %v8147_v63 = vpop.f32.mrf.mxu1  ;;  %v16477_v3 = vpop.f32.mrf.mxu0  ;;  %v9135_v21 = vld [vmem:[%s16981_s8 + $0x88] sm:$0xff]  ;;  %10475 = vmatpush3.msra.mxu1 %v9120_v38 }
 0x5d6   : > { %8905 = vst [vmem:[%s16348_s29 + $0x68] sm:$0xff] %v8833_v26  ;;  %v8977_v40 = vsel %vm1069_vm15, %v8833_v26, -inf  ;;  %v8834_v42 = vadd.f32 %v16331_v33, %v8750_v60  ;;  %v8751_v18 = vadd.f32 %v16336_v36, %v8329_v57  ;;  %v8330_v41 = vadd.f32 %v8147_v63, %v15908_v55  ;;  %v9119_v36 = vld [vmem:[%s16981_s8 + $0x8] sm:$0xff]  ;;  %10476 = vmatprep.subr.mxu1 %v9135_v21 }
 0x5d7   : > { %v9081_v44 = vmax.f32 %v16446_v53, %v8977_v40  ;;  %v8149_v62 = vpop.f32.mrf.mxu1  ;;  %v16486_v29 = vpop.f32.mrf.mxu0  ;;  %10477 = vmatpush3.msra.mxu1 %v9119_v36  ;;  %v17620_v38 = vld [vmem:[#allocation86_spill] sm:$0xff] }
 0x5d8   : > { %8906 = vst [vmem:[%s16348_s29 + $0x70] sm:$0xff] %v8834_v42  ;;  %v8978_v53 = vsel %vm1070_vm14, %v8834_v42, -inf  ;;  %v8835_v34 = vadd.f32 %v16343_v32, %v8751_v18  ;;  %v8752_v5 = vadd.f32 %v16350_v61, %v8330_v41  ;;  %v8331_v52 = vadd.f32 %v8149_v62, %v15916_v23  ;;  %10478 = vmatprep.subr.mxu1 %v9134_v54 }
 0x5d9   : > { %v9041_v30 = vmax.f32 %v16456_v59, %v8978_v53  ;;  %v8153_v24 = vpop.f32.mrf.mxu1  ;;  %v16507_v56 = vpop.f32.mrf.mxu0  ;;  %10479 = vmatpush3.msra.mxu1 %v9118_v22 }
 0x5da   : > { %8907 = vst [vmem:[%s16348_s29 + $0x78] sm:$0xff] %v8835_v34  ;;  %v8979_v23 = vsel %vm1070_vm14, %v8835_v34, -inf  ;;  %v8836_v61 = vadd.f32 %v16331_v33, %v8752_v5  ;;  %v8753_v13 = vadd.f32 %v16355_v7, %v8331_v52  ;;  %v8332_v49 = vadd.f32 %v8153_v24, %v15922_v9  ;;  %v17619_v7 = vld [vmem:[#allocation113_spill] sm:$0xff]  ;;  %v17622_v52 = vld [vmem:[#allocation87_spill] sm:$0xff] }
 0x5db   : > { %v9082_v59 = vmax.f32 %v16466_v46, %v8979_v23  ;;  %v8155_v25 = vpop.f32.mrf.mxu1  ;;  %v16519_v8 = vpop.f32.mrf.mxu0 }
 0x5dc   : > { %8908 = vst [vmem:[%s16348_s29 + $0x80] sm:$0xff] %v8836_v61  ;;  %v8980_v60 = vsel %vm1071_vm1, %v8836_v61, -inf  ;;  %v8837_v57 = vadd.f32 %v16343_v32, %v8753_v13  ;;  %v8754_v63 = vadd.f32 %v16361_v1, %v8332_v49  ;;  %v8333_v40 = vadd.f32 %v8155_v25, %v17619_v7  ;;  %v17623_v13 = vld [vmem:[#allocation112_spill] sm:$0xff] }
 0x5dd   : > { %v16527_v9 = vmax.f32 %v9040_v51, %v8980_v60  ;;  %v8159_v42 = vpop.f32.mrf.mxu1  ;;  %v16529_v46 = vpop.f32.mrf.mxu0 }
 0x5de   : > { %8909 = vst [vmem:[%s16348_s29 + $0x88] sm:$0xff] %v8837_v57  ;;  %v8981_v18 = vsel %vm1071_vm1, %v8837_v57, -inf  ;;  %v8838_v41 = vadd.f32 %v16331_v33, %v8754_v63  ;;  %v8755_v62 = vadd.f32 %v16373_v27, %v8333_v40  ;;  %v8334_v21 = vadd.f32 %v8159_v42, %v17620_v38 }
 0x5df   : > { %v16537_v1 = vmax.f32 %v9081_v44, %v8981_v18  ;;  %v8161_v36 = vpop.f32.mrf.mxu1  ;;  %v16539_v55 = vpop.f32.mrf.mxu0 }
 0x5e0   : > { %8910 = vst [vmem:[%s16348_s29 + $0x90] sm:$0xff] %v8838_v41  ;;  %v8982_v53 = vsel %vm1072_vm0, %v8838_v41, -inf  ;;  %v8839_v34 = vadd.f32 %v16343_v32, %v8755_v62  ;;  %v8756_v5 = vadd.f32 %v16379_v39, %v8334_v21  ;;  %v8335_v54 = vadd.f32 %v8161_v36, %v17622_v52 }
 0x5e1   : > { %v16547_v24 = vmax.f32 %v9041_v30, %v8982_v53  ;;  %v8165_v27 = vpop.f32.mrf.mxu1  ;;  %v16549_v22 = vpop.f32.mrf.mxu0  ;;  %v17626_v53 = vld [vmem:[#allocation64_spill] sm:$0xff] }
 0x5e2   : > { %8911 = vst [vmem:[%s16348_s29 + $0x98] sm:$0xff] %v8839_v34  ;;  %v8983_v44 = vsel %vm1072_vm0, %v8839_v34, -inf  ;;  %v8840_v23 = vadd.f32 %v16331_v33, %v8756_v5  ;;  %v8757_v61 = vadd.f32 %v16387_v47, %v8335_v54  ;;  %v8336_v49 = vadd.f32 %v8165_v27, %v17623_v13  ;;  %v17627_v27 = vld [vmem:[#allocation63_spill] sm:$0xff] }
 0x5e3   : > { %v16557_v25 = vmax.f32 %v9082_v59, %v8983_v44  ;;  %v8167_v39 = vpop.f32.mrf.mxu1  ;;  %v16559_v26 = vpop.f32.mrf.mxu0 }
 0x5e4   : > { %8912 = vst [vmem:[%s16348_s29 + $0xa0] sm:$0xff] %v8840_v23  ;;  %v8984_v60 = vsel %vm1073_vm3, %v8840_v23, -inf  ;;  %v8841_v57 = vadd.f32 %v16343_v32, %v8757_v61  ;;  %v8758_v63 = vadd.f32 %v16397_v31, %v8336_v49  ;;  %v8337_v7 = vadd.f32 %v8167_v39, %v15964_v11 }
 0x5e5   : > { %v9044_v47 = vmax.f32 %v16527_v9, %v8984_v60  ;;  %v8171_v40 = vpop.f32.mrf.mxu1  ;;  %v16568_v42 = vpop.f32.mrf.mxu0 }
 0x5e6   : > { %8913 = vst [vmem:[%s16348_s29 + $0xa8] sm:$0xff] %v8841_v57  ;;  %v8985_v59 = vsel %vm1073_vm3, %v8841_v57, -inf  ;;  %v8842_v18 = vadd.f32 %v16331_v33, %v8758_v63  ;;  %v8759_v41 = vadd.f32 %v16407_v2, %v8337_v7  ;;  %v8338_v62 = vadd.f32 %v8171_v40, %v15970_v43 }
 0x5e7   : > { %v9085_v31 = vmax.f32 %v16537_v1, %v8985_v59  ;;  %v8173_v38 = vpop.f32.mrf.mxu1  ;;  %v16577_v11 = vpop.f32.mrf.mxu0 }
 0x5e8   : > { %8914 = vst [vmem:[%s16348_s29 + $0xb0] sm:$0xff] %v8842_v18  ;;  %v8986_v21 = vsel %vm1074_vm2, %v8842_v18, -inf  ;;  %v8843_v36 = vadd.f32 %v16343_v32, %v8759_v41  ;;  %v8760_v51 = vadd.f32 %v16420_v50, %v8338_v62  ;;  %v8339_v34 = vadd.f32 %v8173_v38, %v17626_v53  ;;  %v17632_v38 = vld [vmem:[#allocation115_spill] sm:$0xff] }
 0x5e9   : > { %v9045_v2 = vmax.f32 %v16547_v24, %v8986_v21  ;;  %v8177_v5 = vpop.f32.mrf.mxu1  ;;  %v16586_v43 = vpop.f32.mrf.mxu0  ;;  %v17628_v24 = vld [vmem:[#allocation20_spill] sm:$0xff]  ;;  %v17633_v53 = vld [vmem:[#allocation43_spill] sm:$0xff] }
 0x5ea   : > { %8915 = vst [vmem:[%s16348_s29 + $0xb8] sm:$0xff] %v8843_v36  ;;  %v8987_v1 = vsel %vm1074_vm2, %v8843_v36, -inf  ;;  %v8844_v52 = vadd.f32 %v16331_v33, %v8760_v51  ;;  %v8761_v54 = vadd.f32 %v16428_v35, %v8339_v34  ;;  %v8340_v44 = vadd.f32 %v8177_v5, %v17627_v27 }
 0x5eb   : > { %v9086_v50 = vmax.f32 %v16557_v25, %v8987_v1  ;;  %v8179_v23 = vpop.f32.mrf.mxu1  ;;  %v16595_v61 = vpop.f32.mrf.mxu0  ;;  %vm17629_vm4 = vcmp.eq.s32.totalorder %v17628_v24, 1 }
 0x5ec   : > { %8916 = vst [vmem:[%s16348_s29 + $0xc0] sm:$0xff] %v8844_v52  ;;  %v8988_v13 = vsel %vm17629_vm4, %v8844_v52, -inf  ;;  %v8845_v49 = vadd.f32 %v16343_v32, %v8761_v54  ;;  %v8762_v39 = vadd.f32 %v16438_v17, %v8340_v44  ;;  %v8341_v30 = vadd.f32 %v8179_v23, %v15998_v48  ;;  %vm17630_vm9 = vmmov %vm17629_vm4 }
 0x5ed   : > { %v16603_v60 = vmax.f32 %v9044_v47, %v8988_v13  ;;  %v8183_v35 = vpop.f32.mrf.mxu1  ;;  %v16605_v57 = vpop.f32.mrf.mxu0 }
 0x5ee   : > { %8917 = vst [vmem:[%s16348_s29 + $0xc8] sm:$0xff] %v8845_v49  ;;  %v8989_v25 = vsel %vm17630_vm9, %v8845_v49, -inf  ;;  %v8846_v63 = vadd.f32 %v16331_v33, %v8762_v39  ;;  %v8763_v7 = vadd.f32 %v16448_v12, %v8341_v30  ;;  %v8342_v40 = vadd.f32 %v8183_v35, %v16004_v6 }
 0x5ef   : > { %v16613_v59 = vmax.f32 %v9085_v31, %v8989_v25  ;;  %v8185_v17 = vpop.f32.mrf.mxu1  ;;  %v16615_v48 = vpop.f32.mrf.mxu0 }
 0x5f0   : > { %8918 = vst [vmem:[%s16348_s29 + $0xd0] sm:$0xff] %v8846_v63  ;;  %v8990_v18 = vsel %vm1076_vm5, %v8846_v63, -inf  ;;  %v8847_v41 = vadd.f32 %v16343_v32, %v8763_v7  ;;  %v8764_v62 = vadd.f32 %v16458_v16, %v8342_v40  ;;  %v8343_v9 = vadd.f32 %v8185_v17, %v17632_v38  ;;  %v17641_v38 = vld [vmem:[#allocation24_spill] sm:$0xff] }
 0x5f1   : > { %v16623_v21 = vmax.f32 %v9045_v2, %v8990_v18  ;;  %v8189_v12 = vpop.f32.mrf.mxu1  ;;  %v16625_v6 = vpop.f32.mrf.mxu0  ;;  %v17634_v2 = vld [vmem:[#allocation22_spill] sm:$0xff]  ;;  %v17640_v18 = vld [vmem:[#allocation44_spill] sm:$0xff]  ;;  %vm17642_vm14 = vcmp.eq.s32.totalorder %v17641_v38, 1 }
 0x5f2   : > { %8919 = vst [vmem:[%s16348_s29 + $0xd8] sm:$0xff] %v8847_v41  ;;  %v8991_v31 = vsel %vm1076_vm5, %v8847_v41, -inf  ;;  %v8848_v36 = vadd.f32 %v16331_v33, %v8764_v62  ;;  %v8765_v51 = vadd.f32 %v16468_v45, %v8343_v9  ;;  %v8344_v34 = vadd.f32 %v8189_v12, %v17633_v53  ;;  %vm17644_vm15 = vmmov %vm17642_vm14 }
 0x5f3   : > { %v16633_v5 = vmax.f32 %v9086_v50, %v8991_v31  ;;  %v8191_v16 = vpop.f32.mrf.mxu1  ;;  %v16635_v1 = vpop.f32.mrf.mxu0  ;;  %vm17635_vm10 = vcmp.eq.s32.totalorder %v17634_v2, 1  ;;  %v17643_v31 = vld [vmem:[#allocation88_spill] sm:$0xff] }
 0x5f4   : > { %8920 = vst [vmem:[%s16348_s29 + $0xe0] sm:$0xff] %v8848_v36  ;;  %v8992_v52 = vsel %vm17635_vm10, %v8848_v36, -inf  ;;  %v8849_v54 = vadd.f32 %v16343_v32, %v8765_v51  ;;  %v8766_v27 = vadd.f32 %v16477_v3, %v8344_v34  ;;  %v8345_v44 = vadd.f32 %v8191_v16, %v16031_v10  ;;  %vm17636_vm11 = vmmov %vm17635_vm10 }
 0x5f5   : > { %v9048_v45 = vmax.f32 %v16603_v60, %v8992_v52  ;;  %v8195_v23 = vpop.f32.mrf.mxu1  ;;  %v16644_v24 = vpop.f32.mrf.mxu0  ;;  %v17637_v60 = vld [vmem:[#allocation21_spill] sm:$0xff] }
 0x5f6   : > { %8921 = vst [vmem:[%s16348_s29 + $0xe8] sm:$0xff] %v8849_v54  ;;  %v8993_v50 = vsel %vm17636_vm11, %v8849_v54, -inf  ;;  %v8850_v13 = vadd.f32 %v16331_v33, %v8766_v27  ;;  %v8767_v49 = vadd.f32 %v16486_v29, %v8345_v44  ;;  %v8346_v39 = vadd.f32 %v8195_v23, %v16037_v20  ;;  %v17645_v27 = vld [vmem:[#allocation23_spill] sm:$0xff] }
 0x5f7   : > { %v9089_v3 = vmax.f32 %v16613_v59, %v8993_v50  ;;  %v8197_v30 = vpop.f32.mrf.mxu1  ;;  %v16653_v10 = vpop.f32.mrf.mxu0  ;;  %vm17638_vm12 = vcmp.eq.s32.totalorder %v17637_v60, 1  ;;  %vm17646_vm0 = vcmp.eq.s32.totalorder %v17645_v27, 1  ;;  %v17647_v50 = vld [vmem:[#allocation89_spill] sm:$0xff]  ;;  %v17649_v60 = vld [vmem:[#allocation114_spill] sm:$0xff] }
 0x5f8   : > { %8922 = vst [vmem:[%s16348_s29 + $0xf0] sm:$0xff] %v8850_v13  ;;  %v8994_v35 = vsel %vm17638_vm12, %v8850_v13, -inf  ;;  %v8851_v25 = vadd.f32 %v16343_v32, %v8767_v49  ;;  %v8768_v63 = vadd.f32 %v16507_v56, %v8346_v39  ;;  %v8347_v7 = vadd.f32 %v8197_v30, %v16044_v58  ;;  %vm17639_vm13 = vmmov %vm17638_vm12 }
 0x5f9   : > { %v9049_v29 = vmax.f32 %v16623_v21, %v8994_v35  ;;  %v8201_v40 = vpop.f32.mrf.mxu1  ;;  %v16662_v20 = vpop.f32.mrf.mxu0  ;;  %vm17648_vm1 = vmmov %vm17646_vm0 }
 0x5fa   : > { %8923 = vst [vmem:[%s16348_s29 + $0xf8] sm:$0xff] %v8851_v25  ;;  %v8995_v59 = vsel %vm17639_vm13, %v8851_v25, -inf  ;;  %v8852_v17 = vadd.f32 %v16331_v33, %v8768_v63  ;;  %v8769_v47 = vadd.f32 %v16519_v8, %v8347_v7  ;;  %v8348_v41 = vadd.f32 %v8201_v40, %v17640_v18  ;;  %v17650_v7 = vld [vmem:[#allocation26_spill] sm:$0xff] }
 0x5fb   : > { %v9090_v56 = vmax.f32 %v16633_v5, %v8995_v59  ;;  %v8203_v62 = vpop.f32.mrf.mxu1  ;;  %v16671_v58 = vpop.f32.mrf.mxu0  ;;  %vm17651_vm2 = vcmp.eq.s32.totalorder %v17650_v7, 1  ;;  %v17664_v7 = vld [vmem:[#allocation90_spill] sm:$0xff] }
 0x5fc   : > { %8924 = vst [vmem:[%s16348_s29 + $0x100] sm:$0xff] %v8852_v17  ;;  %v8996_v9 = vsel %vm17642_vm14, %v8852_v17, -inf  ;;  %v8853_v21 = vadd.f32 %v16343_v32, %v8769_v47  ;;  %v8770_v12 = vadd.f32 %v16529_v46, %v8348_v41  ;;  %v8349_v36 = vadd.f32 %v8203_v62, %v17643_v31  ;;  %v17652_v17 = vld [vmem:[#allocation66_spill] sm:$0xff]  ;;  %vm17653_vm3 = vmmov %vm17651_vm2 }
 0x5fd   : > { %v16679_v51 = vmax.f32 %v9048_v45, %v8996_v9  ;;  %v8207_v8 = vpop.f32.mrf.mxu1  ;;  %v16681_v53 = vpop.f32.mrf.mxu0  ;;  %v17654_v9 = vld [vmem:[#allocation65_spill] sm:$0xff] }
 0x5fe   : > { %8925 = vst [vmem:[%s16348_s29 + $0x108] sm:$0xff] %v8853_v21  ;;  %v8997_v34 = vsel %vm17644_vm15, %v8853_v21, -inf  ;;  %v8854_v5 = vadd.f32 %v16331_v33, %v8770_v12  ;;  %v8771_v16 = vadd.f32 %v16539_v55, %v8349_v36  ;;  %v8350_v2 = vadd.f32 %v8207_v8, %v16069_v14  ;;  %v17655_v36 = vld [vmem:[#allocation25_spill] sm:$0xff] }
 0x5ff   : > { %v16689_v52 = vmax.f32 %v9089_v3, %v8997_v34  ;;  %v8209_v46 = vpop.f32.mrf.mxu1  ;;  %v16691_v54 = vpop.f32.mrf.mxu0  ;;  %vm17656_vm5 = vcmp.eq.s32.totalorder %v17655_v36, 1 }
 0x600   : > { %8926 = vst [vmem:[%s16348_s29 + $0x110] sm:$0xff] %v8854_v5  ;;  %v8998_v44 = vsel %vm17646_vm0, %v8854_v5, -inf  ;;  %v8855_v45 = vadd.f32 %v16343_v32, %v8771_v16  ;;  %v8772_v23 = vadd.f32 %v16549_v22, %v8350_v2  ;;  %v8351_v13 = vadd.f32 %v8209_v46, %v17647_v50  ;;  %v17657_v5 = vld [vmem:[#allocation67_spill] sm:$0xff]  ;;  %vm17658_vm7 = vmmov %vm17656_vm5 }
 0x601   : > { %v16699_v49 = vmax.f32 %v9049_v29, %v8998_v44  ;;  %v8213_v55 = vpop.f32.mrf.mxu1  ;;  %v16701_v14 = vpop.f32.mrf.mxu0  ;;  %v17659_v44 = vld [vmem:[#allocation45_spill] sm:$0xff] }
 0x602   : > { %8927 = vst [vmem:[%s16348_s29 + $0x118] sm:$0xff] %v8855_v45  ;;  %v8999_v39 = vsel %vm17648_vm1, %v8855_v45, -inf  ;;  %v8856_v3 = vadd.f32 %v16331_v33, %v8772_v23  ;;  %v8773_v30 = vadd.f32 %v16559_v26, %v8351_v13  ;;  %v8352_v35 = vadd.f32 %v8213_v55, %v17649_v60  ;;  %v17660_v13 = vld [vmem:[#allocation28_spill] sm:$0xff] }
 0x603   : > { %v9092_v25 = vmax.f32 %v9090_v56, %v8999_v39  ;;  %v8215_v22 = vpop.f32.mrf.mxu1  ;;  %v16709_v63 = vpop.f32.mrf.mxu0  ;;  %vm17661_vm6 = vcmp.eq.s32.totalorder %v17660_v13, 1 }
 0x604   : > { %8928 = vst [vmem:[%s16348_s29 + $0x120] sm:$0xff] %v8856_v3  ;;  %v9000_v29 = vsel %vm17651_vm2, %v8856_v3, -inf  ;;  %v8857_v40 = vadd.f32 %v16343_v32, %v8773_v30  ;;  %v8774_v59 = vadd.f32 %v16568_v42, %v8352_v35  ;;  %v8353_v47 = vadd.f32 %v8215_v22, %v17652_v17  ;;  %v17662_v3 = vld [vmem:[#allocation46_spill] sm:$0xff]  ;;  %vm17663_vm4 = vmmov %vm17661_vm6 }
 0x605   : > { %v9052_v18 = vmax.f32 %v16679_v51, %v9000_v29  ;;  %v8219_v26 = vpop.f32.mrf.mxu1  ;;  %v16718_v41 = vpop.f32.mrf.mxu0 }
 0x606   : > { %8929 = vst [vmem:[%s16348_s29 + $0x128] sm:$0xff] %v8857_v40  ;;  %v9001_v56 = vsel %vm17653_vm3, %v8857_v40, -inf  ;;  %v8858_v62 = vadd.f32 %v16331_v33, %v8774_v59  ;;  %v8775_v38 = vadd.f32 %v16577_v11, %v8353_v47  ;;  %v8354_v21 = vadd.f32 %v8219_v26, %v17654_v9 }
 0x607   : > { %v9093_v42 = vmax.f32 %v16689_v52, %v9001_v56  ;;  %v8221_v12 = vpop.f32.mrf.mxu1  ;;  %v16727_v31 = vpop.f32.mrf.mxu0  ;;  %v17667_v56 = vld [vmem:[#allocation91_spill] sm:$0xff] }
 0x608   : > { %8930 = vst [vmem:[%s16348_s29 + $0x130] sm:$0xff] %v8858_v62  ;;  %v9002_v51 = vsel %vm17656_vm5, %v8858_v62, -inf  ;;  %v8859_v8 = vadd.f32 %v16343_v32, %v8775_v38  ;;  %v8776_v34 = vadd.f32 %v16586_v43, %v8354_v21  ;;  %v8355_v16 = vadd.f32 %v8221_v12, %v17657_v5  ;;  %v17669_v12 = vld [vmem:[#allocation116_spill] sm:$0xff] }
 0x609   : > { %v9053_v11 = vmax.f32 %v16699_v49, %v9002_v51  ;;  %v8225_v2 = vpop.f32.mrf.mxu1  ;;  %v16742_v50 = vpop.f32.mrf.mxu0 }
 0x60a   : > { %8931 = vst [vmem:[%s16348_s29 + $0x138] sm:$0xff] %v8859_v8  ;;  %v9003_v52 = vsel %vm17658_vm7, %v8859_v8, -inf  ;;  %v8860_v46 = vadd.f32 %v16331_v33, %v8776_v34  ;;  %v8777_v27 = vadd.f32 %v16595_v61, %v8355_v16  ;;  %v8356_v45 = vadd.f32 %v8225_v2, %v17659_v44  ;;  %v17672_v2 = vld [vmem:[#allocation68_spill] sm:$0xff] }
 0x60b   : > { %v9094_v23 = vmax.f32 %v9092_v25, %v9003_v52  ;;  %v8227_v43 = vpop.f32.mrf.mxu1  ;;  %v16756_v59 = vpop.f32.mrf.mxu0 }
 0x60c   : > { %8932 = vst [vmem:[%s16348_s29 + $0x140] sm:$0xff] %v8860_v46  ;;  %v9004_v49 = vsel %vm17661_vm6, %v8860_v46, -inf  ;;  %v8861_v55 = vadd.f32 %v16343_v32, %v8777_v27  ;;  %v8778_v39 = vadd.f32 %v16605_v57, %v8356_v45  ;;  %v8357_v30 = vadd.f32 %v8227_v43, %v17662_v3  ;;  %v17665_v57 = vld [vmem:[#allocation27_spill] sm:$0xff] }
 0x60d   : > { %v9054_v60 = vmax.f32 %v9052_v18, %v9004_v49  ;;  %v8231_v35 = vpop.f32.mrf.mxu1  ;;  %vm17666_vm9 = vcmp.eq.s32.totalorder %v17665_v57, 1  ;;  %v16770_v8 = vpop.f32.mrf.mxu0 }
 0x60e   : > { %8933 = vst [vmem:[%s16348_s29 + $0x148] sm:$0xff] %v8861_v55  ;;  %v9005_v61 = vsel %vm17663_vm4, %v8861_v55, -inf  ;;  %v8862_v25 = vadd.f32 %v16331_v33, %v8778_v39  ;;  %v8779_v22 = vadd.f32 %v16615_v48, %v8357_v30  ;;  %v8358_v29 = vadd.f32 %v8231_v35, %v17664_v7  ;;  %vm17668_vm10 = vmmov %vm17666_vm9 }
 0x60f   : > { %v9095_v40 = vmax.f32 %v9093_v42, %v9005_v61  ;;  %v8233_v17 = vpop.f32.mrf.mxu1  ;;  %v16784_v49 = vpop.f32.mrf.mxu0 }
 0x610   : > { %8934 = vst [vmem:[%s16348_s29 + $0x150] sm:$0xff] %v8862_v25  ;;  %v9006_v47 = vsel %vm17666_vm9, %v8862_v25, -inf  ;;  %v8863_v18 = vadd.f32 %v16343_v32, %v8779_v22  ;;  %v8780_v26 = vadd.f32 %v16625_v6, %v8358_v29  ;;  %v8359_v62 = vadd.f32 %v8233_v17, %v17667_v56  ;;  %v17670_v6 = vld [vmem:[#allocation30_spill] sm:$0xff]  ;;  %v17679_v29 = vld [vmem:[#allocation93_spill] sm:$0xff] }
 0x611   : > { %v9055_v38 = vmax.f32 %v9053_v11, %v9006_v47  ;;  %v8237_v9 = vpop.f32.mrf.mxu1  ;;  %vm17671_vm11 = vcmp.eq.s32.totalorder %v17670_v6, 1  ;;  %v16798_v17 = vpop.f32.mrf.mxu0 }
 0x612   : > { %8935 = vst [vmem:[%s16348_s29 + $0x158] sm:$0xff] %v8863_v18  ;;  %v9007_v48 = vsel %vm17668_vm10, %v8863_v18, -inf  ;;  %v8864_v21 = vadd.f32 %v16331_v33, %v8780_v26  ;;  %v8781_v42 = vadd.f32 %v16635_v1, %v8359_v62  ;;  %v8360_v36 = vadd.f32 %v8237_v9, %v17669_v12  ;;  %vm17673_vm12 = vmmov %vm17671_vm11  ;;  %v17682_v62 = vld [vmem:[#allocation70_spill] sm:$0xff] }
 0x613   : > { %v9096_v51 = vmax.f32 %v9094_v23, %v9007_v48  ;;  %v8239_v34 = vpop.f32.mrf.mxu1  ;;  %v17674_v23 = vld [vmem:[#allocation69_spill] sm:$0xff]  ;;  %v17684_v12 = vld [vmem:[#allocation94_spill] sm:$0xff] }
 0x614   : > { %8936 = vst [vmem:[%s16348_s29 + $0x160] sm:$0xff] %v8864_v21  ;;  %v9008_v5 = vsel %vm17671_vm11, %v8864_v21, -inf  ;;  %v8865_v16 = vadd.f32 %v16343_v32, %v8781_v42  ;;  %v8782_v11 = vadd.f32 %v16644_v24, %v8360_v36  ;;  %v8361_v52 = vadd.f32 %v8239_v34, %v17672_v2  ;;  %v17675_v24 = vld [vmem:[#allocation29_spill] sm:$0xff]  ;;  %v17687_v2 = vld [vmem:[#allocation95_spill] sm:$0xff] }
 0x615   : > { %v9056_v46 = vmax.f32 %v9054_v60, %v9008_v5  ;;  %v8243_v27 = vpop.f32.mrf.mxu1  ;;  %vm17676_vm13 = vcmp.eq.s32.totalorder %v17675_v24, 1  ;;  %v17677_v60 = vld [vmem:[#allocation92_spill] sm:$0xff] }
 0x616   : > { %8937 = vst [vmem:[%s16348_s29 + $0x168] sm:$0xff] %v8865_v16  ;;  %v9009_v1 = vsel %vm17673_vm12, %v8865_v16, -inf  ;;  %v8866_v44 = vadd.f32 %v16331_v33, %v8782_v11  ;;  %v8783_v45 = vadd.f32 %v16653_v10, %v8361_v52  ;;  %v8362_v43 = vadd.f32 %v8243_v27, %v17674_v23  ;;  %vm17678_vm14 = vmmov %vm17676_vm13 }
 0x617   : > { %v9097_v13 = vmax.f32 %v9095_v40, %v9009_v1  ;;  %v8245_v55 = vpop.f32.mrf.mxu1 }
 0x618   : > { %8938 = vst [vmem:[%s16348_s29 + $0x170] sm:$0xff] %v8866_v44  ;;  %v9010_v39 = vsel %vm17676_vm13, %v8866_v44, -inf  ;;  %v8867_v3 = vadd.f32 %v16343_v32, %v8783_v45  ;;  %v8784_v30 = vadd.f32 %v16662_v20, %v8362_v43  ;;  %v8363_v35 = vadd.f32 %v8245_v55, %v17677_v60  ;;  %v17680_v20 = vld [vmem:[#allocation32_spill] sm:$0xff]  ;;  %v17689_v45 = vld [vmem:[#allocation117_spill] sm:$0xff] }
 0x619   : > { %v9057_v61 = vmax.f32 %v9055_v38, %v9010_v39  ;;  %v8249_v25 = vpop.f32.mrf.mxu1  ;;  %vm17681_vm15 = vcmp.eq.s32.totalorder %v17680_v20, 1 }
 0x61a   : > { %8939 = vst [vmem:[%s16348_s29 + $0x178] sm:$0xff] %v8867_v3  ;;  %v9011_v10 = vsel %vm17678_vm14, %v8867_v3, -inf  ;;  %v8868_v22 = vadd.f32 %v16331_v33, %v8784_v30  ;;  %v8785_v7 = vadd.f32 %v16671_v58, %v8363_v35  ;;  %v8364_v40 = vadd.f32 %v8249_v25, %v17679_v29  ;;  %vm17683_vm0 = vmmov %vm17681_vm15  ;;  %v17692_v30 = vld [vmem:[#allocation96_spill] sm:$0xff] }
 0x61b   : > { %v9098_v57 = vmax.f32 %v9096_v51, %v9011_v10  ;;  %v8251_v47 = vpop.f32.mrf.mxu1  ;;  %v16812_v51 = vpop.f32.mrf.mxu0 }
 0x61c   : > { %8940 = vst [vmem:[%s16348_s29 + $0x180] sm:$0xff] %v8868_v22  ;;  %v9012_v18 = vsel %vm17681_vm15, %v8868_v22, -inf  ;;  %v8869_v26 = vadd.f32 %v16343_v32, %v8785_v7  ;;  %v8786_v56 = vadd.f32 %v16681_v53, %v8364_v40  ;;  %v8365_v38 = vadd.f32 %v8251_v47, %v17682_v62  ;;  %v17685_v53 = vld [vmem:[#allocation31_spill] sm:$0xff] }
 0x61d   : > { %v9058_v9 = vmax.f32 %v9056_v46, %v9012_v18  ;;  %v8255_v48 = vpop.f32.mrf.mxu1  ;;  %vm17686_vm1 = vcmp.eq.s32.totalorder %v17685_v53, 1  ;;  %v16826_v43 = vpop.f32.mrf.mxu0  ;;  %v17694_v22 = vld [vmem:[#allocation75_spill] sm:$0xff]  ;;  %v17701_v53 = vld [vmem:[#allocation52_spill] sm:$0xff] }
 0x61e   : > { %8941 = vst [vmem:[%s16348_s29 + $0x188] sm:$0xff] %v8869_v26  ;;  %v9013_v58 = vsel %vm17683_vm0, %v8869_v26, -inf  ;;  %v8870_v21 = vadd.f32 %v16331_v33, %v8786_v56  ;;  %v8787_v42 = vadd.f32 %v16691_v54, %v8365_v38  ;;  %v8366_v36 = vadd.f32 %v8255_v48, %v17684_v12  ;;  %vm17688_vm2 = vmmov %vm17686_vm1  ;;  %v17697_v26 = vld [vmem:[#allocation110_spill] sm:$0xff] }
 0x61f   : > { %v9099_v34 = vmax.f32 %v9097_v13, %v9013_v58  ;;  %v8257_v6 = vpop.f32.mrf.mxu1  ;;  %v8709_v29 = vpop.f32.mrf.mxu0 }
 0x620   : > { %8942 = vst [vmem:[%s16348_s29 + $0x190] sm:$0xff] %v8870_v21  ;;  %v9014_v5 = vsel %vm17686_vm1, %v8870_v21, -inf  ;;  %v8871_v16 = vadd.f32 %v16343_v32, %v8787_v42  ;;  %v8788_v11 = vadd.f32 %v16701_v14, %v8366_v36  ;;  %v8367_v52 = vadd.f32 %v8257_v6, %v17687_v2  ;;  %v17690_v14 = vld [vmem:[#allocation34_spill] sm:$0xff] }
 0x621   : > { %v9059_v46 = vmax.f32 %v9057_v61, %v9014_v5  ;;  %v8261_v27 = vpop.f32.mrf.mxu1  ;;  %vm17691_vm3 = vcmp.eq.s32.totalorder %v17690_v14, 1  ;;  %v8713_v21 = vpop.f32.mrf.mxu0 }
 0x622   : > { %8943 = vst [vmem:[%s16348_s29 + $0x198] sm:$0xff] %v8871_v16  ;;  %v9015_v54 = vsel %vm17688_vm2, %v8871_v16, -inf  ;;  %v8872_v1 = vadd.f32 %v16331_v33, %v8788_v11  ;;  %v8789_v44 = vadd.f32 %v16709_v63, %v8367_v52  ;;  %v8368_v23 = vadd.f32 %v8261_v27, %v17689_v45  ;;  %vm17693_vm5 = vmmov %vm17691_vm3  ;;  %v17703_v52 = vld [vmem:[#allocation101_spill] sm:$0xff] }
 0x623   : > { %v9100_v13 = vmax.f32 %v9098_v57, %v9015_v54  ;;  %v8263_v55 = vpop.f32.mrf.mxu1  ;;  %v8715_v27 = vpop.f32.mrf.mxu0 }
 0x624   : > { %8944 = vst [vmem:[%s16348_s29 + $0x1a0] sm:$0xff] %v8872_v1  ;;  %v9016_v24 = vsel %vm17691_vm3, %v8872_v1, -inf  ;;  %v8873_v39 = vadd.f32 %v16343_v32, %v8789_v44  ;;  %v8790_v3 = vadd.f32 %v16718_v41, %v8368_v23  ;;  %v8369_v60 = vadd.f32 %v8263_v55, %v17692_v30  ;;  %v17695_v41 = vld [vmem:[#allocation33_spill] sm:$0xff]  ;;  %v17708_v30 = vld [vmem:[#allocation54_spill] sm:$0xff] }
 0x625   : > { %v9060_v35 = vmax.f32 %v9058_v9, %v9016_v24  ;;  %v8267_v61 = vpop.f32.mrf.mxu1  ;;  %vm17696_vm7 = vcmp.eq.s32.totalorder %v17695_v41, 1 }
 0x626   : > { %8945 = vst [vmem:[%s16348_s29 + $0x1a8] sm:$0xff] %v8873_v39  ;;  %v9017_v63 = vsel %vm17693_vm5, %v8873_v39, -inf  ;;  %v8874_v25 = vadd.f32 %v16331_v33, %v8790_v3  ;;  %v8791_v10 = vadd.f32 %v16727_v31, %v8369_v60  ;;  %v8370_v7 = vadd.f32 %v8267_v61, %v17694_v22  ;;  %vm17698_vm6 = vmmov %vm17696_vm7 }
 0x627   : > { %v9101_v40 = vmax.f32 %v9099_v34, %v9017_v63  ;;  %v8269_v57 = vpop.f32.mrf.mxu1 }
 0x628   : > { %8946 = vst [vmem:[%s16348_s29 + $0x1b0] sm:$0xff] %v8874_v25  ;;  %v9018_v47 = vsel %vm17696_vm7, %v8874_v25, -inf  ;;  %v8875_v20 = vadd.f32 %v16343_v32, %v8791_v10  ;;  %v8792_v18 = vadd.f32 %v16742_v50, %v8370_v7  ;;  %v8371_v56 = vadd.f32 %v8269_v57, %v17697_v26  ;;  %v17699_v50 = vld [vmem:[#allocation36_spill] sm:$0xff] }
 0x629   : > { %v9061_v62 = vmax.f32 %v9059_v46, %v9018_v47  ;;  %v8273_v38 = vpop.f32.mrf.mxu1  ;;  %vm17700_vm4 = vcmp.eq.s32.totalorder %v17699_v50, 1  ;;  %v17716_v50 = vld [vmem:[#allocation48_spill] sm:$0xff] }
 0x62a   : > { %8947 = vst [vmem:[%s16348_s29 + $0x1b8] sm:$0xff] %v8875_v20  ;;  %v9019_v31 = vsel %vm17698_vm6, %v8875_v20, -inf  ;;  %v8876_v9 = vadd.f32 %v16331_v33, %v8792_v18  ;;  %v8793_v48 = vadd.f32 %v16756_v59, %v8371_v56  ;;  %v8372_v58 = vadd.f32 %v8273_v38, %v16235_v15  ;;  %vm17702_vm9 = vmmov %vm17700_vm4 }
 0x62b   : > { %v9102_v42 = vmax.f32 %v9100_v13, %v9019_v31  ;;  %v8275_v12 = vpop.f32.mrf.mxu1  ;;  %v17706_v13 = vld [vmem:[#allocation77_spill] sm:$0xff]  ;;  %v17714_v31 = vld [vmem:[#allocation103_spill] sm:$0xff] }
 0x62c   : > { %8948 = vst [vmem:[%s16348_s29 + $0x1c0] sm:$0xff] %v8876_v9  ;;  %v9020_v36 = vsel %vm17700_vm4, %v8876_v9, -inf  ;;  %v8877_v34 = vadd.f32 %v16343_v32, %v8793_v48  ;;  %v8794_v6 = vadd.f32 %v16770_v8, %v8372_v58  ;;  %v8373_v5 = vadd.f32 %v8275_v12, %v17701_v53  ;;  %v17704_v8 = vld [vmem:[#allocation35_spill] sm:$0xff] }
 0x62d   : > { %v9062_v16 = vmax.f32 %v9060_v35, %v9020_v36  ;;  %v8279_v11 = vpop.f32.mrf.mxu1  ;;  %vm17705_vm10 = vcmp.eq.s32.totalorder %v17704_v8, 1  ;;  %v8719_v35 = vpop.f32.mrf.mxu0 }
 0x62e   : > { %8949 = vst [vmem:[%s16348_s29 + $0x1c8] sm:$0xff] %v8877_v34  ;;  %v9021_v15 = vsel %vm17702_vm9, %v8877_v34, -inf  ;;  %v8878_v59 = vadd.f32 %v16331_v33, %v8794_v6  ;;  %v8795_v2 = vadd.f32 %v16784_v49, %v8373_v5  ;;  %v8374_v46 = vadd.f32 %v8279_v11, %v17703_v52  ;;  %vm17707_vm11 = vmmov %vm17705_vm10 }
 0x62f   : > { %v9103_v54 = vmax.f32 %v9101_v40, %v9021_v15  ;;  %v8281_v1 = vpop.f32.mrf.mxu1  ;;  %v8721_v18 = vpop.f32.mrf.mxu0 }
 0x630   : > { %8950 = vst [vmem:[%s16348_s29 + $0x1d0] sm:$0xff] %v8878_v59  ;;  %v9022_v44 = vsel %vm17705_vm10, %v8878_v59, -inf  ;;  %v8879_v45 = vadd.f32 %v16343_v32, %v8795_v2  ;;  %v8796_v23 = vadd.f32 %v16798_v17, %v8374_v46  ;;  %v8375_v55 = vadd.f32 %v8281_v1, %v17706_v13  ;;  %v17709_v17 = vld [vmem:[#allocation38_spill] sm:$0xff] }
 0x631   : > { %v16870_v14 = vmax.f32 %v9061_v62, %v9022_v44  ;;  %v8285_v24 = vpop.f32.mrf.mxu1  ;;  %vm17710_vm12 = vcmp.eq.s32.totalorder %v17709_v17, 1  ;;  %v17720_v44 = vld [vmem:[#allocation39_spill] sm:$0xff] }
 0x632   : > { %8951 = vst [vmem:[%s16348_s29 + $0x1d8] sm:$0xff] %v8879_v45  ;;  %v9023_v49 = vsel %vm17707_vm11, %v8879_v45, -inf  ;;  %v8880_v39 = vadd.f32 %v16331_v33, %v8796_v23  ;;  %v8797_v3 = vadd.f32 %v16812_v51, %v8375_v55  ;;  %v8376_v60 = vadd.f32 %v8285_v24, %v17708_v30  ;;  %vm17711_vm13 = vmmov %vm17710_vm12 }
 0x633   : > { %v9104_v61 = vmax.f32 %v9102_v42, %v9023_v49  ;;  %v8287_v63 = vpop.f32.mrf.mxu1  ;;  %v8725_v42 = vpop.f32.mrf.mxu0  ;;  %vm17721_vm2 = vcmp.eq.s32.totalorder %v17720_v44, 1 }
 0x634   : > { %8952 = vst [vmem:[%s16348_s29 + $0x1e0] sm:$0xff] %v8880_v39  ;;  %v9024_v25 = vsel %vm17710_vm12, %v8880_v39, -inf  ;;  %v8881_v10 = vadd.f32 %v16343_v32, %v8797_v3  ;;  %v8798_v22 = vadd.f32 %v16826_v43, %v8376_v60  ;;  %v8377_v7 = vadd.f32 %v8287_v63, %v16271_v28  ;;  %v17712_v43 = vld [vmem:[#allocation37_spill] sm:$0xff]  ;;  %vm17722_vm3 = vmmov %vm17721_vm2  ;;  %v17723_v3 = vld [vmem:[#allocation47_spill] sm:$0xff] }
 0x635   : > { %v9064_v40 = vmax.f32 %v9062_v16, %v9024_v25  ;;  %v8291_v57 = vpop.f32.mrf.mxu1  ;;  %vm17713_vm14 = vcmp.eq.s32.totalorder %v17712_v43, 1  ;;  %v8727_v2 = vpop.f32.mrf.mxu0  ;;  %v17726_v25 = vld [vmem:[#allocation72_spill] sm:$0xff] }
 0x636   : > { %8953 = vst [vmem:[%s16348_s29 + $0x1e8] sm:$0xff] %v8881_v10  ;;  %v9025_v51 = vsel %vm17711_vm13, %v8881_v10, -inf  ;;  %v8882_v41 = vadd.f32 %v16331_v33, %v8798_v22  ;;  %v8799_v47 = vadd.f32 %v8709_v29, %v8377_v7  ;;  %v8378_v20 = vadd.f32 %v8291_v57, %v16277_v4  ;;  %vm17715_vm15 = vmmov %vm17713_vm14 }
 0x637   : > { %v9105_v26 = vmax.f32 %v9103_v54, %v9025_v51  ;;  %v8293_v56 = vpop.f32.mrf.mxu1 }
 0x638   : > { %8954 = vst [vmem:[%s16348_s29 + $0x1f0] sm:$0xff] %v8882_v41  ;;  %v9026_v28 = vsel %vm17713_vm14, %v8882_v41, -inf  ;;  %v8883_v62 = vadd.f32 %v16343_v32, %v8799_v47  ;;  %v8800_v38 = vadd.f32 %v8713_v21, %v8378_v20  ;;  %v8379_v9 = vadd.f32 %v8293_v56, %v17714_v31  ;;  %v17717_v21 = vld [vmem:[#allocation40_spill] sm:$0xff] }
 0x639   : > { %v9065_v48 = vmax.f32 %v16870_v14, %v9026_v28  ;;  %v8297_v58 = vpop.f32.mrf.mxu1  ;;  %vm17718_vm0 = vcmp.eq.s32.totalorder %v17717_v21, 1  ;;  %v8731_v14 = vpop.f32.mrf.mxu0 }
 0x63a   : > { %8955 = vst [vmem:[%s16348_s29 + $0x1f8] sm:$0xff] %v8883_v62  ;;  %v9027_v4 = vsel %vm17715_vm15, %v8883_v62, -inf  ;;  %v8884_v29 = vadd.f32 %v16331_v33, %v8800_v38  ;;  %v8801_v12 = vadd.f32 %v8715_v27, %v8379_v9  ;;  %v8380_v36 = vadd.f32 %v8297_v58, %v17716_v50  ;;  %vm17719_vm1 = vmmov %vm17718_vm0 }
 0x63b   : > { %v9106_v34 = vmax.f32 %v9104_v61, %v9027_v4  ;;  %v8299_v6 = vpop.f32.mrf.mxu1  ;;  %v17724_v61 = vld [vmem:[#allocation42_spill] sm:$0xff]  ;;  %v8733_v7 = vpop.f32.mrf.mxu0 }
 0x63c   : > { %8956 = vst [vmem:[%s16348_s29 + $0x200] sm:$0xff] %v8884_v29  ;;  %v9028_v53 = vsel %vm17718_vm0, %v8884_v29, -inf  ;;  %v8885_v5 = vadd.f32 %v16343_v32, %v8801_v12  ;;  %v8802_v16 = vadd.f32 %v8719_v35, %v8380_v36  ;;  %v8381_v11 = vadd.f32 %v8299_v6, %v16301_v0 }
 0x63d   : > { %v8303_v15 = vpop.f32.mrf.mxu1  ;;  %v9066_v59 = vmax.f32 %v9064_v40, %v9028_v53  ;;  %vm17725_vm5 = vcmp.eq.s32.totalorder %v17724_v61, 1 }
 0x63e   : > { %8957 = vst [vmem:[%s16348_s29 + $0x208] sm:$0xff] %v8885_v5  ;;  %v9029_v52 = vsel %vm17719_vm1, %v8885_v5, -inf  ;;  %v8886_v46 = vadd.f32 %v16331_v33, %v8802_v16  ;;  %v8803_v27 = vadd.f32 %v8721_v18, %v8381_v11  ;;  %v8382_v54 = vadd.f32 %v8303_v15, %v16307_v19  ;;  %vm17727_vm7 = vmmov %vm17725_vm5 }
 0x63f   : > { %v8305_v1 = vpop.f32.mrf.mxu1  ;;  %v9107_v8 = vmax.f32 %v9105_v26, %v9029_v52 }
 0x640   : > { %8958 = vst [vmem:[%s16348_s29 + $0x210] sm:$0xff] %v8886_v46  ;;  %v9030_v0 = vsel %vm17721_vm2, %v8886_v46, -inf  ;;  %v8887_v45 = vadd.f32 %v16343_v32, %v8803_v27  ;;  %v8804_v23 = vadd.f32 %v8725_v42, %v8382_v54  ;;  %v8383_v13 = vadd.f32 %v8305_v1, %v16313_v37 }
 0x641   : > { %v8309_v55 = vpop.f32.mrf.mxu1  ;;  %v9067_v24 = vmax.f32 %v9065_v48, %v9030_v0 }
 0x642   : > { %8959 = vst [vmem:[%s16348_s29 + $0x218] sm:$0xff] %v8887_v45  ;;  %v9031_v19 = vsel %vm17722_vm3, %v8887_v45, -inf  ;;  %v8888_v49 = vadd.f32 %v16331_v33, %v8804_v23  ;;  %v8805_v39 = vadd.f32 %v8727_v2, %v8383_v13  ;;  %v8384_v30 = vadd.f32 %v8309_v55, %v17723_v3 }
 0x643   : > { %v8311_v60 = vpop.f32.mrf.mxu1  ;;  %v9108_v35 = vmax.f32 %v9106_v34, %v9031_v19  ;;  %v9150_v34 = vld [vmem:[%s16982_s9] sm:$0x1] }
 0x644   : > { %8960 = vst [vmem:[%s16348_s29 + $0x220] sm:$0xff] %v8888_v49  ;;  %v9032_v37 = vsel %vm17725_vm5, %v8888_v49, -inf  ;;  %v8889_v63 = vadd.f32 %v16343_v32, %v8805_v39  ;;  %v8806_v17 = vadd.f32 %v8731_v14, %v8384_v30  ;;  %v8385_v10 = vadd.f32 %v8311_v60, %v17726_v25 }
 0x645   : > { %v9068_v22 = vmax.f32 %v9066_v59, %v9032_v37 }
 0x646   : > { %8961 = vst [vmem:[%s16348_s29 + $0x228] sm:$0xff] %v8889_v63  ;;  %v9033_v40 = vsel %vm17727_vm7, %v8889_v63, -inf  ;;  %v8890_v57 = vadd.f32 %v16331_v33, %v8806_v17  ;;  %v8807_v51 = vadd.f32 %v8733_v7, %v8385_v10 }
 0x647   : > { %v9109_v41 = vmax.f32 %v9107_v8, %v9033_v40 }
 0x648   : > { %8962 = vst [vmem:[%s16348_s29 + $0x230] sm:$0xff] %v8890_v57  ;;  %v9034_v20 = vsel %vm1098_vm8, %v8890_v57, -inf  ;;  %v8891_v18 = vadd.f32 %v16343_v32, %v8807_v51 }
 0x649   : > { %v9069_v26 = vmax.f32 %v9067_v24, %v9034_v20 }
 0x64a   : > { %8963 = vst [vmem:[%s16348_s29 + $0x238] sm:$0xff] %v8891_v18  ;;  %v9035_v56 = vsel %vm1098_vm8, %v8891_v18, -inf  ;;  %s385_s29 = sand.u32 1, %s11307_s18  }
 0x64b   : > { %v9070_v43 = vmax.f32 %v9068_v22, %v9069_v26  ;;  %v9110_v28 = vmax.f32 %v9108_v35, %v9035_v56  ;;  %s386_s13 = scalar_lea.vmem [#allocation4], %s385_s29  ;;  %s9228_s12 = scalar_lea.sflag [#allocation5], %s385_s29 }
 0x64c   : > { %s9243_s14 = sshll.u32 %s386_s13, 4  ;;  %s9244_s14 = int_to_ptr.vmem [resolvable:$true] %s9243_s14 }
 0x64d   : > { %v9071_v62 = vrot.slane %v9070_v43, 4  ;;  %v9111_v38 = vmax.f32 %v9109_v41, %v9110_v28  ;;  %s11255_s0 = scalar_lea.vmem %s9244_s14, 16  ;;  %p11262_p0 = scmp.lt.s32.totalorder %s9244_s14, %s11260_s25 }
 0x64e   : > { %p11256_p11 = scmp.ne.s32.totalorder %s9244_s14, %s11255_s0  ;;  %p11263_p1 = scmp.lt.s32.totalorder %s11261_s21, %s11255_s0 }
 0x64f   : > { %v9072_v31 = vmax.f32 %v9070_v43, %v9071_v62  ;;  %v9112_v33 = vrot.slane %v9111_v38, 4 }
 0x650   : > { %p11257_p12 = pnand %p11256_p11, %p11418_p5  ;;  %p11264_p2 = por %p11263_p1, %p11262_p0 }
 0x651   : > { %v9073_v9 = vrot.slane %v9072_v31, 2  ;;  %v9113_v48 = vmax.f32 %v9111_v38, %v9112_v33 }
 0x652   : > { %p11258_p13 = pneg %p11257_p12 }
 0x653   : > { %v9074_v58 = vmax.f32 %v9072_v31, %v9073_v9  ;;  %v9114_v42 = vrot.slane %v9113_v48, 2 }
 0x654   : > { %p11265_p3 = pnand %p11264_p2, %p11258_p13 }
 0x655   : > { %v9115_v4 = vmax.f32 %v9113_v48, %v9114_v42  ;;  %v9075_v29 = vrot.slane %v9074_v58, 1 }
 0x657   : > { %v9116_v32 = vrot.slane %v9115_v4, 1  ;;  %v9076_v50 = vmax.f32 %v9074_v58, %v9075_v29 }
 0x659   : > { %v9117_v12 = vmax.f32 %v9115_v4, %v9116_v32 }
 0x65b   : > { %9215 = vmatprep.mubr.f32.mxu1 %v9117_v12 }
 0x65c   : > { %9216 = vmatmul.mubr.f32.vlgmr.msra.gmra.mxu1 %v9076_v50 }
 0x71c   : > { %v10480_v36 = vpop.f32.mrf.mxu1 }
 0x71e   : > { %v10481_v6 = vpop.f32.mrf.mxu1 }
 0x71f   : > { %v10482_v21 = vadd.f32 %v10481_v6, %v10480_v36 }
 0x721   : > { %v9218_v53 = vadd.f32 %v10482_v21, %v9150_v34 }
 0x723   : > { %9221 = vst [vmem:[%s386_s13] sm:$0x1] %v9218_v53 }
 0x724   : > { %11268 = shalt.err (!%p11265_p3)
}
 0x725   : > { %s11269_s1 = scalar_lea.hbm %s9241_s22, 16  ;;  %s11273_s13 = scalar_lea.hbm %s16984_s11, 32 }
 0x726   : > { %p11270_p4 = scmp.ne.s32.totalorder %s9241_s22, %s11269_s1  ;;  %p11274_p9 = scmp.lt.s32.totalorder %s9241_s22, %s16984_s11 }
 0x727   : > { %p11275_p10 = scmp.lt.s32.totalorder %s11273_s13, %s11269_s1 }
 0x728   : > { %p11271_p7 = pnand %p11270_p4, %p11418_p5 }
 0x729   : > { %p11276_p11 = por %p11275_p10, %p11274_p9 }
 0x72a   : > { %p11272_p8 = pneg %p11271_p7 }
 0x72c   : > { %p11277_p12 = pnand %p11276_p11, %p11272_p8 }
 0x72e   : > { %11280 = shalt.err (!%p11277_p12)
}
 0x72f   : > { %11205 = dma.vmem_to_hbm [thread:$0]  (%p11418_p5), %s9244_s14, 16, %s9241_s22, %s9228_s12  }
 0x730 PF: > { %p11211_p13 = scmp.ge.s32.totalorder %s11315_s20, 2  ;;  %s9263_s0 = sand.u32 1, %s11303_s17  }
 0x731   : > { %s9264_s24 = scalar_lea.sflag [#allocation5], %s9263_s0 }
 0x732   : > { %p11208_p0 = pnand %p11211_p13, %p11422_p6 }
 0x734   : > { %p11209_p1 = pneg %p11208_p0 }
 0x736   : > { %11298 = dma.done.wait (%p11209_p1), %s9264_s24, 16  }
 0x737   : > { %11300 = vsyncadd (%p11209_p1), %s9264_s24, 4294967280  ;;  %p22_p2 = scmp.ge.s32.totalorder %s11405_s23, 4   ;;  %s17729_s17 = smov %s11307_s18 }
 0x738   : > { %s17730_s18 = smov %s11311_s19  ;;  %s17731_s19 = smov %s11416_s26 }
 0x739   : > { %s17732_s20 = smov %s11405_s23  ;;  %24 = sbr.rel (!%p22_p2) target bundleno = 6 (0x6), region = 123 }
 0x73e   :  { %9268 = vsyncpa [#allocation5], 1 }
 0x73f   :  { %9270 = vsyncpa [#allocation5 + $0x1], 1 }

</bundles_post_ra>
